<compile_context>
chip_gen: v7x
topology: tpu7x:2x2x1
jax: 0.10.0
libtpu: 0.0.40
codegen_flags: <defaults>
</compile_context>

<pallas_src>
import numpy as np
import jax
import jax.numpy as jnp
from jax.experimental import pallas as pl
from jax.experimental.pallas import tpu as pltpu


# ----------------------------- Pallas kernels ------------------------------ #

def _rate_kernel(x_ref, g_ref, rowsel_ref, colsel_ref, wt_ref, wp_ref, vb_ref,
                 rate_ref):
    """theta conv + 2x2x2 max-pool + phi conv + relu + psi conv + sigmoid.

    Shapes (per grid step):
      x_ref    : (Cout, 2*TD, H, W)   full-res x slab (VMEM)
      g_ref    : (Cin,  TD,  Hg, Wg)  gating signal slab (VMEM)
      rowsel   : (2*Hg, H)            [even-row ; odd-row] selector (VMEM)
      colsel   : (W, 2*Wg)            [even-col | odd-col] selector (VMEM)
      wt, wp   : (Cout, Cout) / (Cout, Cin)   conv weights (SMEM scalars)
      vb       : (3, Cout)  rows: [wpsi ; bt+bp ; bpsi]    (SMEM scalars)
      rate_ref : (TD, Hg, Wg)         pooled-resolution attention rate
    """
    cout = x_ref.shape[0]
    cin = g_ref.shape[0]
    td = g_ref.shape[1]
    hg, wg = rate_ref.shape[1], rate_ref.shape[2]

    rowsel = rowsel_ref[...]
    colsel = colsel_ref[...]

    # TODO(synk): for large channel counts a matmul channel-mix would be
    # preferable to this unrolled VPU FMA loop (fine for Cout=4 / Cin=8).
    for j in range(td):
        xs0 = [x_ref[c, 2 * j] for c in range(cout)]          # (H, W) each
        xs1 = [x_ref[c, 2 * j + 1] for c in range(cout)]
        gs = [g_ref[c, j] for c in range(cin)]                 # (Hg, Wg) each

        psi = jnp.zeros((hg, wg), jnp.float32)
        for o in range(cout):
            # theta_o = sum_c wt[o,c] * x[c]   (per-channel bias added after
            # the max pool - it is constant over the pooling window).
            t0 = wt_ref[o, 0] * xs0[0]
            t1 = wt_ref[o, 0] * xs1[0]
            for c in range(1, cout):
                t0 = t0 + wt_ref[o, c] * xs0[c]
                t1 = t1 + wt_ref[o, c] * xs1[c]
            tm = jnp.maximum(t0, t1)                           # depth-pair max
            # H-direction pairwise max via a row-selection matmul.
            rh = jnp.dot(rowsel, tm, preferred_element_type=jnp.float32)
            th = jnp.maximum(rh[:hg], rh[hg:])                 # (Hg, W)
            # W-direction pairwise max via a column-selection matmul.
            rw = jnp.dot(th, colsel, preferred_element_type=jnp.float32)
            pooled = jnp.maximum(rw[:, :wg], rw[:, wg:])       # (Hg, Wg)
            # phi_o = sum_c wp[o,c] * g[c]
            p = wp_ref[o, 0] * gs[0]
            for c in range(1, cin):
                p = p + wp_ref[o, c] * gs[c]
            f_o = jnp.maximum(pooled + p + vb_ref[1, o], 0.0)  # relu
            psi = psi + vb_ref[0, o] * f_o                     # psi 1x1x1 conv
        rate_ref[j] = jax.nn.sigmoid(psi + vb_ref[2, 0])


def _apply_kernel(rate_ref, x_ref, uw_ref, uh_ref, out_ref):
    """Separable trilinear x2 upsample of the pooled rate + gating multiply.

    Shapes (per grid step):
      rate_ref : (Dg, Hg, Wg)   whole pooled rate of this batch (fetched once)
      x_ref    : (Cout, 2*TD, H, W)
      uw_ref   : (Wg, W), uh_ref: (H, Hg)   separable x2 upsample matrices
      out_ref  : (Cout, 2*TD, H, W)
    """
    td = x_ref.shape[1] // 2
    dg_total = rate_ref.shape[0]
    dg0 = pl.program_id(1) * td
    uw = uw_ref[...]
    uh = uh_ref[...]

    for j in range(td):
        p = dg0 + j
        r_prev = rate_ref[jnp.maximum(p - 1, 0)]               # (Hg, Wg)
        r_cur = rate_ref[p]
        r_next = rate_ref[jnp.minimum(p + 1, dg_total - 1)]
        # Depth-direction 2-tap lerp (align_corners=False, scale=2), done at
        # pooled resolution; H/W upsample as two small matmuls.
        for k, r_p in enumerate((0.25 * r_prev + 0.75 * r_cur,
                                 0.75 * r_cur + 0.25 * r_next)):
            r_w = jnp.dot(r_p, uw, preferred_element_type=jnp.float32)   # (Hg, W)
            r_hw = jnp.dot(uh, r_w, preferred_element_type=jnp.float32)  # (H, W)
            d = 2 * j + k
            out_ref[:, d] = (x_ref[:, d] * r_hw[None]).astype(out_ref.dtype)


# ------------------------------- host glue --------------------------------- #

def _upsample_matrix(n: int) -> np.ndarray:
    """1-D x2 linear-upsample matrix matching F.interpolate(scale_factor=2,
    mode='trilinear', align_corners=False): shape (2n, n)."""
    out = 2 * n
    src = (np.arange(out) + 0.5) * 0.5 - 0.5
    src = np.maximum(src, 0.0)
    i0 = np.minimum(np.floor(src).astype(np.int64), n - 1)
    i1 = np.minimum(i0 + 1, n - 1)
    lam = (src - i0).astype(np.float32)
    u = np.zeros((out, n), dtype=np.float32)
    u[np.arange(out), i0] += (1.0 - lam)
    u[np.arange(out), i1] += lam
    return u


def attention_gate(x, g, params, *, pool_size=2, tile_dg=None):
    """x: (B, Cout, D, H, W);  g: (B, Cin, D/2, H/2, W/2) -> (B, Cout, D, H, W)."""
    assert pool_size == 2  # TODO(synk): pool_size==3 (stride 2, padding 1) path not implemented.
    B, Cout, D, H, W = x.shape
    Bg, Cin, Dg, Hg, Wg = g.shape
    assert Bg == B and (Dg, Hg, Wg) == (D // 2, H // 2, W // 2)
    assert D % 2 == 0 and H % 2 == 0 and W % 2 == 0

    # D-tile size: keep the per-step x slab modest (<= ~4 MiB) and a divisor
    # of Dg so no remainder handling is needed; 1 always works.
    if tile_dg is None:
        per_slab = Cout * 2 * H * W * 4
        cap = int(max(1, min(Dg, 4, (4 << 20) // max(per_slab, 1))))
        tile_dg = max(t for t in range(1, cap + 1) if Dg % t == 0)
    assert Dg % tile_dg == 0
    n_t = Dg // tile_dg

    f32 = jnp.float32
    x = x.astype(f32)
    g = g.astype(f32)

    # Scalar parameters -> SMEM.  bt+bp folded into one bias vector.
    wt = params["wt"].reshape(Cout, Cout).astype(f32)
    wp = params["wp"].reshape(Cout, Cin).astype(f32)
    wpsi = params["wpsi"].reshape(Cout).astype(f32)
    bias_tp = (params["bt"].reshape(Cout) + params["bp"].reshape(Cout)).astype(f32)
    bpsi = jnp.broadcast_to(params["bpsi"].astype(f32).reshape(())[None], (Cout,))
    vb = jnp.stack([wpsi, bias_tp, bpsi], axis=0)            # (3, Cout)

    # 2x2 spatial pooling selectors and separable x2 upsample matrices (consts).
    rowsel = np.zeros((2 * Hg, H), np.float32)
    rowsel[np.arange(Hg), 2 * np.arange(Hg)] = 1.0            # even rows
    rowsel[Hg + np.arange(Hg), 2 * np.arange(Hg) + 1] = 1.0   # odd rows
    colsel = np.zeros((W, 2 * Wg), np.float32)
    colsel[2 * np.arange(Wg), np.arange(Wg)] = 1.0            # even cols
    colsel[2 * np.arange(Wg) + 1, Wg + np.arange(Wg)] = 1.0   # odd cols
    rowsel = jnp.asarray(rowsel)
    colsel = jnp.asarray(colsel)
    uh = jnp.asarray(_upsample_matrix(Hg))                    # (H, Hg)
    uw = jnp.asarray(_upsample_matrix(Wg).T)                  # (Wg, W)

    # Free (no-transpose) reshapes merging leading dims only.
    xf = x.reshape(B * Cout, D, H, W)
    gf = g.reshape(B * Cin, Dg, Hg, Wg)

    smem = pl.BlockSpec(memory_space=pltpu.MemorySpace.SMEM)

    # ---- kernel 1: attention rate at pooled resolution ----
    rate = pl.pallas_call(
        _rate_kernel,
        out_shape=jax.ShapeDtypeStruct((B * Dg, Hg, Wg), f32),
        grid=(B, n_t),
        in_specs=[
            pl.BlockSpec((Cout, 2 * tile_dg, H, W), lambda b, t: (b, t, 0, 0)),
            pl.BlockSpec((Cin, tile_dg, Hg, Wg), lambda b, t: (b, t, 0, 0)),
            pl.BlockSpec((2 * Hg, H), lambda b, t: (0, 0)),
            pl.BlockSpec((W, 2 * Wg), lambda b, t: (0, 0)),
            smem, smem, smem,
        ],
        out_specs=pl.BlockSpec((tile_dg, Hg, Wg),
                               lambda b, t: (b * n_t + t, 0, 0)),
        compiler_params=pltpu.CompilerParams(
            dimension_semantics=("parallel", "parallel")),
    )(xf, gf, rowsel, colsel, wt, wp, vb)

    # ---- kernel 2: trilinear x2 upsample of the rate + gating multiply ----
    out = pl.pallas_call(
        _apply_kernel,
        out_shape=jax.ShapeDtypeStruct((B * Cout, D, H, W), f32),
        grid=(B, n_t),
        in_specs=[
            pl.BlockSpec((Dg, Hg, Wg), lambda b, t: (b, 0, 0)),   # per-batch rate
            pl.BlockSpec((Cout, 2 * tile_dg, H, W), lambda b, t: (b, t, 0, 0)),
            pl.BlockSpec((Wg, W), lambda b, t: (0, 0)),
            pl.BlockSpec((H, Hg), lambda b, t: (0, 0)),
        ],
        out_specs=pl.BlockSpec((Cout, 2 * tile_dg, H, W),
                               lambda b, t: (b, t, 0, 0)),
        compiler_params=pltpu.CompilerParams(
            dimension_semantics=("parallel", "parallel")),
    )(rate, xf, uw, uh)

    return out.reshape(B, Cout, D, H, W)


# ---------------------------- pure-JAX reference ---------------------------- #

def _reference(x, g, params):
    hp = jax.lax.Precision.HIGHEST
    theta = jnp.einsum('bcdhw,oc->bodhw', x, params["wt"], precision=hp) \
        + params["bt"][None, :, None, None, None]
    B, C, D, H, W = theta.shape
    theta_p = theta.reshape(B, C, D // 2, 2, H // 2, 2, W // 2, 2).max(axis=(3, 5, 7))
    phi = jnp.einsum('bcdhw,oc->bodhw', g, params["wp"], precision=hp) \
        + params["bp"][None, :, None, None, None]
    f = jax.nn.relu(theta_p + phi)
    psi = jnp.einsum('bcdhw,oc->bodhw', f, params["wpsi"], precision=hp) \
        + params["bpsi"][None, :, None, None, None]
    rate = jax.nn.sigmoid(psi)

    def up(a, axis):
        n = a.shape[axis]
        src = np.maximum((np.arange(2 * n) + 0.5) * 0.5 - 0.5, 0.0)
        i0 = np.minimum(np.floor(src).astype(np.int64), n - 1)
        i1 = np.minimum(i0 + 1, n - 1)
        lam = jnp.asarray((src - i0).astype(np.float32))
        shape = [1] * a.ndim
        shape[axis] = 2 * n
        lam = lam.reshape(shape)
        return (1.0 - lam) * jnp.take(a, i0, axis=axis) \
            + lam * jnp.take(a, i1, axis=axis)

    rate_up = up(up(up(rate, 2), 3), 4)
    return x * rate_up


# ----------------------------------- main ----------------------------------- #

if __name__ == "__main__":
    B, Cin, Cout = 2, 8, 4          # in_planes=8 (g channels), out_planes=4 (x channels)
    D = H = W = 16
    Dg, Hg, Wg = D // 2, H // 2, W // 2

    key = jax.random.PRNGKey(0)
    ks = jax.random.split(key, 8)
    params = dict(
        wt=jax.random.normal(ks[0], (Cout, Cout), jnp.float32) * 0.3,
        bt=jax.random.normal(ks[1], (Cout,), jnp.float32) * 0.1,
        wp=jax.random.normal(ks[2], (Cout, Cin), jnp.float32) * 0.3,
        bp=jax.random.normal(ks[3], (Cout,), jnp.float32) * 0.1,
        wpsi=jax.random.normal(ks[4], (1, Cout), jnp.float32) * 0.3,
        bpsi=jax.random.normal(ks[5], (1,), jnp.float32) * 0.1,
    )
    x = jax.random.normal(ks[6], (B, Cout, D, H, W), jnp.float32)
    g = jax.random.normal(ks[7], (B, Cin, Dg, Hg, Wg), jnp.float32)

    out = jax.jit(attention_gate)(x, g, params)
    out = jax.block_until_ready(out)

    ref = jax.block_until_ready(_reference(x, g, params))
    assert out.shape == ref.shape == (B, Cout, D, H, W)
    assert bool(jnp.allclose(out, ref, atol=1e-3, rtol=1e-3)), \
        float(jnp.max(jnp.abs(out - ref)))

    print("KERNEL_OK")
</pallas_src>

<mosaic_0001>
module attributes {stable_mosaic.version = 11 : i64} {
  func.func @_rate_kernel(%arg0: i32, %arg1: i32, %arg2: memref<4x8x16x16xf32, #tpu.memory_space<vmem>>, %arg3: memref<8x4x8x8xf32, #tpu.memory_space<vmem>>, %arg4: memref<16x16xf32, #tpu.memory_space<vmem>>, %arg5: memref<16x16xf32, #tpu.memory_space<vmem>>, %arg6: memref<4x4xf32, #tpu.memory_space<smem>>, %arg7: memref<4x8xf32, #tpu.memory_space<smem>>, %arg8: memref<3x4xf32, #tpu.memory_space<smem>>, %arg9: memref<4x8x8xf32, #tpu.memory_space<vmem>>) attributes {dimension_semantics = [#tpu.dimension_semantics<parallel>, #tpu.dimension_semantics<parallel>], iteration_bounds = array<i64: 2, 2>, scalar_prefetch = 0 : i64, scratch_operands = 0 : i64, tpu.core_type = #tpu.core_type<tc>, window_params = [{transform_indices = @transform_0, window_bounds = array<i64: 4, 8, 16, 16>}, {transform_indices = @transform_1, window_bounds = array<i64: 8, 4, 8, 8>}, {pipeline_mode = #tpu.pipeline_mode<synchronous>, transform_indices = @transform_2, window_bounds = array<i64: 16, 16>}, {pipeline_mode = #tpu.pipeline_mode<synchronous>, transform_indices = @transform_3, window_bounds = array<i64: 16, 16>}, {transform_indices = @transform_4, window_bounds = array<i64: 4, 4>}, {transform_indices = @transform_5, window_bounds = array<i64: 4, 8>}, {transform_indices = @transform_6, window_bounds = array<i64: 3, 4>}, {transform_indices = @transform_7, window_bounds = array<i64: 4, 8, 8>}]} {
    %c0 = arith.constant 0 : index
    %c0_0 = arith.constant 0 : index
    %0 = vector.load %arg4[%c0, %c0_0] : memref<16x16xf32, #tpu.memory_space<vmem>>, vector<16x16xf32>
    %c0_1 = arith.constant 0 : index
    %c0_2 = arith.constant 0 : index
    %1 = vector.load %arg5[%c0_1, %c0_2] : memref<16x16xf32, #tpu.memory_space<vmem>>, vector<16x16xf32>
    %c0_3 = arith.constant 0 : index
    %c0_4 = arith.constant 0 : index
    %c0_5 = arith.constant 0 : index
    %c0_6 = arith.constant 0 : index
    %2 = vector.load %arg2[%c0_3, %c0_4, %c0_5, %c0_6] : memref<4x8x16x16xf32, #tpu.memory_space<vmem>>, vector<1x1x16x16xf32>
    %3 = vector.shape_cast %2 : vector<1x1x16x16xf32> to vector<16x16xf32>
    %c1 = arith.constant 1 : index
    %c0_7 = arith.constant 0 : index
    %c0_8 = arith.constant 0 : index
    %c0_9 = arith.constant 0 : index
    %4 = vector.load %arg2[%c1, %c0_7, %c0_8, %c0_9] : memref<4x8x16x16xf32, #tpu.memory_space<vmem>>, vector<1x1x16x16xf32>
    %5 = vector.shape_cast %4 : vector<1x1x16x16xf32> to vector<16x16xf32>
    %c2 = arith.constant 2 : index
    %c0_10 = arith.constant 0 : index
    %c0_11 = arith.constant 0 : index
    %c0_12 = arith.constant 0 : index
    %6 = vector.load %arg2[%c2, %c0_10, %c0_11, %c0_12] : memref<4x8x16x16xf32, #tpu.memory_space<vmem>>, vector<1x1x16x16xf32>
    %7 = vector.shape_cast %6 : vector<1x1x16x16xf32> to vector<16x16xf32>
    %c3 = arith.constant 3 : index
    %c0_13 = arith.constant 0 : index
    %c0_14 = arith.constant 0 : index
    %c0_15 = arith.constant 0 : index
    %8 = vector.load %arg2[%c3, %c0_13, %c0_14, %c0_15] : memref<4x8x16x16xf32, #tpu.memory_space<vmem>>, vector<1x1x16x16xf32>
    %9 = vector.shape_cast %8 : vector<1x1x16x16xf32> to vector<16x16xf32>
    %c0_16 = arith.constant 0 : index
    %c1_17 = arith.constant 1 : index
    %c0_18 = arith.constant 0 : index
    %c0_19 = arith.constant 0 : index
    %10 = vector.load %arg2[%c0_16, %c1_17, %c0_18, %c0_19] : memref<4x8x16x16xf32, #tpu.memory_space<vmem>>, vector<1x1x16x16xf32>
    %11 = vector.shape_cast %10 : vector<1x1x16x16xf32> to vector<16x16xf32>
    %c1_20 = arith.constant 1 : index
    %c1_21 = arith.constant 1 : index
    %c0_22 = arith.constant 0 : index
    %c0_23 = arith.constant 0 : index
    %12 = vector.load %arg2[%c1_20, %c1_21, %c0_22, %c0_23] : memref<4x8x16x16xf32, #tpu.memory_space<vmem>>, vector<1x1x16x16xf32>
    %13 = vector.shape_cast %12 : vector<1x1x16x16xf32> to vector<16x16xf32>
    %c2_24 = arith.constant 2 : index
    %c1_25 = arith.constant 1 : index
    %c0_26 = arith.constant 0 : index
    %c0_27 = arith.constant 0 : index
    %14 = vector.load %arg2[%c2_24, %c1_25, %c0_26, %c0_27] : memref<4x8x16x16xf32, #tpu.memory_space<vmem>>, vector<1x1x16x16xf32>
    %15 = vector.shape_cast %14 : vector<1x1x16x16xf32> to vector<16x16xf32>
    %c3_28 = arith.constant 3 : index
    %c1_29 = arith.constant 1 : index
    %c0_30 = arith.constant 0 : index
    %c0_31 = arith.constant 0 : index
    %16 = vector.load %arg2[%c3_28, %c1_29, %c0_30, %c0_31] : memref<4x8x16x16xf32, #tpu.memory_space<vmem>>, vector<1x1x16x16xf32>
    %17 = vector.shape_cast %16 : vector<1x1x16x16xf32> to vector<16x16xf32>
    %c0_32 = arith.constant 0 : index
    %c0_33 = arith.constant 0 : index
    %c0_34 = arith.constant 0 : index
    %c0_35 = arith.constant 0 : index
    %18 = vector.load %arg3[%c0_32, %c0_33, %c0_34, %c0_35] : memref<8x4x8x8xf32, #tpu.memory_space<vmem>>, vector<1x1x8x8xf32>
    %19 = vector.shape_cast %18 : vector<1x1x8x8xf32> to vector<8x8xf32>
    %c1_36 = arith.constant 1 : index
    %c0_37 = arith.constant 0 : index
    %c0_38 = arith.constant 0 : index
    %c0_39 = arith.constant 0 : index
    %20 = vector.load %arg3[%c1_36, %c0_37, %c0_38, %c0_39] : memref<8x4x8x8xf32, #tpu.memory_space<vmem>>, vector<1x1x8x8xf32>
    %21 = vector.shape_cast %20 : vector<1x1x8x8xf32> to vector<8x8xf32>
    %c2_40 = arith.constant 2 : index
    %c0_41 = arith.constant 0 : index
    %c0_42 = arith.constant 0 : index
    %c0_43 = arith.constant 0 : index
    %22 = vector.load %arg3[%c2_40, %c0_41, %c0_42, %c0_43] : memref<8x4x8x8xf32, #tpu.memory_space<vmem>>, vector<1x1x8x8xf32>
    %23 = vector.shape_cast %22 : vector<1x1x8x8xf32> to vector<8x8xf32>
    %c3_44 = arith.constant 3 : index
    %c0_45 = arith.constant 0 : index
    %c0_46 = arith.constant 0 : index
    %c0_47 = arith.constant 0 : index
    %24 = vector.load %arg3[%c3_44, %c0_45, %c0_46, %c0_47] : memref<8x4x8x8xf32, #tpu.memory_space<vmem>>, vector<1x1x8x8xf32>
    %25 = vector.shape_cast %24 : vector<1x1x8x8xf32> to vector<8x8xf32>
    %c4 = arith.constant 4 : index
    %c0_48 = arith.constant 0 : index
    %c0_49 = arith.constant 0 : index
    %c0_50 = arith.constant 0 : index
    %26 = vector.load %arg3[%c4, %c0_48, %c0_49, %c0_50] : memref<8x4x8x8xf32, #tpu.memory_space<vmem>>, vector<1x1x8x8xf32>
    %27 = vector.shape_cast %26 : vector<1x1x8x8xf32> to vector<8x8xf32>
    %c5 = arith.constant 5 : index
    %c0_51 = arith.constant 0 : index
    %c0_52 = arith.constant 0 : index
    %c0_53 = arith.constant 0 : index
    %28 = vector.load %arg3[%c5, %c0_51, %c0_52, %c0_53] : memref<8x4x8x8xf32, #tpu.memory_space<vmem>>, vector<1x1x8x8xf32>
    %29 = vector.shape_cast %28 : vector<1x1x8x8xf32> to vector<8x8xf32>
    %c6 = arith.constant 6 : index
    %c0_54 = arith.constant 0 : index
    %c0_55 = arith.constant 0 : index
    %c0_56 = arith.constant 0 : index
    %30 = vector.load %arg3[%c6, %c0_54, %c0_55, %c0_56] : memref<8x4x8x8xf32, #tpu.memory_space<vmem>>, vector<1x1x8x8xf32>
    %31 = vector.shape_cast %30 : vector<1x1x8x8xf32> to vector<8x8xf32>
    %c7 = arith.constant 7 : index
    %c0_57 = arith.constant 0 : index
    %c0_58 = arith.constant 0 : index
    %c0_59 = arith.constant 0 : index
    %32 = vector.load %arg3[%c7, %c0_57, %c0_58, %c0_59] : memref<8x4x8x8xf32, #tpu.memory_space<vmem>>, vector<1x1x8x8xf32>
    %33 = vector.shape_cast %32 : vector<1x1x8x8xf32> to vector<8x8xf32>
    %cst = arith.constant 0.000000e+00 : f32
    %34 = vector.broadcast %cst : f32 to vector<8x8xf32>
    %c0_60 = arith.constant 0 : index
    %c0_61 = arith.constant 0 : index
    %35 = memref.load %arg6[%c0_60, %c0_61] : memref<4x4xf32, #tpu.memory_space<smem>>
    %36 = vector.broadcast %35 : f32 to vector<16x16xf32>
    %37 = arith.mulf %36, %3 : vector<16x16xf32>
    %c0_62 = arith.constant 0 : index
    %c0_63 = arith.constant 0 : index
    %38 = memref.load %arg6[%c0_62, %c0_63] : memref<4x4xf32, #tpu.memory_space<smem>>
    %39 = vector.broadcast %38 : f32 to vector<16x16xf32>
    %40 = arith.mulf %39, %11 : vector<16x16xf32>
    %c0_64 = arith.constant 0 : index
    %c1_65 = arith.constant 1 : index
    %41 = memref.load %arg6[%c0_64, %c1_65] : memref<4x4xf32, #tpu.memory_space<smem>>
    %42 = vector.broadcast %41 : f32 to vector<16x16xf32>
    %43 = arith.mulf %42, %5 : vector<16x16xf32>
    %44 = arith.addf %37, %43 : vector<16x16xf32>
    %c0_66 = arith.constant 0 : index
    %c1_67 = arith.constant 1 : index
    %45 = memref.load %arg6[%c0_66, %c1_67] : memref<4x4xf32, #tpu.memory_space<smem>>
    %46 = vector.broadcast %45 : f32 to vector<16x16xf32>
    %47 = arith.mulf %46, %13 : vector<16x16xf32>
    %48 = arith.addf %40, %47 : vector<16x16xf32>
    %c0_68 = arith.constant 0 : index
    %c2_69 = arith.constant 2 : index
    %49 = memref.load %arg6[%c0_68, %c2_69] : memref<4x4xf32, #tpu.memory_space<smem>>
    %50 = vector.broadcast %49 : f32 to vector<16x16xf32>
    %51 = arith.mulf %50, %7 : vector<16x16xf32>
    %52 = arith.addf %44, %51 : vector<16x16xf32>
    %c0_70 = arith.constant 0 : index
    %c2_71 = arith.constant 2 : index
    %53 = memref.load %arg6[%c0_70, %c2_71] : memref<4x4xf32, #tpu.memory_space<smem>>
    %54 = vector.broadcast %53 : f32 to vector<16x16xf32>
    %55 = arith.mulf %54, %15 : vector<16x16xf32>
    %56 = arith.addf %48, %55 : vector<16x16xf32>
    %c0_72 = arith.constant 0 : index
    %c3_73 = arith.constant 3 : index
    %57 = memref.load %arg6[%c0_72, %c3_73] : memref<4x4xf32, #tpu.memory_space<smem>>
    %58 = vector.broadcast %57 : f32 to vector<16x16xf32>
    %59 = arith.mulf %58, %9 : vector<16x16xf32>
    %60 = arith.addf %52, %59 : vector<16x16xf32>
    %c0_74 = arith.constant 0 : index
    %c3_75 = arith.constant 3 : index
    %61 = memref.load %arg6[%c0_74, %c3_75] : memref<4x4xf32, #tpu.memory_space<smem>>
    %62 = vector.broadcast %61 : f32 to vector<16x16xf32>
    %63 = arith.mulf %62, %17 : vector<16x16xf32>
    %64 = arith.addf %56, %63 : vector<16x16xf32>
    %65 = arith.maximumf %60, %64 : vector<16x16xf32>
    %cst_76 = arith.constant dense<0.000000e+00> : vector<16x16xf32>
    %66 = tpu.matmul %0, %65, %cst_76 {dimension_numbers = #tpu.dot_dimension_numbers<[1], [0], [0], [1], [0, 0, 1, 1], [], []>} : vector<16x16xf32>, vector<16x16xf32>, vector<16x16xf32> -> vector<16x16xf32>
    %67 = vector.extract_strided_slice %66 {offsets = [0, 0], sizes = [8, 16], strides = [1, 1]} : vector<16x16xf32> to vector<8x16xf32>
    %68 = vector.extract_strided_slice %66 {offsets = [8, 0], sizes = [8, 16], strides = [1, 1]} : vector<16x16xf32> to vector<8x16xf32>
    %69 = arith.maximumf %67, %68 : vector<8x16xf32>
    %cst_77 = arith.constant dense<0.000000e+00> : vector<8x16xf32>
    %70 = tpu.matmul %69, %1, %cst_77 {dimension_numbers = #tpu.dot_dimension_numbers<[1], [0], [0], [1], [0, 0, 1, 1], [], []>} : vector<8x16xf32>, vector<16x16xf32>, vector<8x16xf32> -> vector<8x16xf32>
    %71 = vector.extract_strided_slice %70 {offsets = [0, 0], sizes = [8, 8], strides = [1, 1]} : vector<8x16xf32> to vector<8x8xf32>
    %72 = vector.extract_strided_slice %70 {offsets = [0, 8], sizes = [8, 8], strides = [1, 1]} : vector<8x16xf32> to vector<8x8xf32>
    %73 = arith.maximumf %71, %72 : vector<8x8xf32>
    %c0_78 = arith.constant 0 : index
    %c0_79 = arith.constant 0 : index
    %74 = memref.load %arg7[%c0_78, %c0_79] : memref<4x8xf32, #tpu.memory_space<smem>>
    %75 = vector.broadcast %74 : f32 to vector<8x8xf32>
    %76 = arith.mulf %75, %19 : vector<8x8xf32>
    %c0_80 = arith.constant 0 : index
    %c1_81 = arith.constant 1 : index
    %77 = memref.load %arg7[%c0_80, %c1_81] : memref<4x8xf32, #tpu.memory_space<smem>>
    %78 = vector.broadcast %77 : f32 to vector<8x8xf32>
    %79 = arith.mulf %78, %21 : vector<8x8xf32>
    %80 = arith.addf %76, %79 : vector<8x8xf32>
    %c0_82 = arith.constant 0 : index
    %c2_83 = arith.constant 2 : index
    %81 = memref.load %arg7[%c0_82, %c2_83] : memref<4x8xf32, #tpu.memory_space<smem>>
    %82 = vector.broadcast %81 : f32 to vector<8x8xf32>
    %83 = arith.mulf %82, %23 : vector<8x8xf32>
    %84 = arith.addf %80, %83 : vector<8x8xf32>
    %c0_84 = arith.constant 0 : index
    %c3_85 = arith.constant 3 : index
    %85 = memref.load %arg7[%c0_84, %c3_85] : memref<4x8xf32, #tpu.memory_space<smem>>
    %86 = vector.broadcast %85 : f32 to vector<8x8xf32>
    %87 = arith.mulf %86, %25 : vector<8x8xf32>
    %88 = arith.addf %84, %87 : vector<8x8xf32>
    %c0_86 = arith.constant 0 : index
    %c4_87 = arith.constant 4 : index
    %89 = memref.load %arg7[%c0_86, %c4_87] : memref<4x8xf32, #tpu.memory_space<smem>>
    %90 = vector.broadcast %89 : f32 to vector<8x8xf32>
    %91 = arith.mulf %90, %27 : vector<8x8xf32>
    %92 = arith.addf %88, %91 : vector<8x8xf32>
    %c0_88 = arith.constant 0 : index
    %c5_89 = arith.constant 5 : index
    %93 = memref.load %arg7[%c0_88, %c5_89] : memref<4x8xf32, #tpu.memory_space<smem>>
    %94 = vector.broadcast %93 : f32 to vector<8x8xf32>
    %95 = arith.mulf %94, %29 : vector<8x8xf32>
    %96 = arith.addf %92, %95 : vector<8x8xf32>
    %c0_90 = arith.constant 0 : index
    %c6_91 = arith.constant 6 : index
    %97 = memref.load %arg7[%c0_90, %c6_91] : memref<4x8xf32, #tpu.memory_space<smem>>
    %98 = vector.broadcast %97 : f32 to vector<8x8xf32>
    %99 = arith.mulf %98, %31 : vector<8x8xf32>
    %100 = arith.addf %96, %99 : vector<8x8xf32>
    %c0_92 = arith.constant 0 : index
    %c7_93 = arith.constant 7 : index
    %101 = memref.load %arg7[%c0_92, %c7_93] : memref<4x8xf32, #tpu.memory_space<smem>>
    %102 = vector.broadcast %101 : f32 to vector<8x8xf32>
    %103 = arith.mulf %102, %33 : vector<8x8xf32>
    %104 = arith.addf %100, %103 : vector<8x8xf32>
    %105 = arith.addf %73, %104 : vector<8x8xf32>
    %c1_94 = arith.constant 1 : index
    %c0_95 = arith.constant 0 : index
    %106 = memref.load %arg8[%c1_94, %c0_95] : memref<3x4xf32, #tpu.memory_space<smem>>
    %107 = vector.broadcast %106 : f32 to vector<8x8xf32>
    %108 = arith.addf %105, %107 : vector<8x8xf32>
    %cst_96 = arith.constant 0.000000e+00 : f32
    %109 = vector.broadcast %cst_96 : f32 to vector<8x8xf32>
    %110 = arith.maximumf %108, %109 : vector<8x8xf32>
    %c0_97 = arith.constant 0 : index
    %c0_98 = arith.constant 0 : index
    %111 = memref.load %arg8[%c0_97, %c0_98] : memref<3x4xf32, #tpu.memory_space<smem>>
    %112 = vector.broadcast %111 : f32 to vector<8x8xf32>
    %113 = arith.mulf %112, %110 : vector<8x8xf32>
    %114 = arith.addf %34, %113 : vector<8x8xf32>
    %c1_99 = arith.constant 1 : index
    %c0_100 = arith.constant 0 : index
    %115 = memref.load %arg6[%c1_99, %c0_100] : memref<4x4xf32, #tpu.memory_space<smem>>
    %116 = vector.broadcast %115 : f32 to vector<16x16xf32>
    %117 = arith.mulf %116, %3 : vector<16x16xf32>
    %c1_101 = arith.constant 1 : index
    %c0_102 = arith.constant 0 : index
    %118 = memref.load %arg6[%c1_101, %c0_102] : memref<4x4xf32, #tpu.memory_space<smem>>
    %119 = vector.broadcast %118 : f32 to vector<16x16xf32>
    %120 = arith.mulf %119, %11 : vector<16x16xf32>
    %c1_103 = arith.constant 1 : index
    %c1_104 = arith.constant 1 : index
    %121 = memref.load %arg6[%c1_103, %c1_104] : memref<4x4xf32, #tpu.memory_space<smem>>
    %122 = vector.broadcast %121 : f32 to vector<16x16xf32>
    %123 = arith.mulf %122, %5 : vector<16x16xf32>
    %124 = arith.addf %117, %123 : vector<16x16xf32>
    %c1_105 = arith.constant 1 : index
    %c1_106 = arith.constant 1 : index
    %125 = memref.load %arg6[%c1_105, %c1_106] : memref<4x4xf32, #tpu.memory_space<smem>>
    %126 = vector.broadcast %125 : f32 to vector<16x16xf32>
    %127 = arith.mulf %126, %13 : vector<16x16xf32>
    %128 = arith.addf %120, %127 : vector<16x16xf32>
    %c1_107 = arith.constant 1 : index
    %c2_108 = arith.constant 2 : index
    %129 = memref.load %arg6[%c1_107, %c2_108] : memref<4x4xf32, #tpu.memory_space<smem>>
    %130 = vector.broadcast %129 : f32 to vector<16x16xf32>
    %131 = arith.mulf %130, %7 : vector<16x16xf32>
    %132 = arith.addf %124, %131 : vector<16x16xf32>
    %c1_109 = arith.constant 1 : index
    %c2_110 = arith.constant 2 : index
    %133 = memref.load %arg6[%c1_109, %c2_110] : memref<4x4xf32, #tpu.memory_space<smem>>
    %134 = vector.broadcast %133 : f32 to vector<16x16xf32>
    %135 = arith.mulf %134, %15 : vector<16x16xf32>
    %136 = arith.addf %128, %135 : vector<16x16xf32>
    %c1_111 = arith.constant 1 : index
    %c3_112 = arith.constant 3 : index
    %137 = memref.load %arg6[%c1_111, %c3_112] : memref<4x4xf32, #tpu.memory_space<smem>>
    %138 = vector.broadcast %137 : f32 to vector<16x16xf32>
    %139 = arith.mulf %138, %9 : vector<16x16xf32>
    %140 = arith.addf %132, %139 : vector<16x16xf32>
    %c1_113 = arith.constant 1 : index
    %c3_114 = arith.constant 3 : index
    %141 = memref.load %arg6[%c1_113, %c3_114] : memref<4x4xf32, #tpu.memory_space<smem>>
    %142 = vector.broadcast %141 : f32 to vector<16x16xf32>
    %143 = arith.mulf %142, %17 : vector<16x16xf32>
    %144 = arith.addf %136, %143 : vector<16x16xf32>
    %145 = arith.maximumf %140, %144 : vector<16x16xf32>
    %cst_115 = arith.constant dense<0.000000e+00> : vector<16x16xf32>
    %146 = tpu.matmul %0, %145, %cst_115 {dimension_numbers = #tpu.dot_dimension_numbers<[1], [0], [0], [1], [0, 0, 1, 1], [], []>} : vector<16x16xf32>, vector<16x16xf32>, vector<16x16xf32> -> vector<16x16xf32>
    %147 = vector.extract_strided_slice %146 {offsets = [0, 0], sizes = [8, 16], strides = [1, 1]} : vector<16x16xf32> to vector<8x16xf32>
    %148 = vector.extract_strided_slice %146 {offsets = [8, 0], sizes = [8, 16], strides = [1, 1]} : vector<16x16xf32> to vector<8x16xf32>
    %149 = arith.maximumf %147, %148 : vector<8x16xf32>
    %cst_116 = arith.constant dense<0.000000e+00> : vector<8x16xf32>
    %150 = tpu.matmul %149, %1, %cst_116 {dimension_numbers = #tpu.dot_dimension_numbers<[1], [0], [0], [1], [0, 0, 1, 1], [], []>} : vector<8x16xf32>, vector<16x16xf32>, vector<8x16xf32> -> vector<8x16xf32>
    %151 = vector.extract_strided_slice %150 {offsets = [0, 0], sizes = [8, 8], strides = [1, 1]} : vector<8x16xf32> to vector<8x8xf32>
    %152 = vector.extract_strided_slice %150 {offsets = [0, 8], sizes = [8, 8], strides = [1, 1]} : vector<8x16xf32> to vector<8x8xf32>
    %153 = arith.maximumf %151, %152 : vector<8x8xf32>
    %c1_117 = arith.constant 1 : index
    %c0_118 = arith.constant 0 : index
    %154 = memref.load %arg7[%c1_117, %c0_118] : memref<4x8xf32, #tpu.memory_space<smem>>
    %155 = vector.broadcast %154 : f32 to vector<8x8xf32>
    %156 = arith.mulf %155, %19 : vector<8x8xf32>
    %c1_119 = arith.constant 1 : index
    %c1_120 = arith.constant 1 : index
    %157 = memref.load %arg7[%c1_119, %c1_120] : memref<4x8xf32, #tpu.memory_space<smem>>
    %158 = vector.broadcast %157 : f32 to vector<8x8xf32>
    %159 = arith.mulf %158, %21 : vector<8x8xf32>
    %160 = arith.addf %156, %159 : vector<8x8xf32>
    %c1_121 = arith.constant 1 : index
    %c2_122 = arith.constant 2 : index
    %161 = memref.load %arg7[%c1_121, %c2_122] : memref<4x8xf32, #tpu.memory_space<smem>>
    %162 = vector.broadcast %161 : f32 to vector<8x8xf32>
    %163 = arith.mulf %162, %23 : vector<8x8xf32>
    %164 = arith.addf %160, %163 : vector<8x8xf32>
    %c1_123 = arith.constant 1 : index
    %c3_124 = arith.constant 3 : index
    %165 = memref.load %arg7[%c1_123, %c3_124] : memref<4x8xf32, #tpu.memory_space<smem>>
    %166 = vector.broadcast %165 : f32 to vector<8x8xf32>
    %167 = arith.mulf %166, %25 : vector<8x8xf32>
    %168 = arith.addf %164, %167 : vector<8x8xf32>
    %c1_125 = arith.constant 1 : index
    %c4_126 = arith.constant 4 : index
    %169 = memref.load %arg7[%c1_125, %c4_126] : memref<4x8xf32, #tpu.memory_space<smem>>
    %170 = vector.broadcast %169 : f32 to vector<8x8xf32>
    %171 = arith.mulf %170, %27 : vector<8x8xf32>
    %172 = arith.addf %168, %171 : vector<8x8xf32>
    %c1_127 = arith.constant 1 : index
    %c5_128 = arith.constant 5 : index
    %173 = memref.load %arg7[%c1_127, %c5_128] : memref<4x8xf32, #tpu.memory_space<smem>>
    %174 = vector.broadcast %173 : f32 to vector<8x8xf32>
    %175 = arith.mulf %174, %29 : vector<8x8xf32>
    %176 = arith.addf %172, %175 : vector<8x8xf32>
    %c1_129 = arith.constant 1 : index
    %c6_130 = arith.constant 6 : index
    %177 = memref.load %arg7[%c1_129, %c6_130] : memref<4x8xf32, #tpu.memory_space<smem>>
    %178 = vector.broadcast %177 : f32 to vector<8x8xf32>
    %179 = arith.mulf %178, %31 : vector<8x8xf32>
    %180 = arith.addf %176, %179 : vector<8x8xf32>
    %c1_131 = arith.constant 1 : index
    %c7_132 = arith.constant 7 : index
    %181 = memref.load %arg7[%c1_131, %c7_132] : memref<4x8xf32, #tpu.memory_space<smem>>
    %182 = vector.broadcast %181 : f32 to vector<8x8xf32>
    %183 = arith.mulf %182, %33 : vector<8x8xf32>
    %184 = arith.addf %180, %183 : vector<8x8xf32>
    %185 = arith.addf %153, %184 : vector<8x8xf32>
    %c1_133 = arith.constant 1 : index
    %c1_134 = arith.constant 1 : index
    %186 = memref.load %arg8[%c1_133, %c1_134] : memref<3x4xf32, #tpu.memory_space<smem>>
    %187 = vector.broadcast %186 : f32 to vector<8x8xf32>
    %188 = arith.addf %185, %187 : vector<8x8xf32>
    %cst_135 = arith.constant 0.000000e+00 : f32
    %189 = vector.broadcast %cst_135 : f32 to vector<8x8xf32>
    %190 = arith.maximumf %188, %189 : vector<8x8xf32>
    %c0_136 = arith.constant 0 : index
    %c1_137 = arith.constant 1 : index
    %191 = memref.load %arg8[%c0_136, %c1_137] : memref<3x4xf32, #tpu.memory_space<smem>>
    %192 = vector.broadcast %191 : f32 to vector<8x8xf32>
    %193 = arith.mulf %192, %190 : vector<8x8xf32>
    %194 = arith.addf %114, %193 : vector<8x8xf32>
    %c2_138 = arith.constant 2 : index
    %c0_139 = arith.constant 0 : index
    %195 = memref.load %arg6[%c2_138, %c0_139] : memref<4x4xf32, #tpu.memory_space<smem>>
    %196 = vector.broadcast %195 : f32 to vector<16x16xf32>
    %197 = arith.mulf %196, %3 : vector<16x16xf32>
    %c2_140 = arith.constant 2 : index
    %c0_141 = arith.constant 0 : index
    %198 = memref.load %arg6[%c2_140, %c0_141] : memref<4x4xf32, #tpu.memory_space<smem>>
    %199 = vector.broadcast %198 : f32 to vector<16x16xf32>
    %200 = arith.mulf %199, %11 : vector<16x16xf32>
    %c2_142 = arith.constant 2 : index
    %c1_143 = arith.constant 1 : index
    %201 = memref.load %arg6[%c2_142, %c1_143] : memref<4x4xf32, #tpu.memory_space<smem>>
    %202 = vector.broadcast %201 : f32 to vector<16x16xf32>
    %203 = arith.mulf %202, %5 : vector<16x16xf32>
    %204 = arith.addf %197, %203 : vector<16x16xf32>
    %c2_144 = arith.constant 2 : index
    %c1_145 = arith.constant 1 : index
    %205 = memref.load %arg6[%c2_144, %c1_145] : memref<4x4xf32, #tpu.memory_space<smem>>
    %206 = vector.broadcast %205 : f32 to vector<16x16xf32>
    %207 = arith.mulf %206, %13 : vector<16x16xf32>
    %208 = arith.addf %200, %207 : vector<16x16xf32>
    %c2_146 = arith.constant 2 : index
    %c2_147 = arith.constant 2 : index
    %209 = memref.load %arg6[%c2_146, %c2_147] : memref<4x4xf32, #tpu.memory_space<smem>>
    %210 = vector.broadcast %209 : f32 to vector<16x16xf32>
    %211 = arith.mulf %210, %7 : vector<16x16xf32>
    %212 = arith.addf %204, %211 : vector<16x16xf32>
    %c2_148 = arith.constant 2 : index
    %c2_149 = arith.constant 2 : index
    %213 = memref.load %arg6[%c2_148, %c2_149] : memref<4x4xf32, #tpu.memory_space<smem>>
    %214 = vector.broadcast %213 : f32 to vector<16x16xf32>
    %215 = arith.mulf %214, %15 : vector<16x16xf32>
    %216 = arith.addf %208, %215 : vector<16x16xf32>
    %c2_150 = arith.constant 2 : index
    %c3_151 = arith.constant 3 : index
    %217 = memref.load %arg6[%c2_150, %c3_151] : memref<4x4xf32, #tpu.memory_space<smem>>
    %218 = vector.broadcast %217 : f32 to vector<16x16xf32>
    %219 = arith.mulf %218, %9 : vector<16x16xf32>
    %220 = arith.addf %212, %219 : vector<16x16xf32>
    %c2_152 = arith.constant 2 : index
    %c3_153 = arith.constant 3 : index
    %221 = memref.load %arg6[%c2_152, %c3_153] : memref<4x4xf32, #tpu.memory_space<smem>>
    %222 = vector.broadcast %221 : f32 to vector<16x16xf32>
    %223 = arith.mulf %222, %17 : vector<16x16xf32>
    %224 = arith.addf %216, %223 : vector<16x16xf32>
    %225 = arith.maximumf %220, %224 : vector<16x16xf32>
    %cst_154 = arith.constant dense<0.000000e+00> : vector<16x16xf32>
    %226 = tpu.matmul %0, %225, %cst_154 {dimension_numbers = #tpu.dot_dimension_numbers<[1], [0], [0], [1], [0, 0, 1, 1], [], []>} : vector<16x16xf32>, vector<16x16xf32>, vector<16x16xf32> -> vector<16x16xf32>
    %227 = vector.extract_strided_slice %226 {offsets = [0, 0], sizes = [8, 16], strides = [1, 1]} : vector<16x16xf32> to vector<8x16xf32>
    %228 = vector.extract_strided_slice %226 {offsets = [8, 0], sizes = [8, 16], strides = [1, 1]} : vector<16x16xf32> to vector<8x16xf32>
    %229 = arith.maximumf %227, %228 : vector<8x16xf32>
    %cst_155 = arith.constant dense<0.000000e+00> : vector<8x16xf32>
    %230 = tpu.matmul %229, %1, %cst_155 {dimension_numbers = #tpu.dot_dimension_numbers<[1], [0], [0], [1], [0, 0, 1, 1], [], []>} : vector<8x16xf32>, vector<16x16xf32>, vector<8x16xf32> -> vector<8x16xf32>
    %231 = vector.extract_strided_slice %230 {offsets = [0, 0], sizes = [8, 8], strides = [1, 1]} : vector<8x16xf32> to vector<8x8xf32>
    %232 = vector.extract_strided_slice %230 {offsets = [0, 8], sizes = [8, 8], strides = [1, 1]} : vector<8x16xf32> to vector<8x8xf32>
    %233 = arith.maximumf %231, %232 : vector<8x8xf32>
    %c2_156 = arith.constant 2 : index
    %c0_157 = arith.constant 0 : index
    %234 = memref.load %arg7[%c2_156, %c0_157] : memref<4x8xf32, #tpu.memory_space<smem>>
    %235 = vector.broadcast %234 : f32 to vector<8x8xf32>
    %236 = arith.mulf %235, %19 : vector<8x8xf32>
    %c2_158 = arith.constant 2 : index
    %c1_159 = arith.constant 1 : index
    %237 = memref.load %arg7[%c2_158, %c1_159] : memref<4x8xf32, #tpu.memory_space<smem>>
    %238 = vector.broadcast %237 : f32 to vector<8x8xf32>
    %239 = arith.mulf %238, %21 : vector<8x8xf32>
    %240 = arith.addf %236, %239 : vector<8x8xf32>
    %c2_160 = arith.constant 2 : index
    %c2_161 = arith.constant 2 : index
    %241 = memref.load %arg7[%c2_160, %c2_161] : memref<4x8xf32, #tpu.memory_space<smem>>
    %242 = vector.broadcast %241 : f32 to vector<8x8xf32>
    %243 = arith.mulf %242, %23 : vector<8x8xf32>
    %244 = arith.addf %240, %243 : vector<8x8xf32>
    %c2_162 = arith.constant 2 : index
    %c3_163 = arith.constant 3 : index
    %245 = memref.load %arg7[%c2_162, %c3_163] : memref<4x8xf32, #tpu.memory_space<smem>>
    %246 = vector.broadcast %245 : f32 to vector<8x8xf32>
    %247 = arith.mulf %246, %25 : vector<8x8xf32>
    %248 = arith.addf %244, %247 : vector<8x8xf32>
    %c2_164 = arith.constant 2 : index
    %c4_165 = arith.constant 4 : index
    %249 = memref.load %arg7[%c2_164, %c4_165] : memref<4x8xf32, #tpu.memory_space<smem>>
    %250 = vector.broadcast %249 : f32 to vector<8x8xf32>
    %251 = arith.mulf %250, %27 : vector<8x8xf32>
    %252 = arith.addf %248, %251 : vector<8x8xf32>
    %c2_166 = arith.constant 2 : index
    %c5_167 = arith.constant 5 : index
    %253 = memref.load %arg7[%c2_166, %c5_167] : memref<4x8xf32, #tpu.memory_space<smem>>
    %254 = vector.broadcast %253 : f32 to vector<8x8xf32>
    %255 = arith.mulf %254, %29 : vector<8x8xf32>
    %256 = arith.addf %252, %255 : vector<8x8xf32>
    %c2_168 = arith.constant 2 : index
    %c6_169 = arith.constant 6 : index
    %257 = memref.load %arg7[%c2_168, %c6_169] : memref<4x8xf32, #tpu.memory_space<smem>>
    %258 = vector.broadcast %257 : f32 to vector<8x8xf32>
    %259 = arith.mulf %258, %31 : vector<8x8xf32>
    %260 = arith.addf %256, %259 : vector<8x8xf32>
    %c2_170 = arith.constant 2 : index
    %c7_171 = arith.constant 7 : index
    %261 = memref.load %arg7[%c2_170, %c7_171] : memref<4x8xf32, #tpu.memory_space<smem>>
    %262 = vector.broadcast %261 : f32 to vector<8x8xf32>
    %263 = arith.mulf %262, %33 : vector<8x8xf32>
    %264 = arith.addf %260, %263 : vector<8x8xf32>
    %265 = arith.addf %233, %264 : vector<8x8xf32>
    %c1_172 = arith.constant 1 : index
    %c2_173 = arith.constant 2 : index
    %266 = memref.load %arg8[%c1_172, %c2_173] : memref<3x4xf32, #tpu.memory_space<smem>>
    %267 = vector.broadcast %266 : f32 to vector<8x8xf32>
    %268 = arith.addf %265, %267 : vector<8x8xf32>
    %cst_174 = arith.constant 0.000000e+00 : f32
    %269 = vector.broadcast %cst_174 : f32 to vector<8x8xf32>
    %270 = arith.maximumf %268, %269 : vector<8x8xf32>
    %c0_175 = arith.constant 0 : index
    %c2_176 = arith.constant 2 : index
    %271 = memref.load %arg8[%c0_175, %c2_176] : memref<3x4xf32, #tpu.memory_space<smem>>
    %272 = vector.broadcast %271 : f32 to vector<8x8xf32>
    %273 = arith.mulf %272, %270 : vector<8x8xf32>
    %274 = arith.addf %194, %273 : vector<8x8xf32>
    %c3_177 = arith.constant 3 : index
    %c0_178 = arith.constant 0 : index
    %275 = memref.load %arg6[%c3_177, %c0_178] : memref<4x4xf32, #tpu.memory_space<smem>>
    %276 = vector.broadcast %275 : f32 to vector<16x16xf32>
    %277 = arith.mulf %276, %3 : vector<16x16xf32>
    %c3_179 = arith.constant 3 : index
    %c0_180 = arith.constant 0 : index
    %278 = memref.load %arg6[%c3_179, %c0_180] : memref<4x4xf32, #tpu.memory_space<smem>>
    %279 = vector.broadcast %278 : f32 to vector<16x16xf32>
    %280 = arith.mulf %279, %11 : vector<16x16xf32>
    %c3_181 = arith.constant 3 : index
    %c1_182 = arith.constant 1 : index
    %281 = memref.load %arg6[%c3_181, %c1_182] : memref<4x4xf32, #tpu.memory_space<smem>>
    %282 = vector.broadcast %281 : f32 to vector<16x16xf32>
    %283 = arith.mulf %282, %5 : vector<16x16xf32>
    %284 = arith.addf %277, %283 : vector<16x16xf32>
    %c3_183 = arith.constant 3 : index
    %c1_184 = arith.constant 1 : index
    %285 = memref.load %arg6[%c3_183, %c1_184] : memref<4x4xf32, #tpu.memory_space<smem>>
    %286 = vector.broadcast %285 : f32 to vector<16x16xf32>
    %287 = arith.mulf %286, %13 : vector<16x16xf32>
    %288 = arith.addf %280, %287 : vector<16x16xf32>
    %c3_185 = arith.constant 3 : index
    %c2_186 = arith.constant 2 : index
    %289 = memref.load %arg6[%c3_185, %c2_186] : memref<4x4xf32, #tpu.memory_space<smem>>
    %290 = vector.broadcast %289 : f32 to vector<16x16xf32>
    %291 = arith.mulf %290, %7 : vector<16x16xf32>
    %292 = arith.addf %284, %291 : vector<16x16xf32>
    %c3_187 = arith.constant 3 : index
    %c2_188 = arith.constant 2 : index
    %293 = memref.load %arg6[%c3_187, %c2_188] : memref<4x4xf32, #tpu.memory_space<smem>>
    %294 = vector.broadcast %293 : f32 to vector<16x16xf32>
    %295 = arith.mulf %294, %15 : vector<16x16xf32>
    %296 = arith.addf %288, %295 : vector<16x16xf32>
    %c3_189 = arith.constant 3 : index
    %c3_190 = arith.constant 3 : index
    %297 = memref.load %arg6[%c3_189, %c3_190] : memref<4x4xf32, #tpu.memory_space<smem>>
    %298 = vector.broadcast %297 : f32 to vector<16x16xf32>
    %299 = arith.mulf %298, %9 : vector<16x16xf32>
    %300 = arith.addf %292, %299 : vector<16x16xf32>
    %c3_191 = arith.constant 3 : index
    %c3_192 = arith.constant 3 : index
    %301 = memref.load %arg6[%c3_191, %c3_192] : memref<4x4xf32, #tpu.memory_space<smem>>
    %302 = vector.broadcast %301 : f32 to vector<16x16xf32>
    %303 = arith.mulf %302, %17 : vector<16x16xf32>
    %304 = arith.addf %296, %303 : vector<16x16xf32>
    %305 = arith.maximumf %300, %304 : vector<16x16xf32>
    %cst_193 = arith.constant dense<0.000000e+00> : vector<16x16xf32>
    %306 = tpu.matmul %0, %305, %cst_193 {dimension_numbers = #tpu.dot_dimension_numbers<[1], [0], [0], [1], [0, 0, 1, 1], [], []>} : vector<16x16xf32>, vector<16x16xf32>, vector<16x16xf32> -> vector<16x16xf32>
    %307 = vector.extract_strided_slice %306 {offsets = [0, 0], sizes = [8, 16], strides = [1, 1]} : vector<16x16xf32> to vector<8x16xf32>
    %308 = vector.extract_strided_slice %306 {offsets = [8, 0], sizes = [8, 16], strides = [1, 1]} : vector<16x16xf32> to vector<8x16xf32>
    %309 = arith.maximumf %307, %308 : vector<8x16xf32>
    %cst_194 = arith.constant dense<0.000000e+00> : vector<8x16xf32>
    %310 = tpu.matmul %309, %1, %cst_194 {dimension_numbers = #tpu.dot_dimension_numbers<[1], [0], [0], [1], [0, 0, 1, 1], [], []>} : vector<8x16xf32>, vector<16x16xf32>, vector<8x16xf32> -> vector<8x16xf32>
    %311 = vector.extract_strided_slice %310 {offsets = [0, 0], sizes = [8, 8], strides = [1, 1]} : vector<8x16xf32> to vector<8x8xf32>
    %312 = vector.extract_strided_slice %310 {offsets = [0, 8], sizes = [8, 8], strides = [1, 1]} : vector<8x16xf32> to vector<8x8xf32>
    %313 = arith.maximumf %311, %312 : vector<8x8xf32>
    %c3_195 = arith.constant 3 : index
    %c0_196 = arith.constant 0 : index
    %314 = memref.load %arg7[%c3_195, %c0_196] : memref<4x8xf32, #tpu.memory_space<smem>>
    %315 = vector.broadcast %314 : f32 to vector<8x8xf32>
    %316 = arith.mulf %315, %19 : vector<8x8xf32>
    %c3_197 = arith.constant 3 : index
    %c1_198 = arith.constant 1 : index
    %317 = memref.load %arg7[%c3_197, %c1_198] : memref<4x8xf32, #tpu.memory_space<smem>>
    %318 = vector.broadcast %317 : f32 to vector<8x8xf32>
    %319 = arith.mulf %318, %21 : vector<8x8xf32>
    %320 = arith.addf %316, %319 : vector<8x8xf32>
    %c3_199 = arith.constant 3 : index
    %c2_200 = arith.constant 2 : index
    %321 = memref.load %arg7[%c3_199, %c2_200] : memref<4x8xf32, #tpu.memory_space<smem>>
    %322 = vector.broadcast %321 : f32 to vector<8x8xf32>
    %323 = arith.mulf %322, %23 : vector<8x8xf32>
    %324 = arith.addf %320, %323 : vector<8x8xf32>
    %c3_201 = arith.constant 3 : index
    %c3_202 = arith.constant 3 : index
    %325 = memref.load %arg7[%c3_201, %c3_202] : memref<4x8xf32, #tpu.memory_space<smem>>
    %326 = vector.broadcast %325 : f32 to vector<8x8xf32>
    %327 = arith.mulf %326, %25 : vector<8x8xf32>
    %328 = arith.addf %324, %327 : vector<8x8xf32>
    %c3_203 = arith.constant 3 : index
    %c4_204 = arith.constant 4 : index
    %329 = memref.load %arg7[%c3_203, %c4_204] : memref<4x8xf32, #tpu.memory_space<smem>>
    %330 = vector.broadcast %329 : f32 to vector<8x8xf32>
    %331 = arith.mulf %330, %27 : vector<8x8xf32>
    %332 = arith.addf %328, %331 : vector<8x8xf32>
    %c3_205 = arith.constant 3 : index
    %c5_206 = arith.constant 5 : index
    %333 = memref.load %arg7[%c3_205, %c5_206] : memref<4x8xf32, #tpu.memory_space<smem>>
    %334 = vector.broadcast %333 : f32 to vector<8x8xf32>
    %335 = arith.mulf %334, %29 : vector<8x8xf32>
    %336 = arith.addf %332, %335 : vector<8x8xf32>
    %c3_207 = arith.constant 3 : index
    %c6_208 = arith.constant 6 : index
    %337 = memref.load %arg7[%c3_207, %c6_208] : memref<4x8xf32, #tpu.memory_space<smem>>
    %338 = vector.broadcast %337 : f32 to vector<8x8xf32>
    %339 = arith.mulf %338, %31 : vector<8x8xf32>
    %340 = arith.addf %336, %339 : vector<8x8xf32>
    %c3_209 = arith.constant 3 : index
    %c7_210 = arith.constant 7 : index
    %341 = memref.load %arg7[%c3_209, %c7_210] : memref<4x8xf32, #tpu.memory_space<smem>>
    %342 = vector.broadcast %341 : f32 to vector<8x8xf32>
    %343 = arith.mulf %342, %33 : vector<8x8xf32>
    %344 = arith.addf %340, %343 : vector<8x8xf32>
    %345 = arith.addf %313, %344 : vector<8x8xf32>
    %c1_211 = arith.constant 1 : index
    %c3_212 = arith.constant 3 : index
    %346 = memref.load %arg8[%c1_211, %c3_212] : memref<3x4xf32, #tpu.memory_space<smem>>
    %347 = vector.broadcast %346 : f32 to vector<8x8xf32>
    %348 = arith.addf %345, %347 : vector<8x8xf32>
    %cst_213 = arith.constant 0.000000e+00 : f32
    %349 = vector.broadcast %cst_213 : f32 to vector<8x8xf32>
    %350 = arith.maximumf %348, %349 : vector<8x8xf32>
    %c0_214 = arith.constant 0 : index
    %c3_215 = arith.constant 3 : index
    %351 = memref.load %arg8[%c0_214, %c3_215] : memref<3x4xf32, #tpu.memory_space<smem>>
    %352 = vector.broadcast %351 : f32 to vector<8x8xf32>
    %353 = arith.mulf %352, %350 : vector<8x8xf32>
    %354 = arith.addf %274, %353 : vector<8x8xf32>
    %c2_216 = arith.constant 2 : index
    %c0_217 = arith.constant 0 : index
    %355 = memref.load %arg8[%c2_216, %c0_217] : memref<3x4xf32, #tpu.memory_space<smem>>
    %356 = vector.broadcast %355 : f32 to vector<8x8xf32>
    %357 = arith.addf %354, %356 : vector<8x8xf32>
    %358 = arith.negf %357 : vector<8x8xf32>
    %359 = math.exp %358 : vector<8x8xf32>
    %cst_218 = arith.constant 1.000000e+00 : f32
    %360 = vector.broadcast %cst_218 : f32 to vector<8x8xf32>
    %361 = arith.addf %360, %359 : vector<8x8xf32>
    %362 = arith.divf %360, %361 : vector<8x8xf32>
    %c0_219 = arith.constant 0 : index
    %c0_220 = arith.constant 0 : index
    %c0_221 = arith.constant 0 : index
    %363 = vector.load %arg9[%c0_219, %c0_220, %c0_221] : memref<4x8x8xf32, #tpu.memory_space<vmem>>, vector<1x8x8xf32>
    %364 = vector.shape_cast %363 : vector<1x8x8xf32> to vector<8x8xf32>
    %365 = vector.shape_cast %362 : vector<8x8xf32> to vector<1x8x8xf32>
    tpu.vector_store %arg9[%c0_219, %c0_220, %c0_221], %365 {strides = array<i32>} : memref<4x8x8xf32, #tpu.memory_space<vmem>>, vector<1x8x8xf32>,
    %c0_222 = arith.constant 0 : index
    %c2_223 = arith.constant 2 : index
    %c0_224 = arith.constant 0 : index
    %c0_225 = arith.constant 0 : index
    %366 = vector.load %arg2[%c0_222, %c2_223, %c0_224, %c0_225] : memref<4x8x16x16xf32, #tpu.memory_space<vmem>>, vector<1x1x16x16xf32>
    %367 = vector.shape_cast %366 : vector<1x1x16x16xf32> to vector<16x16xf32>
    %c1_226 = arith.constant 1 : index
    %c2_227 = arith.constant 2 : index
    %c0_228 = arith.constant 0 : index
    %c0_229 = arith.constant 0 : index
    %368 = vector.load %arg2[%c1_226, %c2_227, %c0_228, %c0_229] : memref<4x8x16x16xf32, #tpu.memory_space<vmem>>, vector<1x1x16x16xf32>
    %369 = vector.shape_cast %368 : vector<1x1x16x16xf32> to vector<16x16xf32>
    %c2_230 = arith.constant 2 : index
    %c2_231 = arith.constant 2 : index
    %c0_232 = arith.constant 0 : index
    %c0_233 = arith.constant 0 : index
    %370 = vector.load %arg2[%c2_230, %c2_231, %c0_232, %c0_233] : memref<4x8x16x16xf32, #tpu.memory_space<vmem>>, vector<1x1x16x16xf32>
    %371 = vector.shape_cast %370 : vector<1x1x16x16xf32> to vector<16x16xf32>
    %c3_234 = arith.constant 3 : index
    %c2_235 = arith.constant 2 : index
    %c0_236 = arith.constant 0 : index
    %c0_237 = arith.constant 0 : index
    %372 = vector.load %arg2[%c3_234, %c2_235, %c0_236, %c0_237] : memref<4x8x16x16xf32, #tpu.memory_space<vmem>>, vector<1x1x16x16xf32>
    %373 = vector.shape_cast %372 : vector<1x1x16x16xf32> to vector<16x16xf32>
    %c0_238 = arith.constant 0 : index
    %c3_239 = arith.constant 3 : index
    %c0_240 = arith.constant 0 : index
    %c0_241 = arith.constant 0 : index
    %374 = vector.load %arg2[%c0_238, %c3_239, %c0_240, %c0_241] : memref<4x8x16x16xf32, #tpu.memory_space<vmem>>, vector<1x1x16x16xf32>
    %375 = vector.shape_cast %374 : vector<1x1x16x16xf32> to vector<16x16xf32>
    %c1_242 = arith.constant 1 : index
    %c3_243 = arith.constant 3 : index
    %c0_244 = arith.constant 0 : index
    %c0_245 = arith.constant 0 : index
    %376 = vector.load %arg2[%c1_242, %c3_243, %c0_244, %c0_245] : memref<4x8x16x16xf32, #tpu.memory_space<vmem>>, vector<1x1x16x16xf32>
    %377 = vector.shape_cast %376 : vector<1x1x16x16xf32> to vector<16x16xf32>
    %c2_246 = arith.constant 2 : index
    %c3_247 = arith.constant 3 : index
    %c0_248 = arith.constant 0 : index
    %c0_249 = arith.constant 0 : index
    %378 = vector.load %arg2[%c2_246, %c3_247, %c0_248, %c0_249] : memref<4x8x16x16xf32, #tpu.memory_space<vmem>>, vector<1x1x16x16xf32>
    %379 = vector.shape_cast %378 : vector<1x1x16x16xf32> to vector<16x16xf32>
    %c3_250 = arith.constant 3 : index
    %c3_251 = arith.constant 3 : index
    %c0_252 = arith.constant 0 : index
    %c0_253 = arith.constant 0 : index
    %380 = vector.load %arg2[%c3_250, %c3_251, %c0_252, %c0_253] : memref<4x8x16x16xf32, #tpu.memory_space<vmem>>, vector<1x1x16x16xf32>
    %381 = vector.shape_cast %380 : vector<1x1x16x16xf32> to vector<16x16xf32>
    %c0_254 = arith.constant 0 : index
    %c1_255 = arith.constant 1 : index
    %c0_256 = arith.constant 0 : index
    %c0_257 = arith.constant 0 : index
    %382 = vector.load %arg3[%c0_254, %c1_255, %c0_256, %c0_257] : memref<8x4x8x8xf32, #tpu.memory_space<vmem>>, vector<1x1x8x8xf32>
    %383 = vector.shape_cast %382 : vector<1x1x8x8xf32> to vector<8x8xf32>
    %c1_258 = arith.constant 1 : index
    %c1_259 = arith.constant 1 : index
    %c0_260 = arith.constant 0 : index
    %c0_261 = arith.constant 0 : index
    %384 = vector.load %arg3[%c1_258, %c1_259, %c0_260, %c0_261] : memref<8x4x8x8xf32, #tpu.memory_space<vmem>>, vector<1x1x8x8xf32>
    %385 = vector.shape_cast %384 : vector<1x1x8x8xf32> to vector<8x8xf32>
    %c2_262 = arith.constant 2 : index
    %c1_263 = arith.constant 1 : index
    %c0_264 = arith.constant 0 : index
    %c0_265 = arith.constant 0 : index
    %386 = vector.load %arg3[%c2_262, %c1_263, %c0_264, %c0_265] : memref<8x4x8x8xf32, #tpu.memory_space<vmem>>, vector<1x1x8x8xf32>
    %387 = vector.shape_cast %386 : vector<1x1x8x8xf32> to vector<8x8xf32>
    %c3_266 = arith.constant 3 : index
    %c1_267 = arith.constant 1 : index
    %c0_268 = arith.constant 0 : index
    %c0_269 = arith.constant 0 : index
    %388 = vector.load %arg3[%c3_266, %c1_267, %c0_268, %c0_269] : memref<8x4x8x8xf32, #tpu.memory_space<vmem>>, vector<1x1x8x8xf32>
    %389 = vector.shape_cast %388 : vector<1x1x8x8xf32> to vector<8x8xf32>
    %c4_270 = arith.constant 4 : index
    %c1_271 = arith.constant 1 : index
    %c0_272 = arith.constant 0 : index
    %c0_273 = arith.constant 0 : index
    %390 = vector.load %arg3[%c4_270, %c1_271, %c0_272, %c0_273] : memref<8x4x8x8xf32, #tpu.memory_space<vmem>>, vector<1x1x8x8xf32>
    %391 = vector.shape_cast %390 : vector<1x1x8x8xf32> to vector<8x8xf32>
    %c5_274 = arith.constant 5 : index
    %c1_275 = arith.constant 1 : index
    %c0_276 = arith.constant 0 : index
    %c0_277 = arith.constant 0 : index
    %392 = vector.load %arg3[%c5_274, %c1_275, %c0_276, %c0_277] : memref<8x4x8x8xf32, #tpu.memory_space<vmem>>, vector<1x1x8x8xf32>
    %393 = vector.shape_cast %392 : vector<1x1x8x8xf32> to vector<8x8xf32>
    %c6_278 = arith.constant 6 : index
    %c1_279 = arith.constant 1 : index
    %c0_280 = arith.constant 0 : index
    %c0_281 = arith.constant 0 : index
    %394 = vector.load %arg3[%c6_278, %c1_279, %c0_280, %c0_281] : memref<8x4x8x8xf32, #tpu.memory_space<vmem>>, vector<1x1x8x8xf32>
    %395 = vector.shape_cast %394 : vector<1x1x8x8xf32> to vector<8x8xf32>
    %c7_282 = arith.constant 7 : index
    %c1_283 = arith.constant 1 : index
    %c0_284 = arith.constant 0 : index
    %c0_285 = arith.constant 0 : index
    %396 = vector.load %arg3[%c7_282, %c1_283, %c0_284, %c0_285] : memref<8x4x8x8xf32, #tpu.memory_space<vmem>>, vector<1x1x8x8xf32>
    %397 = vector.shape_cast %396 : vector<1x1x8x8xf32> to vector<8x8xf32>
    %cst_286 = arith.constant 0.000000e+00 : f32
    %398 = vector.broadcast %cst_286 : f32 to vector<8x8xf32>
    %c0_287 = arith.constant 0 : index
    %c0_288 = arith.constant 0 : index
    %399 = memref.load %arg6[%c0_287, %c0_288] : memref<4x4xf32, #tpu.memory_space<smem>>
    %400 = vector.broadcast %399 : f32 to vector<16x16xf32>
    %401 = arith.mulf %400, %367 : vector<16x16xf32>
    %c0_289 = arith.constant 0 : index
    %c0_290 = arith.constant 0 : index
    %402 = memref.load %arg6[%c0_289, %c0_290] : memref<4x4xf32, #tpu.memory_space<smem>>
    %403 = vector.broadcast %402 : f32 to vector<16x16xf32>
    %404 = arith.mulf %403, %375 : vector<16x16xf32>
    %c0_291 = arith.constant 0 : index
    %c1_292 = arith.constant 1 : index
    %405 = memref.load %arg6[%c0_291, %c1_292] : memref<4x4xf32, #tpu.memory_space<smem>>
    %406 = vector.broadcast %405 : f32 to vector<16x16xf32>
    %407 = arith.mulf %406, %369 : vector<16x16xf32>
    %408 = arith.addf %401, %407 : vector<16x16xf32>
    %c0_293 = arith.constant 0 : index
    %c1_294 = arith.constant 1 : index
    %409 = memref.load %arg6[%c0_293, %c1_294] : memref<4x4xf32, #tpu.memory_space<smem>>
    %410 = vector.broadcast %409 : f32 to vector<16x16xf32>
    %411 = arith.mulf %410, %377 : vector<16x16xf32>
    %412 = arith.addf %404, %411 : vector<16x16xf32>
    %c0_295 = arith.constant 0 : index
    %c2_296 = arith.constant 2 : index
    %413 = memref.load %arg6[%c0_295, %c2_296] : memref<4x4xf32, #tpu.memory_space<smem>>
    %414 = vector.broadcast %413 : f32 to vector<16x16xf32>
    %415 = arith.mulf %414, %371 : vector<16x16xf32>
    %416 = arith.addf %408, %415 : vector<16x16xf32>
    %c0_297 = arith.constant 0 : index
    %c2_298 = arith.constant 2 : index
    %417 = memref.load %arg6[%c0_297, %c2_298] : memref<4x4xf32, #tpu.memory_space<smem>>
    %418 = vector.broadcast %417 : f32 to vector<16x16xf32>
    %419 = arith.mulf %418, %379 : vector<16x16xf32>
    %420 = arith.addf %412, %419 : vector<16x16xf32>
    %c0_299 = arith.constant 0 : index
    %c3_300 = arith.constant 3 : index
    %421 = memref.load %arg6[%c0_299, %c3_300] : memref<4x4xf32, #tpu.memory_space<smem>>
    %422 = vector.broadcast %421 : f32 to vector<16x16xf32>
    %423 = arith.mulf %422, %373 : vector<16x16xf32>
    %424 = arith.addf %416, %423 : vector<16x16xf32>
    %c0_301 = arith.constant 0 : index
    %c3_302 = arith.constant 3 : index
    %425 = memref.load %arg6[%c0_301, %c3_302] : memref<4x4xf32, #tpu.memory_space<smem>>
    %426 = vector.broadcast %425 : f32 to vector<16x16xf32>
    %427 = arith.mulf %426, %381 : vector<16x16xf32>
    %428 = arith.addf %420, %427 : vector<16x16xf32>
    %429 = arith.maximumf %424, %428 : vector<16x16xf32>
    %cst_303 = arith.constant dense<0.000000e+00> : vector<16x16xf32>
    %430 = tpu.matmul %0, %429, %cst_303 {dimension_numbers = #tpu.dot_dimension_numbers<[1], [0], [0], [1], [0, 0, 1, 1], [], []>} : vector<16x16xf32>, vector<16x16xf32>, vector<16x16xf32> -> vector<16x16xf32>
    %431 = vector.extract_strided_slice %430 {offsets = [0, 0], sizes = [8, 16], strides = [1, 1]} : vector<16x16xf32> to vector<8x16xf32>
    %432 = vector.extract_strided_slice %430 {offsets = [8, 0], sizes = [8, 16], strides = [1, 1]} : vector<16x16xf32> to vector<8x16xf32>
    %433 = arith.maximumf %431, %432 : vector<8x16xf32>
    %cst_304 = arith.constant dense<0.000000e+00> : vector<8x16xf32>
    %434 = tpu.matmul %433, %1, %cst_304 {dimension_numbers = #tpu.dot_dimension_numbers<[1], [0], [0], [1], [0, 0, 1, 1], [], []>} : vector<8x16xf32>, vector<16x16xf32>, vector<8x16xf32> -> vector<8x16xf32>
    %435 = vector.extract_strided_slice %434 {offsets = [0, 0], sizes = [8, 8], strides = [1, 1]} : vector<8x16xf32> to vector<8x8xf32>
    %436 = vector.extract_strided_slice %434 {offsets = [0, 8], sizes = [8, 8], strides = [1, 1]} : vector<8x16xf32> to vector<8x8xf32>
    %437 = arith.maximumf %435, %436 : vector<8x8xf32>
    %c0_305 = arith.constant 0 : index
    %c0_306 = arith.constant 0 : index
    %438 = memref.load %arg7[%c0_305, %c0_306] : memref<4x8xf32, #tpu.memory_space<smem>>
    %439 = vector.broadcast %438 : f32 to vector<8x8xf32>
    %440 = arith.mulf %439, %383 : vector<8x8xf32>
    %c0_307 = arith.constant 0 : index
    %c1_308 = arith.constant 1 : index
    %441 = memref.load %arg7[%c0_307, %c1_308] : memref<4x8xf32, #tpu.memory_space<smem>>
    %442 = vector.broadcast %441 : f32 to vector<8x8xf32>
    %443 = arith.mulf %442, %385 : vector<8x8xf32>
    %444 = arith.addf %440, %443 : vector<8x8xf32>
    %c0_309 = arith.constant 0 : index
    %c2_310 = arith.constant 2 : index
    %445 = memref.load %arg7[%c0_309, %c2_310] : memref<4x8xf32, #tpu.memory_space<smem>>
    %446 = vector.broadcast %445 : f32 to vector<8x8xf32>
    %447 = arith.mulf %446, %387 : vector<8x8xf32>
    %448 = arith.addf %444, %447 : vector<8x8xf32>
    %c0_311 = arith.constant 0 : index
    %c3_312 = arith.constant 3 : index
    %449 = memref.load %arg7[%c0_311, %c3_312] : memref<4x8xf32, #tpu.memory_space<smem>>
    %450 = vector.broadcast %449 : f32 to vector<8x8xf32>
    %451 = arith.mulf %450, %389 : vector<8x8xf32>
    %452 = arith.addf %448, %451 : vector<8x8xf32>
    %c0_313 = arith.constant 0 : index
    %c4_314 = arith.constant 4 : index
    %453 = memref.load %arg7[%c0_313, %c4_314] : memref<4x8xf32, #tpu.memory_space<smem>>
    %454 = vector.broadcast %453 : f32 to vector<8x8xf32>
    %455 = arith.mulf %454, %391 : vector<8x8xf32>
    %456 = arith.addf %452, %455 : vector<8x8xf32>
    %c0_315 = arith.constant 0 : index
    %c5_316 = arith.constant 5 : index
    %457 = memref.load %arg7[%c0_315, %c5_316] : memref<4x8xf32, #tpu.memory_space<smem>>
    %458 = vector.broadcast %457 : f32 to vector<8x8xf32>
    %459 = arith.mulf %458, %393 : vector<8x8xf32>
    %460 = arith.addf %456, %459 : vector<8x8xf32>
    %c0_317 = arith.constant 0 : index
    %c6_318 = arith.constant 6 : index
    %461 = memref.load %arg7[%c0_317, %c6_318] : memref<4x8xf32, #tpu.memory_space<smem>>
    %462 = vector.broadcast %461 : f32 to vector<8x8xf32>
    %463 = arith.mulf %462, %395 : vector<8x8xf32>
    %464 = arith.addf %460, %463 : vector<8x8xf32>
    %c0_319 = arith.constant 0 : index
    %c7_320 = arith.constant 7 : index
    %465 = memref.load %arg7[%c0_319, %c7_320] : memref<4x8xf32, #tpu.memory_space<smem>>
    %466 = vector.broadcast %465 : f32 to vector<8x8xf32>
    %467 = arith.mulf %466, %397 : vector<8x8xf32>
    %468 = arith.addf %464, %467 : vector<8x8xf32>
    %469 = arith.addf %437, %468 : vector<8x8xf32>
    %c1_321 = arith.constant 1 : index
    %c0_322 = arith.constant 0 : index
    %470 = memref.load %arg8[%c1_321, %c0_322] : memref<3x4xf32, #tpu.memory_space<smem>>
    %471 = vector.broadcast %470 : f32 to vector<8x8xf32>
    %472 = arith.addf %469, %471 : vector<8x8xf32>
    %cst_323 = arith.constant 0.000000e+00 : f32
    %473 = vector.broadcast %cst_323 : f32 to vector<8x8xf32>
    %474 = arith.maximumf %472, %473 : vector<8x8xf32>
    %c0_324 = arith.constant 0 : index
    %c0_325 = arith.constant 0 : index
    %475 = memref.load %arg8[%c0_324, %c0_325] : memref<3x4xf32, #tpu.memory_space<smem>>
    %476 = vector.broadcast %475 : f32 to vector<8x8xf32>
    %477 = arith.mulf %476, %474 : vector<8x8xf32>
    %478 = arith.addf %398, %477 : vector<8x8xf32>
    %c1_326 = arith.constant 1 : index
    %c0_327 = arith.constant 0 : index
    %479 = memref.load %arg6[%c1_326, %c0_327] : memref<4x4xf32, #tpu.memory_space<smem>>
    %480 = vector.broadcast %479 : f32 to vector<16x16xf32>
    %481 = arith.mulf %480, %367 : vector<16x16xf32>
    %c1_328 = arith.constant 1 : index
    %c0_329 = arith.constant 0 : index
    %482 = memref.load %arg6[%c1_328, %c0_329] : memref<4x4xf32, #tpu.memory_space<smem>>
    %483 = vector.broadcast %482 : f32 to vector<16x16xf32>
    %484 = arith.mulf %483, %375 : vector<16x16xf32>
    %c1_330 = arith.constant 1 : index
    %c1_331 = arith.constant 1 : index
    %485 = memref.load %arg6[%c1_330, %c1_331] : memref<4x4xf32, #tpu.memory_space<smem>>
    %486 = vector.broadcast %485 : f32 to vector<16x16xf32>
    %487 = arith.mulf %486, %369 : vector<16x16xf32>
    %488 = arith.addf %481, %487 : vector<16x16xf32>
    %c1_332 = arith.constant 1 : index
    %c1_333 = arith.constant 1 : index
    %489 = memref.load %arg6[%c1_332, %c1_333] : memref<4x4xf32, #tpu.memory_space<smem>>
    %490 = vector.broadcast %489 : f32 to vector<16x16xf32>
    %491 = arith.mulf %490, %377 : vector<16x16xf32>
    %492 = arith.addf %484, %491 : vector<16x16xf32>
    %c1_334 = arith.constant 1 : index
    %c2_335 = arith.constant 2 : index
    %493 = memref.load %arg6[%c1_334, %c2_335] : memref<4x4xf32, #tpu.memory_space<smem>>
    %494 = vector.broadcast %493 : f32 to vector<16x16xf32>
    %495 = arith.mulf %494, %371 : vector<16x16xf32>
    %496 = arith.addf %488, %495 : vector<16x16xf32>
    %c1_336 = arith.constant 1 : index
    %c2_337 = arith.constant 2 : index
    %497 = memref.load %arg6[%c1_336, %c2_337] : memref<4x4xf32, #tpu.memory_space<smem>>
    %498 = vector.broadcast %497 : f32 to vector<16x16xf32>
    %499 = arith.mulf %498, %379 : vector<16x16xf32>
    %500 = arith.addf %492, %499 : vector<16x16xf32>
    %c1_338 = arith.constant 1 : index
    %c3_339 = arith.constant 3 : index
    %501 = memref.load %arg6[%c1_338, %c3_339] : memref<4x4xf32, #tpu.memory_space<smem>>
    %502 = vector.broadcast %501 : f32 to vector<16x16xf32>
    %503 = arith.mulf %502, %373 : vector<16x16xf32>
    %504 = arith.addf %496, %503 : vector<16x16xf32>
    %c1_340 = arith.constant 1 : index
    %c3_341 = arith.constant 3 : index
    %505 = memref.load %arg6[%c1_340, %c3_341] : memref<4x4xf32, #tpu.memory_space<smem>>
    %506 = vector.broadcast %505 : f32 to vector<16x16xf32>
    %507 = arith.mulf %506, %381 : vector<16x16xf32>
    %508 = arith.addf %500, %507 : vector<16x16xf32>
    %509 = arith.maximumf %504, %508 : vector<16x16xf32>
    %cst_342 = arith.constant dense<0.000000e+00> : vector<16x16xf32>
    %510 = tpu.matmul %0, %509, %cst_342 {dimension_numbers = #tpu.dot_dimension_numbers<[1], [0], [0], [1], [0, 0, 1, 1], [], []>} : vector<16x16xf32>, vector<16x16xf32>, vector<16x16xf32> -> vector<16x16xf32>
    %511 = vector.extract_strided_slice %510 {offsets = [0, 0], sizes = [8, 16], strides = [1, 1]} : vector<16x16xf32> to vector<8x16xf32>
    %512 = vector.extract_strided_slice %510 {offsets = [8, 0], sizes = [8, 16], strides = [1, 1]} : vector<16x16xf32> to vector<8x16xf32>
    %513 = arith.maximumf %511, %512 : vector<8x16xf32>
    %cst_343 = arith.constant dense<0.000000e+00> : vector<8x16xf32>
    %514 = tpu.matmul %513, %1, %cst_343 {dimension_numbers = #tpu.dot_dimension_numbers<[1], [0], [0], [1], [0, 0, 1, 1], [], []>} : vector<8x16xf32>, vector<16x16xf32>, vector<8x16xf32> -> vector<8x16xf32>
    %515 = vector.extract_strided_slice %514 {offsets = [0, 0], sizes = [8, 8], strides = [1, 1]} : vector<8x16xf32> to vector<8x8xf32>
    %516 = vector.extract_strided_slice %514 {offsets = [0, 8], sizes = [8, 8], strides = [1, 1]} : vector<8x16xf32> to vector<8x8xf32>
    %517 = arith.maximumf %515, %516 : vector<8x8xf32>
    %c1_344 = arith.constant 1 : index
    %c0_345 = arith.constant 0 : index
    %518 = memref.load %arg7[%c1_344, %c0_345] : memref<4x8xf32, #tpu.memory_space<smem>>
    %519 = vector.broadcast %518 : f32 to vector<8x8xf32>
    %520 = arith.mulf %519, %383 : vector<8x8xf32>
    %c1_346 = arith.constant 1 : index
    %c1_347 = arith.constant 1 : index
    %521 = memref.load %arg7[%c1_346, %c1_347] : memref<4x8xf32, #tpu.memory_space<smem>>
    %522 = vector.broadcast %521 : f32 to vector<8x8xf32>
    %523 = arith.mulf %522, %385 : vector<8x8xf32>
    %524 = arith.addf %520, %523 : vector<8x8xf32>
    %c1_348 = arith.constant 1 : index
    %c2_349 = arith.constant 2 : index
    %525 = memref.load %arg7[%c1_348, %c2_349] : memref<4x8xf32, #tpu.memory_space<smem>>
    %526 = vector.broadcast %525 : f32 to vector<8x8xf32>
    %527 = arith.mulf %526, %387 : vector<8x8xf32>
    %528 = arith.addf %524, %527 : vector<8x8xf32>
    %c1_350 = arith.constant 1 : index
    %c3_351 = arith.constant 3 : index
    %529 = memref.load %arg7[%c1_350, %c3_351] : memref<4x8xf32, #tpu.memory_space<smem>>
    %530 = vector.broadcast %529 : f32 to vector<8x8xf32>
    %531 = arith.mulf %530, %389 : vector<8x8xf32>
    %532 = arith.addf %528, %531 : vector<8x8xf32>
    %c1_352 = arith.constant 1 : index
    %c4_353 = arith.constant 4 : index
    %533 = memref.load %arg7[%c1_352, %c4_353] : memref<4x8xf32, #tpu.memory_space<smem>>
    %534 = vector.broadcast %533 : f32 to vector<8x8xf32>
    %535 = arith.mulf %534, %391 : vector<8x8xf32>
    %536 = arith.addf %532, %535 : vector<8x8xf32>
    %c1_354 = arith.constant 1 : index
    %c5_355 = arith.constant 5 : index
    %537 = memref.load %arg7[%c1_354, %c5_355] : memref<4x8xf32, #tpu.memory_space<smem>>
    %538 = vector.broadcast %537 : f32 to vector<8x8xf32>
    %539 = arith.mulf %538, %393 : vector<8x8xf32>
    %540 = arith.addf %536, %539 : vector<8x8xf32>
    %c1_356 = arith.constant 1 : index
    %c6_357 = arith.constant 6 : index
    %541 = memref.load %arg7[%c1_356, %c6_357] : memref<4x8xf32, #tpu.memory_space<smem>>
    %542 = vector.broadcast %541 : f32 to vector<8x8xf32>
    %543 = arith.mulf %542, %395 : vector<8x8xf32>
    %544 = arith.addf %540, %543 : vector<8x8xf32>
    %c1_358 = arith.constant 1 : index
    %c7_359 = arith.constant 7 : index
    %545 = memref.load %arg7[%c1_358, %c7_359] : memref<4x8xf32, #tpu.memory_space<smem>>
    %546 = vector.broadcast %545 : f32 to vector<8x8xf32>
    %547 = arith.mulf %546, %397 : vector<8x8xf32>
    %548 = arith.addf %544, %547 : vector<8x8xf32>
    %549 = arith.addf %517, %548 : vector<8x8xf32>
    %c1_360 = arith.constant 1 : index
    %c1_361 = arith.constant 1 : index
    %550 = memref.load %arg8[%c1_360, %c1_361] : memref<3x4xf32, #tpu.memory_space<smem>>
    %551 = vector.broadcast %550 : f32 to vector<8x8xf32>
    %552 = arith.addf %549, %551 : vector<8x8xf32>
    %cst_362 = arith.constant 0.000000e+00 : f32
    %553 = vector.broadcast %cst_362 : f32 to vector<8x8xf32>
    %554 = arith.maximumf %552, %553 : vector<8x8xf32>
    %c0_363 = arith.constant 0 : index
    %c1_364 = arith.constant 1 : index
    %555 = memref.load %arg8[%c0_363, %c1_364] : memref<3x4xf32, #tpu.memory_space<smem>>
    %556 = vector.broadcast %555 : f32 to vector<8x8xf32>
    %557 = arith.mulf %556, %554 : vector<8x8xf32>
    %558 = arith.addf %478, %557 : vector<8x8xf32>
    %c2_365 = arith.constant 2 : index
    %c0_366 = arith.constant 0 : index
    %559 = memref.load %arg6[%c2_365, %c0_366] : memref<4x4xf32, #tpu.memory_space<smem>>
    %560 = vector.broadcast %559 : f32 to vector<16x16xf32>
    %561 = arith.mulf %560, %367 : vector<16x16xf32>
    %c2_367 = arith.constant 2 : index
    %c0_368 = arith.constant 0 : index
    %562 = memref.load %arg6[%c2_367, %c0_368] : memref<4x4xf32, #tpu.memory_space<smem>>
    %563 = vector.broadcast %562 : f32 to vector<16x16xf32>
    %564 = arith.mulf %563, %375 : vector<16x16xf32>
    %c2_369 = arith.constant 2 : index
    %c1_370 = arith.constant 1 : index
    %565 = memref.load %arg6[%c2_369, %c1_370] : memref<4x4xf32, #tpu.memory_space<smem>>
    %566 = vector.broadcast %565 : f32 to vector<16x16xf32>
    %567 = arith.mulf %566, %369 : vector<16x16xf32>
    %568 = arith.addf %561, %567 : vector<16x16xf32>
    %c2_371 = arith.constant 2 : index
    %c1_372 = arith.constant 1 : index
    %569 = memref.load %arg6[%c2_371, %c1_372] : memref<4x4xf32, #tpu.memory_space<smem>>
    %570 = vector.broadcast %569 : f32 to vector<16x16xf32>
    %571 = arith.mulf %570, %377 : vector<16x16xf32>
    %572 = arith.addf %564, %571 : vector<16x16xf32>
    %c2_373 = arith.constant 2 : index
    %c2_374 = arith.constant 2 : index
    %573 = memref.load %arg6[%c2_373, %c2_374] : memref<4x4xf32, #tpu.memory_space<smem>>
    %574 = vector.broadcast %573 : f32 to vector<16x16xf32>
    %575 = arith.mulf %574, %371 : vector<16x16xf32>
    %576 = arith.addf %568, %575 : vector<16x16xf32>
    %c2_375 = arith.constant 2 : index
    %c2_376 = arith.constant 2 : index
    %577 = memref.load %arg6[%c2_375, %c2_376] : memref<4x4xf32, #tpu.memory_space<smem>>
    %578 = vector.broadcast %577 : f32 to vector<16x16xf32>
    %579 = arith.mulf %578, %379 : vector<16x16xf32>
    %580 = arith.addf %572, %579 : vector<16x16xf32>
    %c2_377 = arith.constant 2 : index
    %c3_378 = arith.constant 3 : index
    %581 = memref.load %arg6[%c2_377, %c3_378] : memref<4x4xf32, #tpu.memory_space<smem>>
    %582 = vector.broadcast %581 : f32 to vector<16x16xf32>
    %583 = arith.mulf %582, %373 : vector<16x16xf32>
    %584 = arith.addf %576, %583 : vector<16x16xf32>
    %c2_379 = arith.constant 2 : index
    %c3_380 = arith.constant 3 : index
    %585 = memref.load %arg6[%c2_379, %c3_380] : memref<4x4xf32, #tpu.memory_space<smem>>
    %586 = vector.broadcast %585 : f32 to vector<16x16xf32>
    %587 = arith.mulf %586, %381 : vector<16x16xf32>
    %588 = arith.addf %580, %587 : vector<16x16xf32>
    %589 = arith.maximumf %584, %588 : vector<16x16xf32>
    %cst_381 = arith.constant dense<0.000000e+00> : vector<16x16xf32>
    %590 = tpu.matmul %0, %589, %cst_381 {dimension_numbers = #tpu.dot_dimension_numbers<[1], [0], [0], [1], [0, 0, 1, 1], [], []>} : vector<16x16xf32>, vector<16x16xf32>, vector<16x16xf32> -> vector<16x16xf32>
    %591 = vector.extract_strided_slice %590 {offsets = [0, 0], sizes = [8, 16], strides = [1, 1]} : vector<16x16xf32> to vector<8x16xf32>
    %592 = vector.extract_strided_slice %590 {offsets = [8, 0], sizes = [8, 16], strides = [1, 1]} : vector<16x16xf32> to vector<8x16xf32>
    %593 = arith.maximumf %591, %592 : vector<8x16xf32>
    %cst_382 = arith.constant dense<0.000000e+00> : vector<8x16xf32>
    %594 = tpu.matmul %593, %1, %cst_382 {dimension_numbers = #tpu.dot_dimension_numbers<[1], [0], [0], [1], [0, 0, 1, 1], [], []>} : vector<8x16xf32>, vector<16x16xf32>, vector<8x16xf32> -> vector<8x16xf32>
    %595 = vector.extract_strided_slice %594 {offsets = [0, 0], sizes = [8, 8], strides = [1, 1]} : vector<8x16xf32> to vector<8x8xf32>
    %596 = vector.extract_strided_slice %594 {offsets = [0, 8], sizes = [8, 8], strides = [1, 1]} : vector<8x16xf32> to vector<8x8xf32>
    %597 = arith.maximumf %595, %596 : vector<8x8xf32>
    %c2_383 = arith.constant 2 : index
    %c0_384 = arith.constant 0 : index
    %598 = memref.load %arg7[%c2_383, %c0_384] : memref<4x8xf32, #tpu.memory_space<smem>>
    %599 = vector.broadcast %598 : f32 to vector<8x8xf32>
    %600 = arith.mulf %599, %383 : vector<8x8xf32>
    %c2_385 = arith.constant 2 : index
    %c1_386 = arith.constant 1 : index
    %601 = memref.load %arg7[%c2_385, %c1_386] : memref<4x8xf32, #tpu.memory_space<smem>>
    %602 = vector.broadcast %601 : f32 to vector<8x8xf32>
    %603 = arith.mulf %602, %385 : vector<8x8xf32>
    %604 = arith.addf %600, %603 : vector<8x8xf32>
    %c2_387 = arith.constant 2 : index
    %c2_388 = arith.constant 2 : index
    %605 = memref.load %arg7[%c2_387, %c2_388] : memref<4x8xf32, #tpu.memory_space<smem>>
    %606 = vector.broadcast %605 : f32 to vector<8x8xf32>
    %607 = arith.mulf %606, %387 : vector<8x8xf32>
    %608 = arith.addf %604, %607 : vector<8x8xf32>
    %c2_389 = arith.constant 2 : index
    %c3_390 = arith.constant 3 : index
    %609 = memref.load %arg7[%c2_389, %c3_390] : memref<4x8xf32, #tpu.memory_space<smem>>
    %610 = vector.broadcast %609 : f32 to vector<8x8xf32>
    %611 = arith.mulf %610, %389 : vector<8x8xf32>
    %612 = arith.addf %608, %611 : vector<8x8xf32>
    %c2_391 = arith.constant 2 : index
    %c4_392 = arith.constant 4 : index
    %613 = memref.load %arg7[%c2_391, %c4_392] : memref<4x8xf32, #tpu.memory_space<smem>>
    %614 = vector.broadcast %613 : f32 to vector<8x8xf32>
    %615 = arith.mulf %614, %391 : vector<8x8xf32>
    %616 = arith.addf %612, %615 : vector<8x8xf32>
    %c2_393 = arith.constant 2 : index
    %c5_394 = arith.constant 5 : index
    %617 = memref.load %arg7[%c2_393, %c5_394] : memref<4x8xf32, #tpu.memory_space<smem>>
    %618 = vector.broadcast %617 : f32 to vector<8x8xf32>
    %619 = arith.mulf %618, %393 : vector<8x8xf32>
    %620 = arith.addf %616, %619 : vector<8x8xf32>
    %c2_395 = arith.constant 2 : index
    %c6_396 = arith.constant 6 : index
    %621 = memref.load %arg7[%c2_395, %c6_396] : memref<4x8xf32, #tpu.memory_space<smem>>
    %622 = vector.broadcast %621 : f32 to vector<8x8xf32>
    %623 = arith.mulf %622, %395 : vector<8x8xf32>
    %624 = arith.addf %620, %623 : vector<8x8xf32>
    %c2_397 = arith.constant 2 : index
    %c7_398 = arith.constant 7 : index
    %625 = memref.load %arg7[%c2_397, %c7_398] : memref<4x8xf32, #tpu.memory_space<smem>>
    %626 = vector.broadcast %625 : f32 to vector<8x8xf32>
    %627 = arith.mulf %626, %397 : vector<8x8xf32>
    %628 = arith.addf %624, %627 : vector<8x8xf32>
    %629 = arith.addf %597, %628 : vector<8x8xf32>
    %c1_399 = arith.constant 1 : index
    %c2_400 = arith.constant 2 : index
    %630 = memref.load %arg8[%c1_399, %c2_400] : memref<3x4xf32, #tpu.memory_space<smem>>
    %631 = vector.broadcast %630 : f32 to vector<8x8xf32>
    %632 = arith.addf %629, %631 : vector<8x8xf32>
    %cst_401 = arith.constant 0.000000e+00 : f32
    %633 = vector.broadcast %cst_401 : f32 to vector<8x8xf32>
    %634 = arith.maximumf %632, %633 : vector<8x8xf32>
    %c0_402 = arith.constant 0 : index
    %c2_403 = arith.constant 2 : index
    %635 = memref.load %arg8[%c0_402, %c2_403] : memref<3x4xf32, #tpu.memory_space<smem>>
    %636 = vector.broadcast %635 : f32 to vector<8x8xf32>
    %637 = arith.mulf %636, %634 : vector<8x8xf32>
    %638 = arith.addf %558, %637 : vector<8x8xf32>
    %c3_404 = arith.constant 3 : index
    %c0_405 = arith.constant 0 : index
    %639 = memref.load %arg6[%c3_404, %c0_405] : memref<4x4xf32, #tpu.memory_space<smem>>
    %640 = vector.broadcast %639 : f32 to vector<16x16xf32>
    %641 = arith.mulf %640, %367 : vector<16x16xf32>
    %c3_406 = arith.constant 3 : index
    %c0_407 = arith.constant 0 : index
    %642 = memref.load %arg6[%c3_406, %c0_407] : memref<4x4xf32, #tpu.memory_space<smem>>
    %643 = vector.broadcast %642 : f32 to vector<16x16xf32>
    %644 = arith.mulf %643, %375 : vector<16x16xf32>
    %c3_408 = arith.constant 3 : index
    %c1_409 = arith.constant 1 : index
    %645 = memref.load %arg6[%c3_408, %c1_409] : memref<4x4xf32, #tpu.memory_space<smem>>
    %646 = vector.broadcast %645 : f32 to vector<16x16xf32>
    %647 = arith.mulf %646, %369 : vector<16x16xf32>
    %648 = arith.addf %641, %647 : vector<16x16xf32>
    %c3_410 = arith.constant 3 : index
    %c1_411 = arith.constant 1 : index
    %649 = memref.load %arg6[%c3_410, %c1_411] : memref<4x4xf32, #tpu.memory_space<smem>>
    %650 = vector.broadcast %649 : f32 to vector<16x16xf32>
    %651 = arith.mulf %650, %377 : vector<16x16xf32>
    %652 = arith.addf %644, %651 : vector<16x16xf32>
    %c3_412 = arith.constant 3 : index
    %c2_413 = arith.constant 2 : index
    %653 = memref.load %arg6[%c3_412, %c2_413] : memref<4x4xf32, #tpu.memory_space<smem>>
    %654 = vector.broadcast %653 : f32 to vector<16x16xf32>
    %655 = arith.mulf %654, %371 : vector<16x16xf32>
    %656 = arith.addf %648, %655 : vector<16x16xf32>
    %c3_414 = arith.constant 3 : index
    %c2_415 = arith.constant 2 : index
    %657 = memref.load %arg6[%c3_414, %c2_415] : memref<4x4xf32, #tpu.memory_space<smem>>
    %658 = vector.broadcast %657 : f32 to vector<16x16xf32>
    %659 = arith.mulf %658, %379 : vector<16x16xf32>
    %660 = arith.addf %652, %659 : vector<16x16xf32>
    %c3_416 = arith.constant 3 : index
    %c3_417 = arith.constant 3 : index
    %661 = memref.load %arg6[%c3_416, %c3_417] : memref<4x4xf32, #tpu.memory_space<smem>>
    %662 = vector.broadcast %661 : f32 to vector<16x16xf32>
    %663 = arith.mulf %662, %373 : vector<16x16xf32>
    %664 = arith.addf %656, %663 : vector<16x16xf32>
    %c3_418 = arith.constant 3 : index
    %c3_419 = arith.constant 3 : index
    %665 = memref.load %arg6[%c3_418, %c3_419] : memref<4x4xf32, #tpu.memory_space<smem>>
    %666 = vector.broadcast %665 : f32 to vector<16x16xf32>
    %667 = arith.mulf %666, %381 : vector<16x16xf32>
    %668 = arith.addf %660, %667 : vector<16x16xf32>
    %669 = arith.maximumf %664, %668 : vector<16x16xf32>
    %cst_420 = arith.constant dense<0.000000e+00> : vector<16x16xf32>
    %670 = tpu.matmul %0, %669, %cst_420 {dimension_numbers = #tpu.dot_dimension_numbers<[1], [0], [0], [1], [0, 0, 1, 1], [], []>} : vector<16x16xf32>, vector<16x16xf32>, vector<16x16xf32> -> vector<16x16xf32>
    %671 = vector.extract_strided_slice %670 {offsets = [0, 0], sizes = [8, 16], strides = [1, 1]} : vector<16x16xf32> to vector<8x16xf32>
    %672 = vector.extract_strided_slice %670 {offsets = [8, 0], sizes = [8, 16], strides = [1, 1]} : vector<16x16xf32> to vector<8x16xf32>
    %673 = arith.maximumf %671, %672 : vector<8x16xf32>
    %cst_421 = arith.constant dense<0.000000e+00> : vector<8x16xf32>
    %674 = tpu.matmul %673, %1, %cst_421 {dimension_numbers = #tpu.dot_dimension_numbers<[1], [0], [0], [1], [0, 0, 1, 1], [], []>} : vector<8x16xf32>, vector<16x16xf32>, vector<8x16xf32> -> vector<8x16xf32>
    %675 = vector.extract_strided_slice %674 {offsets = [0, 0], sizes = [8, 8], strides = [1, 1]} : vector<8x16xf32> to vector<8x8xf32>
    %676 = vector.extract_strided_slice %674 {offsets = [0, 8], sizes = [8, 8], strides = [1, 1]} : vector<8x16xf32> to vector<8x8xf32>
    %677 = arith.maximumf %675, %676 : vector<8x8xf32>
    %c3_422 = arith.constant 3 : index
    %c0_423 = arith.constant 0 : index
    %678 = memref.load %arg7[%c3_422, %c0_423] : memref<4x8xf32, #tpu.memory_space<smem>>
    %679 = vector.broadcast %678 : f32 to vector<8x8xf32>
    %680 = arith.mulf %679, %383 : vector<8x8xf32>
    %c3_424 = arith.constant 3 : index
    %c1_425 = arith.constant 1 : index
    %681 = memref.load %arg7[%c3_424, %c1_425] : memref<4x8xf32, #tpu.memory_space<smem>>
    %682 = vector.broadcast %681 : f32 to vector<8x8xf32>
    %683 = arith.mulf %682, %385 : vector<8x8xf32>
    %684 = arith.addf %680, %683 : vector<8x8xf32>
    %c3_426 = arith.constant 3 : index
    %c2_427 = arith.constant 2 : index
    %685 = memref.load %arg7[%c3_426, %c2_427] : memref<4x8xf32, #tpu.memory_space<smem>>
    %686 = vector.broadcast %685 : f32 to vector<8x8xf32>
    %687 = arith.mulf %686, %387 : vector<8x8xf32>
    %688 = arith.addf %684, %687 : vector<8x8xf32>
    %c3_428 = arith.constant 3 : index
    %c3_429 = arith.constant 3 : index
    %689 = memref.load %arg7[%c3_428, %c3_429] : memref<4x8xf32, #tpu.memory_space<smem>>
    %690 = vector.broadcast %689 : f32 to vector<8x8xf32>
    %691 = arith.mulf %690, %389 : vector<8x8xf32>
    %692 = arith.addf %688, %691 : vector<8x8xf32>
    %c3_430 = arith.constant 3 : index
    %c4_431 = arith.constant 4 : index
    %693 = memref.load %arg7[%c3_430, %c4_431] : memref<4x8xf32, #tpu.memory_space<smem>>
    %694 = vector.broadcast %693 : f32 to vector<8x8xf32>
    %695 = arith.mulf %694, %391 : vector<8x8xf32>
    %696 = arith.addf %692, %695 : vector<8x8xf32>
    %c3_432 = arith.constant 3 : index
    %c5_433 = arith.constant 5 : index
    %697 = memref.load %arg7[%c3_432, %c5_433] : memref<4x8xf32, #tpu.memory_space<smem>>
    %698 = vector.broadcast %697 : f32 to vector<8x8xf32>
    %699 = arith.mulf %698, %393 : vector<8x8xf32>
    %700 = arith.addf %696, %699 : vector<8x8xf32>
    %c3_434 = arith.constant 3 : index
    %c6_435 = arith.constant 6 : index
    %701 = memref.load %arg7[%c3_434, %c6_435] : memref<4x8xf32, #tpu.memory_space<smem>>
    %702 = vector.broadcast %701 : f32 to vector<8x8xf32>
    %703 = arith.mulf %702, %395 : vector<8x8xf32>
    %704 = arith.addf %700, %703 : vector<8x8xf32>
    %c3_436 = arith.constant 3 : index
    %c7_437 = arith.constant 7 : index
    %705 = memref.load %arg7[%c3_436, %c7_437] : memref<4x8xf32, #tpu.memory_space<smem>>
    %706 = vector.broadcast %705 : f32 to vector<8x8xf32>
    %707 = arith.mulf %706, %397 : vector<8x8xf32>
    %708 = arith.addf %704, %707 : vector<8x8xf32>
    %709 = arith.addf %677, %708 : vector<8x8xf32>
    %c1_438 = arith.constant 1 : index
    %c3_439 = arith.constant 3 : index
    %710 = memref.load %arg8[%c1_438, %c3_439] : memref<3x4xf32, #tpu.memory_space<smem>>
    %711 = vector.broadcast %710 : f32 to vector<8x8xf32>
    %712 = arith.addf %709, %711 : vector<8x8xf32>
    %cst_440 = arith.constant 0.000000e+00 : f32
    %713 = vector.broadcast %cst_440 : f32 to vector<8x8xf32>
    %714 = arith.maximumf %712, %713 : vector<8x8xf32>
    %c0_441 = arith.constant 0 : index
    %c3_442 = arith.constant 3 : index
    %715 = memref.load %arg8[%c0_441, %c3_442] : memref<3x4xf32, #tpu.memory_space<smem>>
    %716 = vector.broadcast %715 : f32 to vector<8x8xf32>
    %717 = arith.mulf %716, %714 : vector<8x8xf32>
    %718 = arith.addf %638, %717 : vector<8x8xf32>
    %c2_443 = arith.constant 2 : index
    %c0_444 = arith.constant 0 : index
    %719 = memref.load %arg8[%c2_443, %c0_444] : memref<3x4xf32, #tpu.memory_space<smem>>
    %720 = vector.broadcast %719 : f32 to vector<8x8xf32>
    %721 = arith.addf %718, %720 : vector<8x8xf32>
    %722 = arith.negf %721 : vector<8x8xf32>
    %723 = math.exp %722 : vector<8x8xf32>
    %cst_445 = arith.constant 1.000000e+00 : f32
    %724 = vector.broadcast %cst_445 : f32 to vector<8x8xf32>
    %725 = arith.addf %724, %723 : vector<8x8xf32>
    %726 = arith.divf %724, %725 : vector<8x8xf32>
    %c1_446 = arith.constant 1 : index
    %c0_447 = arith.constant 0 : index
    %c0_448 = arith.constant 0 : index
    %727 = vector.load %arg9[%c1_446, %c0_447, %c0_448] : memref<4x8x8xf32, #tpu.memory_space<vmem>>, vector<1x8x8xf32>
    %728 = vector.shape_cast %727 : vector<1x8x8xf32> to vector<8x8xf32>
    %729 = vector.shape_cast %726 : vector<8x8xf32> to vector<1x8x8xf32>
    tpu.vector_store %arg9[%c1_446, %c0_447, %c0_448], %729 {strides = array<i32>} : memref<4x8x8xf32, #tpu.memory_space<vmem>>, vector<1x8x8xf32>,
    %c0_449 = arith.constant 0 : index
    %c4_450 = arith.constant 4 : index
    %c0_451 = arith.constant 0 : index
    %c0_452 = arith.constant 0 : index
    %730 = vector.load %arg2[%c0_449, %c4_450, %c0_451, %c0_452] : memref<4x8x16x16xf32, #tpu.memory_space<vmem>>, vector<1x1x16x16xf32>
    %731 = vector.shape_cast %730 : vector<1x1x16x16xf32> to vector<16x16xf32>
    %c1_453 = arith.constant 1 : index
    %c4_454 = arith.constant 4 : index
    %c0_455 = arith.constant 0 : index
    %c0_456 = arith.constant 0 : index
    %732 = vector.load %arg2[%c1_453, %c4_454, %c0_455, %c0_456] : memref<4x8x16x16xf32, #tpu.memory_space<vmem>>, vector<1x1x16x16xf32>
    %733 = vector.shape_cast %732 : vector<1x1x16x16xf32> to vector<16x16xf32>
    %c2_457 = arith.constant 2 : index
    %c4_458 = arith.constant 4 : index
    %c0_459 = arith.constant 0 : index
    %c0_460 = arith.constant 0 : index
    %734 = vector.load %arg2[%c2_457, %c4_458, %c0_459, %c0_460] : memref<4x8x16x16xf32, #tpu.memory_space<vmem>>, vector<1x1x16x16xf32>
    %735 = vector.shape_cast %734 : vector<1x1x16x16xf32> to vector<16x16xf32>
    %c3_461 = arith.constant 3 : index
    %c4_462 = arith.constant 4 : index
    %c0_463 = arith.constant 0 : index
    %c0_464 = arith.constant 0 : index
    %736 = vector.load %arg2[%c3_461, %c4_462, %c0_463, %c0_464] : memref<4x8x16x16xf32, #tpu.memory_space<vmem>>, vector<1x1x16x16xf32>
    %737 = vector.shape_cast %736 : vector<1x1x16x16xf32> to vector<16x16xf32>
    %c0_465 = arith.constant 0 : index
    %c5_466 = arith.constant 5 : index
    %c0_467 = arith.constant 0 : index
    %c0_468 = arith.constant 0 : index
    %738 = vector.load %arg2[%c0_465, %c5_466, %c0_467, %c0_468] : memref<4x8x16x16xf32, #tpu.memory_space<vmem>>, vector<1x1x16x16xf32>
    %739 = vector.shape_cast %738 : vector<1x1x16x16xf32> to vector<16x16xf32>
    %c1_469 = arith.constant 1 : index
    %c5_470 = arith.constant 5 : index
    %c0_471 = arith.constant 0 : index
    %c0_472 = arith.constant 0 : index
    %740 = vector.load %arg2[%c1_469, %c5_470, %c0_471, %c0_472] : memref<4x8x16x16xf32, #tpu.memory_space<vmem>>, vector<1x1x16x16xf32>
    %741 = vector.shape_cast %740 : vector<1x1x16x16xf32> to vector<16x16xf32>
    %c2_473 = arith.constant 2 : index
    %c5_474 = arith.constant 5 : index
    %c0_475 = arith.constant 0 : index
    %c0_476 = arith.constant 0 : index
    %742 = vector.load %arg2[%c2_473, %c5_474, %c0_475, %c0_476] : memref<4x8x16x16xf32, #tpu.memory_space<vmem>>, vector<1x1x16x16xf32>
    %743 = vector.shape_cast %742 : vector<1x1x16x16xf32> to vector<16x16xf32>
    %c3_477 = arith.constant 3 : index
    %c5_478 = arith.constant 5 : index
    %c0_479 = arith.constant 0 : index
    %c0_480 = arith.constant 0 : index
    %744 = vector.load %arg2[%c3_477, %c5_478, %c0_479, %c0_480] : memref<4x8x16x16xf32, #tpu.memory_space<vmem>>, vector<1x1x16x16xf32>
    %745 = vector.shape_cast %744 : vector<1x1x16x16xf32> to vector<16x16xf32>
    %c0_481 = arith.constant 0 : index
    %c2_482 = arith.constant 2 : index
    %c0_483 = arith.constant 0 : index
    %c0_484 = arith.constant 0 : index
    %746 = vector.load %arg3[%c0_481, %c2_482, %c0_483, %c0_484] : memref<8x4x8x8xf32, #tpu.memory_space<vmem>>, vector<1x1x8x8xf32>
    %747 = vector.shape_cast %746 : vector<1x1x8x8xf32> to vector<8x8xf32>
    %c1_485 = arith.constant 1 : index
    %c2_486 = arith.constant 2 : index
    %c0_487 = arith.constant 0 : index
    %c0_488 = arith.constant 0 : index
    %748 = vector.load %arg3[%c1_485, %c2_486, %c0_487, %c0_488] : memref<8x4x8x8xf32, #tpu.memory_space<vmem>>, vector<1x1x8x8xf32>
    %749 = vector.shape_cast %748 : vector<1x1x8x8xf32> to vector<8x8xf32>
    %c2_489 = arith.constant 2 : index
    %c2_490 = arith.constant 2 : index
    %c0_491 = arith.constant 0 : index
    %c0_492 = arith.constant 0 : index
    %750 = vector.load %arg3[%c2_489, %c2_490, %c0_491, %c0_492] : memref<8x4x8x8xf32, #tpu.memory_space<vmem>>, vector<1x1x8x8xf32>
    %751 = vector.shape_cast %750 : vector<1x1x8x8xf32> to vector<8x8xf32>
    %c3_493 = arith.constant 3 : index
    %c2_494 = arith.constant 2 : index
    %c0_495 = arith.constant 0 : index
    %c0_496 = arith.constant 0 : index
    %752 = vector.load %arg3[%c3_493, %c2_494, %c0_495, %c0_496] : memref<8x4x8x8xf32, #tpu.memory_space<vmem>>, vector<1x1x8x8xf32>
    %753 = vector.shape_cast %752 : vector<1x1x8x8xf32> to vector<8x8xf32>
    %c4_497 = arith.constant 4 : index
    %c2_498 = arith.constant 2 : index
    %c0_499 = arith.constant 0 : index
    %c0_500 = arith.constant 0 : index
    %754 = vector.load %arg3[%c4_497, %c2_498, %c0_499, %c0_500] : memref<8x4x8x8xf32, #tpu.memory_space<vmem>>, vector<1x1x8x8xf32>
    %755 = vector.shape_cast %754 : vector<1x1x8x8xf32> to vector<8x8xf32>
    %c5_501 = arith.constant 5 : index
    %c2_502 = arith.constant 2 : index
    %c0_503 = arith.constant 0 : index
    %c0_504 = arith.constant 0 : index
    %756 = vector.load %arg3[%c5_501, %c2_502, %c0_503, %c0_504] : memref<8x4x8x8xf32, #tpu.memory_space<vmem>>, vector<1x1x8x8xf32>
    %757 = vector.shape_cast %756 : vector<1x1x8x8xf32> to vector<8x8xf32>
    %c6_505 = arith.constant 6 : index
    %c2_506 = arith.constant 2 : index
    %c0_507 = arith.constant 0 : index
    %c0_508 = arith.constant 0 : index
    %758 = vector.load %arg3[%c6_505, %c2_506, %c0_507, %c0_508] : memref<8x4x8x8xf32, #tpu.memory_space<vmem>>, vector<1x1x8x8xf32>
    %759 = vector.shape_cast %758 : vector<1x1x8x8xf32> to vector<8x8xf32>
    %c7_509 = arith.constant 7 : index
    %c2_510 = arith.constant 2 : index
    %c0_511 = arith.constant 0 : index
    %c0_512 = arith.constant 0 : index
    %760 = vector.load %arg3[%c7_509, %c2_510, %c0_511, %c0_512] : memref<8x4x8x8xf32, #tpu.memory_space<vmem>>, vector<1x1x8x8xf32>
    %761 = vector.shape_cast %760 : vector<1x1x8x8xf32> to vector<8x8xf32>
    %cst_513 = arith.constant 0.000000e+00 : f32
    %762 = vector.broadcast %cst_513 : f32 to vector<8x8xf32>
    %c0_514 = arith.constant 0 : index
    %c0_515 = arith.constant 0 : index
    %763 = memref.load %arg6[%c0_514, %c0_515] : memref<4x4xf32, #tpu.memory_space<smem>>
    %764 = vector.broadcast %763 : f32 to vector<16x16xf32>
    %765 = arith.mulf %764, %731 : vector<16x16xf32>
    %c0_516 = arith.constant 0 : index
    %c0_517 = arith.constant 0 : index
    %766 = memref.load %arg6[%c0_516, %c0_517] : memref<4x4xf32, #tpu.memory_space<smem>>
    %767 = vector.broadcast %766 : f32 to vector<16x16xf32>
    %768 = arith.mulf %767, %739 : vector<16x16xf32>
    %c0_518 = arith.constant 0 : index
    %c1_519 = arith.constant 1 : index
    %769 = memref.load %arg6[%c0_518, %c1_519] : memref<4x4xf32, #tpu.memory_space<smem>>
    %770 = vector.broadcast %769 : f32 to vector<16x16xf32>
    %771 = arith.mulf %770, %733 : vector<16x16xf32>
    %772 = arith.addf %765, %771 : vector<16x16xf32>
    %c0_520 = arith.constant 0 : index
    %c1_521 = arith.constant 1 : index
    %773 = memref.load %arg6[%c0_520, %c1_521] : memref<4x4xf32, #tpu.memory_space<smem>>
    %774 = vector.broadcast %773 : f32 to vector<16x16xf32>
    %775 = arith.mulf %774, %741 : vector<16x16xf32>
    %776 = arith.addf %768, %775 : vector<16x16xf32>
    %c0_522 = arith.constant 0 : index
    %c2_523 = arith.constant 2 : index
    %777 = memref.load %arg6[%c0_522, %c2_523] : memref<4x4xf32, #tpu.memory_space<smem>>
    %778 = vector.broadcast %777 : f32 to vector<16x16xf32>
    %779 = arith.mulf %778, %735 : vector<16x16xf32>
    %780 = arith.addf %772, %779 : vector<16x16xf32>
    %c0_524 = arith.constant 0 : index
    %c2_525 = arith.constant 2 : index
    %781 = memref.load %arg6[%c0_524, %c2_525] : memref<4x4xf32, #tpu.memory_space<smem>>
    %782 = vector.broadcast %781 : f32 to vector<16x16xf32>
    %783 = arith.mulf %782, %743 : vector<16x16xf32>
    %784 = arith.addf %776, %783 : vector<16x16xf32>
    %c0_526 = arith.constant 0 : index
    %c3_527 = arith.constant 3 : index
    %785 = memref.load %arg6[%c0_526, %c3_527] : memref<4x4xf32, #tpu.memory_space<smem>>
    %786 = vector.broadcast %785 : f32 to vector<16x16xf32>
    %787 = arith.mulf %786, %737 : vector<16x16xf32>
    %788 = arith.addf %780, %787 : vector<16x16xf32>
    %c0_528 = arith.constant 0 : index
    %c3_529 = arith.constant 3 : index
    %789 = memref.load %arg6[%c0_528, %c3_529] : memref<4x4xf32, #tpu.memory_space<smem>>
    %790 = vector.broadcast %789 : f32 to vector<16x16xf32>
    %791 = arith.mulf %790, %745 : vector<16x16xf32>
    %792 = arith.addf %784, %791 : vector<16x16xf32>
    %793 = arith.maximumf %788, %792 : vector<16x16xf32>
    %cst_530 = arith.constant dense<0.000000e+00> : vector<16x16xf32>
    %794 = tpu.matmul %0, %793, %cst_530 {dimension_numbers = #tpu.dot_dimension_numbers<[1], [0], [0], [1], [0, 0, 1, 1], [], []>} : vector<16x16xf32>, vector<16x16xf32>, vector<16x16xf32> -> vector<16x16xf32>
    %795 = vector.extract_strided_slice %794 {offsets = [0, 0], sizes = [8, 16], strides = [1, 1]} : vector<16x16xf32> to vector<8x16xf32>
    %796 = vector.extract_strided_slice %794 {offsets = [8, 0], sizes = [8, 16], strides = [1, 1]} : vector<16x16xf32> to vector<8x16xf32>
    %797 = arith.maximumf %795, %796 : vector<8x16xf32>
    %cst_531 = arith.constant dense<0.000000e+00> : vector<8x16xf32>
    %798 = tpu.matmul %797, %1, %cst_531 {dimension_numbers = #tpu.dot_dimension_numbers<[1], [0], [0], [1], [0, 0, 1, 1], [], []>} : vector<8x16xf32>, vector<16x16xf32>, vector<8x16xf32> -> vector<8x16xf32>
    %799 = vector.extract_strided_slice %798 {offsets = [0, 0], sizes = [8, 8], strides = [1, 1]} : vector<8x16xf32> to vector<8x8xf32>
    %800 = vector.extract_strided_slice %798 {offsets = [0, 8], sizes = [8, 8], strides = [1, 1]} : vector<8x16xf32> to vector<8x8xf32>
    %801 = arith.maximumf %799, %800 : vector<8x8xf32>
    %c0_532 = arith.constant 0 : index
    %c0_533 = arith.constant 0 : index
    %802 = memref.load %arg7[%c0_532, %c0_533] : memref<4x8xf32, #tpu.memory_space<smem>>
    %803 = vector.broadcast %802 : f32 to vector<8x8xf32>
    %804 = arith.mulf %803, %747 : vector<8x8xf32>
    %c0_534 = arith.constant 0 : index
    %c1_535 = arith.constant 1 : index
    %805 = memref.load %arg7[%c0_534, %c1_535] : memref<4x8xf32, #tpu.memory_space<smem>>
    %806 = vector.broadcast %805 : f32 to vector<8x8xf32>
    %807 = arith.mulf %806, %749 : vector<8x8xf32>
    %808 = arith.addf %804, %807 : vector<8x8xf32>
    %c0_536 = arith.constant 0 : index
    %c2_537 = arith.constant 2 : index
    %809 = memref.load %arg7[%c0_536, %c2_537] : memref<4x8xf32, #tpu.memory_space<smem>>
    %810 = vector.broadcast %809 : f32 to vector<8x8xf32>
    %811 = arith.mulf %810, %751 : vector<8x8xf32>
    %812 = arith.addf %808, %811 : vector<8x8xf32>
    %c0_538 = arith.constant 0 : index
    %c3_539 = arith.constant 3 : index
    %813 = memref.load %arg7[%c0_538, %c3_539] : memref<4x8xf32, #tpu.memory_space<smem>>
    %814 = vector.broadcast %813 : f32 to vector<8x8xf32>
    %815 = arith.mulf %814, %753 : vector<8x8xf32>
    %816 = arith.addf %812, %815 : vector<8x8xf32>
    %c0_540 = arith.constant 0 : index
    %c4_541 = arith.constant 4 : index
    %817 = memref.load %arg7[%c0_540, %c4_541] : memref<4x8xf32, #tpu.memory_space<smem>>
    %818 = vector.broadcast %817 : f32 to vector<8x8xf32>
    %819 = arith.mulf %818, %755 : vector<8x8xf32>
    %820 = arith.addf %816, %819 : vector<8x8xf32>
    %c0_542 = arith.constant 0 : index
    %c5_543 = arith.constant 5 : index
    %821 = memref.load %arg7[%c0_542, %c5_543] : memref<4x8xf32, #tpu.memory_space<smem>>
    %822 = vector.broadcast %821 : f32 to vector<8x8xf32>
    %823 = arith.mulf %822, %757 : vector<8x8xf32>
    %824 = arith.addf %820, %823 : vector<8x8xf32>
    %c0_544 = arith.constant 0 : index
    %c6_545 = arith.constant 6 : index
    %825 = memref.load %arg7[%c0_544, %c6_545] : memref<4x8xf32, #tpu.memory_space<smem>>
    %826 = vector.broadcast %825 : f32 to vector<8x8xf32>
    %827 = arith.mulf %826, %759 : vector<8x8xf32>
    %828 = arith.addf %824, %827 : vector<8x8xf32>
    %c0_546 = arith.constant 0 : index
    %c7_547 = arith.constant 7 : index
    %829 = memref.load %arg7[%c0_546, %c7_547] : memref<4x8xf32, #tpu.memory_space<smem>>
    %830 = vector.broadcast %829 : f32 to vector<8x8xf32>
    %831 = arith.mulf %830, %761 : vector<8x8xf32>
    %832 = arith.addf %828, %831 : vector<8x8xf32>
    %833 = arith.addf %801, %832 : vector<8x8xf32>
    %c1_548 = arith.constant 1 : index
    %c0_549 = arith.constant 0 : index
    %834 = memref.load %arg8[%c1_548, %c0_549] : memref<3x4xf32, #tpu.memory_space<smem>>
    %835 = vector.broadcast %834 : f32 to vector<8x8xf32>
    %836 = arith.addf %833, %835 : vector<8x8xf32>
    %cst_550 = arith.constant 0.000000e+00 : f32
    %837 = vector.broadcast %cst_550 : f32 to vector<8x8xf32>
    %838 = arith.maximumf %836, %837 : vector<8x8xf32>
    %c0_551 = arith.constant 0 : index
    %c0_552 = arith.constant 0 : index
    %839 = memref.load %arg8[%c0_551, %c0_552] : memref<3x4xf32, #tpu.memory_space<smem>>
    %840 = vector.broadcast %839 : f32 to vector<8x8xf32>
    %841 = arith.mulf %840, %838 : vector<8x8xf32>
    %842 = arith.addf %762, %841 : vector<8x8xf32>
    %c1_553 = arith.constant 1 : index
    %c0_554 = arith.constant 0 : index
    %843 = memref.load %arg6[%c1_553, %c0_554] : memref<4x4xf32, #tpu.memory_space<smem>>
    %844 = vector.broadcast %843 : f32 to vector<16x16xf32>
    %845 = arith.mulf %844, %731 : vector<16x16xf32>
    %c1_555 = arith.constant 1 : index
    %c0_556 = arith.constant 0 : index
    %846 = memref.load %arg6[%c1_555, %c0_556] : memref<4x4xf32, #tpu.memory_space<smem>>
    %847 = vector.broadcast %846 : f32 to vector<16x16xf32>
    %848 = arith.mulf %847, %739 : vector<16x16xf32>
    %c1_557 = arith.constant 1 : index
    %c1_558 = arith.constant 1 : index
    %849 = memref.load %arg6[%c1_557, %c1_558] : memref<4x4xf32, #tpu.memory_space<smem>>
    %850 = vector.broadcast %849 : f32 to vector<16x16xf32>
    %851 = arith.mulf %850, %733 : vector<16x16xf32>
    %852 = arith.addf %845, %851 : vector<16x16xf32>
    %c1_559 = arith.constant 1 : index
    %c1_560 = arith.constant 1 : index
    %853 = memref.load %arg6[%c1_559, %c1_560] : memref<4x4xf32, #tpu.memory_space<smem>>
    %854 = vector.broadcast %853 : f32 to vector<16x16xf32>
    %855 = arith.mulf %854, %741 : vector<16x16xf32>
    %856 = arith.addf %848, %855 : vector<16x16xf32>
    %c1_561 = arith.constant 1 : index
    %c2_562 = arith.constant 2 : index
    %857 = memref.load %arg6[%c1_561, %c2_562] : memref<4x4xf32, #tpu.memory_space<smem>>
    %858 = vector.broadcast %857 : f32 to vector<16x16xf32>
    %859 = arith.mulf %858, %735 : vector<16x16xf32>
    %860 = arith.addf %852, %859 : vector<16x16xf32>
    %c1_563 = arith.constant 1 : index
    %c2_564 = arith.constant 2 : index
    %861 = memref.load %arg6[%c1_563, %c2_564] : memref<4x4xf32, #tpu.memory_space<smem>>
    %862 = vector.broadcast %861 : f32 to vector<16x16xf32>
    %863 = arith.mulf %862, %743 : vector<16x16xf32>
    %864 = arith.addf %856, %863 : vector<16x16xf32>
    %c1_565 = arith.constant 1 : index
    %c3_566 = arith.constant 3 : index
    %865 = memref.load %arg6[%c1_565, %c3_566] : memref<4x4xf32, #tpu.memory_space<smem>>
    %866 = vector.broadcast %865 : f32 to vector<16x16xf32>
    %867 = arith.mulf %866, %737 : vector<16x16xf32>
    %868 = arith.addf %860, %867 : vector<16x16xf32>
    %c1_567 = arith.constant 1 : index
    %c3_568 = arith.constant 3 : index
    %869 = memref.load %arg6[%c1_567, %c3_568] : memref<4x4xf32, #tpu.memory_space<smem>>
    %870 = vector.broadcast %869 : f32 to vector<16x16xf32>
    %871 = arith.mulf %870, %745 : vector<16x16xf32>
    %872 = arith.addf %864, %871 : vector<16x16xf32>
    %873 = arith.maximumf %868, %872 : vector<16x16xf32>
    %cst_569 = arith.constant dense<0.000000e+00> : vector<16x16xf32>
    %874 = tpu.matmul %0, %873, %cst_569 {dimension_numbers = #tpu.dot_dimension_numbers<[1], [0], [0], [1], [0, 0, 1, 1], [], []>} : vector<16x16xf32>, vector<16x16xf32>, vector<16x16xf32> -> vector<16x16xf32>
    %875 = vector.extract_strided_slice %874 {offsets = [0, 0], sizes = [8, 16], strides = [1, 1]} : vector<16x16xf32> to vector<8x16xf32>
    %876 = vector.extract_strided_slice %874 {offsets = [8, 0], sizes = [8, 16], strides = [1, 1]} : vector<16x16xf32> to vector<8x16xf32>
    %877 = arith.maximumf %875, %876 : vector<8x16xf32>
    %cst_570 = arith.constant dense<0.000000e+00> : vector<8x16xf32>
    %878 = tpu.matmul %877, %1, %cst_570 {dimension_numbers = #tpu.dot_dimension_numbers<[1], [0], [0], [1], [0, 0, 1, 1], [], []>} : vector<8x16xf32>, vector<16x16xf32>, vector<8x16xf32> -> vector<8x16xf32>
    %879 = vector.extract_strided_slice %878 {offsets = [0, 0], sizes = [8, 8], strides = [1, 1]} : vector<8x16xf32> to vector<8x8xf32>
    %880 = vector.extract_strided_slice %878 {offsets = [0, 8], sizes = [8, 8], strides = [1, 1]} : vector<8x16xf32> to vector<8x8xf32>
    %881 = arith.maximumf %879, %880 : vector<8x8xf32>
    %c1_571 = arith.constant 1 : index
    %c0_572 = arith.constant 0 : index
    %882 = memref.load %arg7[%c1_571, %c0_572] : memref<4x8xf32, #tpu.memory_space<smem>>
    %883 = vector.broadcast %882 : f32 to vector<8x8xf32>
    %884 = arith.mulf %883, %747 : vector<8x8xf32>
    %c1_573 = arith.constant 1 : index
    %c1_574 = arith.constant 1 : index
    %885 = memref.load %arg7[%c1_573, %c1_574] : memref<4x8xf32, #tpu.memory_space<smem>>
    %886 = vector.broadcast %885 : f32 to vector<8x8xf32>
    %887 = arith.mulf %886, %749 : vector<8x8xf32>
    %888 = arith.addf %884, %887 : vector<8x8xf32>
    %c1_575 = arith.constant 1 : index
    %c2_576 = arith.constant 2 : index
    %889 = memref.load %arg7[%c1_575, %c2_576] : memref<4x8xf32, #tpu.memory_space<smem>>
    %890 = vector.broadcast %889 : f32 to vector<8x8xf32>
    %891 = arith.mulf %890, %751 : vector<8x8xf32>
    %892 = arith.addf %888, %891 : vector<8x8xf32>
    %c1_577 = arith.constant 1 : index
    %c3_578 = arith.constant 3 : index
    %893 = memref.load %arg7[%c1_577, %c3_578] : memref<4x8xf32, #tpu.memory_space<smem>>
    %894 = vector.broadcast %893 : f32 to vector<8x8xf32>
    %895 = arith.mulf %894, %753 : vector<8x8xf32>
    %896 = arith.addf %892, %895 : vector<8x8xf32>
    %c1_579 = arith.constant 1 : index
    %c4_580 = arith.constant 4 : index
    %897 = memref.load %arg7[%c1_579, %c4_580] : memref<4x8xf32, #tpu.memory_space<smem>>
    %898 = vector.broadcast %897 : f32 to vector<8x8xf32>
    %899 = arith.mulf %898, %755 : vector<8x8xf32>
    %900 = arith.addf %896, %899 : vector<8x8xf32>
    %c1_581 = arith.constant 1 : index
    %c5_582 = arith.constant 5 : index
    %901 = memref.load %arg7[%c1_581, %c5_582] : memref<4x8xf32, #tpu.memory_space<smem>>
    %902 = vector.broadcast %901 : f32 to vector<8x8xf32>
    %903 = arith.mulf %902, %757 : vector<8x8xf32>
    %904 = arith.addf %900, %903 : vector<8x8xf32>
    %c1_583 = arith.constant 1 : index
    %c6_584 = arith.constant 6 : index
    %905 = memref.load %arg7[%c1_583, %c6_584] : memref<4x8xf32, #tpu.memory_space<smem>>
    %906 = vector.broadcast %905 : f32 to vector<8x8xf32>
    %907 = arith.mulf %906, %759 : vector<8x8xf32>
    %908 = arith.addf %904, %907 : vector<8x8xf32>
    %c1_585 = arith.constant 1 : index
    %c7_586 = arith.constant 7 : index
    %909 = memref.load %arg7[%c1_585, %c7_586] : memref<4x8xf32, #tpu.memory_space<smem>>
    %910 = vector.broadcast %909 : f32 to vector<8x8xf32>
    %911 = arith.mulf %910, %761 : vector<8x8xf32>
    %912 = arith.addf %908, %911 : vector<8x8xf32>
    %913 = arith.addf %881, %912 : vector<8x8xf32>
    %c1_587 = arith.constant 1 : index
    %c1_588 = arith.constant 1 : index
    %914 = memref.load %arg8[%c1_587, %c1_588] : memref<3x4xf32, #tpu.memory_space<smem>>
    %915 = vector.broadcast %914 : f32 to vector<8x8xf32>
    %916 = arith.addf %913, %915 : vector<8x8xf32>
    %cst_589 = arith.constant 0.000000e+00 : f32
    %917 = vector.broadcast %cst_589 : f32 to vector<8x8xf32>
    %918 = arith.maximumf %916, %917 : vector<8x8xf32>
    %c0_590 = arith.constant 0 : index
    %c1_591 = arith.constant 1 : index
    %919 = memref.load %arg8[%c0_590, %c1_591] : memref<3x4xf32, #tpu.memory_space<smem>>
    %920 = vector.broadcast %919 : f32 to vector<8x8xf32>
    %921 = arith.mulf %920, %918 : vector<8x8xf32>
    %922 = arith.addf %842, %921 : vector<8x8xf32>
    %c2_592 = arith.constant 2 : index
    %c0_593 = arith.constant 0 : index
    %923 = memref.load %arg6[%c2_592, %c0_593] : memref<4x4xf32, #tpu.memory_space<smem>>
    %924 = vector.broadcast %923 : f32 to vector<16x16xf32>
    %925 = arith.mulf %924, %731 : vector<16x16xf32>
    %c2_594 = arith.constant 2 : index
    %c0_595 = arith.constant 0 : index
    %926 = memref.load %arg6[%c2_594, %c0_595] : memref<4x4xf32, #tpu.memory_space<smem>>
    %927 = vector.broadcast %926 : f32 to vector<16x16xf32>
    %928 = arith.mulf %927, %739 : vector<16x16xf32>
    %c2_596 = arith.constant 2 : index
    %c1_597 = arith.constant 1 : index
    %929 = memref.load %arg6[%c2_596, %c1_597] : memref<4x4xf32, #tpu.memory_space<smem>>
    %930 = vector.broadcast %929 : f32 to vector<16x16xf32>
    %931 = arith.mulf %930, %733 : vector<16x16xf32>
    %932 = arith.addf %925, %931 : vector<16x16xf32>
    %c2_598 = arith.constant 2 : index
    %c1_599 = arith.constant 1 : index
    %933 = memref.load %arg6[%c2_598, %c1_599] : memref<4x4xf32, #tpu.memory_space<smem>>
    %934 = vector.broadcast %933 : f32 to vector<16x16xf32>
    %935 = arith.mulf %934, %741 : vector<16x16xf32>
    %936 = arith.addf %928, %935 : vector<16x16xf32>
    %c2_600 = arith.constant 2 : index
    %c2_601 = arith.constant 2 : index
    %937 = memref.load %arg6[%c2_600, %c2_601] : memref<4x4xf32, #tpu.memory_space<smem>>
    %938 = vector.broadcast %937 : f32 to vector<16x16xf32>
    %939 = arith.mulf %938, %735 : vector<16x16xf32>
    %940 = arith.addf %932, %939 : vector<16x16xf32>
    %c2_602 = arith.constant 2 : index
    %c2_603 = arith.constant 2 : index
    %941 = memref.load %arg6[%c2_602, %c2_603] : memref<4x4xf32, #tpu.memory_space<smem>>
    %942 = vector.broadcast %941 : f32 to vector<16x16xf32>
    %943 = arith.mulf %942, %743 : vector<16x16xf32>
    %944 = arith.addf %936, %943 : vector<16x16xf32>
    %c2_604 = arith.constant 2 : index
    %c3_605 = arith.constant 3 : index
    %945 = memref.load %arg6[%c2_604, %c3_605] : memref<4x4xf32, #tpu.memory_space<smem>>
    %946 = vector.broadcast %945 : f32 to vector<16x16xf32>
    %947 = arith.mulf %946, %737 : vector<16x16xf32>
    %948 = arith.addf %940, %947 : vector<16x16xf32>
    %c2_606 = arith.constant 2 : index
    %c3_607 = arith.constant 3 : index
    %949 = memref.load %arg6[%c2_606, %c3_607] : memref<4x4xf32, #tpu.memory_space<smem>>
    %950 = vector.broadcast %949 : f32 to vector<16x16xf32>
    %951 = arith.mulf %950, %745 : vector<16x16xf32>
    %952 = arith.addf %944, %951 : vector<16x16xf32>
    %953 = arith.maximumf %948, %952 : vector<16x16xf32>
    %cst_608 = arith.constant dense<0.000000e+00> : vector<16x16xf32>
    %954 = tpu.matmul %0, %953, %cst_608 {dimension_numbers = #tpu.dot_dimension_numbers<[1], [0], [0], [1], [0, 0, 1, 1], [], []>} : vector<16x16xf32>, vector<16x16xf32>, vector<16x16xf32> -> vector<16x16xf32>
    %955 = vector.extract_strided_slice %954 {offsets = [0, 0], sizes = [8, 16], strides = [1, 1]} : vector<16x16xf32> to vector<8x16xf32>
    %956 = vector.extract_strided_slice %954 {offsets = [8, 0], sizes = [8, 16], strides = [1, 1]} : vector<16x16xf32> to vector<8x16xf32>
    %957 = arith.maximumf %955, %956 : vector<8x16xf32>
    %cst_609 = arith.constant dense<0.000000e+00> : vector<8x16xf32>
    %958 = tpu.matmul %957, %1, %cst_609 {dimension_numbers = #tpu.dot_dimension_numbers<[1], [0], [0], [1], [0, 0, 1, 1], [], []>} : vector<8x16xf32>, vector<16x16xf32>, vector<8x16xf32> -> vector<8x16xf32>
    %959 = vector.extract_strided_slice %958 {offsets = [0, 0], sizes = [8, 8], strides = [1, 1]} : vector<8x16xf32> to vector<8x8xf32>
    %960 = vector.extract_strided_slice %958 {offsets = [0, 8], sizes = [8, 8], strides = [1, 1]} : vector<8x16xf32> to vector<8x8xf32>
    %961 = arith.maximumf %959, %960 : vector<8x8xf32>
    %c2_610 = arith.constant 2 : index
    %c0_611 = arith.constant 0 : index
    %962 = memref.load %arg7[%c2_610, %c0_611] : memref<4x8xf32, #tpu.memory_space<smem>>
    %963 = vector.broadcast %962 : f32 to vector<8x8xf32>
    %964 = arith.mulf %963, %747 : vector<8x8xf32>
    %c2_612 = arith.constant 2 : index
    %c1_613 = arith.constant 1 : index
    %965 = memref.load %arg7[%c2_612, %c1_613] : memref<4x8xf32, #tpu.memory_space<smem>>
    %966 = vector.broadcast %965 : f32 to vector<8x8xf32>
    %967 = arith.mulf %966, %749 : vector<8x8xf32>
    %968 = arith.addf %964, %967 : vector<8x8xf32>
    %c2_614 = arith.constant 2 : index
    %c2_615 = arith.constant 2 : index
    %969 = memref.load %arg7[%c2_614, %c2_615] : memref<4x8xf32, #tpu.memory_space<smem>>
    %970 = vector.broadcast %969 : f32 to vector<8x8xf32>
    %971 = arith.mulf %970, %751 : vector<8x8xf32>
    %972 = arith.addf %968, %971 : vector<8x8xf32>
    %c2_616 = arith.constant 2 : index
    %c3_617 = arith.constant 3 : index
    %973 = memref.load %arg7[%c2_616, %c3_617] : memref<4x8xf32, #tpu.memory_space<smem>>
    %974 = vector.broadcast %973 : f32 to vector<8x8xf32>
    %975 = arith.mulf %974, %753 : vector<8x8xf32>
    %976 = arith.addf %972, %975 : vector<8x8xf32>
    %c2_618 = arith.constant 2 : index
    %c4_619 = arith.constant 4 : index
    %977 = memref.load %arg7[%c2_618, %c4_619] : memref<4x8xf32, #tpu.memory_space<smem>>
    %978 = vector.broadcast %977 : f32 to vector<8x8xf32>
    %979 = arith.mulf %978, %755 : vector<8x8xf32>
    %980 = arith.addf %976, %979 : vector<8x8xf32>
    %c2_620 = arith.constant 2 : index
    %c5_621 = arith.constant 5 : index
    %981 = memref.load %arg7[%c2_620, %c5_621] : memref<4x8xf32, #tpu.memory_space<smem>>
    %982 = vector.broadcast %981 : f32 to vector<8x8xf32>
    %983 = arith.mulf %982, %757 : vector<8x8xf32>
    %984 = arith.addf %980, %983 : vector<8x8xf32>
    %c2_622 = arith.constant 2 : index
    %c6_623 = arith.constant 6 : index
    %985 = memref.load %arg7[%c2_622, %c6_623] : memref<4x8xf32, #tpu.memory_space<smem>>
    %986 = vector.broadcast %985 : f32 to vector<8x8xf32>
    %987 = arith.mulf %986, %759 : vector<8x8xf32>
    %988 = arith.addf %984, %987 : vector<8x8xf32>
    %c2_624 = arith.constant 2 : index
    %c7_625 = arith.constant 7 : index
    %989 = memref.load %arg7[%c2_624, %c7_625] : memref<4x8xf32, #tpu.memory_space<smem>>
    %990 = vector.broadcast %989 : f32 to vector<8x8xf32>
    %991 = arith.mulf %990, %761 : vector<8x8xf32>
    %992 = arith.addf %988, %991 : vector<8x8xf32>
    %993 = arith.addf %961, %992 : vector<8x8xf32>
    %c1_626 = arith.constant 1 : index
    %c2_627 = arith.constant 2 : index
    %994 = memref.load %arg8[%c1_626, %c2_627] : memref<3x4xf32, #tpu.memory_space<smem>>
    %995 = vector.broadcast %994 : f32 to vector<8x8xf32>
    %996 = arith.addf %993, %995 : vector<8x8xf32>
    %cst_628 = arith.constant 0.000000e+00 : f32
    %997 = vector.broadcast %cst_628 : f32 to vector<8x8xf32>
    %998 = arith.maximumf %996, %997 : vector<8x8xf32>
    %c0_629 = arith.constant 0 : index
    %c2_630 = arith.constant 2 : index
    %999 = memref.load %arg8[%c0_629, %c2_630] : memref<3x4xf32, #tpu.memory_space<smem>>
    %1000 = vector.broadcast %999 : f32 to vector<8x8xf32>
    %1001 = arith.mulf %1000, %998 : vector<8x8xf32>
    %1002 = arith.addf %922, %1001 : vector<8x8xf32>
    %c3_631 = arith.constant 3 : index
    %c0_632 = arith.constant 0 : index
    %1003 = memref.load %arg6[%c3_631, %c0_632] : memref<4x4xf32, #tpu.memory_space<smem>>
    %1004 = vector.broadcast %1003 : f32 to vector<16x16xf32>
    %1005 = arith.mulf %1004, %731 : vector<16x16xf32>
    %c3_633 = arith.constant 3 : index
    %c0_634 = arith.constant 0 : index
    %1006 = memref.load %arg6[%c3_633, %c0_634] : memref<4x4xf32, #tpu.memory_space<smem>>
    %1007 = vector.broadcast %1006 : f32 to vector<16x16xf32>
    %1008 = arith.mulf %1007, %739 : vector<16x16xf32>
    %c3_635 = arith.constant 3 : index
    %c1_636 = arith.constant 1 : index
    %1009 = memref.load %arg6[%c3_635, %c1_636] : memref<4x4xf32, #tpu.memory_space<smem>>
    %1010 = vector.broadcast %1009 : f32 to vector<16x16xf32>
    %1011 = arith.mulf %1010, %733 : vector<16x16xf32>
    %1012 = arith.addf %1005, %1011 : vector<16x16xf32>
    %c3_637 = arith.constant 3 : index
    %c1_638 = arith.constant 1 : index
    %1013 = memref.load %arg6[%c3_637, %c1_638] : memref<4x4xf32, #tpu.memory_space<smem>>
    %1014 = vector.broadcast %1013 : f32 to vector<16x16xf32>
    %1015 = arith.mulf %1014, %741 : vector<16x16xf32>
    %1016 = arith.addf %1008, %1015 : vector<16x16xf32>
    %c3_639 = arith.constant 3 : index
    %c2_640 = arith.constant 2 : index
    %1017 = memref.load %arg6[%c3_639, %c2_640] : memref<4x4xf32, #tpu.memory_space<smem>>
    %1018 = vector.broadcast %1017 : f32 to vector<16x16xf32>
    %1019 = arith.mulf %1018, %735 : vector<16x16xf32>
    %1020 = arith.addf %1012, %1019 : vector<16x16xf32>
    %c3_641 = arith.constant 3 : index
    %c2_642 = arith.constant 2 : index
    %1021 = memref.load %arg6[%c3_641, %c2_642] : memref<4x4xf32, #tpu.memory_space<smem>>
    %1022 = vector.broadcast %1021 : f32 to vector<16x16xf32>
    %1023 = arith.mulf %1022, %743 : vector<16x16xf32>
    %1024 = arith.addf %1016, %1023 : vector<16x16xf32>
    %c3_643 = arith.constant 3 : index
    %c3_644 = arith.constant 3 : index
    %1025 = memref.load %arg6[%c3_643, %c3_644] : memref<4x4xf32, #tpu.memory_space<smem>>
    %1026 = vector.broadcast %1025 : f32 to vector<16x16xf32>
    %1027 = arith.mulf %1026, %737 : vector<16x16xf32>
    %1028 = arith.addf %1020, %1027 : vector<16x16xf32>
    %c3_645 = arith.constant 3 : index
    %c3_646 = arith.constant 3 : index
    %1029 = memref.load %arg6[%c3_645, %c3_646] : memref<4x4xf32, #tpu.memory_space<smem>>
    %1030 = vector.broadcast %1029 : f32 to vector<16x16xf32>
    %1031 = arith.mulf %1030, %745 : vector<16x16xf32>
    %1032 = arith.addf %1024, %1031 : vector<16x16xf32>
    %1033 = arith.maximumf %1028, %1032 : vector<16x16xf32>
    %cst_647 = arith.constant dense<0.000000e+00> : vector<16x16xf32>
    %1034 = tpu.matmul %0, %1033, %cst_647 {dimension_numbers = #tpu.dot_dimension_numbers<[1], [0], [0], [1], [0, 0, 1, 1], [], []>} : vector<16x16xf32>, vector<16x16xf32>, vector<16x16xf32> -> vector<16x16xf32>
    %1035 = vector.extract_strided_slice %1034 {offsets = [0, 0], sizes = [8, 16], strides = [1, 1]} : vector<16x16xf32> to vector<8x16xf32>
    %1036 = vector.extract_strided_slice %1034 {offsets = [8, 0], sizes = [8, 16], strides = [1, 1]} : vector<16x16xf32> to vector<8x16xf32>
    %1037 = arith.maximumf %1035, %1036 : vector<8x16xf32>
    %cst_648 = arith.constant dense<0.000000e+00> : vector<8x16xf32>
    %1038 = tpu.matmul %1037, %1, %cst_648 {dimension_numbers = #tpu.dot_dimension_numbers<[1], [0], [0], [1], [0, 0, 1, 1], [], []>} : vector<8x16xf32>, vector<16x16xf32>, vector<8x16xf32> -> vector<8x16xf32>
    %1039 = vector.extract_strided_slice %1038 {offsets = [0, 0], sizes = [8, 8], strides = [1, 1]} : vector<8x16xf32> to vector<8x8xf32>
    %1040 = vector.extract_strided_slice %1038 {offsets = [0, 8], sizes = [8, 8], strides = [1, 1]} : vector<8x16xf32> to vector<8x8xf32>
    %1041 = arith.maximumf %1039, %1040 : vector<8x8xf32>
    %c3_649 = arith.constant 3 : index
    %c0_650 = arith.constant 0 : index
    %1042 = memref.load %arg7[%c3_649, %c0_650] : memref<4x8xf32, #tpu.memory_space<smem>>
    %1043 = vector.broadcast %1042 : f32 to vector<8x8xf32>
    %1044 = arith.mulf %1043, %747 : vector<8x8xf32>
    %c3_651 = arith.constant 3 : index
    %c1_652 = arith.constant 1 : index
    %1045 = memref.load %arg7[%c3_651, %c1_652] : memref<4x8xf32, #tpu.memory_space<smem>>
    %1046 = vector.broadcast %1045 : f32 to vector<8x8xf32>
    %1047 = arith.mulf %1046, %749 : vector<8x8xf32>
    %1048 = arith.addf %1044, %1047 : vector<8x8xf32>
    %c3_653 = arith.constant 3 : index
    %c2_654 = arith.constant 2 : index
    %1049 = memref.load %arg7[%c3_653, %c2_654] : memref<4x8xf32, #tpu.memory_space<smem>>
    %1050 = vector.broadcast %1049 : f32 to vector<8x8xf32>
    %1051 = arith.mulf %1050, %751 : vector<8x8xf32>
    %1052 = arith.addf %1048, %1051 : vector<8x8xf32>
    %c3_655 = arith.constant 3 : index
    %c3_656 = arith.constant 3 : index
    %1053 = memref.load %arg7[%c3_655, %c3_656] : memref<4x8xf32, #tpu.memory_space<smem>>
    %1054 = vector.broadcast %1053 : f32 to vector<8x8xf32>
    %1055 = arith.mulf %1054, %753 : vector<8x8xf32>
    %1056 = arith.addf %1052, %1055 : vector<8x8xf32>
    %c3_657 = arith.constant 3 : index
    %c4_658 = arith.constant 4 : index
    %1057 = memref.load %arg7[%c3_657, %c4_658] : memref<4x8xf32, #tpu.memory_space<smem>>
    %1058 = vector.broadcast %1057 : f32 to vector<8x8xf32>
    %1059 = arith.mulf %1058, %755 : vector<8x8xf32>
    %1060 = arith.addf %1056, %1059 : vector<8x8xf32>
    %c3_659 = arith.constant 3 : index
    %c5_660 = arith.constant 5 : index
    %1061 = memref.load %arg7[%c3_659, %c5_660] : memref<4x8xf32, #tpu.memory_space<smem>>
    %1062 = vector.broadcast %1061 : f32 to vector<8x8xf32>
    %1063 = arith.mulf %1062, %757 : vector<8x8xf32>
    %1064 = arith.addf %1060, %1063 : vector<8x8xf32>
    %c3_661 = arith.constant 3 : index
    %c6_662 = arith.constant 6 : index
    %1065 = memref.load %arg7[%c3_661, %c6_662] : memref<4x8xf32, #tpu.memory_space<smem>>
    %1066 = vector.broadcast %1065 : f32 to vector<8x8xf32>
    %1067 = arith.mulf %1066, %759 : vector<8x8xf32>
    %1068 = arith.addf %1064, %1067 : vector<8x8xf32>
    %c3_663 = arith.constant 3 : index
    %c7_664 = arith.constant 7 : index
    %1069 = memref.load %arg7[%c3_663, %c7_664] : memref<4x8xf32, #tpu.memory_space<smem>>
    %1070 = vector.broadcast %1069 : f32 to vector<8x8xf32>
    %1071 = arith.mulf %1070, %761 : vector<8x8xf32>
    %1072 = arith.addf %1068, %1071 : vector<8x8xf32>
    %1073 = arith.addf %1041, %1072 : vector<8x8xf32>
    %c1_665 = arith.constant 1 : index
    %c3_666 = arith.constant 3 : index
    %1074 = memref.load %arg8[%c1_665, %c3_666] : memref<3x4xf32, #tpu.memory_space<smem>>
    %1075 = vector.broadcast %1074 : f32 to vector<8x8xf32>
    %1076 = arith.addf %1073, %1075 : vector<8x8xf32>
    %cst_667 = arith.constant 0.000000e+00 : f32
    %1077 = vector.broadcast %cst_667 : f32 to vector<8x8xf32>
    %1078 = arith.maximumf %1076, %1077 : vector<8x8xf32>
    %c0_668 = arith.constant 0 : index
    %c3_669 = arith.constant 3 : index
    %1079 = memref.load %arg8[%c0_668, %c3_669] : memref<3x4xf32, #tpu.memory_space<smem>>
    %1080 = vector.broadcast %1079 : f32 to vector<8x8xf32>
    %1081 = arith.mulf %1080, %1078 : vector<8x8xf32>
    %1082 = arith.addf %1002, %1081 : vector<8x8xf32>
    %c2_670 = arith.constant 2 : index
    %c0_671 = arith.constant 0 : index
    %1083 = memref.load %arg8[%c2_670, %c0_671] : memref<3x4xf32, #tpu.memory_space<smem>>
    %1084 = vector.broadcast %1083 : f32 to vector<8x8xf32>
    %1085 = arith.addf %1082, %1084 : vector<8x8xf32>
    %1086 = arith.negf %1085 : vector<8x8xf32>
    %1087 = math.exp %1086 : vector<8x8xf32>
    %cst_672 = arith.constant 1.000000e+00 : f32
    %1088 = vector.broadcast %cst_672 : f32 to vector<8x8xf32>
    %1089 = arith.addf %1088, %1087 : vector<8x8xf32>
    %1090 = arith.divf %1088, %1089 : vector<8x8xf32>
    %c2_673 = arith.constant 2 : index
    %c0_674 = arith.constant 0 : index
    %c0_675 = arith.constant 0 : index
    %1091 = vector.load %arg9[%c2_673, %c0_674, %c0_675] : memref<4x8x8xf32, #tpu.memory_space<vmem>>, vector<1x8x8xf32>
    %1092 = vector.shape_cast %1091 : vector<1x8x8xf32> to vector<8x8xf32>
    %1093 = vector.shape_cast %1090 : vector<8x8xf32> to vector<1x8x8xf32>
    tpu.vector_store %arg9[%c2_673, %c0_674, %c0_675], %1093 {strides = array<i32>} : memref<4x8x8xf32, #tpu.memory_space<vmem>>, vector<1x8x8xf32>,
    %c0_676 = arith.constant 0 : index
    %c6_677 = arith.constant 6 : index
    %c0_678 = arith.constant 0 : index
    %c0_679 = arith.constant 0 : index
    %1094 = vector.load %arg2[%c0_676, %c6_677, %c0_678, %c0_679] : memref<4x8x16x16xf32, #tpu.memory_space<vmem>>, vector<1x1x16x16xf32>
    %1095 = vector.shape_cast %1094 : vector<1x1x16x16xf32> to vector<16x16xf32>
    %c1_680 = arith.constant 1 : index
    %c6_681 = arith.constant 6 : index
    %c0_682 = arith.constant 0 : index
    %c0_683 = arith.constant 0 : index
    %1096 = vector.load %arg2[%c1_680, %c6_681, %c0_682, %c0_683] : memref<4x8x16x16xf32, #tpu.memory_space<vmem>>, vector<1x1x16x16xf32>
    %1097 = vector.shape_cast %1096 : vector<1x1x16x16xf32> to vector<16x16xf32>
    %c2_684 = arith.constant 2 : index
    %c6_685 = arith.constant 6 : index
    %c0_686 = arith.constant 0 : index
    %c0_687 = arith.constant 0 : index
    %1098 = vector.load %arg2[%c2_684, %c6_685, %c0_686, %c0_687] : memref<4x8x16x16xf32, #tpu.memory_space<vmem>>, vector<1x1x16x16xf32>
    %1099 = vector.shape_cast %1098 : vector<1x1x16x16xf32> to vector<16x16xf32>
    %c3_688 = arith.constant 3 : index
    %c6_689 = arith.constant 6 : index
    %c0_690 = arith.constant 0 : index
    %c0_691 = arith.constant 0 : index
    %1100 = vector.load %arg2[%c3_688, %c6_689, %c0_690, %c0_691] : memref<4x8x16x16xf32, #tpu.memory_space<vmem>>, vector<1x1x16x16xf32>
    %1101 = vector.shape_cast %1100 : vector<1x1x16x16xf32> to vector<16x16xf32>
    %c0_692 = arith.constant 0 : index
    %c7_693 = arith.constant 7 : index
    %c0_694 = arith.constant 0 : index
    %c0_695 = arith.constant 0 : index
    %1102 = vector.load %arg2[%c0_692, %c7_693, %c0_694, %c0_695] : memref<4x8x16x16xf32, #tpu.memory_space<vmem>>, vector<1x1x16x16xf32>
    %1103 = vector.shape_cast %1102 : vector<1x1x16x16xf32> to vector<16x16xf32>
    %c1_696 = arith.constant 1 : index
    %c7_697 = arith.constant 7 : index
    %c0_698 = arith.constant 0 : index
    %c0_699 = arith.constant 0 : index
    %1104 = vector.load %arg2[%c1_696, %c7_697, %c0_698, %c0_699] : memref<4x8x16x16xf32, #tpu.memory_space<vmem>>, vector<1x1x16x16xf32>
    %1105 = vector.shape_cast %1104 : vector<1x1x16x16xf32> to vector<16x16xf32>
    %c2_700 = arith.constant 2 : index
    %c7_701 = arith.constant 7 : index
    %c0_702 = arith.constant 0 : index
    %c0_703 = arith.constant 0 : index
    %1106 = vector.load %arg2[%c2_700, %c7_701, %c0_702, %c0_703] : memref<4x8x16x16xf32, #tpu.memory_space<vmem>>, vector<1x1x16x16xf32>
    %1107 = vector.shape_cast %1106 : vector<1x1x16x16xf32> to vector<16x16xf32>
    %c3_704 = arith.constant 3 : index
    %c7_705 = arith.constant 7 : index
    %c0_706 = arith.constant 0 : index
    %c0_707 = arith.constant 0 : index
    %1108 = vector.load %arg2[%c3_704, %c7_705, %c0_706, %c0_707] : memref<4x8x16x16xf32, #tpu.memory_space<vmem>>, vector<1x1x16x16xf32>
    %1109 = vector.shape_cast %1108 : vector<1x1x16x16xf32> to vector<16x16xf32>
    %c0_708 = arith.constant 0 : index
    %c3_709 = arith.constant 3 : index
    %c0_710 = arith.constant 0 : index
    %c0_711 = arith.constant 0 : index
    %1110 = vector.load %arg3[%c0_708, %c3_709, %c0_710, %c0_711] : memref<8x4x8x8xf32, #tpu.memory_space<vmem>>, vector<1x1x8x8xf32>
    %1111 = vector.shape_cast %1110 : vector<1x1x8x8xf32> to vector<8x8xf32>
    %c1_712 = arith.constant 1 : index
    %c3_713 = arith.constant 3 : index
    %c0_714 = arith.constant 0 : index
    %c0_715 = arith.constant 0 : index
    %1112 = vector.load %arg3[%c1_712, %c3_713, %c0_714, %c0_715] : memref<8x4x8x8xf32, #tpu.memory_space<vmem>>, vector<1x1x8x8xf32>
    %1113 = vector.shape_cast %1112 : vector<1x1x8x8xf32> to vector<8x8xf32>
    %c2_716 = arith.constant 2 : index
    %c3_717 = arith.constant 3 : index
    %c0_718 = arith.constant 0 : index
    %c0_719 = arith.constant 0 : index
    %1114 = vector.load %arg3[%c2_716, %c3_717, %c0_718, %c0_719] : memref<8x4x8x8xf32, #tpu.memory_space<vmem>>, vector<1x1x8x8xf32>
    %1115 = vector.shape_cast %1114 : vector<1x1x8x8xf32> to vector<8x8xf32>
    %c3_720 = arith.constant 3 : index
    %c3_721 = arith.constant 3 : index
    %c0_722 = arith.constant 0 : index
    %c0_723 = arith.constant 0 : index
    %1116 = vector.load %arg3[%c3_720, %c3_721, %c0_722, %c0_723] : memref<8x4x8x8xf32, #tpu.memory_space<vmem>>, vector<1x1x8x8xf32>
    %1117 = vector.shape_cast %1116 : vector<1x1x8x8xf32> to vector<8x8xf32>
    %c4_724 = arith.constant 4 : index
    %c3_725 = arith.constant 3 : index
    %c0_726 = arith.constant 0 : index
    %c0_727 = arith.constant 0 : index
    %1118 = vector.load %arg3[%c4_724, %c3_725, %c0_726, %c0_727] : memref<8x4x8x8xf32, #tpu.memory_space<vmem>>, vector<1x1x8x8xf32>
    %1119 = vector.shape_cast %1118 : vector<1x1x8x8xf32> to vector<8x8xf32>
    %c5_728 = arith.constant 5 : index
    %c3_729 = arith.constant 3 : index
    %c0_730 = arith.constant 0 : index
    %c0_731 = arith.constant 0 : index
    %1120 = vector.load %arg3[%c5_728, %c3_729, %c0_730, %c0_731] : memref<8x4x8x8xf32, #tpu.memory_space<vmem>>, vector<1x1x8x8xf32>
    %1121 = vector.shape_cast %1120 : vector<1x1x8x8xf32> to vector<8x8xf32>
    %c6_732 = arith.constant 6 : index
    %c3_733 = arith.constant 3 : index
    %c0_734 = arith.constant 0 : index
    %c0_735 = arith.constant 0 : index
    %1122 = vector.load %arg3[%c6_732, %c3_733, %c0_734, %c0_735] : memref<8x4x8x8xf32, #tpu.memory_space<vmem>>, vector<1x1x8x8xf32>
    %1123 = vector.shape_cast %1122 : vector<1x1x8x8xf32> to vector<8x8xf32>
    %c7_736 = arith.constant 7 : index
    %c3_737 = arith.constant 3 : index
    %c0_738 = arith.constant 0 : index
    %c0_739 = arith.constant 0 : index
    %1124 = vector.load %arg3[%c7_736, %c3_737, %c0_738, %c0_739] : memref<8x4x8x8xf32, #tpu.memory_space<vmem>>, vector<1x1x8x8xf32>
    %1125 = vector.shape_cast %1124 : vector<1x1x8x8xf32> to vector<8x8xf32>
    %cst_740 = arith.constant 0.000000e+00 : f32
    %1126 = vector.broadcast %cst_740 : f32 to vector<8x8xf32>
    %c0_741 = arith.constant 0 : index
    %c0_742 = arith.constant 0 : index
    %1127 = memref.load %arg6[%c0_741, %c0_742] : memref<4x4xf32, #tpu.memory_space<smem>>
    %1128 = vector.broadcast %1127 : f32 to vector<16x16xf32>
    %1129 = arith.mulf %1128, %1095 : vector<16x16xf32>
    %c0_743 = arith.constant 0 : index
    %c0_744 = arith.constant 0 : index
    %1130 = memref.load %arg6[%c0_743, %c0_744] : memref<4x4xf32, #tpu.memory_space<smem>>
    %1131 = vector.broadcast %1130 : f32 to vector<16x16xf32>
    %1132 = arith.mulf %1131, %1103 : vector<16x16xf32>
    %c0_745 = arith.constant 0 : index
    %c1_746 = arith.constant 1 : index
    %1133 = memref.load %arg6[%c0_745, %c1_746] : memref<4x4xf32, #tpu.memory_space<smem>>
    %1134 = vector.broadcast %1133 : f32 to vector<16x16xf32>
    %1135 = arith.mulf %1134, %1097 : vector<16x16xf32>
    %1136 = arith.addf %1129, %1135 : vector<16x16xf32>
    %c0_747 = arith.constant 0 : index
    %c1_748 = arith.constant 1 : index
    %1137 = memref.load %arg6[%c0_747, %c1_748] : memref<4x4xf32, #tpu.memory_space<smem>>
    %1138 = vector.broadcast %1137 : f32 to vector<16x16xf32>
    %1139 = arith.mulf %1138, %1105 : vector<16x16xf32>
    %1140 = arith.addf %1132, %1139 : vector<16x16xf32>
    %c0_749 = arith.constant 0 : index
    %c2_750 = arith.constant 2 : index
    %1141 = memref.load %arg6[%c0_749, %c2_750] : memref<4x4xf32, #tpu.memory_space<smem>>
    %1142 = vector.broadcast %1141 : f32 to vector<16x16xf32>
    %1143 = arith.mulf %1142, %1099 : vector<16x16xf32>
    %1144 = arith.addf %1136, %1143 : vector<16x16xf32>
    %c0_751 = arith.constant 0 : index
    %c2_752 = arith.constant 2 : index
    %1145 = memref.load %arg6[%c0_751, %c2_752] : memref<4x4xf32, #tpu.memory_space<smem>>
    %1146 = vector.broadcast %1145 : f32 to vector<16x16xf32>
    %1147 = arith.mulf %1146, %1107 : vector<16x16xf32>
    %1148 = arith.addf %1140, %1147 : vector<16x16xf32>
    %c0_753 = arith.constant 0 : index
    %c3_754 = arith.constant 3 : index
    %1149 = memref.load %arg6[%c0_753, %c3_754] : memref<4x4xf32, #tpu.memory_space<smem>>
    %1150 = vector.broadcast %1149 : f32 to vector<16x16xf32>
    %1151 = arith.mulf %1150, %1101 : vector<16x16xf32>
    %1152 = arith.addf %1144, %1151 : vector<16x16xf32>
    %c0_755 = arith.constant 0 : index
    %c3_756 = arith.constant 3 : index
    %1153 = memref.load %arg6[%c0_755, %c3_756] : memref<4x4xf32, #tpu.memory_space<smem>>
    %1154 = vector.broadcast %1153 : f32 to vector<16x16xf32>
    %1155 = arith.mulf %1154, %1109 : vector<16x16xf32>
    %1156 = arith.addf %1148, %1155 : vector<16x16xf32>
    %1157 = arith.maximumf %1152, %1156 : vector<16x16xf32>
    %cst_757 = arith.constant dense<0.000000e+00> : vector<16x16xf32>
    %1158 = tpu.matmul %0, %1157, %cst_757 {dimension_numbers = #tpu.dot_dimension_numbers<[1], [0], [0], [1], [0, 0, 1, 1], [], []>} : vector<16x16xf32>, vector<16x16xf32>, vector<16x16xf32> -> vector<16x16xf32>
    %1159 = vector.extract_strided_slice %1158 {offsets = [0, 0], sizes = [8, 16], strides = [1, 1]} : vector<16x16xf32> to vector<8x16xf32>
    %1160 = vector.extract_strided_slice %1158 {offsets = [8, 0], sizes = [8, 16], strides = [1, 1]} : vector<16x16xf32> to vector<8x16xf32>
    %1161 = arith.maximumf %1159, %1160 : vector<8x16xf32>
    %cst_758 = arith.constant dense<0.000000e+00> : vector<8x16xf32>
    %1162 = tpu.matmul %1161, %1, %cst_758 {dimension_numbers = #tpu.dot_dimension_numbers<[1], [0], [0], [1], [0, 0, 1, 1], [], []>} : vector<8x16xf32>, vector<16x16xf32>, vector<8x16xf32> -> vector<8x16xf32>
    %1163 = vector.extract_strided_slice %1162 {offsets = [0, 0], sizes = [8, 8], strides = [1, 1]} : vector<8x16xf32> to vector<8x8xf32>
    %1164 = vector.extract_strided_slice %1162 {offsets = [0, 8], sizes = [8, 8], strides = [1, 1]} : vector<8x16xf32> to vector<8x8xf32>
    %1165 = arith.maximumf %1163, %1164 : vector<8x8xf32>
    %c0_759 = arith.constant 0 : index
    %c0_760 = arith.constant 0 : index
    %1166 = memref.load %arg7[%c0_759, %c0_760] : memref<4x8xf32, #tpu.memory_space<smem>>
    %1167 = vector.broadcast %1166 : f32 to vector<8x8xf32>
    %1168 = arith.mulf %1167, %1111 : vector<8x8xf32>
    %c0_761 = arith.constant 0 : index
    %c1_762 = arith.constant 1 : index
    %1169 = memref.load %arg7[%c0_761, %c1_762] : memref<4x8xf32, #tpu.memory_space<smem>>
    %1170 = vector.broadcast %1169 : f32 to vector<8x8xf32>
    %1171 = arith.mulf %1170, %1113 : vector<8x8xf32>
    %1172 = arith.addf %1168, %1171 : vector<8x8xf32>
    %c0_763 = arith.constant 0 : index
    %c2_764 = arith.constant 2 : index
    %1173 = memref.load %arg7[%c0_763, %c2_764] : memref<4x8xf32, #tpu.memory_space<smem>>
    %1174 = vector.broadcast %1173 : f32 to vector<8x8xf32>
    %1175 = arith.mulf %1174, %1115 : vector<8x8xf32>
    %1176 = arith.addf %1172, %1175 : vector<8x8xf32>
    %c0_765 = arith.constant 0 : index
    %c3_766 = arith.constant 3 : index
    %1177 = memref.load %arg7[%c0_765, %c3_766] : memref<4x8xf32, #tpu.memory_space<smem>>
    %1178 = vector.broadcast %1177 : f32 to vector<8x8xf32>
    %1179 = arith.mulf %1178, %1117 : vector<8x8xf32>
    %1180 = arith.addf %1176, %1179 : vector<8x8xf32>
    %c0_767 = arith.constant 0 : index
    %c4_768 = arith.constant 4 : index
    %1181 = memref.load %arg7[%c0_767, %c4_768] : memref<4x8xf32, #tpu.memory_space<smem>>
    %1182 = vector.broadcast %1181 : f32 to vector<8x8xf32>
    %1183 = arith.mulf %1182, %1119 : vector<8x8xf32>
    %1184 = arith.addf %1180, %1183 : vector<8x8xf32>
    %c0_769 = arith.constant 0 : index
    %c5_770 = arith.constant 5 : index
    %1185 = memref.load %arg7[%c0_769, %c5_770] : memref<4x8xf32, #tpu.memory_space<smem>>
    %1186 = vector.broadcast %1185 : f32 to vector<8x8xf32>
    %1187 = arith.mulf %1186, %1121 : vector<8x8xf32>
    %1188 = arith.addf %1184, %1187 : vector<8x8xf32>
    %c0_771 = arith.constant 0 : index
    %c6_772 = arith.constant 6 : index
    %1189 = memref.load %arg7[%c0_771, %c6_772] : memref<4x8xf32, #tpu.memory_space<smem>>
    %1190 = vector.broadcast %1189 : f32 to vector<8x8xf32>
    %1191 = arith.mulf %1190, %1123 : vector<8x8xf32>
    %1192 = arith.addf %1188, %1191 : vector<8x8xf32>
    %c0_773 = arith.constant 0 : index
    %c7_774 = arith.constant 7 : index
    %1193 = memref.load %arg7[%c0_773, %c7_774] : memref<4x8xf32, #tpu.memory_space<smem>>
    %1194 = vector.broadcast %1193 : f32 to vector<8x8xf32>
    %1195 = arith.mulf %1194, %1125 : vector<8x8xf32>
    %1196 = arith.addf %1192, %1195 : vector<8x8xf32>
    %1197 = arith.addf %1165, %1196 : vector<8x8xf32>
    %c1_775 = arith.constant 1 : index
    %c0_776 = arith.constant 0 : index
    %1198 = memref.load %arg8[%c1_775, %c0_776] : memref<3x4xf32, #tpu.memory_space<smem>>
    %1199 = vector.broadcast %1198 : f32 to vector<8x8xf32>
    %1200 = arith.addf %1197, %1199 : vector<8x8xf32>
    %cst_777 = arith.constant 0.000000e+00 : f32
    %1201 = vector.broadcast %cst_777 : f32 to vector<8x8xf32>
    %1202 = arith.maximumf %1200, %1201 : vector<8x8xf32>
    %c0_778 = arith.constant 0 : index
    %c0_779 = arith.constant 0 : index
    %1203 = memref.load %arg8[%c0_778, %c0_779] : memref<3x4xf32, #tpu.memory_space<smem>>
    %1204 = vector.broadcast %1203 : f32 to vector<8x8xf32>
    %1205 = arith.mulf %1204, %1202 : vector<8x8xf32>
    %1206 = arith.addf %1126, %1205 : vector<8x8xf32>
    %c1_780 = arith.constant 1 : index
    %c0_781 = arith.constant 0 : index
    %1207 = memref.load %arg6[%c1_780, %c0_781] : memref<4x4xf32, #tpu.memory_space<smem>>
    %1208 = vector.broadcast %1207 : f32 to vector<16x16xf32>
    %1209 = arith.mulf %1208, %1095 : vector<16x16xf32>
    %c1_782 = arith.constant 1 : index
    %c0_783 = arith.constant 0 : index
    %1210 = memref.load %arg6[%c1_782, %c0_783] : memref<4x4xf32, #tpu.memory_space<smem>>
    %1211 = vector.broadcast %1210 : f32 to vector<16x16xf32>
    %1212 = arith.mulf %1211, %1103 : vector<16x16xf32>
    %c1_784 = arith.constant 1 : index
    %c1_785 = arith.constant 1 : index
    %1213 = memref.load %arg6[%c1_784, %c1_785] : memref<4x4xf32, #tpu.memory_space<smem>>
    %1214 = vector.broadcast %1213 : f32 to vector<16x16xf32>
    %1215 = arith.mulf %1214, %1097 : vector<16x16xf32>
    %1216 = arith.addf %1209, %1215 : vector<16x16xf32>
    %c1_786 = arith.constant 1 : index
    %c1_787 = arith.constant 1 : index
    %1217 = memref.load %arg6[%c1_786, %c1_787] : memref<4x4xf32, #tpu.memory_space<smem>>
    %1218 = vector.broadcast %1217 : f32 to vector<16x16xf32>
    %1219 = arith.mulf %1218, %1105 : vector<16x16xf32>
    %1220 = arith.addf %1212, %1219 : vector<16x16xf32>
    %c1_788 = arith.constant 1 : index
    %c2_789 = arith.constant 2 : index
    %1221 = memref.load %arg6[%c1_788, %c2_789] : memref<4x4xf32, #tpu.memory_space<smem>>
    %1222 = vector.broadcast %1221 : f32 to vector<16x16xf32>
    %1223 = arith.mulf %1222, %1099 : vector<16x16xf32>
    %1224 = arith.addf %1216, %1223 : vector<16x16xf32>
    %c1_790 = arith.constant 1 : index
    %c2_791 = arith.constant 2 : index
    %1225 = memref.load %arg6[%c1_790, %c2_791] : memref<4x4xf32, #tpu.memory_space<smem>>
    %1226 = vector.broadcast %1225 : f32 to vector<16x16xf32>
    %1227 = arith.mulf %1226, %1107 : vector<16x16xf32>
    %1228 = arith.addf %1220, %1227 : vector<16x16xf32>
    %c1_792 = arith.constant 1 : index
    %c3_793 = arith.constant 3 : index
    %1229 = memref.load %arg6[%c1_792, %c3_793] : memref<4x4xf32, #tpu.memory_space<smem>>
    %1230 = vector.broadcast %1229 : f32 to vector<16x16xf32>
    %1231 = arith.mulf %1230, %1101 : vector<16x16xf32>
    %1232 = arith.addf %1224, %1231 : vector<16x16xf32>
    %c1_794 = arith.constant 1 : index
    %c3_795 = arith.constant 3 : index
    %1233 = memref.load %arg6[%c1_794, %c3_795] : memref<4x4xf32, #tpu.memory_space<smem>>
    %1234 = vector.broadcast %1233 : f32 to vector<16x16xf32>
    %1235 = arith.mulf %1234, %1109 : vector<16x16xf32>
    %1236 = arith.addf %1228, %1235 : vector<16x16xf32>
    %1237 = arith.maximumf %1232, %1236 : vector<16x16xf32>
    %cst_796 = arith.constant dense<0.000000e+00> : vector<16x16xf32>
    %1238 = tpu.matmul %0, %1237, %cst_796 {dimension_numbers = #tpu.dot_dimension_numbers<[1], [0], [0], [1], [0, 0, 1, 1], [], []>} : vector<16x16xf32>, vector<16x16xf32>, vector<16x16xf32> -> vector<16x16xf32>
    %1239 = vector.extract_strided_slice %1238 {offsets = [0, 0], sizes = [8, 16], strides = [1, 1]} : vector<16x16xf32> to vector<8x16xf32>
    %1240 = vector.extract_strided_slice %1238 {offsets = [8, 0], sizes = [8, 16], strides = [1, 1]} : vector<16x16xf32> to vector<8x16xf32>
    %1241 = arith.maximumf %1239, %1240 : vector<8x16xf32>
    %cst_797 = arith.constant dense<0.000000e+00> : vector<8x16xf32>
    %1242 = tpu.matmul %1241, %1, %cst_797 {dimension_numbers = #tpu.dot_dimension_numbers<[1], [0], [0], [1], [0, 0, 1, 1], [], []>} : vector<8x16xf32>, vector<16x16xf32>, vector<8x16xf32> -> vector<8x16xf32>
    %1243 = vector.extract_strided_slice %1242 {offsets = [0, 0], sizes = [8, 8], strides = [1, 1]} : vector<8x16xf32> to vector<8x8xf32>
    %1244 = vector.extract_strided_slice %1242 {offsets = [0, 8], sizes = [8, 8], strides = [1, 1]} : vector<8x16xf32> to vector<8x8xf32>
    %1245 = arith.maximumf %1243, %1244 : vector<8x8xf32>
    %c1_798 = arith.constant 1 : index
    %c0_799 = arith.constant 0 : index
    %1246 = memref.load %arg7[%c1_798, %c0_799] : memref<4x8xf32, #tpu.memory_space<smem>>
    %1247 = vector.broadcast %1246 : f32 to vector<8x8xf32>
    %1248 = arith.mulf %1247, %1111 : vector<8x8xf32>
    %c1_800 = arith.constant 1 : index
    %c1_801 = arith.constant 1 : index
    %1249 = memref.load %arg7[%c1_800, %c1_801] : memref<4x8xf32, #tpu.memory_space<smem>>
    %1250 = vector.broadcast %1249 : f32 to vector<8x8xf32>
    %1251 = arith.mulf %1250, %1113 : vector<8x8xf32>
    %1252 = arith.addf %1248, %1251 : vector<8x8xf32>
    %c1_802 = arith.constant 1 : index
    %c2_803 = arith.constant 2 : index
    %1253 = memref.load %arg7[%c1_802, %c2_803] : memref<4x8xf32, #tpu.memory_space<smem>>
    %1254 = vector.broadcast %1253 : f32 to vector<8x8xf32>
    %1255 = arith.mulf %1254, %1115 : vector<8x8xf32>
    %1256 = arith.addf %1252, %1255 : vector<8x8xf32>
    %c1_804 = arith.constant 1 : index
    %c3_805 = arith.constant 3 : index
    %1257 = memref.load %arg7[%c1_804, %c3_805] : memref<4x8xf32, #tpu.memory_space<smem>>
    %1258 = vector.broadcast %1257 : f32 to vector<8x8xf32>
    %1259 = arith.mulf %1258, %1117 : vector<8x8xf32>
    %1260 = arith.addf %1256, %1259 : vector<8x8xf32>
    %c1_806 = arith.constant 1 : index
    %c4_807 = arith.constant 4 : index
    %1261 = memref.load %arg7[%c1_806, %c4_807] : memref<4x8xf32, #tpu.memory_space<smem>>
    %1262 = vector.broadcast %1261 : f32 to vector<8x8xf32>
    %1263 = arith.mulf %1262, %1119 : vector<8x8xf32>
    %1264 = arith.addf %1260, %1263 : vector<8x8xf32>
    %c1_808 = arith.constant 1 : index
    %c5_809 = arith.constant 5 : index
    %1265 = memref.load %arg7[%c1_808, %c5_809] : memref<4x8xf32, #tpu.memory_space<smem>>
    %1266 = vector.broadcast %1265 : f32 to vector<8x8xf32>
    %1267 = arith.mulf %1266, %1121 : vector<8x8xf32>
    %1268 = arith.addf %1264, %1267 : vector<8x8xf32>
    %c1_810 = arith.constant 1 : index
    %c6_811 = arith.constant 6 : index
    %1269 = memref.load %arg7[%c1_810, %c6_811] : memref<4x8xf32, #tpu.memory_space<smem>>
    %1270 = vector.broadcast %1269 : f32 to vector<8x8xf32>
    %1271 = arith.mulf %1270, %1123 : vector<8x8xf32>
    %1272 = arith.addf %1268, %1271 : vector<8x8xf32>
    %c1_812 = arith.constant 1 : index
    %c7_813 = arith.constant 7 : index
    %1273 = memref.load %arg7[%c1_812, %c7_813] : memref<4x8xf32, #tpu.memory_space<smem>>
    %1274 = vector.broadcast %1273 : f32 to vector<8x8xf32>
    %1275 = arith.mulf %1274, %1125 : vector<8x8xf32>
    %1276 = arith.addf %1272, %1275 : vector<8x8xf32>
    %1277 = arith.addf %1245, %1276 : vector<8x8xf32>
    %c1_814 = arith.constant 1 : index
    %c1_815 = arith.constant 1 : index
    %1278 = memref.load %arg8[%c1_814, %c1_815] : memref<3x4xf32, #tpu.memory_space<smem>>
    %1279 = vector.broadcast %1278 : f32 to vector<8x8xf32>
    %1280 = arith.addf %1277, %1279 : vector<8x8xf32>
    %cst_816 = arith.constant 0.000000e+00 : f32
    %1281 = vector.broadcast %cst_816 : f32 to vector<8x8xf32>
    %1282 = arith.maximumf %1280, %1281 : vector<8x8xf32>
    %c0_817 = arith.constant 0 : index
    %c1_818 = arith.constant 1 : index
    %1283 = memref.load %arg8[%c0_817, %c1_818] : memref<3x4xf32, #tpu.memory_space<smem>>
    %1284 = vector.broadcast %1283 : f32 to vector<8x8xf32>
    %1285 = arith.mulf %1284, %1282 : vector<8x8xf32>
    %1286 = arith.addf %1206, %1285 : vector<8x8xf32>
    %c2_819 = arith.constant 2 : index
    %c0_820 = arith.constant 0 : index
    %1287 = memref.load %arg6[%c2_819, %c0_820] : memref<4x4xf32, #tpu.memory_space<smem>>
    %1288 = vector.broadcast %1287 : f32 to vector<16x16xf32>
    %1289 = arith.mulf %1288, %1095 : vector<16x16xf32>
    %c2_821 = arith.constant 2 : index
    %c0_822 = arith.constant 0 : index
    %1290 = memref.load %arg6[%c2_821, %c0_822] : memref<4x4xf32, #tpu.memory_space<smem>>
    %1291 = vector.broadcast %1290 : f32 to vector<16x16xf32>
    %1292 = arith.mulf %1291, %1103 : vector<16x16xf32>
    %c2_823 = arith.constant 2 : index
    %c1_824 = arith.constant 1 : index
    %1293 = memref.load %arg6[%c2_823, %c1_824] : memref<4x4xf32, #tpu.memory_space<smem>>
    %1294 = vector.broadcast %1293 : f32 to vector<16x16xf32>
    %1295 = arith.mulf %1294, %1097 : vector<16x16xf32>
    %1296 = arith.addf %1289, %1295 : vector<16x16xf32>
    %c2_825 = arith.constant 2 : index
    %c1_826 = arith.constant 1 : index
    %1297 = memref.load %arg6[%c2_825, %c1_826] : memref<4x4xf32, #tpu.memory_space<smem>>
    %1298 = vector.broadcast %1297 : f32 to vector<16x16xf32>
    %1299 = arith.mulf %1298, %1105 : vector<16x16xf32>
    %1300 = arith.addf %1292, %1299 : vector<16x16xf32>
    %c2_827 = arith.constant 2 : index
    %c2_828 = arith.constant 2 : index
    %1301 = memref.load %arg6[%c2_827, %c2_828] : memref<4x4xf32, #tpu.memory_space<smem>>
    %1302 = vector.broadcast %1301 : f32 to vector<16x16xf32>
    %1303 = arith.mulf %1302, %1099 : vector<16x16xf32>
    %1304 = arith.addf %1296, %1303 : vector<16x16xf32>
    %c2_829 = arith.constant 2 : index
    %c2_830 = arith.constant 2 : index
    %1305 = memref.load %arg6[%c2_829, %c2_830] : memref<4x4xf32, #tpu.memory_space<smem>>
    %1306 = vector.broadcast %1305 : f32 to vector<16x16xf32>
    %1307 = arith.mulf %1306, %1107 : vector<16x16xf32>
    %1308 = arith.addf %1300, %1307 : vector<16x16xf32>
    %c2_831 = arith.constant 2 : index
    %c3_832 = arith.constant 3 : index
    %1309 = memref.load %arg6[%c2_831, %c3_832] : memref<4x4xf32, #tpu.memory_space<smem>>
    %1310 = vector.broadcast %1309 : f32 to vector<16x16xf32>
    %1311 = arith.mulf %1310, %1101 : vector<16x16xf32>
    %1312 = arith.addf %1304, %1311 : vector<16x16xf32>
    %c2_833 = arith.constant 2 : index
    %c3_834 = arith.constant 3 : index
    %1313 = memref.load %arg6[%c2_833, %c3_834] : memref<4x4xf32, #tpu.memory_space<smem>>
    %1314 = vector.broadcast %1313 : f32 to vector<16x16xf32>
    %1315 = arith.mulf %1314, %1109 : vector<16x16xf32>
    %1316 = arith.addf %1308, %1315 : vector<16x16xf32>
    %1317 = arith.maximumf %1312, %1316 : vector<16x16xf32>
    %cst_835 = arith.constant dense<0.000000e+00> : vector<16x16xf32>
    %1318 = tpu.matmul %0, %1317, %cst_835 {dimension_numbers = #tpu.dot_dimension_numbers<[1], [0], [0], [1], [0, 0, 1, 1], [], []>} : vector<16x16xf32>, vector<16x16xf32>, vector<16x16xf32> -> vector<16x16xf32>
    %1319 = vector.extract_strided_slice %1318 {offsets = [0, 0], sizes = [8, 16], strides = [1, 1]} : vector<16x16xf32> to vector<8x16xf32>
    %1320 = vector.extract_strided_slice %1318 {offsets = [8, 0], sizes = [8, 16], strides = [1, 1]} : vector<16x16xf32> to vector<8x16xf32>
    %1321 = arith.maximumf %1319, %1320 : vector<8x16xf32>
    %cst_836 = arith.constant dense<0.000000e+00> : vector<8x16xf32>
    %1322 = tpu.matmul %1321, %1, %cst_836 {dimension_numbers = #tpu.dot_dimension_numbers<[1], [0], [0], [1], [0, 0, 1, 1], [], []>} : vector<8x16xf32>, vector<16x16xf32>, vector<8x16xf32> -> vector<8x16xf32>
    %1323 = vector.extract_strided_slice %1322 {offsets = [0, 0], sizes = [8, 8], strides = [1, 1]} : vector<8x16xf32> to vector<8x8xf32>
    %1324 = vector.extract_strided_slice %1322 {offsets = [0, 8], sizes = [8, 8], strides = [1, 1]} : vector<8x16xf32> to vector<8x8xf32>
    %1325 = arith.maximumf %1323, %1324 : vector<8x8xf32>
    %c2_837 = arith.constant 2 : index
    %c0_838 = arith.constant 0 : index
    %1326 = memref.load %arg7[%c2_837, %c0_838] : memref<4x8xf32, #tpu.memory_space<smem>>
    %1327 = vector.broadcast %1326 : f32 to vector<8x8xf32>
    %1328 = arith.mulf %1327, %1111 : vector<8x8xf32>
    %c2_839 = arith.constant 2 : index
    %c1_840 = arith.constant 1 : index
    %1329 = memref.load %arg7[%c2_839, %c1_840] : memref<4x8xf32, #tpu.memory_space<smem>>
    %1330 = vector.broadcast %1329 : f32 to vector<8x8xf32>
    %1331 = arith.mulf %1330, %1113 : vector<8x8xf32>
    %1332 = arith.addf %1328, %1331 : vector<8x8xf32>
    %c2_841 = arith.constant 2 : index
    %c2_842 = arith.constant 2 : index
    %1333 = memref.load %arg7[%c2_841, %c2_842] : memref<4x8xf32, #tpu.memory_space<smem>>
    %1334 = vector.broadcast %1333 : f32 to vector<8x8xf32>
    %1335 = arith.mulf %1334, %1115 : vector<8x8xf32>
    %1336 = arith.addf %1332, %1335 : vector<8x8xf32>
    %c2_843 = arith.constant 2 : index
    %c3_844 = arith.constant 3 : index
    %1337 = memref.load %arg7[%c2_843, %c3_844] : memref<4x8xf32, #tpu.memory_space<smem>>
    %1338 = vector.broadcast %1337 : f32 to vector<8x8xf32>
    %1339 = arith.mulf %1338, %1117 : vector<8x8xf32>
    %1340 = arith.addf %1336, %1339 : vector<8x8xf32>
    %c2_845 = arith.constant 2 : index
    %c4_846 = arith.constant 4 : index
    %1341 = memref.load %arg7[%c2_845, %c4_846] : memref<4x8xf32, #tpu.memory_space<smem>>
    %1342 = vector.broadcast %1341 : f32 to vector<8x8xf32>
    %1343 = arith.mulf %1342, %1119 : vector<8x8xf32>
    %1344 = arith.addf %1340, %1343 : vector<8x8xf32>
    %c2_847 = arith.constant 2 : index
    %c5_848 = arith.constant 5 : index
    %1345 = memref.load %arg7[%c2_847, %c5_848] : memref<4x8xf32, #tpu.memory_space<smem>>
    %1346 = vector.broadcast %1345 : f32 to vector<8x8xf32>
    %1347 = arith.mulf %1346, %1121 : vector<8x8xf32>
    %1348 = arith.addf %1344, %1347 : vector<8x8xf32>
    %c2_849 = arith.constant 2 : index
    %c6_850 = arith.constant 6 : index
    %1349 = memref.load %arg7[%c2_849, %c6_850] : memref<4x8xf32, #tpu.memory_space<smem>>
    %1350 = vector.broadcast %1349 : f32 to vector<8x8xf32>
    %1351 = arith.mulf %1350, %1123 : vector<8x8xf32>
    %1352 = arith.addf %1348, %1351 : vector<8x8xf32>
    %c2_851 = arith.constant 2 : index
    %c7_852 = arith.constant 7 : index
    %1353 = memref.load %arg7[%c2_851, %c7_852] : memref<4x8xf32, #tpu.memory_space<smem>>
    %1354 = vector.broadcast %1353 : f32 to vector<8x8xf32>
    %1355 = arith.mulf %1354, %1125 : vector<8x8xf32>
    %1356 = arith.addf %1352, %1355 : vector<8x8xf32>
    %1357 = arith.addf %1325, %1356 : vector<8x8xf32>
    %c1_853 = arith.constant 1 : index
    %c2_854 = arith.constant 2 : index
    %1358 = memref.load %arg8[%c1_853, %c2_854] : memref<3x4xf32, #tpu.memory_space<smem>>
    %1359 = vector.broadcast %1358 : f32 to vector<8x8xf32>
    %1360 = arith.addf %1357, %1359 : vector<8x8xf32>
    %cst_855 = arith.constant 0.000000e+00 : f32
    %1361 = vector.broadcast %cst_855 : f32 to vector<8x8xf32>
    %1362 = arith.maximumf %1360, %1361 : vector<8x8xf32>
    %c0_856 = arith.constant 0 : index
    %c2_857 = arith.constant 2 : index
    %1363 = memref.load %arg8[%c0_856, %c2_857] : memref<3x4xf32, #tpu.memory_space<smem>>
    %1364 = vector.broadcast %1363 : f32 to vector<8x8xf32>
    %1365 = arith.mulf %1364, %1362 : vector<8x8xf32>
    %1366 = arith.addf %1286, %1365 : vector<8x8xf32>
    %c3_858 = arith.constant 3 : index
    %c0_859 = arith.constant 0 : index
    %1367 = memref.load %arg6[%c3_858, %c0_859] : memref<4x4xf32, #tpu.memory_space<smem>>
    %1368 = vector.broadcast %1367 : f32 to vector<16x16xf32>
    %1369 = arith.mulf %1368, %1095 : vector<16x16xf32>
    %c3_860 = arith.constant 3 : index
    %c0_861 = arith.constant 0 : index
    %1370 = memref.load %arg6[%c3_860, %c0_861] : memref<4x4xf32, #tpu.memory_space<smem>>
    %1371 = vector.broadcast %1370 : f32 to vector<16x16xf32>
    %1372 = arith.mulf %1371, %1103 : vector<16x16xf32>
    %c3_862 = arith.constant 3 : index
    %c1_863 = arith.constant 1 : index
    %1373 = memref.load %arg6[%c3_862, %c1_863] : memref<4x4xf32, #tpu.memory_space<smem>>
    %1374 = vector.broadcast %1373 : f32 to vector<16x16xf32>
    %1375 = arith.mulf %1374, %1097 : vector<16x16xf32>
    %1376 = arith.addf %1369, %1375 : vector<16x16xf32>
    %c3_864 = arith.constant 3 : index
    %c1_865 = arith.constant 1 : index
    %1377 = memref.load %arg6[%c3_864, %c1_865] : memref<4x4xf32, #tpu.memory_space<smem>>
    %1378 = vector.broadcast %1377 : f32 to vector<16x16xf32>
    %1379 = arith.mulf %1378, %1105 : vector<16x16xf32>
    %1380 = arith.addf %1372, %1379 : vector<16x16xf32>
    %c3_866 = arith.constant 3 : index
    %c2_867 = arith.constant 2 : index
    %1381 = memref.load %arg6[%c3_866, %c2_867] : memref<4x4xf32, #tpu.memory_space<smem>>
    %1382 = vector.broadcast %1381 : f32 to vector<16x16xf32>
    %1383 = arith.mulf %1382, %1099 : vector<16x16xf32>
    %1384 = arith.addf %1376, %1383 : vector<16x16xf32>
    %c3_868 = arith.constant 3 : index
    %c2_869 = arith.constant 2 : index
    %1385 = memref.load %arg6[%c3_868, %c2_869] : memref<4x4xf32, #tpu.memory_space<smem>>
    %1386 = vector.broadcast %1385 : f32 to vector<16x16xf32>
    %1387 = arith.mulf %1386, %1107 : vector<16x16xf32>
    %1388 = arith.addf %1380, %1387 : vector<16x16xf32>
    %c3_870 = arith.constant 3 : index
    %c3_871 = arith.constant 3 : index
    %1389 = memref.load %arg6[%c3_870, %c3_871] : memref<4x4xf32, #tpu.memory_space<smem>>
    %1390 = vector.broadcast %1389 : f32 to vector<16x16xf32>
    %1391 = arith.mulf %1390, %1101 : vector<16x16xf32>
    %1392 = arith.addf %1384, %1391 : vector<16x16xf32>
    %c3_872 = arith.constant 3 : index
    %c3_873 = arith.constant 3 : index
    %1393 = memref.load %arg6[%c3_872, %c3_873] : memref<4x4xf32, #tpu.memory_space<smem>>
    %1394 = vector.broadcast %1393 : f32 to vector<16x16xf32>
    %1395 = arith.mulf %1394, %1109 : vector<16x16xf32>
    %1396 = arith.addf %1388, %1395 : vector<16x16xf32>
    %1397 = arith.maximumf %1392, %1396 : vector<16x16xf32>
    %cst_874 = arith.constant dense<0.000000e+00> : vector<16x16xf32>
    %1398 = tpu.matmul %0, %1397, %cst_874 {dimension_numbers = #tpu.dot_dimension_numbers<[1], [0], [0], [1], [0, 0, 1, 1], [], []>} : vector<16x16xf32>, vector<16x16xf32>, vector<16x16xf32> -> vector<16x16xf32>
    %1399 = vector.extract_strided_slice %1398 {offsets = [0, 0], sizes = [8, 16], strides = [1, 1]} : vector<16x16xf32> to vector<8x16xf32>
    %1400 = vector.extract_strided_slice %1398 {offsets = [8, 0], sizes = [8, 16], strides = [1, 1]} : vector<16x16xf32> to vector<8x16xf32>
    %1401 = arith.maximumf %1399, %1400 : vector<8x16xf32>
    %cst_875 = arith.constant dense<0.000000e+00> : vector<8x16xf32>
    %1402 = tpu.matmul %1401, %1, %cst_875 {dimension_numbers = #tpu.dot_dimension_numbers<[1], [0], [0], [1], [0, 0, 1, 1], [], []>} : vector<8x16xf32>, vector<16x16xf32>, vector<8x16xf32> -> vector<8x16xf32>
    %1403 = vector.extract_strided_slice %1402 {offsets = [0, 0], sizes = [8, 8], strides = [1, 1]} : vector<8x16xf32> to vector<8x8xf32>
    %1404 = vector.extract_strided_slice %1402 {offsets = [0, 8], sizes = [8, 8], strides = [1, 1]} : vector<8x16xf32> to vector<8x8xf32>
    %1405 = arith.maximumf %1403, %1404 : vector<8x8xf32>
    %c3_876 = arith.constant 3 : index
    %c0_877 = arith.constant 0 : index
    %1406 = memref.load %arg7[%c3_876, %c0_877] : memref<4x8xf32, #tpu.memory_space<smem>>
    %1407 = vector.broadcast %1406 : f32 to vector<8x8xf32>
    %1408 = arith.mulf %1407, %1111 : vector<8x8xf32>
    %c3_878 = arith.constant 3 : index
    %c1_879 = arith.constant 1 : index
    %1409 = memref.load %arg7[%c3_878, %c1_879] : memref<4x8xf32, #tpu.memory_space<smem>>
    %1410 = vector.broadcast %1409 : f32 to vector<8x8xf32>
    %1411 = arith.mulf %1410, %1113 : vector<8x8xf32>
    %1412 = arith.addf %1408, %1411 : vector<8x8xf32>
    %c3_880 = arith.constant 3 : index
    %c2_881 = arith.constant 2 : index
    %1413 = memref.load %arg7[%c3_880, %c2_881] : memref<4x8xf32, #tpu.memory_space<smem>>
    %1414 = vector.broadcast %1413 : f32 to vector<8x8xf32>
    %1415 = arith.mulf %1414, %1115 : vector<8x8xf32>
    %1416 = arith.addf %1412, %1415 : vector<8x8xf32>
    %c3_882 = arith.constant 3 : index
    %c3_883 = arith.constant 3 : index
    %1417 = memref.load %arg7[%c3_882, %c3_883] : memref<4x8xf32, #tpu.memory_space<smem>>
    %1418 = vector.broadcast %1417 : f32 to vector<8x8xf32>
    %1419 = arith.mulf %1418, %1117 : vector<8x8xf32>
    %1420 = arith.addf %1416, %1419 : vector<8x8xf32>
    %c3_884 = arith.constant 3 : index
    %c4_885 = arith.constant 4 : index
    %1421 = memref.load %arg7[%c3_884, %c4_885] : memref<4x8xf32, #tpu.memory_space<smem>>
    %1422 = vector.broadcast %1421 : f32 to vector<8x8xf32>
    %1423 = arith.mulf %1422, %1119 : vector<8x8xf32>
    %1424 = arith.addf %1420, %1423 : vector<8x8xf32>
    %c3_886 = arith.constant 3 : index
    %c5_887 = arith.constant 5 : index
    %1425 = memref.load %arg7[%c3_886, %c5_887] : memref<4x8xf32, #tpu.memory_space<smem>>
    %1426 = vector.broadcast %1425 : f32 to vector<8x8xf32>
    %1427 = arith.mulf %1426, %1121 : vector<8x8xf32>
    %1428 = arith.addf %1424, %1427 : vector<8x8xf32>
    %c3_888 = arith.constant 3 : index
    %c6_889 = arith.constant 6 : index
    %1429 = memref.load %arg7[%c3_888, %c6_889] : memref<4x8xf32, #tpu.memory_space<smem>>
    %1430 = vector.broadcast %1429 : f32 to vector<8x8xf32>
    %1431 = arith.mulf %1430, %1123 : vector<8x8xf32>
    %1432 = arith.addf %1428, %1431 : vector<8x8xf32>
    %c3_890 = arith.constant 3 : index
    %c7_891 = arith.constant 7 : index
    %1433 = memref.load %arg7[%c3_890, %c7_891] : memref<4x8xf32, #tpu.memory_space<smem>>
    %1434 = vector.broadcast %1433 : f32 to vector<8x8xf32>
    %1435 = arith.mulf %1434, %1125 : vector<8x8xf32>
    %1436 = arith.addf %1432, %1435 : vector<8x8xf32>
    %1437 = arith.addf %1405, %1436 : vector<8x8xf32>
    %c1_892 = arith.constant 1 : index
    %c3_893 = arith.constant 3 : index
    %1438 = memref.load %arg8[%c1_892, %c3_893] : memref<3x4xf32, #tpu.memory_space<smem>>
    %1439 = vector.broadcast %1438 : f32 to vector<8x8xf32>
    %1440 = arith.addf %1437, %1439 : vector<8x8xf32>
    %cst_894 = arith.constant 0.000000e+00 : f32
    %1441 = vector.broadcast %cst_894 : f32 to vector<8x8xf32>
    %1442 = arith.maximumf %1440, %1441 : vector<8x8xf32>
    %c0_895 = arith.constant 0 : index
    %c3_896 = arith.constant 3 : index
    %1443 = memref.load %arg8[%c0_895, %c3_896] : memref<3x4xf32, #tpu.memory_space<smem>>
    %1444 = vector.broadcast %1443 : f32 to vector<8x8xf32>
    %1445 = arith.mulf %1444, %1442 : vector<8x8xf32>
    %1446 = arith.addf %1366, %1445 : vector<8x8xf32>
    %c2_897 = arith.constant 2 : index
    %c0_898 = arith.constant 0 : index
    %1447 = memref.load %arg8[%c2_897, %c0_898] : memref<3x4xf32, #tpu.memory_space<smem>>
    %1448 = vector.broadcast %1447 : f32 to vector<8x8xf32>
    %1449 = arith.addf %1446, %1448 : vector<8x8xf32>
    %1450 = arith.negf %1449 : vector<8x8xf32>
    %1451 = math.exp %1450 : vector<8x8xf32>
    %cst_899 = arith.constant 1.000000e+00 : f32
    %1452 = vector.broadcast %cst_899 : f32 to vector<8x8xf32>
    %1453 = arith.addf %1452, %1451 : vector<8x8xf32>
    %1454 = arith.divf %1452, %1453 : vector<8x8xf32>
    %c3_900 = arith.constant 3 : index
    %c0_901 = arith.constant 0 : index
    %c0_902 = arith.constant 0 : index
    %1455 = vector.load %arg9[%c3_900, %c0_901, %c0_902] : memref<4x8x8xf32, #tpu.memory_space<vmem>>, vector<1x8x8xf32>
    %1456 = vector.shape_cast %1455 : vector<1x8x8xf32> to vector<8x8xf32>
    %1457 = vector.shape_cast %1454 : vector<8x8xf32> to vector<1x8x8xf32>
    tpu.vector_store %arg9[%c3_900, %c0_901, %c0_902], %1457 {strides = array<i32>} : memref<4x8x8xf32, #tpu.memory_space<vmem>>, vector<1x8x8xf32>,
    return
  }
  func.func @transform_0(%arg0: i32, %arg1: i32) -> (i32, i32, i32, i32) {
    %c0_i32 = arith.constant 0 : i32
    %c0_i32_0 = arith.constant 0 : i32
    %c0_i32_1 = arith.constant 0 : i32
    return %arg0, %arg1, %c0_i32, %c0_i32_0 : i32, i32, i32, i32
  }
  func.func @transform_1(%arg0: i32, %arg1: i32) -> (i32, i32, i32, i32) {
    %c0_i32 = arith.constant 0 : i32
    %c0_i32_0 = arith.constant 0 : i32
    %c0_i32_1 = arith.constant 0 : i32
    return %arg0, %arg1, %c0_i32, %c0_i32_0 : i32, i32, i32, i32
  }
  func.func @transform_2(%arg0: i32, %arg1: i32) -> (i32, i32) {
    %c0_i32 = arith.constant 0 : i32
    %c0_i32_0 = arith.constant 0 : i32
    %c0_i32_1 = arith.constant 0 : i32
    return %c0_i32, %c0_i32_0 : i32, i32
  }
  func.func @transform_3(%arg0: i32, %arg1: i32) -> (i32, i32) {
    %c0_i32 = arith.constant 0 : i32
    %c0_i32_0 = arith.constant 0 : i32
    %c0_i32_1 = arith.constant 0 : i32
    return %c0_i32, %c0_i32_0 : i32, i32
  }
  func.func @transform_4(%arg0: i32, %arg1: i32) -> (i32, i32) {
    %c0_i32 = arith.constant 0 : i32
    %c0_i32_0 = arith.constant 0 : i32
    %c0_i32_1 = arith.constant 0 : i32
    return %c0_i32, %c0_i32_0 : i32, i32
  }
  func.func @transform_5(%arg0: i32, %arg1: i32) -> (i32, i32) {
    %c0_i32 = arith.constant 0 : i32
    %c0_i32_0 = arith.constant 0 : i32
    %c0_i32_1 = arith.constant 0 : i32
    return %c0_i32, %c0_i32_0 : i32, i32
  }
  func.func @transform_6(%arg0: i32, %arg1: i32) -> (i32, i32) {
    %c0_i32 = arith.constant 0 : i32
    %c0_i32_0 = arith.constant 0 : i32
    %c0_i32_1 = arith.constant 0 : i32
    return %c0_i32, %c0_i32_0 : i32, i32
  }
  func.func @transform_7(%arg0: i32, %arg1: i32) -> (i32, i32, i32) {
    %c2_i32 = arith.constant 2 : i32
    %0 = arith.muli %arg0, %c2_i32 : i32
    %1 = arith.addi %0, %arg1 : i32
    %c0_i32 = arith.constant 0 : i32
    %c0_i32_0 = arith.constant 0 : i32
    %c0_i32_1 = arith.constant 0 : i32
    return %1, %c0_i32, %c0_i32_0 : i32, i32, i32
  }
}

module attributes {stable_mosaic.version = 11 : i64} {
  func.func @_apply_kernel(%arg0: i32, %arg1: i32, %arg2: memref<8x8x8xf32, #tpu.memory_space<vmem>>, %arg3: memref<4x8x16x16xf32, #tpu.memory_space<vmem>>, %arg4: memref<8x16xf32, #tpu.memory_space<vmem>>, %arg5: memref<16x8xf32, #tpu.memory_space<vmem>>, %arg6: memref<4x8x16x16xf32, #tpu.memory_space<vmem>>) attributes {dimension_semantics = [#tpu.dimension_semantics<parallel>, #tpu.dimension_semantics<parallel>], iteration_bounds = array<i64: 2, 2>, scalar_prefetch = 0 : i64, scratch_operands = 0 : i64, tpu.core_type = #tpu.core_type<tc>, window_params = [{transform_indices = @transform_0, window_bounds = array<i64: 8, 8, 8>}, {transform_indices = @transform_1, window_bounds = array<i64: 4, 8, 16, 16>}, {pipeline_mode = #tpu.pipeline_mode<synchronous>, transform_indices = @transform_2, window_bounds = array<i64: 8, 16>}, {pipeline_mode = #tpu.pipeline_mode<synchronous>, transform_indices = @transform_3, window_bounds = array<i64: 16, 8>}, {transform_indices = @transform_4, window_bounds = array<i64: 4, 8, 16, 16>}]} {
    %c4_i32 = arith.constant 4 : i32
    %0 = arith.muli %arg1, %c4_i32 : i32
    %c0 = arith.constant 0 : index
    %c0_0 = arith.constant 0 : index
    %1 = vector.load %arg4[%c0, %c0_0] : memref<8x16xf32, #tpu.memory_space<vmem>>, vector<8x16xf32>
    %c0_1 = arith.constant 0 : index
    %c0_2 = arith.constant 0 : index
    %2 = vector.load %arg5[%c0_1, %c0_2] : memref<16x8xf32, #tpu.memory_space<vmem>>, vector<16x8xf32>
    %c0_i32 = arith.constant 0 : i32
    %3 = arith.addi %0, %c0_i32 : i32
    %c1_i32 = arith.constant 1 : i32
    %4 = arith.subi %3, %c1_i32 : i32
    %c0_i32_3 = arith.constant 0 : i32
    %5 = arith.maxsi %4, %c0_i32_3 : i32
    %6 = arith.index_cast %5 : i32 to index
    %c0_4 = arith.constant 0 : index
    %c0_5 = arith.constant 0 : index
    %7 = vector.load %arg2[%6, %c0_4, %c0_5] : memref<8x8x8xf32, #tpu.memory_space<vmem>>, vector<1x8x8xf32>
    %8 = vector.shape_cast %7 : vector<1x8x8xf32> to vector<8x8xf32>
    %9 = arith.index_cast %3 : i32 to index
    %c0_6 = arith.constant 0 : index
    %c0_7 = arith.constant 0 : index
    %10 = vector.load %arg2[%9, %c0_6, %c0_7] : memref<8x8x8xf32, #tpu.memory_space<vmem>>, vector<1x8x8xf32>
    %11 = vector.shape_cast %10 : vector<1x8x8xf32> to vector<8x8xf32>
    %c1_i32_8 = arith.constant 1 : i32
    %12 = arith.addi %3, %c1_i32_8 : i32
    %c7_i32 = arith.constant 7 : i32
    %13 = arith.minsi %12, %c7_i32 : i32
    %14 = arith.index_cast %13 : i32 to index
    %c0_9 = arith.constant 0 : index
    %c0_10 = arith.constant 0 : index
    %15 = vector.load %arg2[%14, %c0_9, %c0_10] : memref<8x8x8xf32, #tpu.memory_space<vmem>>, vector<1x8x8xf32>
    %16 = vector.shape_cast %15 : vector<1x8x8xf32> to vector<8x8xf32>
    %cst = arith.constant 2.500000e-01 : f32
    %17 = vector.broadcast %cst : f32 to vector<8x8xf32>
    %18 = arith.mulf %17, %8 : vector<8x8xf32>
    %cst_11 = arith.constant 7.500000e-01 : f32
    %19 = vector.broadcast %cst_11 : f32 to vector<8x8xf32>
    %20 = arith.mulf %19, %11 : vector<8x8xf32>
    %21 = arith.addf %18, %20 : vector<8x8xf32>
    %cst_12 = arith.constant 7.500000e-01 : f32
    %22 = vector.broadcast %cst_12 : f32 to vector<8x8xf32>
    %23 = arith.mulf %22, %11 : vector<8x8xf32>
    %cst_13 = arith.constant 2.500000e-01 : f32
    %24 = vector.broadcast %cst_13 : f32 to vector<8x8xf32>
    %25 = arith.mulf %24, %16 : vector<8x8xf32>
    %26 = arith.addf %23, %25 : vector<8x8xf32>
    %cst_14 = arith.constant dense<0.000000e+00> : vector<8x16xf32>
    %27 = tpu.matmul %21, %1, %cst_14 {dimension_numbers = #tpu.dot_dimension_numbers<[1], [0], [0], [1], [0, 0, 1, 1], [], []>} : vector<8x8xf32>, vector<8x16xf32>, vector<8x16xf32> -> vector<8x16xf32>
    %cst_15 = arith.constant dense<0.000000e+00> : vector<16x16xf32>
    %28 = tpu.matmul %2, %27, %cst_15 {dimension_numbers = #tpu.dot_dimension_numbers<[1], [0], [0], [1], [0, 0, 1, 1], [], []>} : vector<16x8xf32>, vector<8x16xf32>, vector<16x16xf32> -> vector<16x16xf32>
    %c0_16 = arith.constant 0 : index
    %c0_17 = arith.constant 0 : index
    %c0_18 = arith.constant 0 : index
    %c0_19 = arith.constant 0 : index
    %29 = vector.load %arg3[%c0_16, %c0_17, %c0_18, %c0_19] : memref<4x8x16x16xf32, #tpu.memory_space<vmem>>, vector<4x1x16x16xf32>
    %30 = vector.shape_cast %29 : vector<4x1x16x16xf32> to vector<4x16x16xf32>
    %31 = vector.shape_cast %28 : vector<16x16xf32> to vector<1x16x16xf32>
    %32 = vector.broadcast %31 : vector<1x16x16xf32> to vector<4x16x16xf32>
    %33 = arith.mulf %30, %32 : vector<4x16x16xf32>
    %c0_20 = arith.constant 0 : index
    %c0_21 = arith.constant 0 : index
    %c0_22 = arith.constant 0 : index
    %c0_23 = arith.constant 0 : index
    %34 = vector.load %arg6[%c0_20, %c0_21, %c0_22, %c0_23] : memref<4x8x16x16xf32, #tpu.memory_space<vmem>>, vector<4x1x16x16xf32>
    %35 = vector.shape_cast %34 : vector<4x1x16x16xf32> to vector<4x16x16xf32>
    %36 = vector.shape_cast %33 : vector<4x16x16xf32> to vector<4x1x16x16xf32>
    tpu.vector_store %arg6[%c0_20, %c0_21, %c0_22, %c0_23], %36 {strides = array<i32>} : memref<4x8x16x16xf32, #tpu.memory_space<vmem>>, vector<4x1x16x16xf32>,
    %cst_24 = arith.constant dense<0.000000e+00> : vector<8x16xf32>
    %37 = tpu.matmul %26, %1, %cst_24 {dimension_numbers = #tpu.dot_dimension_numbers<[1], [0], [0], [1], [0, 0, 1, 1], [], []>} : vector<8x8xf32>, vector<8x16xf32>, vector<8x16xf32> -> vector<8x16xf32>
    %cst_25 = arith.constant dense<0.000000e+00> : vector<16x16xf32>
    %38 = tpu.matmul %2, %37, %cst_25 {dimension_numbers = #tpu.dot_dimension_numbers<[1], [0], [0], [1], [0, 0, 1, 1], [], []>} : vector<16x8xf32>, vector<8x16xf32>, vector<16x16xf32> -> vector<16x16xf32>
    %c0_26 = arith.constant 0 : index
    %c1 = arith.constant 1 : index
    %c0_27 = arith.constant 0 : index
    %c0_28 = arith.constant 0 : index
    %39 = vector.load %arg3[%c0_26, %c1, %c0_27, %c0_28] : memref<4x8x16x16xf32, #tpu.memory_space<vmem>>, vector<4x1x16x16xf32>
    %40 = vector.shape_cast %39 : vector<4x1x16x16xf32> to vector<4x16x16xf32>
    %41 = vector.shape_cast %38 : vector<16x16xf32> to vector<1x16x16xf32>
    %42 = vector.broadcast %41 : vector<1x16x16xf32> to vector<4x16x16xf32>
    %43 = arith.mulf %40, %42 : vector<4x16x16xf32>
    %c0_29 = arith.constant 0 : index
    %c1_30 = arith.constant 1 : index
    %c0_31 = arith.constant 0 : index
    %c0_32 = arith.constant 0 : index
    %44 = vector.load %arg6[%c0_29, %c1_30, %c0_31, %c0_32] : memref<4x8x16x16xf32, #tpu.memory_space<vmem>>, vector<4x1x16x16xf32>
    %45 = vector.shape_cast %44 : vector<4x1x16x16xf32> to vector<4x16x16xf32>
    %46 = vector.shape_cast %43 : vector<4x16x16xf32> to vector<4x1x16x16xf32>
    tpu.vector_store %arg6[%c0_29, %c1_30, %c0_31, %c0_32], %46 {strides = array<i32>} : memref<4x8x16x16xf32, #tpu.memory_space<vmem>>, vector<4x1x16x16xf32>,
    %c1_i32_33 = arith.constant 1 : i32
    %47 = arith.addi %0, %c1_i32_33 : i32
    %c1_i32_34 = arith.constant 1 : i32
    %48 = arith.subi %47, %c1_i32_34 : i32
    %c0_i32_35 = arith.constant 0 : i32
    %49 = arith.maxsi %48, %c0_i32_35 : i32
    %50 = arith.index_cast %49 : i32 to index
    %c0_36 = arith.constant 0 : index
    %c0_37 = arith.constant 0 : index
    %51 = vector.load %arg2[%50, %c0_36, %c0_37] : memref<8x8x8xf32, #tpu.memory_space<vmem>>, vector<1x8x8xf32>
    %52 = vector.shape_cast %51 : vector<1x8x8xf32> to vector<8x8xf32>
    %53 = arith.index_cast %47 : i32 to index
    %c0_38 = arith.constant 0 : index
    %c0_39 = arith.constant 0 : index
    %54 = vector.load %arg2[%53, %c0_38, %c0_39] : memref<8x8x8xf32, #tpu.memory_space<vmem>>, vector<1x8x8xf32>
    %55 = vector.shape_cast %54 : vector<1x8x8xf32> to vector<8x8xf32>
    %c1_i32_40 = arith.constant 1 : i32
    %56 = arith.addi %47, %c1_i32_40 : i32
    %c7_i32_41 = arith.constant 7 : i32
    %57 = arith.minsi %56, %c7_i32_41 : i32
    %58 = arith.index_cast %57 : i32 to index
    %c0_42 = arith.constant 0 : index
    %c0_43 = arith.constant 0 : index
    %59 = vector.load %arg2[%58, %c0_42, %c0_43] : memref<8x8x8xf32, #tpu.memory_space<vmem>>, vector<1x8x8xf32>
    %60 = vector.shape_cast %59 : vector<1x8x8xf32> to vector<8x8xf32>
    %cst_44 = arith.constant 2.500000e-01 : f32
    %61 = vector.broadcast %cst_44 : f32 to vector<8x8xf32>
    %62 = arith.mulf %61, %52 : vector<8x8xf32>
    %cst_45 = arith.constant 7.500000e-01 : f32
    %63 = vector.broadcast %cst_45 : f32 to vector<8x8xf32>
    %64 = arith.mulf %63, %55 : vector<8x8xf32>
    %65 = arith.addf %62, %64 : vector<8x8xf32>
    %cst_46 = arith.constant 7.500000e-01 : f32
    %66 = vector.broadcast %cst_46 : f32 to vector<8x8xf32>
    %67 = arith.mulf %66, %55 : vector<8x8xf32>
    %cst_47 = arith.constant 2.500000e-01 : f32
    %68 = vector.broadcast %cst_47 : f32 to vector<8x8xf32>
    %69 = arith.mulf %68, %60 : vector<8x8xf32>
    %70 = arith.addf %67, %69 : vector<8x8xf32>
    %cst_48 = arith.constant dense<0.000000e+00> : vector<8x16xf32>
    %71 = tpu.matmul %65, %1, %cst_48 {dimension_numbers = #tpu.dot_dimension_numbers<[1], [0], [0], [1], [0, 0, 1, 1], [], []>} : vector<8x8xf32>, vector<8x16xf32>, vector<8x16xf32> -> vector<8x16xf32>
    %cst_49 = arith.constant dense<0.000000e+00> : vector<16x16xf32>
    %72 = tpu.matmul %2, %71, %cst_49 {dimension_numbers = #tpu.dot_dimension_numbers<[1], [0], [0], [1], [0, 0, 1, 1], [], []>} : vector<16x8xf32>, vector<8x16xf32>, vector<16x16xf32> -> vector<16x16xf32>
    %c0_50 = arith.constant 0 : index
    %c2 = arith.constant 2 : index
    %c0_51 = arith.constant 0 : index
    %c0_52 = arith.constant 0 : index
    %73 = vector.load %arg3[%c0_50, %c2, %c0_51, %c0_52] : memref<4x8x16x16xf32, #tpu.memory_space<vmem>>, vector<4x1x16x16xf32>
    %74 = vector.shape_cast %73 : vector<4x1x16x16xf32> to vector<4x16x16xf32>
    %75 = vector.shape_cast %72 : vector<16x16xf32> to vector<1x16x16xf32>
    %76 = vector.broadcast %75 : vector<1x16x16xf32> to vector<4x16x16xf32>
    %77 = arith.mulf %74, %76 : vector<4x16x16xf32>
    %c0_53 = arith.constant 0 : index
    %c2_54 = arith.constant 2 : index
    %c0_55 = arith.constant 0 : index
    %c0_56 = arith.constant 0 : index
    %78 = vector.load %arg6[%c0_53, %c2_54, %c0_55, %c0_56] : memref<4x8x16x16xf32, #tpu.memory_space<vmem>>, vector<4x1x16x16xf32>
    %79 = vector.shape_cast %78 : vector<4x1x16x16xf32> to vector<4x16x16xf32>
    %80 = vector.shape_cast %77 : vector<4x16x16xf32> to vector<4x1x16x16xf32>
    tpu.vector_store %arg6[%c0_53, %c2_54, %c0_55, %c0_56], %80 {strides = array<i32>} : memref<4x8x16x16xf32, #tpu.memory_space<vmem>>, vector<4x1x16x16xf32>,
    %cst_57 = arith.constant dense<0.000000e+00> : vector<8x16xf32>
    %81 = tpu.matmul %70, %1, %cst_57 {dimension_numbers = #tpu.dot_dimension_numbers<[1], [0], [0], [1], [0, 0, 1, 1], [], []>} : vector<8x8xf32>, vector<8x16xf32>, vector<8x16xf32> -> vector<8x16xf32>
    %cst_58 = arith.constant dense<0.000000e+00> : vector<16x16xf32>
    %82 = tpu.matmul %2, %81, %cst_58 {dimension_numbers = #tpu.dot_dimension_numbers<[1], [0], [0], [1], [0, 0, 1, 1], [], []>} : vector<16x8xf32>, vector<8x16xf32>, vector<16x16xf32> -> vector<16x16xf32>
    %c0_59 = arith.constant 0 : index
    %c3 = arith.constant 3 : index
    %c0_60 = arith.constant 0 : index
    %c0_61 = arith.constant 0 : index
    %83 = vector.load %arg3[%c0_59, %c3, %c0_60, %c0_61] : memref<4x8x16x16xf32, #tpu.memory_space<vmem>>, vector<4x1x16x16xf32>
    %84 = vector.shape_cast %83 : vector<4x1x16x16xf32> to vector<4x16x16xf32>
    %85 = vector.shape_cast %82 : vector<16x16xf32> to vector<1x16x16xf32>
    %86 = vector.broadcast %85 : vector<1x16x16xf32> to vector<4x16x16xf32>
    %87 = arith.mulf %84, %86 : vector<4x16x16xf32>
    %c0_62 = arith.constant 0 : index
    %c3_63 = arith.constant 3 : index
    %c0_64 = arith.constant 0 : index
    %c0_65 = arith.constant 0 : index
    %88 = vector.load %arg6[%c0_62, %c3_63, %c0_64, %c0_65] : memref<4x8x16x16xf32, #tpu.memory_space<vmem>>, vector<4x1x16x16xf32>
    %89 = vector.shape_cast %88 : vector<4x1x16x16xf32> to vector<4x16x16xf32>
    %90 = vector.shape_cast %87 : vector<4x16x16xf32> to vector<4x1x16x16xf32>
    tpu.vector_store %arg6[%c0_62, %c3_63, %c0_64, %c0_65], %90 {strides = array<i32>} : memref<4x8x16x16xf32, #tpu.memory_space<vmem>>, vector<4x1x16x16xf32>,
    %c2_i32 = arith.constant 2 : i32
    %91 = arith.addi %0, %c2_i32 : i32
    %c1_i32_66 = arith.constant 1 : i32
    %92 = arith.subi %91, %c1_i32_66 : i32
    %c0_i32_67 = arith.constant 0 : i32
    %93 = arith.maxsi %92, %c0_i32_67 : i32
    %94 = arith.index_cast %93 : i32 to index
    %c0_68 = arith.constant 0 : index
    %c0_69 = arith.constant 0 : index
    %95 = vector.load %arg2[%94, %c0_68, %c0_69] : memref<8x8x8xf32, #tpu.memory_space<vmem>>, vector<1x8x8xf32>
    %96 = vector.shape_cast %95 : vector<1x8x8xf32> to vector<8x8xf32>
    %97 = arith.index_cast %91 : i32 to index
    %c0_70 = arith.constant 0 : index
    %c0_71 = arith.constant 0 : index
    %98 = vector.load %arg2[%97, %c0_70, %c0_71] : memref<8x8x8xf32, #tpu.memory_space<vmem>>, vector<1x8x8xf32>
    %99 = vector.shape_cast %98 : vector<1x8x8xf32> to vector<8x8xf32>
    %c1_i32_72 = arith.constant 1 : i32
    %100 = arith.addi %91, %c1_i32_72 : i32
    %c7_i32_73 = arith.constant 7 : i32
    %101 = arith.minsi %100, %c7_i32_73 : i32
    %102 = arith.index_cast %101 : i32 to index
    %c0_74 = arith.constant 0 : index
    %c0_75 = arith.constant 0 : index
    %103 = vector.load %arg2[%102, %c0_74, %c0_75] : memref<8x8x8xf32, #tpu.memory_space<vmem>>, vector<1x8x8xf32>
    %104 = vector.shape_cast %103 : vector<1x8x8xf32> to vector<8x8xf32>
    %cst_76 = arith.constant 2.500000e-01 : f32
    %105 = vector.broadcast %cst_76 : f32 to vector<8x8xf32>
    %106 = arith.mulf %105, %96 : vector<8x8xf32>
    %cst_77 = arith.constant 7.500000e-01 : f32
    %107 = vector.broadcast %cst_77 : f32 to vector<8x8xf32>
    %108 = arith.mulf %107, %99 : vector<8x8xf32>
    %109 = arith.addf %106, %108 : vector<8x8xf32>
    %cst_78 = arith.constant 7.500000e-01 : f32
    %110 = vector.broadcast %cst_78 : f32 to vector<8x8xf32>
    %111 = arith.mulf %110, %99 : vector<8x8xf32>
    %cst_79 = arith.constant 2.500000e-01 : f32
    %112 = vector.broadcast %cst_79 : f32 to vector<8x8xf32>
    %113 = arith.mulf %112, %104 : vector<8x8xf32>
    %114 = arith.addf %111, %113 : vector<8x8xf32>
    %cst_80 = arith.constant dense<0.000000e+00> : vector<8x16xf32>
    %115 = tpu.matmul %109, %1, %cst_80 {dimension_numbers = #tpu.dot_dimension_numbers<[1], [0], [0], [1], [0, 0, 1, 1], [], []>} : vector<8x8xf32>, vector<8x16xf32>, vector<8x16xf32> -> vector<8x16xf32>
    %cst_81 = arith.constant dense<0.000000e+00> : vector<16x16xf32>
    %116 = tpu.matmul %2, %115, %cst_81 {dimension_numbers = #tpu.dot_dimension_numbers<[1], [0], [0], [1], [0, 0, 1, 1], [], []>} : vector<16x8xf32>, vector<8x16xf32>, vector<16x16xf32> -> vector<16x16xf32>
    %c0_82 = arith.constant 0 : index
    %c4 = arith.constant 4 : index
    %c0_83 = arith.constant 0 : index
    %c0_84 = arith.constant 0 : index
    %117 = vector.load %arg3[%c0_82, %c4, %c0_83, %c0_84] : memref<4x8x16x16xf32, #tpu.memory_space<vmem>>, vector<4x1x16x16xf32>
    %118 = vector.shape_cast %117 : vector<4x1x16x16xf32> to vector<4x16x16xf32>
    %119 = vector.shape_cast %116 : vector<16x16xf32> to vector<1x16x16xf32>
    %120 = vector.broadcast %119 : vector<1x16x16xf32> to vector<4x16x16xf32>
    %121 = arith.mulf %118, %120 : vector<4x16x16xf32>
    %c0_85 = arith.constant 0 : index
    %c4_86 = arith.constant 4 : index
    %c0_87 = arith.constant 0 : index
    %c0_88 = arith.constant 0 : index
    %122 = vector.load %arg6[%c0_85, %c4_86, %c0_87, %c0_88] : memref<4x8x16x16xf32, #tpu.memory_space<vmem>>, vector<4x1x16x16xf32>
    %123 = vector.shape_cast %122 : vector<4x1x16x16xf32> to vector<4x16x16xf32>
    %124 = vector.shape_cast %121 : vector<4x16x16xf32> to vector<4x1x16x16xf32>
    tpu.vector_store %arg6[%c0_85, %c4_86, %c0_87, %c0_88], %124 {strides = array<i32>} : memref<4x8x16x16xf32, #tpu.memory_space<vmem>>, vector<4x1x16x16xf32>,
    %cst_89 = arith.constant dense<0.000000e+00> : vector<8x16xf32>
    %125 = tpu.matmul %114, %1, %cst_89 {dimension_numbers = #tpu.dot_dimension_numbers<[1], [0], [0], [1], [0, 0, 1, 1], [], []>} : vector<8x8xf32>, vector<8x16xf32>, vector<8x16xf32> -> vector<8x16xf32>
    %cst_90 = arith.constant dense<0.000000e+00> : vector<16x16xf32>
    %126 = tpu.matmul %2, %125, %cst_90 {dimension_numbers = #tpu.dot_dimension_numbers<[1], [0], [0], [1], [0, 0, 1, 1], [], []>} : vector<16x8xf32>, vector<8x16xf32>, vector<16x16xf32> -> vector<16x16xf32>
    %c0_91 = arith.constant 0 : index
    %c5 = arith.constant 5 : index
    %c0_92 = arith.constant 0 : index
    %c0_93 = arith.constant 0 : index
    %127 = vector.load %arg3[%c0_91, %c5, %c0_92, %c0_93] : memref<4x8x16x16xf32, #tpu.memory_space<vmem>>, vector<4x1x16x16xf32>
    %128 = vector.shape_cast %127 : vector<4x1x16x16xf32> to vector<4x16x16xf32>
    %129 = vector.shape_cast %126 : vector<16x16xf32> to vector<1x16x16xf32>
    %130 = vector.broadcast %129 : vector<1x16x16xf32> to vector<4x16x16xf32>
    %131 = arith.mulf %128, %130 : vector<4x16x16xf32>
    %c0_94 = arith.constant 0 : index
    %c5_95 = arith.constant 5 : index
    %c0_96 = arith.constant 0 : index
    %c0_97 = arith.constant 0 : index
    %132 = vector.load %arg6[%c0_94, %c5_95, %c0_96, %c0_97] : memref<4x8x16x16xf32, #tpu.memory_space<vmem>>, vector<4x1x16x16xf32>
    %133 = vector.shape_cast %132 : vector<4x1x16x16xf32> to vector<4x16x16xf32>
    %134 = vector.shape_cast %131 : vector<4x16x16xf32> to vector<4x1x16x16xf32>
    tpu.vector_store %arg6[%c0_94, %c5_95, %c0_96, %c0_97], %134 {strides = array<i32>} : memref<4x8x16x16xf32, #tpu.memory_space<vmem>>, vector<4x1x16x16xf32>,
    %c3_i32 = arith.constant 3 : i32
    %135 = arith.addi %0, %c3_i32 : i32
    %c1_i32_98 = arith.constant 1 : i32
    %136 = arith.subi %135, %c1_i32_98 : i32
    %c0_i32_99 = arith.constant 0 : i32
    %137 = arith.maxsi %136, %c0_i32_99 : i32
    %138 = arith.index_cast %137 : i32 to index
    %c0_100 = arith.constant 0 : index
    %c0_101 = arith.constant 0 : index
    %139 = vector.load %arg2[%138, %c0_100, %c0_101] : memref<8x8x8xf32, #tpu.memory_space<vmem>>, vector<1x8x8xf32>
    %140 = vector.shape_cast %139 : vector<1x8x8xf32> to vector<8x8xf32>
    %141 = arith.index_cast %135 : i32 to index
    %c0_102 = arith.constant 0 : index
    %c0_103 = arith.constant 0 : index
    %142 = vector.load %arg2[%141, %c0_102, %c0_103] : memref<8x8x8xf32, #tpu.memory_space<vmem>>, vector<1x8x8xf32>
    %143 = vector.shape_cast %142 : vector<1x8x8xf32> to vector<8x8xf32>
    %c1_i32_104 = arith.constant 1 : i32
    %144 = arith.addi %135, %c1_i32_104 : i32
    %c7_i32_105 = arith.constant 7 : i32
    %145 = arith.minsi %144, %c7_i32_105 : i32
    %146 = arith.index_cast %145 : i32 to index
    %c0_106 = arith.constant 0 : index
    %c0_107 = arith.constant 0 : index
    %147 = vector.load %arg2[%146, %c0_106, %c0_107] : memref<8x8x8xf32, #tpu.memory_space<vmem>>, vector<1x8x8xf32>
    %148 = vector.shape_cast %147 : vector<1x8x8xf32> to vector<8x8xf32>
    %cst_108 = arith.constant 2.500000e-01 : f32
    %149 = vector.broadcast %cst_108 : f32 to vector<8x8xf32>
    %150 = arith.mulf %149, %140 : vector<8x8xf32>
    %cst_109 = arith.constant 7.500000e-01 : f32
    %151 = vector.broadcast %cst_109 : f32 to vector<8x8xf32>
    %152 = arith.mulf %151, %143 : vector<8x8xf32>
    %153 = arith.addf %150, %152 : vector<8x8xf32>
    %cst_110 = arith.constant 7.500000e-01 : f32
    %154 = vector.broadcast %cst_110 : f32 to vector<8x8xf32>
    %155 = arith.mulf %154, %143 : vector<8x8xf32>
    %cst_111 = arith.constant 2.500000e-01 : f32
    %156 = vector.broadcast %cst_111 : f32 to vector<8x8xf32>
    %157 = arith.mulf %156, %148 : vector<8x8xf32>
    %158 = arith.addf %155, %157 : vector<8x8xf32>
    %cst_112 = arith.constant dense<0.000000e+00> : vector<8x16xf32>
    %159 = tpu.matmul %153, %1, %cst_112 {dimension_numbers = #tpu.dot_dimension_numbers<[1], [0], [0], [1], [0, 0, 1, 1], [], []>} : vector<8x8xf32>, vector<8x16xf32>, vector<8x16xf32> -> vector<8x16xf32>
    %cst_113 = arith.constant dense<0.000000e+00> : vector<16x16xf32>
    %160 = tpu.matmul %2, %159, %cst_113 {dimension_numbers = #tpu.dot_dimension_numbers<[1], [0], [0], [1], [0, 0, 1, 1], [], []>} : vector<16x8xf32>, vector<8x16xf32>, vector<16x16xf32> -> vector<16x16xf32>
    %c0_114 = arith.constant 0 : index
    %c6 = arith.constant 6 : index
    %c0_115 = arith.constant 0 : index
    %c0_116 = arith.constant 0 : index
    %161 = vector.load %arg3[%c0_114, %c6, %c0_115, %c0_116] : memref<4x8x16x16xf32, #tpu.memory_space<vmem>>, vector<4x1x16x16xf32>
    %162 = vector.shape_cast %161 : vector<4x1x16x16xf32> to vector<4x16x16xf32>
    %163 = vector.shape_cast %160 : vector<16x16xf32> to vector<1x16x16xf32>
    %164 = vector.broadcast %163 : vector<1x16x16xf32> to vector<4x16x16xf32>
    %165 = arith.mulf %162, %164 : vector<4x16x16xf32>
    %c0_117 = arith.constant 0 : index
    %c6_118 = arith.constant 6 : index
    %c0_119 = arith.constant 0 : index
    %c0_120 = arith.constant 0 : index
    %166 = vector.load %arg6[%c0_117, %c6_118, %c0_119, %c0_120] : memref<4x8x16x16xf32, #tpu.memory_space<vmem>>, vector<4x1x16x16xf32>
    %167 = vector.shape_cast %166 : vector<4x1x16x16xf32> to vector<4x16x16xf32>
    %168 = vector.shape_cast %165 : vector<4x16x16xf32> to vector<4x1x16x16xf32>
    tpu.vector_store %arg6[%c0_117, %c6_118, %c0_119, %c0_120], %168 {strides = array<i32>} : memref<4x8x16x16xf32, #tpu.memory_space<vmem>>, vector<4x1x16x16xf32>,
    %cst_121 = arith.constant dense<0.000000e+00> : vector<8x16xf32>
    %169 = tpu.matmul %158, %1, %cst_121 {dimension_numbers = #tpu.dot_dimension_numbers<[1], [0], [0], [1], [0, 0, 1, 1], [], []>} : vector<8x8xf32>, vector<8x16xf32>, vector<8x16xf32> -> vector<8x16xf32>
    %cst_122 = arith.constant dense<0.000000e+00> : vector<16x16xf32>
    %170 = tpu.matmul %2, %169, %cst_122 {dimension_numbers = #tpu.dot_dimension_numbers<[1], [0], [0], [1], [0, 0, 1, 1], [], []>} : vector<16x8xf32>, vector<8x16xf32>, vector<16x16xf32> -> vector<16x16xf32>
    %c0_123 = arith.constant 0 : index
    %c7 = arith.constant 7 : index
    %c0_124 = arith.constant 0 : index
    %c0_125 = arith.constant 0 : index
    %171 = vector.load %arg3[%c0_123, %c7, %c0_124, %c0_125] : memref<4x8x16x16xf32, #tpu.memory_space<vmem>>, vector<4x1x16x16xf32>
    %172 = vector.shape_cast %171 : vector<4x1x16x16xf32> to vector<4x16x16xf32>
    %173 = vector.shape_cast %170 : vector<16x16xf32> to vector<1x16x16xf32>
    %174 = vector.broadcast %173 : vector<1x16x16xf32> to vector<4x16x16xf32>
    %175 = arith.mulf %172, %174 : vector<4x16x16xf32>
    %c0_126 = arith.constant 0 : index
    %c7_127 = arith.constant 7 : index
    %c0_128 = arith.constant 0 : index
    %c0_129 = arith.constant 0 : index
    %176 = vector.load %arg6[%c0_126, %c7_127, %c0_128, %c0_129] : memref<4x8x16x16xf32, #tpu.memory_space<vmem>>, vector<4x1x16x16xf32>
    %177 = vector.shape_cast %176 : vector<4x1x16x16xf32> to vector<4x16x16xf32>
    %178 = vector.shape_cast %175 : vector<4x16x16xf32> to vector<4x1x16x16xf32>
    tpu.vector_store %arg6[%c0_126, %c7_127, %c0_128, %c0_129], %178 {strides = array<i32>} : memref<4x8x16x16xf32, #tpu.memory_space<vmem>>, vector<4x1x16x16xf32>,
    return
  }
  func.func @transform_0(%arg0: i32, %arg1: i32) -> (i32, i32, i32) {
    %c0_i32 = arith.constant 0 : i32
    %c0_i32_0 = arith.constant 0 : i32
    %c0_i32_1 = arith.constant 0 : i32
    return %arg0, %c0_i32, %c0_i32_0 : i32, i32, i32
  }
  func.func @transform_1(%arg0: i32, %arg1: i32) -> (i32, i32, i32, i32) {
    %c0_i32 = arith.constant 0 : i32
    %c0_i32_0 = arith.constant 0 : i32
    %c0_i32_1 = arith.constant 0 : i32
    return %arg0, %arg1, %c0_i32, %c0_i32_0 : i32, i32, i32, i32
  }
  func.func @transform_2(%arg0: i32, %arg1: i32) -> (i32, i32) {
    %c0_i32 = arith.constant 0 : i32
    %c0_i32_0 = arith.constant 0 : i32
    %c0_i32_1 = arith.constant 0 : i32
    return %c0_i32, %c0_i32_0 : i32, i32
  }
  func.func @transform_3(%arg0: i32, %arg1: i32) -> (i32, i32) {
    %c0_i32 = arith.constant 0 : i32
    %c0_i32_0 = arith.constant 0 : i32
    %c0_i32_1 = arith.constant 0 : i32
    return %c0_i32, %c0_i32_0 : i32, i32
  }
  func.func @transform_4(%arg0: i32, %arg1: i32) -> (i32, i32, i32, i32) {
    %c0_i32 = arith.constant 0 : i32
    %c0_i32_0 = arith.constant 0 : i32
    %c0_i32_1 = arith.constant 0 : i32
    return %arg0, %arg1, %c0_i32, %c0_i32_0 : i32, i32, i32, i32
  }
}

</mosaic_0001>

<bundles_post_ra>
// kernel: attention_gate.3
= control target key start
LH: loop header
LB: loop body
LE: loop exit
PB: predicated region body
PF: predicated region fallthrough
CT: control target
= control target key end

     0   :  { %9 = vsyncpa [#allocation4], 0  ;;  %s3255_s0 = inlined_call_operand.vmem [shape: f32[16,8,8], index: 0, kind: input, shape index: {}]   ;;  %s3256_s1 = inlined_call_operand.vmem [shape: f32[8,16,16,16], index: 1, kind: input, shape index: {}]   ;;  %s3257_s2 = inlined_call_operand.vmem [shape: f32[8,16], index: 2, kind: input, shape index: {}]   ;;  %s3258_s3 = inlined_call_operand.vmem [shape: f32[16,8], index: 3, kind: input, shape index: {}]   ;;  %s3259_s4 = inlined_call_operand.hbm [shape: f32[8,16,16,16], index: 4, kind: output, shape index: {}]  }
   0x1   :  { %11 = vsyncpa [#allocation4 + $0x1], 0  ;;  %s2676_s15 = smov 0   ;;  %s2678_s16 = smov 0  }
   0x2   :  { %s2680_s17 = smov 0   ;;  %s2682_s18 = smov 0  }
   0x3   :  { %s2684_s19 = smov 0   ;;  %s2686_s20 = smov 0  }
   0x4   :  { %s2688_s21 = smov 0   ;;  %s2690_s22 = smov 0  }
   0x5 LB: > { %s2182_s23 = sadd.s32 4294967295, %s2640_s22   ;;  %s2183_s24 = sadd.s32 4294967294, %s2640_s22   ;;  %s2640_s22 = sphi %s2690_s22, %s17_s22   ;;  %s2636_s21 = sphi %s2688_s21, %s3269_s21   ;;  %s2632_s20 = sphi %s2686_s20, %s3268_s20   ;;  %s2628_s19 = sphi %s2684_s19, %s3267_s19   ;;  %s2624_s18 = sphi %s2682_s18, %s3266_s18   ;;  %s2620_s17 = sphi %s2680_s17, %s3265_s17   ;;  %s2616_s16 = sphi %s2678_s16, %s3264_s16   ;;  %s2612_s15 = sphi %s2676_s15, %s3263_s15  }
   0x6   : > { %s26_s25 = sadd.s32 1, %s2632_s20  ;;  %s29_s26 = sadd.s32 1, %s2636_s21 }
   0x7   : > { %p27_p0 = scmp.ge.s32.totalorder %s26_s25, 2  ;;  %p71_p1 = scmp.ne.s32.totalorder %s2620_s17, %s2616_s16 }
   0x8   : > { %p72_p2 = scmp.eq.s32.totalorder %s2640_s22, 0  ;;  %p145_p5 = scmp.eq.s32.totalorder %s2182_s23, 3 }
   0x9   : > { %s3271_s25 = smov (%p27_p0, %s26_s25), 0  ;;  %s3273_s26 = smov (!%p27_p0, %s29_s26), %s2636_s21 }
   0xa   : > { %s60_s27 = ssub.s32 %s2632_s20, %s3271_s25  ;;  %p2728_p3 = por %p72_p2, %p71_p1 }
   0xb   : > { %p31_p4 = scmp.ge.s32.totalorder %s3273_s26, 2  ;;  %p150_p6 = scmp.ne.s32.totalorder %s2616_s16, %s2612_s15 }
   0xc   : > { %p151_p7 = scmp.eq.s32.totalorder %s2183_s24, 3  ;;  %p2736_p8 = por %p145_p5, %p71_p1 }
   0xd   : > { %s3275_s26 = smov (%p31_p4, %s3273_s26), 0  ;;  %s64_s7 = sadd.s32 1, %s2620_s17 }
   0xe   : > { %p2740_p9 = por %p151_p7, %p150_p6  ;;  %s59_s5 = ssub.s32 %s2636_s21, %s3275_s26 }
   0xf   : > { %s61_s6 = sor.u32 %s60_s27, %s59_s5  ;;  %p2185_p11 = scmp.ge.s32.totalorder %s2640_s22, 4 }
  0x10   : > { %p62_p10 = scmp.eq.s32.totalorder %s61_s6, 0 }
  0x11   : > { %173 = sbr.rel (%p2185_p11) target bundleno = 63 (0x3f), region = 24 }
  0x12   : > { %s2748_s8 = scalar_select %p62_p10, %s2620_s17, %s64_s7  }
  0x18   : > { %185 = sbr.rel (!%p2728_p3) target bundleno = 63 (0x3f), region = 32  ;;  %s187_s9 = sand.u32 (%p2728_p3), 1, %s2620_s17  }
  0x19   : > { %s2360_s10 = sshll.u32 (%p2728_p3), %s2632_s20, 4  ;;  %s2186_s11 = sshll.u32 (%p2728_p3), %s187_s9, 9 }
  0x1a   : > { %s2361_s12 = sshll.u32 (%p2728_p3), %s2636_s21, 7  ;;  %s2764_s28 = scalar_lea.vmem (%p2728_p3), [#allocation2], %s2186_s11 }
  0x1b   : > { %s194_s13 = sadd.s32 (%p2728_p3), %s2361_s12, %s2360_s10 }
  0x1c   : > { %s2191_s14 = sshll.u32 (%p2728_p3), %s194_s13, 3 }
  0x1d   : > { %s2759_s27 = scalar_lea.vmem (%p2728_p3), %s3256_s1, %s2191_s14 }
  0x1e   : > { %v350_v0 = vld [vmem:[%s2759_s27] sm:$0xff] (%p2728_p3)  ;;  %v352_v1 = vld [vmem:[%s2759_s27 + $0x8] sm:$0xff] (%p2728_p3)  ;;  %v354_v2 = vld [vmem:[%s2759_s27 + $0x10] sm:$0xff] (%p2728_p3) }
  0x1f   : > { %351 = vst [vmem:[%s2764_s28] sm:$0xff] %v350_v0  ;;  %353 = vst [vmem:[%s2764_s28 + $0x8] sm:$0xff] %v352_v1  ;;  %v356_v3 = vld [vmem:[%s2759_s27 + $0x18] sm:$0xff]  ;;  %v358_v4 = vld [vmem:[%s2759_s27 + $0x20] sm:$0xff] }
  0x20   : > { %355 = vst [vmem:[%s2764_s28 + $0x10] sm:$0xff] %v354_v2  ;;  %v360_v5 = vld [vmem:[%s2759_s27 + $0x28] sm:$0xff]  ;;  %357 = vst [vmem:[%s2764_s28 + $0x18] sm:$0xff] %v356_v3  ;;  %v362_v6 = vld [vmem:[%s2759_s27 + $0x30] sm:$0xff] }
  0x21   : > { %359 = vst [vmem:[%s2764_s28 + $0x20] sm:$0xff] %v358_v4  ;;  %361 = vst [vmem:[%s2764_s28 + $0x28] sm:$0xff] %v360_v5  ;;  %v364_v7 = vld [vmem:[%s2759_s27 + $0x38] sm:$0xff]  ;;  %v366_v8 = vld [vmem:[%s2759_s27 + $0x40] sm:$0xff] }
  0x22   : > { %363 = vst [vmem:[%s2764_s28 + $0x30] sm:$0xff] %v362_v6  ;;  %365 = vst [vmem:[%s2764_s28 + $0x38] sm:$0xff] %v364_v7  ;;  %v368_v9 = vld [vmem:[%s2759_s27 + $0x48] sm:$0xff]  ;;  %v370_v10 = vld [vmem:[%s2759_s27 + $0x50] sm:$0xff] }
  0x23   : > { %367 = vst [vmem:[%s2764_s28 + $0x40] sm:$0xff] %v366_v8  ;;  %v372_v11 = vld [vmem:[%s2759_s27 + $0x58] sm:$0xff]  ;;  %369 = vst [vmem:[%s2764_s28 + $0x48] sm:$0xff] %v368_v9  ;;  %v374_v12 = vld [vmem:[%s2759_s27 + $0x60] sm:$0xff] }
  0x24   : > { %371 = vst [vmem:[%s2764_s28 + $0x50] sm:$0xff] %v370_v10  ;;  %373 = vst [vmem:[%s2764_s28 + $0x58] sm:$0xff] %v372_v11  ;;  %v376_v13 = vld [vmem:[%s2759_s27 + $0x68] sm:$0xff]  ;;  %v378_v14 = vld [vmem:[%s2759_s27 + $0x70] sm:$0xff] }
  0x25   : > { %375 = vst [vmem:[%s2764_s28 + $0x60] sm:$0xff] %v374_v12  ;;  %377 = vst [vmem:[%s2764_s28 + $0x68] sm:$0xff] %v376_v13  ;;  %v380_v15 = vld [vmem:[%s2759_s27 + $0x78] sm:$0xff]  ;;  %v382_v16 = vld [vmem:[%s2759_s27 + $0x100] sm:$0xff] }
  0x26   : > { %379 = vst [vmem:[%s2764_s28 + $0x70] sm:$0xff] %v378_v14  ;;  %v384_v17 = vld [vmem:[%s2759_s27 + $0x108] sm:$0xff]  ;;  %381 = vst [vmem:[%s2764_s28 + $0x78] sm:$0xff] %v380_v15  ;;  %v386_v18 = vld [vmem:[%s2759_s27 + $0x110] sm:$0xff] }
  0x27   : > { %383 = vst [vmem:[%s2764_s28 + $0x80] sm:$0xff] %v382_v16  ;;  %385 = vst [vmem:[%s2764_s28 + $0x88] sm:$0xff] %v384_v17  ;;  %v388_v19 = vld [vmem:[%s2759_s27 + $0x118] sm:$0xff]  ;;  %v390_v20 = vld [vmem:[%s2759_s27 + $0x120] sm:$0xff] }
  0x28   : > { %387 = vst [vmem:[%s2764_s28 + $0x90] sm:$0xff] %v386_v18  ;;  %389 = vst [vmem:[%s2764_s28 + $0x98] sm:$0xff] %v388_v19  ;;  %v392_v21 = vld [vmem:[%s2759_s27 + $0x128] sm:$0xff]  ;;  %v394_v22 = vld [vmem:[%s2759_s27 + $0x130] sm:$0xff] }
  0x29   : > { %391 = vst [vmem:[%s2764_s28 + $0xa0] sm:$0xff] %v390_v20  ;;  %v396_v23 = vld [vmem:[%s2759_s27 + $0x138] sm:$0xff]  ;;  %393 = vst [vmem:[%s2764_s28 + $0xa8] sm:$0xff] %v392_v21  ;;  %v398_v24 = vld [vmem:[%s2759_s27 + $0x140] sm:$0xff] }
  0x2a   : > { %395 = vst [vmem:[%s2764_s28 + $0xb0] sm:$0xff] %v394_v22  ;;  %397 = vst [vmem:[%s2764_s28 + $0xb8] sm:$0xff] %v396_v23  ;;  %v400_v25 = vld [vmem:[%s2759_s27 + $0x148] sm:$0xff]  ;;  %v402_v26 = vld [vmem:[%s2759_s27 + $0x150] sm:$0xff] }
  0x2b   : > { %399 = vst [vmem:[%s2764_s28 + $0xc0] sm:$0xff] %v398_v24  ;;  %401 = vst [vmem:[%s2764_s28 + $0xc8] sm:$0xff] %v400_v25  ;;  %v404_v27 = vld [vmem:[%s2759_s27 + $0x158] sm:$0xff]  ;;  %v406_v28 = vld [vmem:[%s2759_s27 + $0x160] sm:$0xff] }
  0x2c   : > { %403 = vst [vmem:[%s2764_s28 + $0xd0] sm:$0xff] %v402_v26  ;;  %v408_v29 = vld [vmem:[%s2759_s27 + $0x168] sm:$0xff]  ;;  %405 = vst [vmem:[%s2764_s28 + $0xd8] sm:$0xff] %v404_v27  ;;  %v410_v30 = vld [vmem:[%s2759_s27 + $0x170] sm:$0xff] }
  0x2d   : > { %407 = vst [vmem:[%s2764_s28 + $0xe0] sm:$0xff] %v406_v28  ;;  %409 = vst [vmem:[%s2764_s28 + $0xe8] sm:$0xff] %v408_v29  ;;  %v412_v31 = vld [vmem:[%s2759_s27 + $0x178] sm:$0xff]  ;;  %v414_v32 = vld [vmem:[%s2759_s27 + $0x200] sm:$0xff] }
  0x2e   : > { %411 = vst [vmem:[%s2764_s28 + $0xf0] sm:$0xff] %v410_v30  ;;  %413 = vst [vmem:[%s2764_s28 + $0xf8] sm:$0xff] %v412_v31  ;;  %v416_v33 = vld [vmem:[%s2759_s27 + $0x208] sm:$0xff]  ;;  %v418_v34 = vld [vmem:[%s2759_s27 + $0x210] sm:$0xff] }
  0x2f   : > { %415 = vst [vmem:[%s2764_s28 + $0x100] sm:$0xff] %v414_v32  ;;  %v420_v35 = vld [vmem:[%s2759_s27 + $0x218] sm:$0xff]  ;;  %417 = vst [vmem:[%s2764_s28 + $0x108] sm:$0xff] %v416_v33  ;;  %v422_v36 = vld [vmem:[%s2759_s27 + $0x220] sm:$0xff] }
  0x30   : > { %419 = vst [vmem:[%s2764_s28 + $0x110] sm:$0xff] %v418_v34  ;;  %421 = vst [vmem:[%s2764_s28 + $0x118] sm:$0xff] %v420_v35  ;;  %v424_v37 = vld [vmem:[%s2759_s27 + $0x228] sm:$0xff]  ;;  %v426_v38 = vld [vmem:[%s2759_s27 + $0x230] sm:$0xff] }
  0x31   : > { %423 = vst [vmem:[%s2764_s28 + $0x120] sm:$0xff] %v422_v36  ;;  %425 = vst [vmem:[%s2764_s28 + $0x128] sm:$0xff] %v424_v37  ;;  %v428_v39 = vld [vmem:[%s2759_s27 + $0x238] sm:$0xff]  ;;  %v430_v40 = vld [vmem:[%s2759_s27 + $0x240] sm:$0xff] }
  0x32   : > { %427 = vst [vmem:[%s2764_s28 + $0x130] sm:$0xff] %v426_v38  ;;  %v432_v41 = vld [vmem:[%s2759_s27 + $0x248] sm:$0xff]  ;;  %429 = vst [vmem:[%s2764_s28 + $0x138] sm:$0xff] %v428_v39  ;;  %v434_v42 = vld [vmem:[%s2759_s27 + $0x250] sm:$0xff] }
  0x33   : > { %431 = vst [vmem:[%s2764_s28 + $0x140] sm:$0xff] %v430_v40  ;;  %433 = vst [vmem:[%s2764_s28 + $0x148] sm:$0xff] %v432_v41  ;;  %v436_v43 = vld [vmem:[%s2759_s27 + $0x258] sm:$0xff]  ;;  %v438_v44 = vld [vmem:[%s2759_s27 + $0x260] sm:$0xff] }
  0x34   : > { %435 = vst [vmem:[%s2764_s28 + $0x150] sm:$0xff] %v434_v42  ;;  %437 = vst [vmem:[%s2764_s28 + $0x158] sm:$0xff] %v436_v43  ;;  %v440_v45 = vld [vmem:[%s2759_s27 + $0x268] sm:$0xff]  ;;  %v442_v46 = vld [vmem:[%s2759_s27 + $0x270] sm:$0xff] }
  0x35   : > { %439 = vst [vmem:[%s2764_s28 + $0x160] sm:$0xff] %v438_v44  ;;  %v444_v47 = vld [vmem:[%s2759_s27 + $0x278] sm:$0xff]  ;;  %441 = vst [vmem:[%s2764_s28 + $0x168] sm:$0xff] %v440_v45  ;;  %v446_v48 = vld [vmem:[%s2759_s27 + $0x300] sm:$0xff] }
  0x36   : > { %443 = vst [vmem:[%s2764_s28 + $0x170] sm:$0xff] %v442_v46  ;;  %445 = vst [vmem:[%s2764_s28 + $0x178] sm:$0xff] %v444_v47  ;;  %v448_v49 = vld [vmem:[%s2759_s27 + $0x308] sm:$0xff]  ;;  %v450_v50 = vld [vmem:[%s2759_s27 + $0x310] sm:$0xff] }
  0x37   : > { %447 = vst [vmem:[%s2764_s28 + $0x180] sm:$0xff] %v446_v48  ;;  %449 = vst [vmem:[%s2764_s28 + $0x188] sm:$0xff] %v448_v49  ;;  %v452_v51 = vld [vmem:[%s2759_s27 + $0x318] sm:$0xff]  ;;  %v454_v52 = vld [vmem:[%s2759_s27 + $0x320] sm:$0xff] }
  0x38   : > { %451 = vst [vmem:[%s2764_s28 + $0x190] sm:$0xff] %v450_v50  ;;  %v456_v53 = vld [vmem:[%s2759_s27 + $0x328] sm:$0xff]  ;;  %453 = vst [vmem:[%s2764_s28 + $0x198] sm:$0xff] %v452_v51  ;;  %v458_v54 = vld [vmem:[%s2759_s27 + $0x330] sm:$0xff] }
  0x39   : > { %455 = vst [vmem:[%s2764_s28 + $0x1a0] sm:$0xff] %v454_v52  ;;  %457 = vst [vmem:[%s2764_s28 + $0x1a8] sm:$0xff] %v456_v53  ;;  %v460_v55 = vld [vmem:[%s2759_s27 + $0x338] sm:$0xff]  ;;  %v462_v56 = vld [vmem:[%s2759_s27 + $0x340] sm:$0xff] }
  0x3a   : > { %459 = vst [vmem:[%s2764_s28 + $0x1b0] sm:$0xff] %v458_v54  ;;  %461 = vst [vmem:[%s2764_s28 + $0x1b8] sm:$0xff] %v460_v55  ;;  %v464_v57 = vld [vmem:[%s2759_s27 + $0x348] sm:$0xff]  ;;  %v466_v58 = vld [vmem:[%s2759_s27 + $0x350] sm:$0xff] }
  0x3b   : > { %463 = vst [vmem:[%s2764_s28 + $0x1c0] sm:$0xff] %v462_v56  ;;  %v468_v59 = vld [vmem:[%s2759_s27 + $0x358] sm:$0xff]  ;;  %465 = vst [vmem:[%s2764_s28 + $0x1c8] sm:$0xff] %v464_v57  ;;  %v470_v60 = vld [vmem:[%s2759_s27 + $0x360] sm:$0xff] }
  0x3c   : > { %467 = vst [vmem:[%s2764_s28 + $0x1d0] sm:$0xff] %v466_v58  ;;  %469 = vst [vmem:[%s2764_s28 + $0x1d8] sm:$0xff] %v468_v59  ;;  %v472_v61 = vld [vmem:[%s2759_s27 + $0x368] sm:$0xff]  ;;  %v474_v62 = vld [vmem:[%s2759_s27 + $0x370] sm:$0xff] }
  0x3d   : > { %471 = vst [vmem:[%s2764_s28 + $0x1e0] sm:$0xff] %v470_v60  ;;  %473 = vst [vmem:[%s2764_s28 + $0x1e8] sm:$0xff] %v472_v61  ;;  %v476_v63 = vld [vmem:[%s2759_s27 + $0x378] sm:$0xff] }
  0x3e   : > { %475 = vst [vmem:[%s2764_s28 + $0x1f0] sm:$0xff] %v474_v62  ;;  %477 = vst [vmem:[%s2764_s28 + $0x1f8] sm:$0xff] %v476_v63 }
  0x3f PF: > { %p2192_p12 = scmp.ge.s32.totalorder %s2640_s22, 1  ;;  %p482_p13 = scmp.lt.s32.totalorder %s2640_s22, 5 }
  0x41   : > { %p483_p0 = pnand %p2192_p12, %p482_p13 }
  0x42   : > { %v2896_v0 = vld [vmem:[%s3257_s2] sm:$0xff] (!%p483_p0)  ;;  %s2195_s7 = sshll.u32 (!%p483_p0), %s2628_s19, 3  ;;  %s2900_s9 = sshll.u32 (!%p483_p0), %s2624_s18, 2  ;;  %v2642_v1 = vmov (!%p483_p0), 0.0   ;;  %vm2643_vm0 = vmmov (!%p483_p0), 0   ;;  %vm553_vm1 = vcmask (!%p483_p0), 64512  }
  0x43   : > { %486 = sbr.rel (%p483_p0) target bundleno = 555 (0x22b), region = 70  ;;  %2408 = vmatprep.subr.mxu0 (!%p483_p0), %v2642_v1  ;;  %2410 = vmatprep.mubr.msk.f32.mxu0 (!%p483_p0), %vm2643_vm0, %v2642_v1  ;;  %p520_p1 = scmp.lt.s32.totalorder (!%p483_p0), %s2195_s7, 15  ;;  %v531_v34 = vld [vmem:[%s3258_s3] sm:$0xff] (!%p483_p0)  ;;  %v532_v36 = vld [vmem:[%s3258_s3 + $0x8] sm:$0xff] (!%p483_p0)  ;;  %vm724_vm2 = vcmask (!%p483_p0), 130048  }
  0x44   : > { %s533_s10 = sadd.s32 (!%p483_p0), 4294967295, %s2900_s9  ;;  %2409 = vmatpush3.msra.mxu0 (!%p483_p0), %v2896_v0  ;;  %s2362_s11 = sshll.u32 (!%p483_p0), %s2624_s18, 5  ;;  %2415 = vmatprep.mubr.msk.f32.mxu1 (!%p483_p0), %vm553_vm1, %v531_v34 }
  0x45   : > { %p534_p2 = scmp.gt.s32.totalorder (!%p483_p0), %s533_s10, 0  ;;  %2418 = vmatprep.subr.mxu0 (!%p483_p0), %v2642_v1  ;;  %s2910_s13 = sadd.s32 (!%p483_p0), 1, %s2900_s9 }
  0x46   : > { %p543_p3 = scmp.lt.s32.totalorder (!%p483_p0), %s2910_s13, 7  ;;  %p907_p4 = scmp.gt.s32.totalorder (!%p483_p0), %s2900_s9, 0 }
  0x47   : > { %s2925_s6 = sadd.s32 (!%p483_p0), 2, %s2900_s9  ;;  %p1274_p5 = scmp.gt.s32.totalorder (!%p483_p0), %s2910_s13, 0 }
  0x48   : > { %p916_p6 = scmp.lt.s32.totalorder (!%p483_p0), %s2925_s6, 7  ;;  %p1641_p10 = scmp.gt.s32.totalorder (!%p483_p0), %s2925_s6, 0 }
  0x4a   : > { %s3277_s7 = smov (!%p520_p1, %s2195_s7), 15  ;;  %s3279_s10 = smov (!%p534_p2, %s533_s10), 0 }
  0x4b   : > { %s2196_s12 = sshll.u32 %s3277_s7, 3  ;;  %s2198_s27 = sshll.u32 %s3279_s10, 3 }
  0x4c   : > { %s2915_s24 = scalar_lea.vmem %s3255_s0, %s2196_s12 }
  0x4d   : > { %s537_s28 = scalar_lea.vmem %s2915_s24, %s2198_s27  ;;  %s2919_s5 = scalar_lea.vmem %s2915_s24, %s2362_s11 }
  0x4e   : > { %v538_v2 = vld [vmem:[%s537_s28] sm:$0xff]  ;;  %s544_s7 = scalar_select %p543_p3, %s2910_s13, 7  ;;  %v2226_v7 = vld [vmem:[%s2919_s5 + $0x8] sm:$0xff]  ;;  %v2269_v18 = vld [vmem:[%s2919_s5 + $0x10] sm:$0xff] }
  0x4f   : > { %v541_v3 = vld [vmem:[%s2919_s5] sm:$0xff]  ;;  %v548_v4 = vmul.f32 0.25, %v538_v2  ;;  %s908_s10 = scalar_select %p907_p4, %s2900_s9, 0  ;;  %v922_v11 = vmul.f32 0.75, %v2226_v7  ;;  %v1289_v21 = vmul.f32 0.75, %v2269_v18  ;;  %v2312_v26 = vld [vmem:[%s2919_s5 + $0x18] sm:$0xff] }
  0x50   : > { %v549_v5 = vmul.f32 0.75, %v541_v3  ;;  %s2200_s11 = sshll.u32 %s544_s7, 3  ;;  %s1282_s27 = sadd.s32 3, %s2900_s9  ;;  %v1656_v29 = vmul.f32 0.75, %v2312_v26 }
  0x51   : > { %s546_s12 = scalar_lea.vmem %s2915_s24, %s2200_s11  ;;  %s2223_s14 = sshll.u32 %s908_s10, 3 }
  0x52   : > { %v550_v6 = vadd.f32 %v549_v5, %v548_v4  ;;  %v547_v8 = vld [vmem:[%s546_s12] sm:$0xff]  ;;  %s910_s23 = scalar_lea.vmem %s2915_s24, %s2223_s14  ;;  %s3281_s13 = smov (!%p1274_p5, %s2910_s13), 0 }
  0x53   : > { %v551_v9 = vmul.f32 0.25, %v547_v8  ;;  %v911_v10 = vld [vmem:[%s910_s23] sm:$0xff]  ;;  %s917_s28 = scalar_select %p916_p6, %s2925_s6, 7 }
  0x54   : > { %2411 = vmatmul.mubr.msk.f32.vlgmr.msra.gmra.mrb[0].mxu0 %vm553_vm1, %v550_v6  ;;  %v921_v12 = vmul.f32 0.25, %v911_v10  ;;  %p1283_p7 = scmp.lt.s32.totalorder %s1282_s27, 7  ;;  %s2266_s11 = sshll.u32 %s3281_s13, 3 }
  0x55   : > { %2419 = vmatpush3.msra.mxu0 %v2896_v0  ;;  %2420 = vmatprep.mubr.msk.f32.mxu0 %vm2643_vm0, %v2642_v1  ;;  %v552_v13 = vadd.f32 %v551_v9, %v549_v5  ;;  %s2227_s7 = sshll.u32 %s917_s28, 3  ;;  %s1277_s12 = scalar_lea.vmem %s2915_s24, %s2266_s11 }
  0x56   : > { %2428 = vmatprep.subr.mxu0 %v2642_v1  ;;  %s919_s10 = scalar_lea.vmem %s2915_s24, %s2227_s7  ;;  %v923_v14 = vadd.f32 %v922_v11, %v921_v12  ;;  %v1278_v17 = vld [vmem:[%s1277_s12] sm:$0xff]  ;;  %s3283_s27 = smov (!%p1283_p7, %s1282_s27), 7 }
  0x57   : > { %v920_v15 = vld [vmem:[%s919_s10] sm:$0xff]  ;;  %s3285_s6 = smov (!%p1641_p10, %s2925_s6), 0  ;;  %s2270_s13 = sshll.u32 %s3283_s27, 3  ;;  %v1288_v20 = vmul.f32 0.25, %v1278_v17 }
  0x58   : > { %2421 = vmatmul.mubr.msk.f32.vlgmr.msra.gmra.mrb[2].mxu0 %vm553_vm1, %v552_v13  ;;  %v924_v16 = vmul.f32 0.25, %v920_v15  ;;  %s1649_s14 = sadd.s32 4, %s2900_s9  ;;  %s1286_s23 = scalar_lea.vmem %s2915_s24, %s2270_s13 }
  0x59   : > { %2429 = vmatpush3.msra.mxu0 %v2896_v0  ;;  %2430 = vmatprep.mubr.msk.f32.mxu0 %vm2643_vm0, %v2642_v1  ;;  %s2309_s28 = sshll.u32 %s3285_s6, 3  ;;  %v1287_v22 = vld [vmem:[%s1286_s23] sm:$0xff]  ;;  %p1650_p11 = scmp.lt.s32.totalorder %s1649_s14, 7  ;;  %v1290_v23 = vadd.f32 %v1289_v21, %v1288_v20 }
  0x5a   : > { %2438 = vmatprep.subr.mxu0 %v2642_v1  ;;  %v925_v19 = vadd.f32 %v924_v16, %v922_v11  ;;  %s1644_s27 = scalar_lea.vmem %s2915_s24, %s2309_s28  ;;  %v1291_v24 = vmul.f32 0.25, %v1287_v22  ;;  %s489_s11 = sand.u32 1, %s2616_s16  }
  0x5b   : > { %s3287_s14 = smov (!%p1650_p11, %s1649_s14), 7  ;;  %v1645_v25 = vld [vmem:[%s1644_s27] sm:$0xff]  ;;  %s2193_s12 = sshll.u32 %s489_s11, 9 }
  0x5c   : > { %2431 = vmatmul.mubr.msk.f32.vlgmr.msra.gmra.mrb[4].mxu0 %vm553_vm1, %v923_v14  ;;  %s2313_s9 = sshll.u32 %s3287_s14, 3  ;;  %v1292_v27 = vadd.f32 %v1291_v24, %v1289_v21  ;;  %v1655_v28 = vmul.f32 0.25, %v1645_v25  ;;  %s3009_s13 = scalar_lea.vmem [#allocation2], %s2193_s12 }
  0x5d   : > { %2439 = vmatpush3.msra.mxu0 %v2896_v0  ;;  %2440 = vmatprep.mubr.msk.f32.mxu0 %vm2643_vm0, %v2642_v1  ;;  %s1653_s6 = scalar_lea.vmem %s2915_s24, %s2313_s9  ;;  %v709_v52 = vld [vmem:[%s3009_s13 + $0x8] sm:$0xff]  ;;  %v708_v56 = vld [vmem:[%s3009_s13] sm:$0xff]  ;;  %s3019_s14 = scalar_lea.vmem [#allocation3], %s2193_s12  ;;  %v2208_v6 = vld [vmem:[%s3009_s13 + $0x18] sm:$0xff] }
  0x5e   : > { %2448 = vmatprep.subr.mxu0 %v2642_v1  ;;  %v1654_v30 = vld [vmem:[%s1653_s6] sm:$0xff]  ;;  %v1657_v31 = vadd.f32 %v1656_v29, %v1655_v28  ;;  %v711_v53 = vld [vmem:[%s3009_s13 + $0x88] sm:$0xff]  ;;  %v2210_v7 = vld [vmem:[%s3009_s13 + $0x98] sm:$0xff]  ;;  %s2009_s23 = scalar_lea.sflag [#allocation4], %s489_s11 }
  0x5f   : > { %v1658_v32 = vmul.f32 0.25, %v1654_v30  ;;  %v713_v54 = vld [vmem:[%s3009_s13 + $0x108] sm:$0xff]  ;;  %v710_v57 = vld [vmem:[%s3009_s13 + $0x80] sm:$0xff]  ;;  %v2212_v8 = vld [vmem:[%s3009_s13 + $0x118] sm:$0xff] }
  0x60   : > { %2441 = vmatmul.mubr.msk.f32.vlgmr.msra.gmra.mrb[6].mxu0 %vm553_vm1, %v925_v19  ;;  %v715_v55 = vld [vmem:[%s3009_s13 + $0x188] sm:$0xff]  ;;  %v712_v58 = vld [vmem:[%s3009_s13 + $0x100] sm:$0xff]  ;;  %v2214_v9 = vld [vmem:[%s3009_s13 + $0x198] sm:$0xff] }
  0x61   : > { %2449 = vmatpush3.msra.mxu0 %v2896_v0  ;;  %2450 = vmatprep.mubr.msk.f32.mxu0 %vm2643_vm0, %v2642_v1  ;;  %v1659_v33 = vadd.f32 %v1658_v32, %v1656_v29  ;;  %v714_v59 = vld [vmem:[%s3009_s13 + $0x180] sm:$0xff]  ;;  %v2207_v10 = vld [vmem:[%s3009_s13 + $0x10] sm:$0xff]  ;;  %v2232_v20 = vld [vmem:[%s3009_s13 + $0x28] sm:$0xff] }
  0x62   : > { %2458 = vmatprep.subr.mxu0 %v2642_v1  ;;  %v2209_v11 = vld [vmem:[%s3009_s13 + $0x90] sm:$0xff]  ;;  %v2234_v21 = vld [vmem:[%s3009_s13 + $0xa8] sm:$0xff]  ;;  %v2231_v28 = vld [vmem:[%s3009_s13 + $0x20] sm:$0xff] }
  0x63   : > { %v2211_v12 = vld [vmem:[%s3009_s13 + $0x110] sm:$0xff]  ;;  %v2236_v26 = vld [vmem:[%s3009_s13 + $0x128] sm:$0xff]  ;;  %v2233_v29 = vld [vmem:[%s3009_s13 + $0xa0] sm:$0xff] }
  0x64   : > { %2451 = vmatmul.mubr.msk.f32.vlgmr.msra.gmra.mrb[8].mxu0 %vm553_vm1, %v1290_v23  ;;  %v2213_v13 = vld [vmem:[%s3009_s13 + $0x190] sm:$0xff]  ;;  %v2235_v30 = vld [vmem:[%s3009_s13 + $0x120] sm:$0xff] }
  0x65   : > { %2459 = vmatpush3.msra.mxu0 %v2896_v0  ;;  %2460 = vmatprep.mubr.msk.f32.mxu0 %vm2643_vm0, %v2642_v1 }
  0x66   : > { %2468 = vmatprep.subr.mxu0 %v2642_v1 }
  0x68   : > { %2461 = vmatmul.mubr.msk.f32.vlgmr.msra.gmra.mrb[10].mxu0 %vm553_vm1, %v1292_v27  ;;  %v2238_v27 = vld [vmem:[%s3009_s13 + $0x1a8] sm:$0xff] }
  0x69   : > { %2469 = vmatpush3.msra.mxu0 %v2896_v0  ;;  %2470 = vmatprep.mubr.msk.f32.mxu0 %vm2643_vm0, %v2642_v1 }
  0x6a   : > { %2478 = vmatprep.subr.mxu0 %v2642_v1 }
  0x6c   : > { %2471 = vmatmul.mubr.msk.f32.vlgmr.msra.gmra.mrb[12].mxu0 %vm553_vm1, %v1657_v31  ;;  %v2237_v31 = vld [vmem:[%s3009_s13 + $0x1a0] sm:$0xff] }
  0x6d   : > { %2479 = vmatpush3.msra.mxu0 %v2896_v0  ;;  %2480 = vmatprep.mubr.msk.f32.mxu0 %vm2643_vm0, %v2642_v1 }
  0x70   : > { %2481 = vmatmul.mubr.msk.f32.vlgmr.msra.gmra.mrb[14].mxu0 %vm553_vm1, %v1659_v33 }
 0x127   : > { %v623_v35 = vpop.f32.mrb[0].mxu0 }
 0x128   : > { %v2412_v37 = vpop.f32.mrb[1].mxu0  ;;  %2413 = vmatprep.subr.mxu1 %v623_v35 }
 0x129   : > { %2414 = vmatpush3.msra.mxu1 %v623_v35 }
 0x12a   : > { %2416 = vmatmul.mubr.msk.f32.vlgmr.msra.gmra.mrb[0].mxu1 %vm553_vm1, %v532_v36 }
 0x12b   : > { %2425 = vmatprep.mubr.msk.f32.mxu1 %vm553_vm1, %v531_v34  ;;  %v802_v38 = vpop.f32.mrb[2].mxu0 }
 0x12c   : > { %v2422_v39 = vpop.f32.mrb[3].mxu0  ;;  %2423 = vmatprep.subr.mxu1 %v802_v38 }
 0x12d   : > { %2424 = vmatpush3.msra.mxu1 %v802_v38  ;;  %v2251_v38 = vld [vmem:[%s3009_s13 + $0x38] sm:$0xff] }
 0x12e   : > { %2426 = vmatmul.mubr.msk.f32.vlgmr.msra.gmra.mrb[2].mxu1 %vm553_vm1, %v532_v36  ;;  %v2253_v39 = vld [vmem:[%s3009_s13 + $0xb8] sm:$0xff] }
 0x12f   : > { %v995_v40 = vpop.f32.mrb[4].mxu0  ;;  %2435 = vmatprep.mubr.msk.f32.mxu1 %vm553_vm1, %v531_v34 }
 0x130   : > { %v2432_v41 = vpop.f32.mrb[5].mxu0  ;;  %2433 = vmatprep.subr.mxu1 %v995_v40 }
 0x131   : > { %2434 = vmatpush3.msra.mxu1 %v995_v40 }
 0x132   : > { %2436 = vmatmul.mubr.msk.f32.vlgmr.msra.gmra.mrb[4].mxu1 %vm553_vm1, %v532_v36 }
 0x133   : > { %v1169_v42 = vpop.f32.mrb[6].mxu0  ;;  %2445 = vmatprep.mubr.msk.f32.mxu1 %vm553_vm1, %v531_v34 }
 0x134   : > { %v2442_v43 = vpop.f32.mrb[7].mxu0  ;;  %2443 = vmatprep.subr.mxu1 %v1169_v42 }
 0x135   : > { %2444 = vmatpush3.msra.mxu1 %v1169_v42 }
 0x136   : > { %2446 = vmatmul.mubr.msk.f32.vlgmr.msra.gmra.mrb[6].mxu1 %vm553_vm1, %v532_v36 }
 0x137   : > { %v1362_v44 = vpop.f32.mrb[8].mxu0  ;;  %2455 = vmatprep.mubr.msk.f32.mxu1 %vm553_vm1, %v531_v34 }
 0x138   : > { %v2452_v45 = vpop.f32.mrb[9].mxu0  ;;  %2453 = vmatprep.subr.mxu1 %v1362_v44 }
 0x139   : > { %2454 = vmatpush3.msra.mxu1 %v1362_v44  ;;  %v2255_v44 = vld [vmem:[%s3009_s13 + $0x138] sm:$0xff] }
 0x13a   : > { %2456 = vmatmul.mubr.msk.f32.vlgmr.msra.gmra.mrb[8].mxu1 %vm553_vm1, %v532_v36  ;;  %v2257_v45 = vld [vmem:[%s3009_s13 + $0x1b8] sm:$0xff] }
 0x13b   : > { %v1536_v46 = vpop.f32.mrb[10].mxu0  ;;  %2465 = vmatprep.mubr.msk.f32.mxu1 %vm553_vm1, %v531_v34 }
 0x13c   : > { %v2462_v47 = vpop.f32.mrb[11].mxu0  ;;  %2463 = vmatprep.subr.mxu1 %v1536_v46 }
 0x13d   : > { %2464 = vmatpush3.msra.mxu1 %v1536_v46  ;;  %v2250_v46 = vld [vmem:[%s3009_s13 + $0x30] sm:$0xff] }
 0x13e   : > { %2466 = vmatmul.mubr.msk.f32.vlgmr.msra.gmra.mrb[10].mxu1 %vm553_vm1, %v532_v36  ;;  %v2252_v47 = vld [vmem:[%s3009_s13 + $0xb0] sm:$0xff] }
 0x13f   : > { %v1729_v48 = vpop.f32.mrb[12].mxu0  ;;  %2475 = vmatprep.mubr.msk.f32.mxu1 %vm553_vm1, %v531_v34 }
 0x140   : > { %v2472_v49 = vpop.f32.mrb[13].mxu0  ;;  %2473 = vmatprep.subr.mxu1 %v1729_v48 }
 0x141   : > { %2474 = vmatpush3.msra.mxu1 %v1729_v48  ;;  %v2254_v48 = vld [vmem:[%s3009_s13 + $0x130] sm:$0xff] }
 0x142   : > { %2476 = vmatmul.mubr.msk.f32.vlgmr.msra.gmra.mrb[12].mxu1 %vm553_vm1, %v532_v36  ;;  %v2256_v49 = vld [vmem:[%s3009_s13 + $0x1b0] sm:$0xff] }
 0x143   : > { %v1903_v50 = vpop.f32.mrb[14].mxu0  ;;  %2485 = vmatprep.mubr.msk.f32.mxu1 %vm553_vm1, %v531_v34 }
 0x144   : > { %v2482_v51 = vpop.f32.mrb[15].mxu0  ;;  %2483 = vmatprep.subr.mxu1 %v1903_v50 }
 0x145   : > { %2484 = vmatpush3.msra.mxu1 %v1903_v50 }
 0x146   : > { %2486 = vmatmul.mubr.msk.f32.vlgmr.msra.gmra.mrb[14].mxu1 %vm553_vm1, %v532_v36 }
 0x1fd   : > { %v2417_v60 = vpop.f32.mrb[0].mxu1 }
 0x1fe   : > { %v717_v61 = vmul.f32 %v2417_v60, %v709_v52  ;;  %v719_v62 = vmul.f32 %v2417_v60, %v711_v53  ;;  %v721_v63 = vmul.f32 %v2417_v60, %v713_v54  ;;  %v723_v0 = vmul.f32 %v2417_v60, %v715_v55  ;;  %v699_v1 = vpop.f32.mrb[1].mxu1 }
 0x1ff   : > { %v716_v2 = vmul.f32 %v708_v56, %v699_v1  ;;  %v718_v3 = vmul.f32 %v710_v57, %v699_v1  ;;  %v720_v4 = vmul.f32 %v712_v58, %v699_v1  ;;  %v722_v5 = vmul.f32 %v714_v59, %v699_v1  ;;  %v2275_v56 = vld [vmem:[%s3009_s13 + $0x48] sm:$0xff]  ;;  %v2276_v1 = vld [vmem:[%s3009_s13 + $0xc0] sm:$0xff] }
 0x200   : > { %726 = vst.msk [vmem:[%s3019_s14 + $0x8] sm:$0xff] %vm724_vm2, %v717_v61  ;;  %728 = vst.msk [vmem:[%s3019_s14 + $0x88] sm:$0xff] %vm724_vm2, %v719_v62  ;;  %v2277_v57 = vld [vmem:[%s3009_s13 + $0xc8] sm:$0xff] }
 0x201   : > { %730 = vst.msk [vmem:[%s3019_s14 + $0x108] sm:$0xff] %vm724_vm2, %v721_v63  ;;  %732 = vst.msk [vmem:[%s3019_s14 + $0x188] sm:$0xff] %vm724_vm2, %v723_v0  ;;  %v2427_v14 = vpop.f32.mrb[2].mxu1  ;;  %v2279_v62 = vld [vmem:[%s3009_s13 + $0x148] sm:$0xff]  ;;  %v2274_v0 = vld [vmem:[%s3009_s13 + $0x40] sm:$0xff] }
 0x202   : > { %725 = vst.msk [vmem:[%s3019_s14] sm:$0xff] %vm724_vm2, %v716_v2  ;;  %727 = vst.msk [vmem:[%s3019_s14 + $0x80] sm:$0xff] %vm724_vm2, %v718_v3  ;;  %v891_v15 = vmul.f32 %v2427_v14, %v2208_v6  ;;  %v893_v16 = vmul.f32 %v2427_v14, %v2210_v7  ;;  %v895_v17 = vmul.f32 %v2427_v14, %v2212_v8  ;;  %v872_v19 = vpop.f32.mrb[3].mxu1  ;;  %v2281_v63 = vld [vmem:[%s3009_s13 + $0x1c8] sm:$0xff]  ;;  %v2278_v2 = vld [vmem:[%s3009_s13 + $0x140] sm:$0xff] }
 0x203   : > { %729 = vst.msk [vmem:[%s3019_s14 + $0x100] sm:$0xff] %vm724_vm2, %v720_v4  ;;  %731 = vst.msk [vmem:[%s3019_s14 + $0x180] sm:$0xff] %vm724_vm2, %v722_v5  ;;  %v897_v18 = vmul.f32 %v2427_v14, %v2214_v9  ;;  %v890_v22 = vmul.f32 %v2207_v10, %v872_v19  ;;  %v892_v23 = vmul.f32 %v2209_v11, %v872_v19  ;;  %v2280_v3 = vld [vmem:[%s3009_s13 + $0x1c0] sm:$0xff]  ;;  %v2294_v10 = vld [vmem:[%s3009_s13 + $0x58] sm:$0xff] }
 0x204   : > { %v894_v24 = vmul.f32 %v2211_v12, %v872_v19  ;;  %v896_v25 = vmul.f32 %v2213_v13, %v872_v19  ;;  %2216 = vst.msk [vmem:[%s3019_s14 + $0x18] sm:$0xff] %vm724_vm2, %v891_v15  ;;  %2218 = vst.msk [vmem:[%s3019_s14 + $0x98] sm:$0xff] %vm724_vm2, %v893_v16  ;;  %v2296_v11 = vld [vmem:[%s3009_s13 + $0xd8] sm:$0xff]  ;;  %v2295_v19 = vld [vmem:[%s3009_s13 + $0xd0] sm:$0xff] }
 0x205   : > { %2220 = vst.msk [vmem:[%s3019_s14 + $0x118] sm:$0xff] %vm724_vm2, %v895_v17  ;;  %2222 = vst.msk [vmem:[%s3019_s14 + $0x198] sm:$0xff] %vm724_vm2, %v897_v18  ;;  %v2437_v32 = vpop.f32.mrb[4].mxu1  ;;  %v2298_v16 = vld [vmem:[%s3009_s13 + $0x158] sm:$0xff]  ;;  %v2293_v18 = vld [vmem:[%s3009_s13 + $0x50] sm:$0xff] }
 0x206   : > { %2215 = vst.msk [vmem:[%s3019_s14 + $0x10] sm:$0xff] %vm724_vm2, %v890_v22  ;;  %2217 = vst.msk [vmem:[%s3019_s14 + $0x90] sm:$0xff] %vm724_vm2, %v892_v23  ;;  %v1084_v33 = vmul.f32 %v2437_v32, %v2232_v20  ;;  %v1086_v34 = vmul.f32 %v2437_v32, %v2234_v21  ;;  %v1088_v35 = vmul.f32 %v2437_v32, %v2236_v26  ;;  %v1065_v37 = vpop.f32.mrb[5].mxu1  ;;  %v2300_v17 = vld [vmem:[%s3009_s13 + $0x1d8] sm:$0xff]  ;;  %v2297_v20 = vld [vmem:[%s3009_s13 + $0x150] sm:$0xff] }
 0x207   : > { %2219 = vst.msk [vmem:[%s3019_s14 + $0x110] sm:$0xff] %vm724_vm2, %v894_v24  ;;  %2221 = vst.msk [vmem:[%s3019_s14 + $0x190] sm:$0xff] %vm724_vm2, %v896_v25  ;;  %v1090_v36 = vmul.f32 %v2437_v32, %v2238_v27  ;;  %v1083_v40 = vmul.f32 %v2231_v28, %v1065_v37  ;;  %v1085_v41 = vmul.f32 %v2233_v29, %v1065_v37  ;;  %v2299_v21 = vld [vmem:[%s3009_s13 + $0x1d0] sm:$0xff]  ;;  %v2318_v28 = vld [vmem:[%s3009_s13 + $0x68] sm:$0xff] }
 0x208   : > { %v1087_v42 = vmul.f32 %v2235_v30, %v1065_v37  ;;  %v1089_v43 = vmul.f32 %v2237_v31, %v1065_v37  ;;  %2240 = vst.msk [vmem:[%s3019_s14 + $0x28] sm:$0xff] %vm724_vm2, %v1084_v33  ;;  %2242 = vst.msk [vmem:[%s3019_s14 + $0xa8] sm:$0xff] %vm724_vm2, %v1086_v34  ;;  %v2320_v29 = vld [vmem:[%s3009_s13 + $0xe8] sm:$0xff]  ;;  %v2319_v37 = vld [vmem:[%s3009_s13 + $0xe0] sm:$0xff] }
 0x209   : > { %2244 = vst.msk [vmem:[%s3019_s14 + $0x128] sm:$0xff] %vm724_vm2, %v1088_v35  ;;  %2246 = vst.msk [vmem:[%s3019_s14 + $0x1a8] sm:$0xff] %vm724_vm2, %v1090_v36  ;;  %v2447_v50 = vpop.f32.mrb[6].mxu1  ;;  %v2322_v34 = vld [vmem:[%s3009_s13 + $0x168] sm:$0xff]  ;;  %v2317_v36 = vld [vmem:[%s3009_s13 + $0x60] sm:$0xff] }
 0x20a   : > { %2239 = vst.msk [vmem:[%s3019_s14 + $0x20] sm:$0xff] %vm724_vm2, %v1083_v40  ;;  %2241 = vst.msk [vmem:[%s3019_s14 + $0xa0] sm:$0xff] %vm724_vm2, %v1085_v41  ;;  %v1258_v51 = vmul.f32 %v2447_v50, %v2251_v38  ;;  %v1260_v52 = vmul.f32 %v2447_v50, %v2253_v39  ;;  %v1262_v53 = vmul.f32 %v2447_v50, %v2255_v44  ;;  %v1239_v55 = vpop.f32.mrb[7].mxu1  ;;  %v2324_v35 = vld [vmem:[%s3009_s13 + $0x1e8] sm:$0xff]  ;;  %v2321_v38 = vld [vmem:[%s3009_s13 + $0x160] sm:$0xff] }
 0x20b   : > { %2243 = vst.msk [vmem:[%s3019_s14 + $0x120] sm:$0xff] %vm724_vm2, %v1087_v42  ;;  %2245 = vst.msk [vmem:[%s3019_s14 + $0x1a0] sm:$0xff] %vm724_vm2, %v1089_v43  ;;  %v1264_v54 = vmul.f32 %v2447_v50, %v2257_v45  ;;  %v1257_v58 = vmul.f32 %v2250_v46, %v1239_v55  ;;  %v1259_v59 = vmul.f32 %v2252_v47, %v1239_v55  ;;  %v2323_v39 = vld [vmem:[%s3009_s13 + $0x1e0] sm:$0xff]  ;;  %v2337_v46 = vld [vmem:[%s3009_s13 + $0x78] sm:$0xff] }
 0x20c   : > { %v1261_v60 = vmul.f32 %v2254_v48, %v1239_v55  ;;  %v1263_v61 = vmul.f32 %v2256_v49, %v1239_v55  ;;  %2259 = vst.msk [vmem:[%s3019_s14 + $0x38] sm:$0xff] %vm724_vm2, %v1258_v51  ;;  %2261 = vst.msk [vmem:[%s3019_s14 + $0xb8] sm:$0xff] %vm724_vm2, %v1260_v52  ;;  %v2339_v47 = vld [vmem:[%s3009_s13 + $0xf8] sm:$0xff]  ;;  %v2338_v55 = vld [vmem:[%s3009_s13 + $0xf0] sm:$0xff] }
 0x20d   : > { %2263 = vst.msk [vmem:[%s3019_s14 + $0x138] sm:$0xff] %vm724_vm2, %v1262_v53  ;;  %2265 = vst.msk [vmem:[%s3019_s14 + $0x1b8] sm:$0xff] %vm724_vm2, %v1264_v54  ;;  %v2457_v4 = vpop.f32.mrb[8].mxu1  ;;  %v2341_v52 = vld [vmem:[%s3009_s13 + $0x178] sm:$0xff]  ;;  %v2336_v54 = vld [vmem:[%s3009_s13 + $0x70] sm:$0xff] }
 0x20e   : > { %2258 = vst.msk [vmem:[%s3019_s14 + $0x30] sm:$0xff] %vm724_vm2, %v1257_v58  ;;  %2260 = vst.msk [vmem:[%s3019_s14 + $0xb0] sm:$0xff] %vm724_vm2, %v1259_v59  ;;  %v1451_v5 = vmul.f32 %v2457_v4, %v2275_v56  ;;  %v1453_v6 = vmul.f32 %v2457_v4, %v2277_v57  ;;  %v1455_v7 = vmul.f32 %v2457_v4, %v2279_v62  ;;  %v1432_v9 = vpop.f32.mrb[9].mxu1  ;;  %v2343_v53 = vld [vmem:[%s3009_s13 + $0x1f8] sm:$0xff]  ;;  %v2340_v56 = vld [vmem:[%s3009_s13 + $0x170] sm:$0xff] }
 0x20f   : > { %2262 = vst.msk [vmem:[%s3019_s14 + $0x130] sm:$0xff] %vm724_vm2, %v1261_v60  ;;  %2264 = vst.msk [vmem:[%s3019_s14 + $0x1b0] sm:$0xff] %vm724_vm2, %v1263_v61  ;;  %v1457_v8 = vmul.f32 %v2457_v4, %v2281_v63  ;;  %v1450_v12 = vmul.f32 %v2274_v0, %v1432_v9  ;;  %v1452_v13 = vmul.f32 %v2276_v1, %v1432_v9  ;;  %v2342_v57 = vld [vmem:[%s3009_s13 + $0x1f0] sm:$0xff] }
 0x210   : > { %v1454_v14 = vmul.f32 %v2278_v2, %v1432_v9  ;;  %v1456_v15 = vmul.f32 %v2280_v3, %v1432_v9  ;;  %2283 = vst.msk [vmem:[%s3019_s14 + $0x48] sm:$0xff] %vm724_vm2, %v1451_v5  ;;  %2285 = vst.msk [vmem:[%s3019_s14 + $0xc8] sm:$0xff] %vm724_vm2, %v1453_v6 }
 0x211   : > { %2287 = vst.msk [vmem:[%s3019_s14 + $0x148] sm:$0xff] %vm724_vm2, %v1455_v7  ;;  %2289 = vst.msk [vmem:[%s3019_s14 + $0x1c8] sm:$0xff] %vm724_vm2, %v1457_v8  ;;  %v2467_v22 = vpop.f32.mrb[10].mxu1 }
 0x212   : > { %2282 = vst.msk [vmem:[%s3019_s14 + $0x40] sm:$0xff] %vm724_vm2, %v1450_v12  ;;  %2284 = vst.msk [vmem:[%s3019_s14 + $0xc0] sm:$0xff] %vm724_vm2, %v1452_v13  ;;  %v1625_v23 = vmul.f32 %v2467_v22, %v2294_v10  ;;  %v1627_v24 = vmul.f32 %v2467_v22, %v2296_v11  ;;  %v1629_v25 = vmul.f32 %v2467_v22, %v2298_v16  ;;  %v1606_v27 = vpop.f32.mrb[11].mxu1 }
 0x213   : > { %2286 = vst.msk [vmem:[%s3019_s14 + $0x140] sm:$0xff] %vm724_vm2, %v1454_v14  ;;  %2288 = vst.msk [vmem:[%s3019_s14 + $0x1c0] sm:$0xff] %vm724_vm2, %v1456_v15  ;;  %v1631_v26 = vmul.f32 %v2467_v22, %v2300_v17  ;;  %v1624_v30 = vmul.f32 %v2293_v18, %v1606_v27  ;;  %v1626_v31 = vmul.f32 %v2295_v19, %v1606_v27 }
 0x214   : > { %v1628_v32 = vmul.f32 %v2297_v20, %v1606_v27  ;;  %v1630_v33 = vmul.f32 %v2299_v21, %v1606_v27  ;;  %2302 = vst.msk [vmem:[%s3019_s14 + $0x58] sm:$0xff] %vm724_vm2, %v1625_v23  ;;  %2304 = vst.msk [vmem:[%s3019_s14 + $0xd8] sm:$0xff] %vm724_vm2, %v1627_v24 }
 0x215   : > { %2306 = vst.msk [vmem:[%s3019_s14 + $0x158] sm:$0xff] %vm724_vm2, %v1629_v25  ;;  %2308 = vst.msk [vmem:[%s3019_s14 + $0x1d8] sm:$0xff] %vm724_vm2, %v1631_v26  ;;  %v2477_v40 = vpop.f32.mrb[12].mxu1 }
 0x216   : > { %2301 = vst.msk [vmem:[%s3019_s14 + $0x50] sm:$0xff] %vm724_vm2, %v1624_v30  ;;  %2303 = vst.msk [vmem:[%s3019_s14 + $0xd0] sm:$0xff] %vm724_vm2, %v1626_v31  ;;  %v1818_v41 = vmul.f32 %v2477_v40, %v2318_v28  ;;  %v1820_v42 = vmul.f32 %v2477_v40, %v2320_v29  ;;  %v1822_v43 = vmul.f32 %v2477_v40, %v2322_v34  ;;  %v1799_v45 = vpop.f32.mrb[13].mxu1 }
 0x217   : > { %2305 = vst.msk [vmem:[%s3019_s14 + $0x150] sm:$0xff] %vm724_vm2, %v1628_v32  ;;  %2307 = vst.msk [vmem:[%s3019_s14 + $0x1d0] sm:$0xff] %vm724_vm2, %v1630_v33  ;;  %v1824_v44 = vmul.f32 %v2477_v40, %v2324_v35  ;;  %v1817_v48 = vmul.f32 %v2317_v36, %v1799_v45  ;;  %v1819_v49 = vmul.f32 %v2319_v37, %v1799_v45 }
 0x218   : > { %v1821_v50 = vmul.f32 %v2321_v38, %v1799_v45  ;;  %v1823_v51 = vmul.f32 %v2323_v39, %v1799_v45  ;;  %2326 = vst.msk [vmem:[%s3019_s14 + $0x68] sm:$0xff] %vm724_vm2, %v1818_v41  ;;  %2328 = vst.msk [vmem:[%s3019_s14 + $0xe8] sm:$0xff] %vm724_vm2, %v1820_v42 }
 0x219   : > { %2330 = vst.msk [vmem:[%s3019_s14 + $0x168] sm:$0xff] %vm724_vm2, %v1822_v43  ;;  %2332 = vst.msk [vmem:[%s3019_s14 + $0x1e8] sm:$0xff] %vm724_vm2, %v1824_v44  ;;  %v2487_v58 = vpop.f32.mrb[14].mxu1 }
 0x21a   : > { %2325 = vst.msk [vmem:[%s3019_s14 + $0x60] sm:$0xff] %vm724_vm2, %v1817_v48  ;;  %2327 = vst.msk [vmem:[%s3019_s14 + $0xe0] sm:$0xff] %vm724_vm2, %v1819_v49  ;;  %v1992_v59 = vmul.f32 %v2487_v58, %v2337_v46  ;;  %v1994_v60 = vmul.f32 %v2487_v58, %v2339_v47  ;;  %v1996_v61 = vmul.f32 %v2487_v58, %v2341_v52  ;;  %v1973_v63 = vpop.f32.mrb[15].mxu1 }
 0x21b   : > { %2329 = vst.msk [vmem:[%s3019_s14 + $0x160] sm:$0xff] %vm724_vm2, %v1821_v50  ;;  %2331 = vst.msk [vmem:[%s3019_s14 + $0x1e0] sm:$0xff] %vm724_vm2, %v1823_v51  ;;  %v1998_v62 = vmul.f32 %v2487_v58, %v2343_v53  ;;  %v1991_v0 = vmul.f32 %v2336_v54, %v1973_v63  ;;  %v1993_v1 = vmul.f32 %v2338_v55, %v1973_v63 }
 0x21c   : > { %v1995_v2 = vmul.f32 %v2340_v56, %v1973_v63  ;;  %v1997_v3 = vmul.f32 %v2342_v57, %v1973_v63  ;;  %2345 = vst.msk [vmem:[%s3019_s14 + $0x78] sm:$0xff] %vm724_vm2, %v1992_v59  ;;  %2347 = vst.msk [vmem:[%s3019_s14 + $0xf8] sm:$0xff] %vm724_vm2, %v1994_v60 }
 0x21d   : > { %2349 = vst.msk [vmem:[%s3019_s14 + $0x178] sm:$0xff] %vm724_vm2, %v1996_v61  ;;  %2351 = vst.msk [vmem:[%s3019_s14 + $0x1f8] sm:$0xff] %vm724_vm2, %v1998_v62 }
 0x21e   : > { %2344 = vst.msk [vmem:[%s3019_s14 + $0x70] sm:$0xff] %vm724_vm2, %v1991_v0  ;;  %2346 = vst.msk [vmem:[%s3019_s14 + $0xf0] sm:$0xff] %vm724_vm2, %v1993_v1 }
 0x21f   : > { %2348 = vst.msk [vmem:[%s3019_s14 + $0x170] sm:$0xff] %vm724_vm2, %v1995_v2  ;;  %2350 = vst.msk [vmem:[%s3019_s14 + $0x1f0] sm:$0xff] %vm724_vm2, %v1997_v3 }
 0x220   : > { %s2366_s28 = sshll.u32 %s2624_s18, 4  ;;  %s2367_s27 = sshll.u32 %s2628_s19, 7 }
 0x221   : > { %s2023_s9 = sadd.s32 %s2367_s27, %s2366_s28  ;;  %s2042_s6 = sshll.u32 %s3019_s14, 4  ;;  %s2043_s6 = int_to_ptr.vmem [resolvable:$true] %s2042_s6 }
 0x222   : > { %s2357_s24 = sshll.u32 %s2023_s9, 7  ;;  %s2644_s11 = smov 2048  }
 0x223   : > { %s2025_s10 = scalar_lea.hbm %s3259_s4, %s2357_s24  ;;  %2488 = sst [smem:[#allocation6]] (%p2736_p8), %s2644_s11 }
 0x224   : > { %s2645_s12 = smov 4096   ;;  %s2646_s13 = smov 16  }
 0x225   : > { %2489 = sst [smem:[#allocation6 + $0x1]] (%p2736_p8), %s2645_s12  ;;  %s2647_s18 = smov 128  }
 0x226   : > { %2490 = sst [smem:[#allocation6 + $0x2]] (%p2736_p8), %s2646_s13  ;;  %s2648_s19 = smov 8  }
 0x227   : > { %2491 = sst [smem:[#allocation6 + $0x3]] (%p2736_p8), %s2647_s18  ;;  %s2649_s14 = smov [#allocation5]  }
 0x228   : > { %2492 = sst [smem:[#allocation6 + $0x4]] (%p2736_p8), %s2647_s18  ;;  %s2650_s28 = smov 0  }
 0x229   : > { %2493 = sst [smem:[#allocation6 + $0x5]] (%p2736_p8), %s2648_s19 }
 0x22a   : > { %2494 = dma.general (%p2736_p8), %s2043_s6, 8192, %s2025_s10, %s2009_s23, %s2649_s14, [#allocation6], %s2650_s28, 0  }
 0x22b PF: > { %p2500_p12 = scmp.ge.s32.totalorder %s2640_s22, 2  ;;  %s2070_s27 = sand.u32 1, %s2612_s15  }
 0x22c   : > { %s2071_s9 = scalar_lea.sflag [#allocation4], %s2070_s27 }
 0x22d   : > { %p2497_p13 = pnand %p2500_p12, %p2740_p9 }
 0x22f   : > { %2607 = dma.done.wait (!%p2497_p13), %s2071_s9, 8192  }
 0x230   : > { %2609 = vsyncadd (!%p2497_p13), %s2071_s9, 4294959104  ;;  %s17_s22 = sadd.s32 1, %s2640_s22   ;;  %s3263_s15 = smov %s2616_s16 }
 0x231   : > { %p14_p0 = scmp.ge.s32.totalorder %s17_s22, 6   ;;  %s3264_s16 = smov %s2620_s17 }
 0x232   : > { %s3265_s17 = smov %s2748_s8  ;;  %s3266_s18 = smov %s2632_s20 }
 0x233   : > { %s3267_s19 = smov %s2636_s21  ;;  %s3268_s20 = smov %s3271_s25 }
 0x234   : > { %s3269_s21 = smov %s3275_s26  ;;  %16 = sbr.rel (!%p14_p0) target bundleno = 5 (0x5), region = 148 }
 0x23b   :  { %2076 = vsyncpa [#allocation4], 1 }
 0x23c   :  { %2078 = vsyncpa [#allocation4 + $0x1], 1 }

// kernel: attention_gate.2
= control target key start
LH: loop header
LB: loop body
LE: loop exit
PB: predicated region body
PF: predicated region fallthrough
CT: control target
= control target key end

     0   :  { %s7539_s0 = inlined_call_operand.hbm [shape: f32[8,16,16,16], index: 0, kind: input, shape index: {}]   ;;  %s7540_s1 = inlined_call_operand.hbm [shape: f32[16,8,8,8], index: 1, kind: input, shape index: {}]   ;;  %s7541_s2 = inlined_call_operand.vmem [shape: f32[16,16], index: 2, kind: input, shape index: {}]   ;;  %s7542_s3 = inlined_call_operand.vmem [shape: f32[16,16], index: 3, kind: input, shape index: {}]   ;;  %s7543_s4 = inlined_call_operand.vmem [shape: f32[4,4], index: 4, kind: input, shape index: {}]   ;;  %s7544_s5 = inlined_call_operand.vmem [shape: f32[4,8], index: 5, kind: input, shape index: {}]   ;;  %s7545_s6 = inlined_call_operand.vmem [shape: f32[3,4], index: 6, kind: input, shape index: {}]   ;;  %s7546_s7 = inlined_call_operand.vmem [shape: f32[16,8,8], index: 7, kind: output, shape index: {}]  }
   0x1   :  { %7574 = sst [smem:[#allocation41_spill]] %s7539_s0 }
   0x2   :  { %7575 = sst [smem:[#allocation42_spill]] %s7543_s4 }
   0x3   :  { %7576 = sst [smem:[#allocation43_spill]] %s7544_s5 }
   0x4   :  { %7577 = sst [smem:[#allocation44_spill]] %s7545_s6 }
   0x5   :  { %12 = vsyncpa [#allocation3], 0 }
   0x6   :  { %14 = vsyncpa [#allocation3 + $0x1], 0 }
   0x7   :  { %15 = vsyncpa [#allocation6], 0 }
   0x8   :  { %17 = vsyncpa [#allocation6 + $0x1], 0 }
   0x9   :  { %18 = vsyncpa [#allocation4], 0 }
   0xa   :  { %19 = vsyncpa [#allocation9], 0  ;;  %s5717_s24 = smov 0   ;;  %s5719_s25 = smov 0  }
   0xb   :  { %s5721_s26 = smov 0   ;;  %s5723_s27 = smov 0  }
   0xc   :  { %s5725_s28 = smov 0   ;;  %s5727_s29 = smov 0  }
   0xd   :  { %s5729_s30 = smov 0   ;;  %s5731_s8 = smov 0  }
   0xe LB: > { %s4536_s9 = sadd.s32 4294967295, %s5656_s8   ;;  %s34_s10 = sadd.s32 1, %s5648_s29  ;;  %s5656_s8 = sphi %s5731_s8, %s25_s8   ;;  %s5652_s30 = sphi %s5729_s30, %s7637_s30   ;;  %s5648_s29 = sphi %s5727_s29, %s7636_s29   ;;  %s5644_s28 = sphi %s5725_s28, %s7635_s28   ;;  %s5640_s27 = sphi %s5723_s27, %s7634_s27   ;;  %s5636_s26 = sphi %s5721_s26, %s7633_s26   ;;  %s5632_s25 = sphi %s5719_s25, %s7632_s25   ;;  %s5628_s24 = sphi %s5717_s24, %s7631_s24  }
   0xf   : > { %p35_p0 = scmp.ge.s32.totalorder %s34_s10, 2  ;;  %s37_s11 = sadd.s32 1, %s5652_s30 }
  0x10   : > { %s46_s12 = sadd.s32 1, %s5636_s26  ;;  %p53_p1 = scmp.ne.s32.totalorder %s5636_s26, %s5632_s25 }
  0x11   : > { %s7639_s10 = smov (%p35_p0, %s34_s10), 0  ;;  %s7641_s11 = smov (!%p35_p0, %s37_s11), %s5652_s30 }
  0x12   : > { %7578 = sst [smem:[#allocation21_spill]] %s7639_s10  ;;  %s42_s13 = ssub.s32 %s5648_s29, %s7639_s10 }
  0x13   : > { %p54_p2 = scmp.eq.s32.totalorder %s5656_s8, 0  ;;  %p39_p3 = scmp.ge.s32.totalorder %s7641_s11, 2 }
  0x14   : > { %p59_p4 = scmp.ne.s32.totalorder %s5632_s25, %s5628_s24  ;;  %p5772_p6 = scmp.eq.s32.totalorder %s4536_s9, 0 }
  0x15   : > { %p5768_p5 = por %p54_p2, %p53_p1  ;;  %s7643_s11 = smov (%p39_p3, %s7641_s11), 0 }
  0x16   : > { %s7580_s15 = scalar_select %p5772_p6, 1, 0 }
  0x17   : > { %s7579_s14 = scalar_select %p5768_p5, 1, 0 }
  0x18   : > { %7581 = sst [smem:[#allocation22_spill]] %s7643_s11  ;;  %p5780_p7 = por %p5772_p6, %p59_p4 }
  0x19   : > { %p4540_p8 = scmp.ge.s32.totalorder %s5656_s8, 1  ;;  %s41_s17 = ssub.s32 %s5652_s30, %s7643_s11 }
  0x1a   : > { %s7582_s16 = scalar_select %p5780_p7, 1, 0 }
  0x1b   : > { %p233_p9 = scmp.lt.s32.totalorder %s5656_s8, 5  ;;  %s43_s18 = sor.u32 %s42_s13, %s41_s17 }
  0x1c   : > { %p44_p10 = scmp.eq.s32.totalorder %s43_s18, 0  ;;  %s7584_s5 = sld [smem:[#allocation43_spill]] }
  0x1d   : > { %p5788_p11 = pnand %p4540_p8, %p233_p9  ;;  %s7586_s4 = sld [smem:[#allocation42_spill]] }
  0x1e   : > { %s5796_s23 = scalar_select %p44_p10, %s5636_s26, %s46_s12  }
  0x1f   : > { %s7583_s19 = scalar_select %p5788_p11, 1, 0 }
  0x20   : > { %p5416_p12 = pneg %p5788_p11 }
  0x22   : > { %s263_s22 = sshll.u32 %s7584_s5, 4  ;;  %p5802_p13 = pnand %p5416_p12, %p5772_p6  ;;  %s264_s22 = int_to_ptr.vmem [resolvable:$true] %s263_s22 }
  0x23   : > { %s252_s17 = sshll.u32 %s7586_s4, 4  ;;  %s5533_s18 = scalar_lea.vmem %s264_s22, 64  ;;  %s253_s17 = int_to_ptr.vmem [resolvable:$true] %s252_s17 }
  0x24   : > { %p5534_p0 = scmp.ne.s32.totalorder %s264_s22, %s5533_s18  ;;  %p5535_p1 = pneg %p5802_p13 }
  0x25   : > { %p5541_p4 = scmp.lt.s32.totalorder %s264_s22, %s264_s22  ;;  %p5542_p8 = scmp.lt.s32.totalorder %s5533_s18, %s5533_s18 }
  0x26   : > { %p5536_p2 = pnand %p5535_p1, %p5534_p0 }
  0x27   : > { %p5543_p9 = por %p5542_p8, %p5541_p4 }
  0x28   : > { %p5537_p3 = pneg %p5536_p2 }
  0x2a   : > { %p5544_p10 = pnand %p5543_p9, %p5537_p3 }
  0x2c   : > { %5547 = shalt.err (!%p5544_p10)
}
  0x2d   : > { %s5658_s12 = smov [#allocation8]   ;;  %s7587_s6 = sld [smem:[#allocation44_spill]] }
  0x2e   : > { %5422 = dma.vmem_to_smem (!%p5802_p13), %s264_s22, 64, %s5658_s12, [#allocation9]  }
  0x2f   : > { %s5548_s13 = scalar_lea.vmem %s253_s17, 64  ;;  %p5556_p6 = scmp.lt.s32.totalorder %s253_s17, %s253_s17 }
  0x30   : > { %p5549_p12 = scmp.ne.s32.totalorder %s253_s17, %s5548_s13  ;;  %p5557_p7 = scmp.lt.s32.totalorder %s5548_s13, %s5548_s13 }
  0x32   : > { %p5551_p0 = pnand %p5549_p12, %p5535_p1  ;;  %p5558_p4 = por %p5557_p7, %p5556_p6 }
  0x33   : > { %s274_s9 = sshll.u32 %s7587_s6, 4  ;;  %s275_s9 = int_to_ptr.vmem [resolvable:$true] %s274_s9 }
  0x34   : > { %p5552_p2 = pneg %p5551_p0 }
  0x36   : > { %p5559_p3 = pnand %p5558_p4, %p5552_p2 }
  0x38   : > { %5562 = shalt.err (!%p5559_p3)
}
  0x39   : > { %s5659_s18 = smov [#allocation7]   ;;  %s5563_s22 = scalar_lea.vmem %s275_s9, 64 }
  0x3a   : > { %5419 = dma.vmem_to_smem (!%p5802_p13), %s253_s17, 64, %s5659_s18, [#allocation4]  }
  0x3b   : > { %p5564_p8 = scmp.ne.s32.totalorder %s275_s9, %s5563_s22  ;;  %p5571_p11 = scmp.lt.s32.totalorder %s275_s9, %s275_s9 }
  0x3c   : > { %p5572_p12 = scmp.lt.s32.totalorder %s5563_s22, %s5563_s22 }
  0x3d   : > { %p5566_p9 = pnand %p5564_p8, %p5535_p1 }
  0x3e   : > { %p5573_p0 = por %p5572_p12, %p5571_p11 }
  0x3f   : > { %p5567_p10 = pneg %p5566_p9 }
  0x41   : > { %p5574_p5 = pnand %p5573_p0, %p5567_p10 }
  0x43   : > { %5577 = shalt.err (!%p5574_p5)
}
  0x44   : > { %s5660_s12 = smov [#allocation10]   ;;  %p4544_p6 = scmp.ge.s32.totalorder %s5656_s8, 4 }
  0x45   : > { %5425 = dma.vmem_to_smem (!%p5802_p13), %s275_s9, 64, %s5660_s12, [#allocation9]  }
  0x46   : > { %281 = sbr.rel (%p4544_p6) target bundleno = 110 (0x6e), region = 36 }
  0x4d   : > { %s5831_s17 = sand.u32 1, %s5636_s26   ;;  %s4935_s20 = sshll.u32 %s5648_s29, 4 }
  0x4e   : > { %s4545_s21 = sshll.u32 %s5831_s17, 9  ;;  %s4936_s13 = sshll.u32 %s5652_s30, 7 }
  0x4f   : > { %s297_s18 = sadd.s32 %s4936_s13, %s4935_s20  ;;  %s289_s24 = scalar_lea.vmem [#allocation2], %s4545_s21 }
  0x50   : > { %s312_s9 = sshll.u32 %s289_s24, 4  ;;  %s4550_s22 = sshll.u32 %s297_s18, 7  ;;  %s313_s9 = int_to_ptr.vmem [resolvable:$true] %s312_s9 }
  0x51   : > { %p7588_p5 = scmp.ne.s32.totalorder %s7579_s14, 0  ;;  %s5661_s4 = smov 4096  }
  0x52   : > { %s5662_s6 = smov 2048   ;;  %s5663_s11 = smov 16  }
  0x53   : > { %s5392_s12 = scalar_select %p7588_p5, [#allocation0], [#allocation15] }
  0x54   : > { %5393 = sst [smem:[#allocation12]] (%p7588_p5), %s5661_s4  ;;  %s5664_s20 = smov 128  }
  0x55   : > { %s304_s5 = sld [smem:[%s5392_s12]]   ;;  %s5665_s24 = smov 8  }
  0x56   : > { %5394 = sst [smem:[#allocation12 + $0x1]] (%p7588_p5), %s5662_s6  ;;  %s7589_s0 = sld [smem:[#allocation41_spill]] }
  0x57   : > { %5395 = sst [smem:[#allocation12 + $0x2]] (%p7588_p5), %s5663_s11  ;;  %s286_s10 = scalar_lea.sflag [#allocation3], %s5831_s17 }
  0x58   : > { %5396 = sst [smem:[#allocation12 + $0x3]] (%p7588_p5), %s5664_s20  ;;  %s5666_s6 = smov [#allocation11]  }
  0x59   : > { %5397 = sst [smem:[#allocation12 + $0x4]] (%p7588_p5), %s5664_s20 }
  0x5a   : > { %5398 = sst [smem:[#allocation12 + $0x5]] (%p7588_p5), %s5665_s24 }
  0x5b   : > { %s4551_s4 = sshll.u32 %s304_s5, 26 }
  0x5c   : > { %s299_s18 = scalar_lea.hbm %s7589_s0, %s4550_s22  ;;  %s4552_s12 = sadd.s32 134217728, %s4551_s4 }
  0x5d   : > { %5399 = dma.general (%p7588_p5), %s299_s18, 8192, %s313_s9, %s286_s10, %s5666_s6, [#allocation12], %s4552_s12, 0  }
  0x5e   : > { %s4553_s11 = sshll.u32 %s5831_s17, 8  ;;  %s4555_s22 = sshll.u32 %s5648_s29, 2 }
  0x5f   : > { %s4937_s20 = sshll.u32 %s5652_s30, 6  ;;  %s339_s13 = scalar_lea.vmem [#allocation5], %s4553_s11 }
  0x60   : > { %s346_s21 = sadd.s32 %s4937_s20, %s4555_s22  ;;  %s361_s5 = sshll.u32 %s339_s13, 4  ;;  %s362_s5 = int_to_ptr.vmem [resolvable:$true] %s361_s5 }
  0x61   : > { %s4557_s24 = sshll.u32 %s346_s21, 7  ;;  %s5667_s4 = smov 1024  }
  0x62   : > { %5401 = sst [smem:[#allocation14]] (%p7588_p5), %s5667_s4  ;;  %s5668_s18 = smov 512  }
  0x63   : > { %s5400_s10 = scalar_select %p7588_p5, [#allocation0], [#allocation16] }
  0x64   : > { %5402 = sst [smem:[#allocation14 + $0x1]] (%p7588_p5), %s5668_s18  ;;  %s5669_s12 = smov 4  }
  0x65   : > { %s353_s9 = sld [smem:[%s5400_s10]]   ;;  %s5670_s6 = smov 128  }
  0x66   : > { %5403 = sst [smem:[#allocation14 + $0x2]] (%p7588_p5), %s5669_s12  ;;  %s5671_s11 = smov 8  }
  0x67   : > { %5404 = sst [smem:[#allocation14 + $0x3]] (%p7588_p5), %s5670_s6  ;;  %s348_s21 = scalar_lea.hbm %s7540_s1, %s4557_s24 }
  0x68   : > { %5405 = sst [smem:[#allocation14 + $0x4]] (%p7588_p5), %s5670_s6  ;;  %s336_s10 = scalar_lea.sflag [#allocation6], %s5831_s17 }
  0x69   : > { %5406 = sst [smem:[#allocation14 + $0x5]] (%p7588_p5), %s5671_s11  ;;  %s5672_s18 = smov [#allocation13]  }
  0x6b   : > { %s4558_s13 = sshll.u32 %s353_s9, 26 }
  0x6c   : > { %s4559_s4 = sadd.s32 134217728, %s4558_s13 }
  0x6d   : > { %5407 = dma.general (%p7588_p5), %s348_s21, 4096, %s362_s5, %s336_s10, %s5672_s18, [#allocation14], %s4559_s4, 0  }
  0x6e PF: > { %p7590_p7 = scmp.ne.s32.totalorder %s7583_s19, 0 }
  0x70   : > { %386 = sbr.rel (%p7590_p7) target bundleno = 864 (0x360), region = 48 }
  0x77   : > { %s388_s12 = sand.u32 1, %s5632_s25   ;;  %p7591_p11 = scmp.ne.s32.totalorder %s7582_s16, 0 }
  0x78   : > { %s4561_s6 = sshll.u32 %s388_s12, 9  ;;  %s389_s0 = scalar_lea.sflag [#allocation3], %s388_s12 }
  0x79   : > { %s5882_s11 = scalar_lea.vmem [#allocation2], %s4561_s6 }
  0x7a   : > { %5611 = dma.done.wait (%p7591_p11), %s389_s0, 8192  }
  0x7b   : > { %5613 = vsyncadd (%p7591_p11), %s389_s0, 4294959104  ;;  %s4562_s17 = sshll.u32 %s388_s12, 8  ;;  %s398_s14 = scalar_lea.sflag [#allocation6], %s388_s12 }
  0x7c   : > { %s5888_s5 = scalar_lea.vmem [#allocation5], %s4562_s17 }
  0x7d   : > { %5615 = dma.done.wait (%p7591_p11), %s398_s14, 4096  }
  0x7e   : > { %5617 = vsyncadd (%p7591_p11), %s398_s14, 4294963200  ;;  %p7592_p13 = scmp.ne.s32.totalorder %s7580_s15, 0 }
  0x80   : > { %5619 = dma.done.wait (%p7592_p13), [#allocation4], 64  }
  0x81   : > { %5621 = vsyncadd (%p7592_p13), [#allocation4], 4294967232 }
  0x82   : > { %5623 = dma.done.wait (%p7592_p13), [#allocation9], 128  }
  0x83   : > { %5625 = vsyncadd (%p7592_p13), [#allocation9], 4294967168 }
  0x84   : > { %418 = sfence }
  0x85   : > { %s508_s0 = sld [smem:[#allocation7]]  ;;  %s4590_s16 = sld [smem:[#allocation7 + $0x1]]  ;;  %v5903_v0 = vld [vmem:[%s5882_s11] sm:$0xff]  ;;  %v5906_v1 = vld [vmem:[%s5882_s11 + $0x8] sm:$0xff]  ;;  %vm546_vm0 = vcmask 130048   ;;  %v5915_v4 = vld [vmem:[%s5882_s11 + $0x10] sm:$0xff] }
  0x86   : > { %s4591_s19 = sld [smem:[#allocation7 + $0x2]]  ;;  %v5909_v2 = vld [vmem:[%s5882_s11 + $0x80] sm:$0xff]  ;;  %v5912_v3 = vld [vmem:[%s5882_s11 + $0x88] sm:$0xff]  ;;  %v5918_v5 = vld [vmem:[%s5882_s11 + $0x18] sm:$0xff]  ;;  %s5920_s15 = sld [smem:[#allocation7 + $0x3]]  ;;  %vm5674_vm1 = vmmov 0  }
  0x87   : > { %s5922_s24 = sld [smem:[#allocation7 + $0x80]]  ;;  %v5925_v6 = vld [vmem:[%s5882_s11 + $0x100] sm:$0xff]  ;;  %v5928_v7 = vld [vmem:[%s5882_s11 + $0x90] sm:$0xff]  ;;  %s5935_s20 = sld [smem:[#allocation7 + $0x81]]  ;;  %v5938_v9 = vld [vmem:[%s5882_s11 + $0x98] sm:$0xff]  ;;  %vm1452_vm2 = vcmask 64512  }
  0x88   : > { %v5933_v8 = vld [vmem:[%s7541_s2] sm:$0xff]  ;;  %s5944_s21 = sld [smem:[#allocation7 + $0x82]]  ;;  %v5950_v12 = vld [vmem:[%s5882_s11 + $0x28] sm:$0xff]  ;;  %v5956_v14 = vld [vmem:[%s5882_s11 + $0x110] sm:$0xff]  ;;  %s6021_s13 = sld [smem:[#allocation7 + $0x83]] }
  0x89   : > { %5054 = vmatprep.mubr.msk.f32.mxu0 %vm546_vm0, %v5933_v8  ;;  %v5947_v11 = vld [vmem:[%s5882_s11 + $0x20] sm:$0xff]  ;;  %v5953_v13 = vld [vmem:[%s5882_s11 + $0x108] sm:$0xff]  ;;  %v5959_v15 = vld [vmem:[%s5882_s11 + $0x118] sm:$0xff]  ;;  %s6039_s4 = sld [smem:[#allocation7 + $0x100]]  ;;  %s6041_s10 = sld [smem:[#allocation7 + $0x101]] }
  0x8a   : > { %v5990_v28 = vld [vmem:[%s5882_s11 + $0x180] sm:$0xff]  ;;  %v6001_v33 = vld [vmem:[%s5882_s11 + $0x188] sm:$0xff]  ;;  %v6004_v34 = vld [vmem:[%s5882_s11 + $0x190] sm:$0xff]  ;;  %s6055_s18 = sld [smem:[#allocation7 + $0x102]]  ;;  %s6057_s12 = sld [smem:[#allocation7 + $0x103]] }
  0x8b   : > { %v5940_v10 = vstv %s508_s0  ;;  %v5969_v20 = vstv %s4590_s16  ;;  %v6007_v35 = vld [vmem:[%s5882_s11 + $0x198] sm:$0xff]  ;;  %s6085_s14 = sld [smem:[#allocation7 + $0x180]]  ;;  %s6099_s0 = sld [smem:[#allocation7 + $0x181]] }
  0x8c   : > { %v510_v16 = vmul.f32 %v5940_v10, %v5903_v0  ;;  %v511_v17 = vmul.f32 %v5940_v10, %v5906_v1  ;;  %v512_v18 = vmul.f32 %v5915_v4, %v5940_v10  ;;  %v513_v19 = vmul.f32 %v5918_v5, %v5940_v10  ;;  %s6107_s16 = sld [smem:[#allocation7 + $0x182]]  ;;  %s6551_s22 = sld [smem:[#allocation7 + $0x3]] }
  0x8d   : > { %v5971_v21 = vstv %s4591_s19  ;;  %v5975_v22 = vmul.f32 %v5947_v11, %v5940_v10  ;;  %v5979_v23 = vmul.f32 %v5950_v12, %v5940_v10  ;;  %v516_v24 = vmul.f32 %v5909_v2, %v5969_v20  ;;  %s6109_s19 = sld [smem:[#allocation7 + $0x183]]  ;;  %s6549_s9 = sld [smem:[#allocation7 + $0x2]] }
  0x8e   : > { %v517_v25 = vmul.f32 %v5912_v3, %v5969_v20  ;;  %v520_v26 = vmul.f32 %v5928_v7, %v5969_v20  ;;  %v521_v27 = vmul.f32 %v5938_v9, %v5969_v20  ;;  %v526_v29 = vmul.f32 %v5925_v6, %v5971_v21  ;;  %s6675_s6 = sld [smem:[#allocation7 + $0x102]]  ;;  %s6677_s17 = sld [smem:[#allocation7 + $0x103]] }
  0x8f   : > { %v527_v30 = vmul.f32 %v5953_v13, %v5971_v21  ;;  %v530_v31 = vmul.f32 %v5956_v14, %v5971_v21  ;;  %v531_v32 = vmul.f32 %v5959_v15, %v5971_v21  ;;  %v518_v36 = vadd.f32 %v516_v24, %v510_v16 }
  0x90   : > { %v519_v37 = vadd.f32 %v517_v25, %v511_v17  ;;  %v522_v38 = vadd.f32 %v520_v26, %v512_v18  ;;  %v523_v39 = vadd.f32 %v521_v27, %v513_v19  ;;  %v6010_v40 = vstv %s5920_s15  ;;  %s6527_s15 = sld [smem:[#allocation7]] }
  0x91   : > { %v6013_v41 = vstv %s5922_s24  ;;  %v6016_v42 = vstv %s5935_s20  ;;  %v6019_v43 = vstv %s5944_s21  ;;  %v528_v44 = vadd.f32 %v526_v29, %v518_v36  ;;  %s6529_s24 = sld [smem:[#allocation7 + $0x1]]  ;;  %s6593_s20 = sld [smem:[#allocation7 + $0x80]] }
  0x92   : > { %v529_v45 = vadd.f32 %v527_v30, %v519_v37  ;;  %v532_v46 = vadd.f32 %v530_v31, %v522_v38  ;;  %v533_v47 = vadd.f32 %v531_v32, %v523_v39  ;;  %v536_v48 = vmul.f32 %v5990_v28, %v6010_v40  ;;  %s6597_s21 = sld [smem:[#allocation7 + $0x81]] }
  0x93   : > { %v537_v49 = vmul.f32 %v6001_v33, %v6010_v40  ;;  %v540_v50 = vmul.f32 %v6004_v34, %v6010_v40  ;;  %v541_v51 = vmul.f32 %v6007_v35, %v6010_v40  ;;  %v749_v52 = vmul.f32 %v6013_v41, %v5903_v0 }
  0x94   : > { %v750_v53 = vmul.f32 %v6013_v41, %v5906_v1  ;;  %v751_v54 = vmul.f32 %v5915_v4, %v6013_v41  ;;  %v752_v55 = vmul.f32 %v5918_v5, %v6013_v41  ;;  %v538_v56 = vadd.f32 %v536_v48, %v528_v44  ;;  %v6077_v48 = vld [vmem:[%s7541_s2 + $0x8] sm:$0xff] }
  0x95   : > { %v539_v57 = vadd.f32 %v537_v49, %v529_v45  ;;  %v542_v58 = vadd.f32 %v540_v50, %v532_v46  ;;  %v543_v59 = vadd.f32 %v541_v51, %v533_v47  ;;  %v755_v60 = vmul.f32 %v5909_v2, %v6016_v42 }
  0x96   : > { %v756_v61 = vmul.f32 %v5912_v3, %v6016_v42  ;;  %v759_v62 = vmul.f32 %v5928_v7, %v6016_v42  ;;  %v760_v63 = vmul.f32 %v5938_v9, %v6016_v42  ;;  %v765_v18 = vmul.f32 %v5925_v6, %v6019_v43 }
  0x97   : > { %v544_v16 = vmax.f32 %v538_v56, %v542_v58  ;;  %v545_v17 = vmax.f32 %v539_v57, %v543_v59  ;;  %v766_v19 = vmul.f32 %v5953_v13, %v6019_v43  ;;  %v757_v24 = vadd.f32 %v755_v60, %v749_v52 }
  0x98   : > { %v758_v25 = vadd.f32 %v756_v61, %v750_v53  ;;  %v761_v26 = vadd.f32 %v759_v62, %v751_v54  ;;  %v762_v27 = vadd.f32 %v760_v63, %v752_v55  ;;  %v769_v30 = vmul.f32 %v5956_v14, %v6019_v43 }
  0x99   : > { %v5274_v29 = vpack.c.bf16 %v545_v17, %v544_v16  ;;  %v770_v31 = vmul.f32 %v5959_v15, %v6019_v43  ;;  %v6064_v32 = vstv %s6021_s13  ;;  %v767_v36 = vadd.f32 %v765_v18, %v757_v24  ;;  %s6599_s13 = sld [smem:[#allocation7 + $0x82]] }
  0x9a   : > { %v768_v37 = vadd.f32 %v766_v19, %v758_v25  ;;  %v775_v38 = vmul.f32 %v5990_v28, %v6064_v32  ;;  %v776_v39 = vmul.f32 %v6001_v33, %v6064_v32  ;;  %v771_v44 = vadd.f32 %v769_v30, %v761_v26 }
  0x9b   : > { %5275 = vmatprep.subr.bf16.mxu0 %v5274_v29  ;;  %v772_v45 = vadd.f32 %v770_v31, %v762_v27  ;;  %v779_v46 = vmul.f32 %v6004_v34, %v6064_v32  ;;  %v780_v47 = vmul.f32 %v6007_v35, %v6064_v32  ;;  %v6080_v51 = vstv %s6039_s4  ;;  %s6614_s4 = sld [smem:[#allocation7 + $0x83]] }
  0x9c   : > { %5277 = vmatpush3.bf16.msra.mxu0 %v5274_v29  ;;  %v777_v49 = vadd.f32 %v775_v38, %v767_v36  ;;  %v778_v50 = vadd.f32 %v776_v39, %v768_v37  ;;  %v6083_v52 = vstv %s6041_s10  ;;  %v981_v55 = vmul.f32 %v6080_v51, %v5903_v0  ;;  %s6627_s10 = sld [smem:[#allocation7 + $0x100]] }
  0x9d   : > { %v781_v53 = vadd.f32 %v779_v46, %v771_v44  ;;  %v782_v54 = vadd.f32 %v780_v47, %v772_v45  ;;  %v982_v56 = vmul.f32 %v6080_v51, %v5906_v1  ;;  %v983_v57 = vmul.f32 %v5915_v4, %v6080_v51 }
  0x9e   : > { %v984_v58 = vmul.f32 %v5918_v5, %v6080_v51  ;;  %v987_v59 = vmul.f32 %v5909_v2, %v6083_v52  ;;  %v988_v60 = vmul.f32 %v5912_v3, %v6083_v52  ;;  %v991_v63 = vmul.f32 %v5928_v7, %v6083_v52 }
  0x9f   : > { %5055 = vmatmul.mubr.msk.f32.vlgmr.msra.gmra.mrb[0].mxu0 %vm546_vm0, %v6077_v48  ;;  %v783_v61 = vmax.f32 %v777_v49, %v781_v53  ;;  %v784_v62 = vmax.f32 %v778_v50, %v782_v54  ;;  %v992_v16 = vmul.f32 %v5938_v9, %v6083_v52  ;;  %v6114_v19 = vstv %s6055_s18  ;;  %v6139_v53 = vld [vmem:[%s5882_s11 + $0x30] sm:$0xff]  ;;  %s4628_s18 = sld [smem:[#allocation8 + $0x100]] }
  0xa0   : > { %5068 = vmatprep.mubr.msk.f32.mxu0 %vm546_vm0, %v5933_v8  ;;  %v989_v17 = vadd.f32 %v987_v59, %v981_v55  ;;  %v990_v18 = vadd.f32 %v988_v60, %v982_v56  ;;  %v6117_v24 = vstv %s6057_s12  ;;  %v993_v26 = vadd.f32 %v991_v63, %v983_v57  ;;  %s4629_s12 = sld [smem:[#allocation8 + $0x101]] }
  0xa1   : > { %v5281_v25 = vpack.c.bf16 %v784_v62, %v783_v61  ;;  %v994_v27 = vadd.f32 %v992_v16, %v984_v58  ;;  %v997_v29 = vmul.f32 %v5925_v6, %v6114_v19  ;;  %v998_v30 = vmul.f32 %v5953_v13, %v6114_v19 }
  0xa2   : > { %v1001_v31 = vmul.f32 %v5956_v14, %v6114_v19  ;;  %v1002_v36 = vmul.f32 %v5959_v15, %v6114_v19  ;;  %v1007_v37 = vmul.f32 %v5990_v28, %v6117_v24  ;;  %v1008_v39 = vmul.f32 %v6001_v33, %v6117_v24 }
  0xa3   : > { %5282 = vmatprep.subr.bf16.mxu0 %v5281_v25  ;;  %v999_v38 = vadd.f32 %v997_v29, %v989_v17  ;;  %v1011_v44 = vmul.f32 %v6004_v34, %v6117_v24  ;;  %v1012_v45 = vmul.f32 %v6007_v35, %v6117_v24  ;;  %v1000_v46 = vadd.f32 %v998_v30, %v990_v18 }
  0xa4   : > { %5284 = vmatpush3.bf16.msra.mxu0 %v5281_v25  ;;  %v1003_v47 = vadd.f32 %v1001_v31, %v993_v26  ;;  %v1004_v49 = vadd.f32 %v1002_v36, %v994_v27  ;;  %v6136_v50 = vstv %s6085_s14  ;;  %v6152_v62 = vstv %s6099_s0  ;;  %v6179_v31 = vld [vmem:[%s5882_s11 + $0x38] sm:$0xff]  ;;  %s6686_s14 = sld [smem:[#allocation7 + $0x180]]  ;;  %s6690_s0 = sld [smem:[#allocation7 + $0x181]] }
  0xa5   : > { %v1009_v54 = vadd.f32 %v1007_v37, %v999_v38  ;;  %v1213_v55 = vmul.f32 %v6136_v50, %v5903_v0  ;;  %v1214_v56 = vmul.f32 %v6136_v50, %v5906_v1  ;;  %v1215_v57 = vmul.f32 %v5915_v4, %v6136_v50  ;;  %v6189_v37 = vld [vmem:[%s5882_s11 + $0xa8] sm:$0xff] }
  0xa6   : > { %v1010_v58 = vadd.f32 %v1008_v39, %v1000_v46  ;;  %v1013_v59 = vadd.f32 %v1011_v44, %v1003_v47  ;;  %v1014_v60 = vadd.f32 %v1012_v45, %v1004_v49  ;;  %v1216_v61 = vmul.f32 %v5918_v5, %v6136_v50  ;;  %v6196_v45 = vld [vmem:[%s5882_s11 + $0xb0] sm:$0xff]  ;;  %v6204_v49 = vld [vmem:[%s5882_s11 + $0x120] sm:$0xff] }
  0xa7   : > { %5069 = vmatmul.mubr.msk.f32.vlgmr.msra.gmra.mrb[2].mxu0 %vm546_vm0, %v6077_v48  ;;  %v6155_v63 = vstv %s6107_s16  ;;  %v6158_v0 = vstv %s6109_s19  ;;  %v1498_v1 = vmul.f32 %v6139_v53, %v5940_v10  ;;  %v1219_v5 = vmul.f32 %v5909_v2, %v6152_v62  ;;  %s6692_s16 = sld [smem:[#allocation7 + $0x182]]  ;;  %s6713_s19 = sld [smem:[#allocation7 + $0x183]] }
  0xa8   : > { %v1015_v4 = vmax.f32 %v1009_v54, %v1013_v59  ;;  %v1016_v16 = vmax.f32 %v1010_v58, %v1014_v60  ;;  %5082 = vmatprep.mubr.msk.f32.mxu0 %vm546_vm0, %v5933_v8  ;;  %v1220_v17 = vmul.f32 %v5912_v3, %v6152_v62  ;;  %v1223_v18 = vmul.f32 %v5928_v7, %v6152_v62  ;;  %v6219_v60 = vld [vmem:[%s5882_s11 + $0x138] sm:$0xff] }
  0xa9   : > { %v1224_v25 = vmul.f32 %v5938_v9, %v6152_v62  ;;  %v1229_v26 = vmul.f32 %v5925_v6, %v6155_v63  ;;  %v1230_v27 = vmul.f32 %v5953_v13, %v6155_v63  ;;  %v1221_v30 = vadd.f32 %v1219_v5, %v1213_v55  ;;  %v6186_v13 = vld [vmem:[%s5882_s11 + $0xa0] sm:$0xff]  ;;  %v6231_v5 = vld [vmem:[%s5882_s11 + $0x1a8] sm:$0xff] }
  0xaa   : > { %v5288_v29 = vpack.c.bf16 %v1016_v16, %v1015_v4  ;;  %v1222_v2 = vadd.f32 %v1220_v17, %v1214_v56  ;;  %v1233_v3 = vmul.f32 %v5956_v14, %v6155_v63  ;;  %v1225_v7 = vadd.f32 %v1223_v18, %v1215_v57  ;;  %v6228_v16 = vld [vmem:[%s5882_s11 + $0x1a0] sm:$0xff]  ;;  %v6234_v17 = vld [vmem:[%s5882_s11 + $0x1b0] sm:$0xff] }
  0xab   : > { %v1226_v36 = vadd.f32 %v1224_v25, %v1216_v61  ;;  %v1234_v9 = vmul.f32 %v5959_v15, %v6155_v63  ;;  %v1239_v6 = vmul.f32 %v5990_v28, %v6158_v0  ;;  %v1231_v38 = vadd.f32 %v1229_v26, %v1221_v30  ;;  %v6199_v15 = vld [vmem:[%s5882_s11 + $0xb8] sm:$0xff] }
  0xac   : > { %5289 = vmatprep.subr.bf16.mxu0 %v5288_v29  ;;  %v1232_v39 = vadd.f32 %v1230_v27, %v1222_v2  ;;  %v1240_v14 = vmul.f32 %v6001_v33, %v6158_v0  ;;  %v1243_v44 = vmul.f32 %v6004_v34, %v6158_v0  ;;  %v1235_v28 = vadd.f32 %v1233_v3, %v1225_v7  ;;  %v6207_v33 = vld [vmem:[%s5882_s11 + $0x128] sm:$0xff]  ;;  %v6245_v2 = vld [vmem:[%s5882_s11 + $0x1b8] sm:$0xff] }
  0xad   : > { %5291 = vmatpush3.bf16.msra.mxu0 %v5288_v29  ;;  %v1236_v46 = vadd.f32 %v1234_v9, %v1226_v36  ;;  %v1244_v47 = vmul.f32 %v6007_v35, %v6158_v0  ;;  %v1499_v34 = vmul.f32 %v6179_v31, %v5940_v10  ;;  %v1241_v54 = vadd.f32 %v1239_v6, %v1231_v38  ;;  %v6216_v35 = vld [vmem:[%s5882_s11 + $0x130] sm:$0xff] }
  0xae   : > { %v1242_v55 = vadd.f32 %v1240_v14, %v1232_v39  ;;  %v1502_v56 = vmul.f32 %v6186_v13, %v5969_v20  ;;  %v1503_v57 = vmul.f32 %v6189_v37, %v5969_v20  ;;  %v1245_v58 = vadd.f32 %v1243_v44, %v1235_v28 }
  0xaf   : > { %v1246_v59 = vadd.f32 %v1244_v47, %v1236_v46  ;;  %v1506_v61 = vmul.f32 %v6196_v45, %v5969_v20  ;;  %v1507_v4 = vmul.f32 %v6199_v15, %v5969_v20  ;;  %v1512_v26 = vmul.f32 %v6204_v49, %v5971_v21 }
  0xb0   : > { %5083 = vmatmul.mubr.msk.f32.vlgmr.msra.gmra.mrb[4].mxu0 %vm546_vm0, %v6077_v48  ;;  %v1504_v18 = vadd.f32 %v1502_v56, %v5975_v22  ;;  %v1505_v25 = vadd.f32 %v1503_v57, %v5979_v23  ;;  %v1513_v27 = vmul.f32 %v6207_v33, %v5971_v21  ;;  %v1247_v29 = vmax.f32 %v1241_v54, %v1245_v58 }
  0xb1   : > { %v1248_v30 = vmax.f32 %v1242_v55, %v1246_v59  ;;  %5096 = vmatprep.mubr.msk.f32.mxu0 %vm546_vm0, %v5933_v8  ;;  %v1508_v3 = vadd.f32 %v1506_v61, %v1498_v1  ;;  %v1509_v7 = vadd.f32 %v1507_v4, %v1499_v34  ;;  %v1516_v22 = vmul.f32 %v6216_v35, %v5971_v21 }
  0xb2   : > { %v1514_v36 = vadd.f32 %v1512_v26, %v1504_v18  ;;  %v1515_v9 = vadd.f32 %v1513_v27, %v1505_v25  ;;  %v1517_v23 = vmul.f32 %v6219_v60, %v5971_v21  ;;  %v1522_v38 = vmul.f32 %v6228_v16, %v6010_v40 }
  0xb3   : > { %v5295_v6 = vpack.c.bf16 %v1248_v30, %v1247_v29  ;;  %v1523_v39 = vmul.f32 %v6231_v5, %v6010_v40  ;;  %v1526_v14 = vmul.f32 %v6234_v17, %v6010_v40  ;;  %v1518_v1 = vadd.f32 %v1516_v22, %v1508_v3 }
  0xb4   : > { %v1519_v44 = vadd.f32 %v1517_v23, %v1509_v7  ;;  %v1527_v28 = vmul.f32 %v6245_v2, %v6010_v40  ;;  %v1728_v46 = vmul.f32 %v5947_v11, %v6013_v41  ;;  %v1524_v47 = vadd.f32 %v1522_v38, %v1514_v36 }
  0xb5   : > { %5296 = vmatprep.subr.bf16.mxu0 %v5295_v6  ;;  %v1525_v34 = vadd.f32 %v1523_v39, %v1515_v9  ;;  %v1729_v54 = vmul.f32 %v5950_v12, %v6013_v41  ;;  %v1730_v55 = vmul.f32 %v6139_v53, %v6013_v41  ;;  %v1528_v56 = vadd.f32 %v1526_v14, %v1518_v1 }
  0xb6   : > { %5298 = vmatpush3.bf16.msra.mxu0 %v5295_v6  ;;  %v1529_v57 = vadd.f32 %v1527_v28, %v1519_v44  ;;  %v1731_v58 = vmul.f32 %v6179_v31, %v6013_v41  ;;  %v1734_v59 = vmul.f32 %v6186_v13, %v6016_v42  ;;  %v1735_v61 = vmul.f32 %v6189_v37, %v6016_v42 }
  0xb7   : > { %v1738_v4 = vmul.f32 %v6196_v45, %v6016_v42  ;;  %v1739_v18 = vmul.f32 %v6199_v15, %v6016_v42  ;;  %v1744_v25 = vmul.f32 %v6204_v49, %v6019_v43  ;;  %v1530_v26 = vmax.f32 %v1524_v47, %v1528_v56 }
  0xb8   : > { %v1531_v27 = vmax.f32 %v1525_v34, %v1529_v57  ;;  %v1736_v29 = vadd.f32 %v1734_v59, %v1728_v46  ;;  %v1745_v30 = vmul.f32 %v6207_v33, %v6019_v43  ;;  %v1737_v3 = vadd.f32 %v1735_v61, %v1729_v54 }
  0xb9   : > { %5097 = vmatmul.mubr.msk.f32.vlgmr.msra.gmra.mrb[6].mxu0 %vm546_vm0, %v6077_v48  ;;  %v1740_v7 = vadd.f32 %v1738_v4, %v1730_v55  ;;  %v1741_v36 = vadd.f32 %v1739_v18, %v1731_v58  ;;  %v1748_v9 = vmul.f32 %v6216_v35, %v6019_v43  ;;  %v1749_v6 = vmul.f32 %v6219_v60, %v6019_v43 }
  0xba   : > { %v5302_v22 = vpack.c.bf16 %v1531_v27, %v1530_v26  ;;  %5110 = vmatprep.mubr.msk.f32.mxu0 %vm546_vm0, %v5933_v8  ;;  %v1746_v23 = vadd.f32 %v1744_v25, %v1736_v29  ;;  %v1754_v38 = vmul.f32 %v6228_v16, %v6064_v32  ;;  %v1747_v39 = vadd.f32 %v1745_v30, %v1737_v3 }
  0xbb   : > { %v1750_v14 = vadd.f32 %v1748_v9, %v1740_v7  ;;  %v1755_v1 = vmul.f32 %v6231_v5, %v6064_v32  ;;  %v1758_v44 = vmul.f32 %v6234_v17, %v6064_v32  ;;  %v1751_v28 = vadd.f32 %v1749_v6, %v1741_v36 }
  0xbc   : > { %5303 = vmatprep.subr.bf16.mxu0 %v5302_v22  ;;  %v1756_v46 = vadd.f32 %v1754_v38, %v1746_v23  ;;  %v1759_v47 = vmul.f32 %v6245_v2, %v6064_v32  ;;  %v1960_v34 = vmul.f32 %v5947_v11, %v6080_v51  ;;  %v1961_v56 = vmul.f32 %v5950_v12, %v6080_v51 }
  0xbd   : > { %5305 = vmatpush3.bf16.msra.mxu0 %v5302_v22  ;;  %v1757_v54 = vadd.f32 %v1755_v1, %v1747_v39  ;;  %v1760_v55 = vadd.f32 %v1758_v44, %v1750_v14  ;;  %v1962_v57 = vmul.f32 %v6139_v53, %v6080_v51  ;;  %v1963_v59 = vmul.f32 %v6179_v31, %v6080_v51 }
  0xbe   : > { %v1761_v58 = vadd.f32 %v1759_v47, %v1751_v28  ;;  %v1966_v61 = vmul.f32 %v6186_v13, %v6083_v52  ;;  %v1967_v4 = vmul.f32 %v6189_v37, %v6083_v52  ;;  %v1970_v25 = vmul.f32 %v6196_v45, %v6083_v52 }
  0xbf   : > { %v1762_v18 = vmax.f32 %v1756_v46, %v1760_v55  ;;  %v1971_v26 = vmul.f32 %v6199_v15, %v6083_v52  ;;  %v1976_v27 = vmul.f32 %v6204_v49, %v6114_v19  ;;  %v1977_v7 = vmul.f32 %v6207_v33, %v6114_v19 }
  0xc0   : > { %5111 = vmatmul.mubr.msk.f32.vlgmr.msra.gmra.mrb[8].mxu0 %vm546_vm0, %v6077_v48  ;;  %v1763_v29 = vmax.f32 %v1757_v54, %v1761_v58  ;;  %v1968_v30 = vadd.f32 %v1966_v61, %v1960_v34  ;;  %v1969_v3 = vadd.f32 %v1967_v4, %v1961_v56  ;;  %v1972_v36 = vadd.f32 %v1970_v25, %v1962_v57 }
  0xc1   : > { %5124 = vmatprep.mubr.msk.f32.mxu0 %vm546_vm0, %v5933_v8  ;;  %v1973_v9 = vadd.f32 %v1971_v26, %v1963_v59  ;;  %v1980_v22 = vmul.f32 %v6216_v35, %v6114_v19  ;;  %v1981_v23 = vmul.f32 %v6219_v60, %v6114_v19  ;;  %v1986_v14 = vmul.f32 %v6228_v16, %v6117_v24 }
  0xc2   : > { %v5309_v6 = vpack.c.bf16 %v1763_v29, %v1762_v18  ;;  %v1978_v38 = vadd.f32 %v1976_v27, %v1968_v30  ;;  %v1979_v39 = vadd.f32 %v1977_v7, %v1969_v3  ;;  %v1987_v28 = vmul.f32 %v6231_v5, %v6117_v24  ;;  %v6362_v29 = vld [vmem:[%s5882_s11 + $0x40] sm:$0xff]  ;;  %v6365_v30 = vld [vmem:[%s5882_s11 + $0x48] sm:$0xff] }
  0xc3   : > { %v1982_v1 = vadd.f32 %v1980_v22, %v1972_v36  ;;  %v1983_v44 = vadd.f32 %v1981_v23, %v1973_v9  ;;  %v1990_v46 = vmul.f32 %v6234_v17, %v6117_v24  ;;  %v1991_v34 = vmul.f32 %v6245_v2, %v6117_v24  ;;  %v6370_v9 = vld [vmem:[%s5882_s11 + $0xc0] sm:$0xff]  ;;  %v6376_v22 = vld [vmem:[%s5882_s11 + $0x58] sm:$0xff] }
  0xc4   : > { %5310 = vmatprep.subr.bf16.mxu0 %v5309_v6  ;;  %v1988_v47 = vadd.f32 %v1986_v14, %v1978_v38  ;;  %v2192_v54 = vmul.f32 %v5947_v11, %v6136_v50  ;;  %v2193_v55 = vmul.f32 %v5950_v12, %v6136_v50  ;;  %v1989_v56 = vadd.f32 %v1987_v28, %v1979_v39  ;;  %v6383_v39 = vld [vmem:[%s5882_s11 + $0xc8] sm:$0xff]  ;;  %v6386_v14 = vld [vmem:[%s5882_s11 + $0xd0] sm:$0xff]  ;;  %v6392_v28 = vld [vmem:[%s5882_s11 + $0x140] sm:$0xff] }
  0xc5   : > { %5312 = vmatpush3.bf16.msra.mxu0 %v5309_v6  ;;  %v1992_v57 = vadd.f32 %v1990_v46, %v1982_v1  ;;  %v2194_v58 = vmul.f32 %v6139_v53, %v6136_v50  ;;  %v2195_v59 = vmul.f32 %v6179_v31, %v6136_v50  ;;  %v1993_v61 = vadd.f32 %v1991_v34, %v1983_v44  ;;  %v6395_v46 = vld [vmem:[%s5882_s11 + $0x148] sm:$0xff] }
  0xc6   : > { %v2198_v4 = vmul.f32 %v6186_v13, %v6152_v62  ;;  %v2199_v18 = vmul.f32 %v6189_v37, %v6152_v62  ;;  %v2202_v11 = vmul.f32 %v6196_v45, %v6152_v62  ;;  %v2203_v25 = vmul.f32 %v6199_v15, %v6152_v62 }
  0xc7   : > { %v1994_v12 = vmax.f32 %v1988_v47, %v1992_v57  ;;  %v2208_v53 = vmul.f32 %v6204_v49, %v6155_v63  ;;  %v2209_v31 = vmul.f32 %v6207_v33, %v6155_v63  ;;  %v1995_v13 = vmax.f32 %v1989_v56, %v1993_v61  ;;  %v6406_v56 = vld [vmem:[%s5882_s11 + $0x1c0] sm:$0xff]  ;;  %v6409_v57 = vld [vmem:[%s5882_s11 + $0x150] sm:$0xff] }
  0xc8   : > { %5125 = vmatmul.mubr.msk.f32.vlgmr.msra.gmra.mrb[10].mxu0 %vm546_vm0, %v6077_v48  ;;  %v2200_v37 = vadd.f32 %v2198_v4, %v2192_v54  ;;  %v2201_v45 = vadd.f32 %v2199_v18, %v2193_v55  ;;  %v2204_v26 = vadd.f32 %v2202_v11, %v2194_v58  ;;  %v2205_v15 = vadd.f32 %v2203_v25, %v2195_v59  ;;  %v6412_v58 = vld [vmem:[%s5882_s11 + $0x158] sm:$0xff]  ;;  %v6426_v25 = vld [vmem:[%s5882_s11 + $0x1d0] sm:$0xff] }
  0xc9   : > { %5138 = vmatprep.mubr.msk.f32.mxu0 %vm546_vm0, %v5933_v8  ;;  %v2212_v49 = vmul.f32 %v6216_v35, %v6155_v63  ;;  %v2213_v33 = vmul.f32 %v6219_v60, %v6155_v63  ;;  %v2218_v27 = vmul.f32 %v6228_v16, %v6158_v0  ;;  %v5316_v3 = vpack.c.bf16 %v1995_v13, %v1994_v12  ;;  %v6373_v60 = vld [vmem:[%s5882_s11 + $0x50] sm:$0xff]  ;;  %v6423_v12 = vld [vmem:[%s5882_s11 + $0x1c8] sm:$0xff]  ;;  %v6435_v13 = vld [vmem:[%s5882_s11 + $0x1d8] sm:$0xff] }
  0xca   : > { %v2210_v7 = vadd.f32 %v2208_v53, %v2200_v37  ;;  %v2211_v36 = vadd.f32 %v2209_v31, %v2201_v45  ;;  %v2219_v35 = vmul.f32 %v6231_v5, %v6158_v0  ;;  %v2222_v6 = vmul.f32 %v6234_v17, %v6158_v0  ;;  %v6389_v5 = vld [vmem:[%s5882_s11 + $0xd8] sm:$0xff] }
  0xcb   : > { %v2214_v16 = vadd.f32 %v2212_v49, %v2204_v26  ;;  %v2215_v23 = vadd.f32 %v2213_v33, %v2205_v15  ;;  %v2223_v38 = vmul.f32 %v6245_v2, %v6158_v0  ;;  %5317 = vmatprep.subr.bf16.mxu0 %v5316_v3  ;;  %v2475_v17 = vmul.f32 %v6362_v29, %v5940_v10 }
  0xcc   : > { %v2220_v1 = vadd.f32 %v2218_v27, %v2210_v7  ;;  %v2221_v44 = vadd.f32 %v2219_v35, %v2211_v36  ;;  %v2476_v2 = vmul.f32 %v6365_v30, %v5940_v10  ;;  %5319 = vmatpush3.bf16.msra.mxu0 %v5316_v3  ;;  %v2477_v54 = vmul.f32 %v6373_v60, %v5940_v10 }
  0xcd   : > { %v2224_v47 = vadd.f32 %v2222_v6, %v2214_v16  ;;  %v2225_v34 = vadd.f32 %v2223_v38, %v2215_v23  ;;  %v2478_v55 = vmul.f32 %v6376_v22, %v5940_v10  ;;  %v2481_v59 = vmul.f32 %v6370_v9, %v5969_v20 }
  0xce   : > { %v2482_v61 = vmul.f32 %v6383_v39, %v5969_v20  ;;  %v2485_v4 = vmul.f32 %v6386_v14, %v5969_v20  ;;  %v2486_v18 = vmul.f32 %v6389_v5, %v5969_v20  ;;  %v2491_v53 = vmul.f32 %v6392_v28, %v5971_v21 }
  0xcf   : > { %v2226_v11 = vmax.f32 %v2220_v1, %v2224_v47  ;;  %v2227_v10 = vmax.f32 %v2221_v44, %v2225_v34  ;;  %v2492_v31 = vmul.f32 %v6395_v46, %v5971_v21  ;;  %5139 = vmatmul.mubr.msk.f32.vlgmr.msra.gmra.mrb[12].mxu0 %vm546_vm0, %v6077_v48  ;;  %v2483_v37 = vadd.f32 %v2481_v59, %v2475_v17 }
  0xd0   : > { %v2484_v45 = vadd.f32 %v2482_v61, %v2476_v2  ;;  %v2487_v20 = vadd.f32 %v2485_v4, %v2477_v54  ;;  %v2488_v26 = vadd.f32 %v2486_v18, %v2478_v55  ;;  %5152 = vmatprep.mubr.msk.f32.mxu0 %vm546_vm0, %v5933_v8  ;;  %v2495_v49 = vmul.f32 %v6409_v57, %v5971_v21 }
  0xd1   : > { %v5323_v15 = vpack.c.bf16 %v2227_v10, %v2226_v11  ;;  %v2496_v33 = vmul.f32 %v6412_v58, %v5971_v21  ;;  %v2501_v27 = vmul.f32 %v6406_v56, %v6010_v40  ;;  %v2493_v3 = vadd.f32 %v2491_v53, %v2483_v37 }
  0xd2   : > { %v2494_v7 = vadd.f32 %v2492_v31, %v2484_v45  ;;  %v2502_v36 = vmul.f32 %v6423_v12, %v6010_v40  ;;  %v2505_v35 = vmul.f32 %v6426_v25, %v6010_v40  ;;  %v2497_v16 = vadd.f32 %v2495_v49, %v2487_v20 }
  0xd3   : > { %5324 = vmatprep.subr.bf16.mxu0 %v5323_v15  ;;  %v2498_v23 = vadd.f32 %v2496_v33, %v2488_v26  ;;  %v2506_v6 = vmul.f32 %v6435_v13, %v6010_v40  ;;  %v2707_v21 = vmul.f32 %v6362_v29, %v6013_v41  ;;  %v2503_v38 = vadd.f32 %v2501_v27, %v2493_v3 }
  0xd4   : > { %5326 = vmatpush3.bf16.msra.mxu0 %v5323_v15  ;;  %v2504_v1 = vadd.f32 %v2502_v36, %v2494_v7  ;;  %v2708_v44 = vmul.f32 %v6365_v30, %v6013_v41  ;;  %v2709_v17 = vmul.f32 %v6373_v60, %v6013_v41  ;;  %v2507_v2 = vadd.f32 %v2505_v35, %v2497_v16 }
  0xd5   : > { %v2508_v47 = vadd.f32 %v2506_v6, %v2498_v23  ;;  %v2710_v34 = vmul.f32 %v6376_v22, %v6013_v41  ;;  %v2713_v40 = vmul.f32 %v6370_v9, %v6016_v42  ;;  %v2714_v54 = vmul.f32 %v6383_v39, %v6016_v42 }
  0xd6   : > { %v2717_v55 = vmul.f32 %v6386_v14, %v6016_v42  ;;  %v2718_v59 = vmul.f32 %v6389_v5, %v6016_v42  ;;  %v2723_v61 = vmul.f32 %v6392_v28, %v6019_v43  ;;  %v2509_v4 = vmax.f32 %v2503_v38, %v2507_v2 }
  0xd7   : > { %5153 = vmatmul.mubr.msk.f32.vlgmr.msra.gmra.mrb[14].mxu0 %vm546_vm0, %v6077_v48  ;;  %v2510_v41 = vmax.f32 %v2504_v1, %v2508_v47  ;;  %v2715_v18 = vadd.f32 %v2713_v40, %v2707_v21  ;;  %v2724_v11 = vmul.f32 %v6395_v46, %v6019_v43  ;;  %v2716_v10 = vadd.f32 %v2714_v54, %v2708_v44 }
  0xd8   : > { %5166 = vmatprep.mubr.msk.f32.mxu0 %vm546_vm0, %v5933_v8  ;;  %v2719_v53 = vadd.f32 %v2717_v55, %v2709_v17  ;;  %v2720_v31 = vadd.f32 %v2718_v59, %v2710_v34  ;;  %v2727_v42 = vmul.f32 %v6409_v57, %v6019_v43  ;;  %v2728_v20 = vmul.f32 %v6412_v58, %v6019_v43 }
  0xd9   : > { %v5330_v37 = vpack.c.bf16 %v2510_v41, %v2509_v4  ;;  %v2725_v45 = vadd.f32 %v2723_v61, %v2715_v18  ;;  %v2733_v26 = vmul.f32 %v6406_v56, %v6064_v32  ;;  %v2726_v15 = vadd.f32 %v2724_v11, %v2716_v10 }
  0xda   : > { %v2729_v49 = vadd.f32 %v2727_v42, %v2719_v53  ;;  %v2734_v33 = vmul.f32 %v6423_v12, %v6064_v32  ;;  %v2737_v27 = vmul.f32 %v6426_v25, %v6064_v32  ;;  %v2730_v3 = vadd.f32 %v2728_v20, %v2720_v31 }
  0xdb   : > { %5331 = vmatprep.subr.bf16.mxu0 %v5330_v37  ;;  %v2735_v7 = vadd.f32 %v2733_v26, %v2725_v45  ;;  %v2738_v36 = vmul.f32 %v6435_v13, %v6064_v32  ;;  %v2939_v43 = vmul.f32 %v6362_v29, %v6080_v51  ;;  %v2940_v23 = vmul.f32 %v6365_v30, %v6080_v51 }
  0xdc   : > { %5333 = vmatpush3.bf16.msra.mxu0 %v5330_v37  ;;  %v2736_v35 = vadd.f32 %v2734_v33, %v2726_v15  ;;  %v2739_v16 = vadd.f32 %v2737_v27, %v2729_v49  ;;  %v2941_v6 = vmul.f32 %v6373_v60, %v6080_v51  ;;  %v2942_v38 = vmul.f32 %v6376_v22, %v6080_v51 }
  0xdd   : > { %v2740_v21 = vadd.f32 %v2738_v36, %v2730_v3  ;;  %v2945_v1 = vmul.f32 %v6370_v9, %v6083_v52  ;;  %v2946_v32 = vmul.f32 %v6383_v39, %v6083_v52  ;;  %v2949_v17 = vmul.f32 %v6386_v14, %v6083_v52 }
  0xde   : > { %v2741_v44 = vmax.f32 %v2735_v7, %v2739_v16  ;;  %v2950_v2 = vmul.f32 %v6389_v5, %v6083_v52  ;;  %v2955_v47 = vmul.f32 %v6392_v28, %v6114_v19  ;;  %v2956_v54 = vmul.f32 %v6395_v46, %v6114_v19  ;;  %v6564_v16 = vld [vmem:[%s5882_s11 + $0x60] sm:$0xff] }
  0xdf   : > { %5167 = vmatmul.mubr.msk.f32.vlgmr.msra.gmra.mrb[16].mxu0 %vm546_vm0, %v6077_v48  ;;  %v2742_v51 = vmax.f32 %v2736_v35, %v2740_v21  ;;  %v2947_v34 = vadd.f32 %v2945_v1, %v2939_v43  ;;  %v2948_v40 = vadd.f32 %v2946_v32, %v2940_v23  ;;  %v2951_v55 = vadd.f32 %v2949_v17, %v2941_v6  ;;  %v6570_v23 = vld [vmem:[%s5882_s11 + $0xe0] sm:$0xff]  ;;  %v6577_v21 = vld [vmem:[%s5882_s11 + $0xe8] sm:$0xff]  ;;  %v6589_v17 = vld [vmem:[%s5882_s11 + $0xf8] sm:$0xff] }
  0xe0   : > { %5180 = vmatprep.mubr.msk.f32.mxu0 %vm546_vm0, %v5933_v8  ;;  %v2952_v59 = vadd.f32 %v2950_v2, %v2942_v38  ;;  %v2959_v52 = vmul.f32 %v6409_v57, %v6114_v19  ;;  %v2960_v61 = vmul.f32 %v6412_v58, %v6114_v19  ;;  %v2965_v11 = vmul.f32 %v6406_v56, %v6117_v24  ;;  %v6580_v38 = vld [vmem:[%s5882_s11 + $0x70] sm:$0xff] }
  0xe1   : > { %v5337_v4 = vpack.c.bf16 %v2742_v51, %v2741_v44  ;;  %v2957_v41 = vadd.f32 %v2955_v47, %v2947_v34  ;;  %v2958_v18 = vadd.f32 %v2956_v54, %v2948_v40  ;;  %v2966_v31 = vmul.f32 %v6423_v12, %v6117_v24  ;;  %v6586_v44 = vld [vmem:[%s5882_s11 + $0xf0] sm:$0xff]  ;;  %v6602_v34 = vld [vmem:[%s5882_s11 + $0x160] sm:$0xff]  ;;  %v6605_v40 = vld [vmem:[%s5882_s11 + $0x168] sm:$0xff] }
  0xe2   : > { %v2961_v10 = vadd.f32 %v2959_v52, %v2951_v55  ;;  %v2962_v53 = vadd.f32 %v2960_v61, %v2952_v59  ;;  %v2969_v42 = vmul.f32 %v6426_v25, %v6117_v24  ;;  %v2970_v45 = vmul.f32 %v6435_v13, %v6117_v24  ;;  %v6608_v54 = vld [vmem:[%s5882_s11 + $0x1e0] sm:$0xff] }
  0xe3   : > { %5338 = vmatprep.subr.bf16.mxu0 %v5337_v4  ;;  %v2967_v37 = vadd.f32 %v2965_v11, %v2957_v41  ;;  %v3171_v19 = vmul.f32 %v6362_v29, %v6136_v50  ;;  %v3172_v20 = vmul.f32 %v6365_v30, %v6136_v50  ;;  %v2968_v26 = vadd.f32 %v2966_v31, %v2958_v18  ;;  %v6617_v18 = vld [vmem:[%s5882_s11 + $0x1e8] sm:$0xff]  ;;  %v6620_v11 = vld [vmem:[%s5882_s11 + $0x170] sm:$0xff] }
  0xe4   : > { %5340 = vmatpush3.bf16.msra.mxu0 %v5337_v4  ;;  %v2971_v15 = vadd.f32 %v2969_v42, %v2961_v10  ;;  %v3173_v49 = vmul.f32 %v6373_v60, %v6136_v50  ;;  %v3174_v33 = vmul.f32 %v6376_v22, %v6136_v50  ;;  %v2972_v24 = vadd.f32 %v2970_v45, %v2962_v53  ;;  %v6623_v10 = vld [vmem:[%s5882_s11 + $0x178] sm:$0xff]  ;;  %v6632_v42 = vld [vmem:[%s5882_s11 + $0x1f0] sm:$0xff] }
  0xe5   : > { %v3177_v29 = vmul.f32 %v6370_v9, %v6152_v62  ;;  %v3178_v30 = vmul.f32 %v6383_v39, %v6152_v62  ;;  %v3181_v27 = vmul.f32 %v6386_v14, %v6152_v62  ;;  %v3182_v7 = vmul.f32 %v6389_v5, %v6152_v62 }
  0xe6   : > { %v2973_v3 = vmax.f32 %v2967_v37, %v2971_v15  ;;  %v3187_v60 = vmul.f32 %v6392_v28, %v6155_v63  ;;  %v3188_v50 = vmul.f32 %v6395_v46, %v6155_v63  ;;  %v2974_v9 = vmax.f32 %v2968_v26, %v2972_v24  ;;  %v6635_v37 = vld [vmem:[%s5882_s11 + $0x1f8] sm:$0xff] }
  0xe7   : > { %5181 = vmatmul.mubr.msk.f32.vlgmr.msra.gmra.mrb[18].mxu0 %vm546_vm0, %v6077_v48  ;;  %v3179_v22 = vadd.f32 %v3177_v29, %v3171_v19  ;;  %v3180_v39 = vadd.f32 %v3178_v30, %v3172_v20  ;;  %v3183_v14 = vadd.f32 %v3181_v27, %v3173_v49  ;;  %v3184_v62 = vadd.f32 %v3182_v7, %v3174_v33  ;;  %v6642_v49 = vld [vmem:[%s7541_s2] sm:$0xff] }
  0xe8   : > { %5194 = vmatprep.mubr.msk.f32.mxu0 %vm546_vm0, %v5933_v8  ;;  %v3191_v5 = vmul.f32 %v6409_v57, %v6155_v63  ;;  %v3192_v28 = vmul.f32 %v6412_v58, %v6155_v63  ;;  %v3197_v46 = vmul.f32 %v6406_v56, %v6158_v0  ;;  %v5344_v36 = vpack.c.bf16 %v2974_v9, %v2973_v3  ;;  %v6567_v57 = vld [vmem:[%s5882_s11 + $0x68] sm:$0xff] }
  0xe9   : > { %v3189_v43 = vadd.f32 %v3187_v60, %v3179_v22  ;;  %v3190_v35 = vadd.f32 %v3188_v50, %v3180_v39  ;;  %v3198_v8 = vmul.f32 %v6423_v12, %v6158_v0  ;;  %v3201_v56 = vmul.f32 %v6426_v25, %v6158_v0  ;;  %v6583_v12 = vld [vmem:[%s5882_s11 + $0x78] sm:$0xff]  ;;  %s6665_s11 = sld [smem:[#allocation7 + $0x101]] }
  0xea   : > { %v3193_v63 = vadd.f32 %v3191_v5, %v3183_v14  ;;  %v3194_v58 = vadd.f32 %v3192_v28, %v3184_v62  ;;  %v3202_v6 = vmul.f32 %v6435_v13, %v6158_v0  ;;  %5345 = vmatprep.subr.bf16.mxu0 %v5344_v36  ;;  %v3453_v25 = vstv %s6527_s15  ;;  %s4600_s15 = sld [smem:[#allocation8 + $0x5]] }
  0xeb   : > { %v3199_v1 = vadd.f32 %v3197_v46, %v3189_v43  ;;  %v3200_v32 = vadd.f32 %v3198_v8, %v3190_v35  ;;  %v3459_v2 = vstv %s6529_s24  ;;  %5347 = vmatpush3.bf16.msra.mxu0 %v5344_v36  ;;  %v3454_v47 = vmul.f32 %v6564_v16, %v3453_v25  ;;  %s4615_s24 = sld [smem:[#allocation8 + $0x84]] }
  0xec   : > { %v3203_v0 = vadd.f32 %v3201_v56, %v3193_v63  ;;  %v3204_v13 = vadd.f32 %v3202_v6, %v3194_v58  ;;  %v3455_v51 = vmul.f32 %v6567_v57, %v3453_v25  ;;  %v3456_v55 = vmul.f32 %v6580_v38, %v3453_v25 }
  0xed   : > { %v3457_v59 = vmul.f32 %v6583_v12, %v3453_v25  ;;  %v3460_v52 = vmul.f32 %v6570_v23, %v3459_v2  ;;  %v3461_v61 = vmul.f32 %v6577_v21, %v3459_v2  ;;  %v3464_v53 = vmul.f32 %v6586_v44, %v3459_v2 }
  0xee   : > { %v3205_v4 = vmax.f32 %v3199_v1, %v3203_v0  ;;  %v3206_v41 = vmax.f32 %v3200_v32, %v3204_v13  ;;  %v3465_v31 = vmul.f32 %v6589_v17, %v3459_v2  ;;  %5195 = vmatmul.mubr.msk.f32.vlgmr.msra.gmra.mrb[20].mxu0 %vm546_vm0, %v6077_v48  ;;  %v3469_v20 = vstv %s6549_s9  ;;  %s4630_s9 = sld [smem:[#allocation8 + $0x102]] }
  0xef   : > { %v3462_v45 = vadd.f32 %v3460_v52, %v3454_v47  ;;  %v3463_v19 = vadd.f32 %v3461_v61, %v3455_v51  ;;  %v3479_v26 = vstv %s6551_s22  ;;  %5208 = vmatprep.mubr.msk.f32.mxu0 %vm546_vm0, %v6642_v49  ;;  %v3466_v33 = vadd.f32 %v3464_v53, %v3456_v55  ;;  %s4601_s22 = sld [smem:[#allocation8 + $0x6]] }
  0xf0   : > { %v5351_v15 = vpack.c.bf16 %v3206_v41, %v3205_v4  ;;  %v3467_v24 = vadd.f32 %v3465_v31, %v3457_v59  ;;  %v3470_v29 = vmul.f32 %v6602_v34, %v3469_v20  ;;  %v3471_v30 = vmul.f32 %v6605_v40, %v3469_v20 }
  0xf1   : > { %v3474_v27 = vmul.f32 %v6620_v11, %v3469_v20  ;;  %v3475_v3 = vmul.f32 %v6623_v10, %v3469_v20  ;;  %v3480_v7 = vmul.f32 %v6608_v54, %v3479_v26  ;;  %v3481_v50 = vmul.f32 %v6617_v18, %v3479_v26 }
  0xf2   : > { %5352 = vmatprep.subr.bf16.mxu0 %v5351_v15  ;;  %v3472_v60 = vadd.f32 %v3470_v29, %v3462_v45  ;;  %v3484_v9 = vmul.f32 %v6632_v42, %v3479_v26  ;;  %v3485_v22 = vmul.f32 %v6635_v37, %v3479_v26  ;;  %v3473_v39 = vadd.f32 %v3471_v30, %v3463_v19 }
  0xf3   : > { %5354 = vmatpush3.bf16.msra.mxu0 %v5351_v15  ;;  %v3476_v14 = vadd.f32 %v3474_v27, %v3466_v33  ;;  %v3477_v62 = vadd.f32 %v3475_v3, %v3467_v24  ;;  %v3685_v5 = vstv %s6593_s20  ;;  %v3691_v56 = vstv %s6597_s21  ;;  %s4616_s20 = sld [smem:[#allocation8 + $0x85]]  ;;  %s6955_s21 = sld [smem:[#allocation8 + $0x7]] }
  0xf4   : > { %v3482_v28 = vadd.f32 %v3480_v7, %v3472_v60  ;;  %v3686_v46 = vmul.f32 %v6564_v16, %v3685_v5  ;;  %v3687_v36 = vmul.f32 %v6567_v57, %v3685_v5  ;;  %v3688_v43 = vmul.f32 %v6580_v38, %v3685_v5 }
  0xf5   : > { %v3483_v35 = vadd.f32 %v3481_v50, %v3473_v39  ;;  %v3486_v8 = vadd.f32 %v3484_v9, %v3476_v14  ;;  %v3487_v63 = vadd.f32 %v3485_v22, %v3477_v62  ;;  %v3689_v58 = vmul.f32 %v6583_v12, %v3685_v5 }
  0xf6   : > { %5209 = vmatmul.mubr.msk.f32.vlgmr.msra.gmra.mrb[22].mxu0 %vm546_vm0, %v6077_v48  ;;  %v3701_v6 = vstv %s6599_s13  ;;  %v3711_v1 = vstv %s6614_s4  ;;  %v3917_v32 = vstv %s6627_s10  ;;  %v3692_v0 = vmul.f32 %v6570_v23, %v3691_v56  ;;  %s5676_s13 = smov 120   ;;  %s4611_s4 = sld [smem:[#allocation8 + $0x80]] }
  0xf7   : > { %v3488_v25 = vmax.f32 %v3482_v28, %v3486_v8  ;;  %v3489_v2 = vmax.f32 %v3483_v35, %v3487_v63  ;;  %5222 = vmatprep.mubr.msk.f32.mxu0 %vm546_vm0, %v6642_v49  ;;  %v3693_v13 = vmul.f32 %v6577_v21, %v3691_v56  ;;  %v3696_v47 = vmul.f32 %v6586_v44, %v3691_v56  ;;  %s4612_s10 = sld [smem:[#allocation8 + $0x81]] }
  0xf8   : > { %v3697_v51 = vmul.f32 %v6589_v17, %v3691_v56  ;;  %v3702_v55 = vmul.f32 %v6602_v34, %v3701_v6  ;;  %v3703_v59 = vmul.f32 %v6605_v40, %v3701_v6  ;;  %v3694_v61 = vadd.f32 %v3692_v0, %v3686_v46 }
  0xf9   : > { %v5358_v52 = vpack.c.bf16 %v3489_v2, %v3488_v25  ;;  %v3695_v4 = vadd.f32 %v3693_v13, %v3687_v36  ;;  %v3706_v41 = vmul.f32 %v6620_v11, %v3701_v6  ;;  %v3698_v53 = vadd.f32 %v3696_v47, %v3688_v43 }
  0xfa   : > { %v3699_v31 = vadd.f32 %v3697_v51, %v3689_v58  ;;  %v3707_v45 = vmul.f32 %v6623_v10, %v3701_v6  ;;  %v3712_v19 = vmul.f32 %v6608_v54, %v3711_v1  ;;  %v3704_v20 = vadd.f32 %v3702_v55, %v3694_v61 }
  0xfb   : > { %5359 = vmatprep.subr.bf16.mxu0 %v5358_v52  ;;  %v3705_v26 = vadd.f32 %v3703_v59, %v3695_v4  ;;  %v3713_v15 = vmul.f32 %v6617_v18, %v3711_v1  ;;  %v3716_v33 = vmul.f32 %v6632_v42, %v3711_v1  ;;  %v3708_v24 = vadd.f32 %v3706_v41, %v3698_v53 }
  0xfc   : > { %5361 = vmatpush3.bf16.msra.mxu0 %v5358_v52  ;;  %v3709_v29 = vadd.f32 %v3707_v45, %v3699_v31  ;;  %v3717_v30 = vmul.f32 %v6635_v37, %v3711_v1  ;;  %v3918_v27 = vmul.f32 %v6564_v16, %v3917_v32  ;;  %v3714_v3 = vadd.f32 %v3712_v19, %v3704_v20 }
  0xfd   : > { %v3715_v7 = vadd.f32 %v3713_v15, %v3705_v26  ;;  %v3919_v60 = vmul.f32 %v6567_v57, %v3917_v32  ;;  %v3920_v50 = vmul.f32 %v6580_v38, %v3917_v32  ;;  %v3718_v9 = vadd.f32 %v3716_v33, %v3708_v24 }
  0xfe   : > { %v3719_v22 = vadd.f32 %v3717_v30, %v3709_v29  ;;  %v3921_v39 = vmul.f32 %v6583_v12, %v3917_v32  ;;  %v3923_v14 = vstv %s6665_s11  ;;  %v3933_v35 = vstv %s6675_s6  ;;  %v5532_v29 = vld [vmem:[%s7541_s2 + $0x8] sm:$0xff]  ;;  %s707_s11 = sld [smem:[#allocation8]]  ;;  %s4596_s6 = sld [smem:[#allocation8 + $0x1]] }
  0xff   : > { %5223 = vmatmul.mubr.msk.f32.vlgmr.msra.gmra.mrb[24].mxu0 %vm546_vm0, %v6077_v48  ;;  %v3924_v62 = vmul.f32 %v6570_v23, %v3923_v14  ;;  %v3925_v5 = vmul.f32 %v6577_v21, %v3923_v14  ;;  %v3928_v28 = vmul.f32 %v6586_v44, %v3923_v14  ;;  %v3929_v46 = vmul.f32 %v6589_v17, %v3923_v14  ;;  %v468_v14 = vld [vmem:[%s7542_s3] sm:$0xff] }
 0x100   : > { %v3720_v36 = vmax.f32 %v3714_v3, %v3718_v9  ;;  %v3721_v43 = vmax.f32 %v3715_v7, %v3719_v22  ;;  %5236 = vmatprep.mubr.msk.f32.mxu0 %vm546_vm0, %v6642_v49  ;;  %v3943_v8 = vstv %s6677_s17  ;;  %v3934_v1 = vmul.f32 %v6602_v34, %v3933_v35  ;;  %s4597_s17 = sld [smem:[#allocation8 + $0x2]] }
 0x101   : > { %v3926_v63 = vadd.f32 %v3924_v62, %v3918_v27  ;;  %v3927_v58 = vadd.f32 %v3925_v5, %v3919_v60  ;;  %v3930_v56 = vadd.f32 %v3928_v28, %v3920_v50  ;;  %v3931_v6 = vadd.f32 %v3929_v46, %v3921_v39 }
 0x102   : > { %v5365_v48 = vpack.c.bf16 %v3721_v43, %v3720_v36  ;;  %v3935_v32 = vmul.f32 %v6605_v40, %v3933_v35  ;;  %v3938_v25 = vmul.f32 %v6620_v11, %v3933_v35  ;;  %v3939_v2 = vmul.f32 %v6623_v10, %v3933_v35 }
 0x103   : > { %v3944_v0 = vmul.f32 %v6608_v54, %v3943_v8  ;;  %v3945_v13 = vmul.f32 %v6617_v18, %v3943_v8  ;;  %v3948_v47 = vmul.f32 %v6632_v42, %v3943_v8  ;;  %v3936_v51 = vadd.f32 %v3934_v1, %v3926_v63 }
 0x104   : > { %5366 = vmatprep.subr.bf16.mxu0 %v5365_v48  ;;  %v3937_v55 = vadd.f32 %v3935_v32, %v3927_v58  ;;  %v3940_v59 = vadd.f32 %v3938_v25, %v3930_v56  ;;  %v3949_v52 = vmul.f32 %v6635_v37, %v3943_v8  ;;  %v3941_v61 = vadd.f32 %v3939_v2, %v3931_v6 }
 0x105   : > { %5368 = vmatpush3.bf16.msra.mxu0 %v5365_v48  ;;  %v4149_v4 = vstv %s6686_s14  ;;  %v4155_v41 = vstv %s6690_s0  ;;  %v4165_v53 = vstv %s6692_s16  ;;  %v3946_v31 = vadd.f32 %v3944_v0, %v3936_v51  ;;  %s4598_s14 = sld [smem:[#allocation8 + $0x3]]  ;;  %s4613_s0 = sld [smem:[#allocation8 + $0x82]] }
 0x106   : > { %v3947_v45 = vadd.f32 %v3945_v13, %v3937_v55  ;;  %v3950_v19 = vadd.f32 %v3948_v47, %v3940_v59  ;;  %v4150_v20 = vmul.f32 %v6564_v16, %v4149_v4  ;;  %v3951_v26 = vadd.f32 %v3949_v52, %v3941_v61  ;;  %s4599_s16 = sld [smem:[#allocation8 + $0x4]] }
 0x107   : > { %v4151_v15 = vmul.f32 %v6567_v57, %v4149_v4  ;;  %v4152_v33 = vmul.f32 %v6580_v38, %v4149_v4  ;;  %v4153_v24 = vmul.f32 %v6583_v12, %v4149_v4  ;;  %v4156_v27 = vmul.f32 %v6570_v23, %v4155_v41 }
 0x108   : > { %5237 = vmatmul.mubr.msk.f32.vlgmr.msra.gmra.mrb[26].mxu0 %vm546_vm0, %v5532_v29  ;;  %v3952_v30 = vmax.f32 %v3946_v31, %v3950_v19  ;;  %v4157_v3 = vmul.f32 %v6577_v21, %v4155_v41  ;;  %v4160_v16 = vmul.f32 %v6586_v44, %v4155_v41  ;;  %v3953_v7 = vmax.f32 %v3947_v45, %v3951_v26 }
 0x109   : > { %5250 = vmatprep.mubr.msk.f32.mxu0 %vm546_vm0, %v6642_v49  ;;  %v4161_v57 = vmul.f32 %v6589_v17, %v4155_v41  ;;  %v4166_v38 = vmul.f32 %v6602_v34, %v4165_v53  ;;  %v4167_v12 = vmul.f32 %v6605_v40, %v4165_v53  ;;  %v4158_v60 = vadd.f32 %v4156_v27, %v4150_v20  ;;  %v469_v17 = vld [vmem:[%s7542_s3 + $0x8] sm:$0xff] }
 0x10a   : > { %v4159_v50 = vadd.f32 %v4157_v3, %v4151_v15  ;;  %v4162_v9 = vadd.f32 %v4160_v16, %v4152_v33  ;;  %v4170_v22 = vmul.f32 %v6620_v11, %v4165_v53  ;;  %v5372_v23 = vpack.c.bf16 %v3953_v7, %v3952_v30 }
 0x10b   : > { %v4163_v39 = vadd.f32 %v4161_v57, %v4153_v24  ;;  %v4171_v21 = vmul.f32 %v6623_v10, %v4165_v53  ;;  %v4175_v44 = vstv %s6713_s19  ;;  %v4168_v34 = vadd.f32 %v4166_v38, %v4158_v60  ;;  %s4614_s19 = sld [smem:[#allocation8 + $0x83]] }
 0x10c   : > { %v4169_v40 = vadd.f32 %v4167_v12, %v4159_v50  ;;  %v4172_v62 = vadd.f32 %v4170_v22, %v4162_v9  ;;  %v4176_v5 = vmul.f32 %v6608_v54, %v4175_v44  ;;  %5373 = vmatprep.subr.bf16.mxu0 %v5372_v23  ;;  %v4177_v28 = vmul.f32 %v6617_v18, %v4175_v44 }
 0x10d   : > { %v4173_v11 = vadd.f32 %v4171_v21, %v4163_v39  ;;  %v4180_v10 = vmul.f32 %v6632_v42, %v4175_v44  ;;  %v4181_v46 = vmul.f32 %v6635_v37, %v4175_v44  ;;  %5375 = vmatpush3.bf16.msra.mxu0 %v5372_v23  ;;  %v6748_v43 = vpack.c.bf16 %v469_v17, %v468_v14 }
 0x10e   : > { %v4178_v36 = vadd.f32 %v4176_v5, %v4168_v34  ;;  %v4179_v35 = vadd.f32 %v4177_v28, %v4169_v40  ;;  %v5673_v58 = vmov 0.0|0.0   ;;  %v5675_v54 = vmov 0.0  }
 0x10f   : > { %v4182_v8 = vadd.f32 %v4180_v10, %v4172_v62  ;;  %v4183_v63 = vadd.f32 %v4181_v46, %v4173_v11  ;;  %5278 = vmatprep.subr.bf16.mxu1 %v5673_v58  ;;  %5061 = vmatprep.mubr.msk.f32.mxu1 %vm5674_vm1, %v5675_v54 }
 0x110   : > { %5280 = vmatpush3.bf16.msra.mxu1 %v6748_v43  ;;  %5251 = vmatmul.mubr.msk.f32.vlgmr.msra.gmra.mrb[28].mxu0 %vm546_vm0, %v5532_v29 }
 0x111   : > { %v4184_v18 = vmax.f32 %v4178_v36, %v4182_v8  ;;  %v4185_v42 = vmax.f32 %v4179_v35, %v4183_v63  ;;  %5285 = vmatprep.subr.bf16.mxu1 %v5673_v58  ;;  %5264 = vmatprep.mubr.msk.f32.mxu0 %vm546_vm0, %v6642_v49 }
 0x113   : > { %v5379_v37 = vpack.c.bf16 %v4185_v42, %v4184_v18 }
 0x115   : > { %5380 = vmatprep.subr.bf16.mxu0 %v5379_v37 }
 0x116   : > { %5382 = vmatpush3.bf16.msra.mxu0 %v5379_v37 }
 0x119   : > { %5265 = vmatmul.mubr.msk.f32.vlgmr.msra.gmra.mrb[30].mxu0 %vm546_vm0, %v5532_v29 }
 0x172   : > { %v5056_v56 = vpop.f32.mrb[0].mxu0 }
 0x173   : > { %v619_v6 = vpop.f32.mrb[1].mxu0 }
 0x174   : > { %v628_v48 = vmax.f32 %v619_v6, %v5056_v56 }
 0x176   : > { %5062 = vmatmul.mubr.msk.f32.vlgmr.msra.gmra.mrb[0].mxu1 %vm546_vm0, %v628_v48  ;;  %v6870_v48 = vstv %s4611_s4  ;;  %s6957_s4 = sld [smem:[#allocation8 + $0x103]] }
 0x177   : > { %5287 = vmatpush3.bf16.msra.mxu1 %v6748_v43  ;;  %5075 = vmatprep.mubr.msk.f32.mxu1 %vm5674_vm1, %v5675_v54 }
 0x178   : > { %5292 = vmatprep.subr.bf16.mxu1 %v5673_v58 }
 0x17a   : > { %v5070_v1 = vpop.f32.mrb[2].mxu0 }
 0x17b   : > { %v851_v32 = vpop.f32.mrb[3].mxu0 }
 0x17c   : > { %v860_v49 = vmax.f32 %v851_v32, %v5070_v1  ;;  %v6872_v1 = vstv %s4612_s10  ;;  %v6875_v32 = vld [vmem:[%s5888_s5 + $0x10] sm:$0xff]  ;;  %s6966_s10 = sld [smem:[#allocation8 + $0x180]] }
 0x17e   : > { %5076 = vmatmul.mubr.msk.f32.vlgmr.msra.gmra.mrb[2].mxu1 %vm546_vm0, %v860_v49  ;;  %v6878_v49 = vld [vmem:[%s5888_s5 + $0x30] sm:$0xff] }
 0x17f   : > { %5294 = vmatpush3.bf16.msra.mxu1 %v6748_v43  ;;  %5089 = vmatprep.mubr.msk.f32.mxu1 %vm5674_vm1, %v5675_v54 }
 0x180   : > { %5299 = vmatprep.subr.bf16.mxu1 %v5673_v58 }
 0x183   : > { %v5084_v25 = vpop.f32.mrb[4].mxu0 }
 0x184   : > { %v1083_v2 = vpop.f32.mrb[5].mxu0 }
 0x185   : > { %v1092_v0 = vmax.f32 %v1083_v2, %v5084_v25  ;;  %v2899_v2 = vmul.f32 %v6875_v32, %v6870_v48 }
 0x187   : > { %5090 = vmatmul.mubr.msk.f32.vlgmr.msra.gmra.mrb[4].mxu1 %vm546_vm0, %v1092_v0  ;;  %v2902_v0 = vmul.f32 %v6878_v49, %v6872_v1 }
 0x188   : > { %5301 = vmatpush3.bf16.msra.mxu1 %v6748_v43  ;;  %5103 = vmatprep.mubr.msk.f32.mxu1 %vm5674_vm1, %v5675_v54 }
 0x189   : > { %5306 = vmatprep.subr.bf16.mxu1 %v5673_v58 }
 0x18c   : > { %v5098_v13 = vpop.f32.mrb[6].mxu0 }
 0x18d   : > { %v1315_v47 = vpop.f32.mrb[7].mxu0 }
 0x18e   : > { %v1324_v51 = vmax.f32 %v1315_v47, %v5098_v13  ;;  %v6888_v47 = vadd.f32 %v2902_v0, %v2899_v2  ;;  %v6987_v2 = vld [vmem:[%s5888_s5 + $0xc0] sm:$0xff]  ;;  %v6989_v0 = vstv %s4601_s22  ;;  %s7069_s22 = sld [smem:[#allocation8 + $0x185]] }
 0x190   : > { %5104 = vmatmul.mubr.msk.f32.vlgmr.msra.gmra.mrb[6].mxu1 %vm546_vm0, %v1324_v51  ;;  %7597 = vst [vmem:[#allocation27_spill] sm:$0xff] %v6888_v47  ;;  %v6890_v51 = vstv %s4628_s18  ;;  %s6968_s18 = sld [smem:[#allocation8 + $0x181]] }
 0x191   : > { %5308 = vmatpush3.bf16.msra.mxu1 %v6748_v43  ;;  %5117 = vmatprep.mubr.msk.f32.mxu1 %vm5674_vm1, %v5675_v54 }
 0x192   : > { %5313 = vmatprep.subr.bf16.mxu1 %v5673_v58 }
 0x193   : > { %v5112_v55 = vpop.f32.mrb[8].mxu0 }
 0x194   : > { %v1598_v59 = vpop.f32.mrb[9].mxu0 }
 0x195   : > { %v1607_v52 = vmax.f32 %v1598_v59, %v5112_v55  ;;  %v6892_v55 = vstv %s4629_s12  ;;  %v3131_v59 = vmul.f32 %v6875_v32, %v6890_v51  ;;  %s6974_s12 = sld [smem:[#allocation8 + $0x86]] }
 0x197   : > { %5118 = vmatmul.mubr.msk.f32.vlgmr.msra.gmra.mrb[8].mxu1 %vm546_vm0, %v1607_v52  ;;  %v3134_v52 = vmul.f32 %v6878_v49, %v6892_v55 }
 0x198   : > { %5315 = vmatpush3.bf16.msra.mxu1 %v6748_v43  ;;  %5131 = vmatprep.mubr.msk.f32.mxu1 %vm5674_vm1, %v5675_v54 }
 0x199   : > { %5320 = vmatprep.subr.bf16.mxu1 %v5673_v58 }
 0x19b   : > { %v5126_v61 = vpop.f32.mrb[10].mxu0 }
 0x19c   : > { %v1830_v4 = vpop.f32.mrb[11].mxu0 }
 0x19d   : > { %v1839_v41 = vmax.f32 %v1830_v4, %v5126_v61  ;;  %v6898_v61 = vadd.f32 %v3134_v52, %v3131_v59 }
 0x19f   : > { %5132 = vmatmul.mubr.msk.f32.vlgmr.msra.gmra.mrb[10].mxu1 %vm546_vm0, %v1839_v41  ;;  %7598 = vst [vmem:[#allocation28_spill] sm:$0xff] %v6898_v61 }
 0x1a0   : > { %5322 = vmatpush3.bf16.msra.mxu1 %v6748_v43  ;;  %5145 = vmatprep.mubr.msk.f32.mxu1 %vm5674_vm1, %v5675_v54 }
 0x1a1   : > { %5327 = vmatprep.subr.bf16.mxu1 %v5673_v58 }
 0x1a2   : > { %v5140_v53 = vpop.f32.mrb[12].mxu0 }
 0x1a3   : > { %v2062_v31 = vpop.f32.mrb[13].mxu0 }
 0x1a4   : > { %v2071_v45 = vmax.f32 %v2062_v31, %v5140_v53  ;;  %v6905_v53 = vld [vmem:[%s5888_s5] sm:$0xff] }
 0x1a5   : > { %v6908_v31 = vld [vmem:[%s5888_s5 + $0x20] sm:$0xff] }
 0x1a6   : > { %5146 = vmatmul.mubr.msk.f32.vlgmr.msra.gmra.mrb[12].mxu1 %vm546_vm0, %v2071_v45  ;;  %v6910_v45 = vstv %s707_s11  ;;  %s4632_s11 = sld [smem:[#allocation8 + $0x104]] }
 0x1a7   : > { %5329 = vmatpush3.bf16.msra.mxu1 %v6748_v43  ;;  %5159 = vmatprep.mubr.msk.f32.mxu1 %vm5674_vm1, %v5675_v54 }
 0x1a8   : > { %5334 = vmatprep.subr.bf16.mxu1 %v5673_v58 }
 0x1aa   : > { %v5154_v19 = vpop.f32.mrb[14].mxu0 }
 0x1ab   : > { %v2294_v20 = vpop.f32.mrb[15].mxu0 }
 0x1ac   : > { %v2303_v26 = vmax.f32 %v2294_v20, %v5154_v19  ;;  %v6912_v19 = vstv %s4596_s6  ;;  %s4647_s6 = sld [smem:[#allocation8 + $0x182]] }
 0x1ae   : > { %5160 = vmatmul.mubr.msk.f32.vlgmr.msra.gmra.mrb[14].mxu1 %vm546_vm0, %v2303_v26 }
 0x1af   : > { %5336 = vmatpush3.bf16.msra.mxu1 %v6748_v43  ;;  %5173 = vmatprep.mubr.msk.f32.mxu1 %vm5674_vm1, %v5675_v54 }
 0x1b0   : > { %5341 = vmatprep.subr.bf16.mxu1 %v5673_v58 }
 0x1b2   : > { %v5168_v15 = vpop.f32.mrb[16].mxu0 }
 0x1b3   : > { %v2577_v33 = vpop.f32.mrb[17].mxu0 }
 0x1b4   : > { %v2586_v24 = vmax.f32 %v2577_v33, %v5168_v15  ;;  %v709_v15 = vmul.f32 %v6910_v45, %v6905_v53  ;;  %v712_v33 = vmul.f32 %v6908_v31, %v6912_v19 }
 0x1b6   : > { %5174 = vmatmul.mubr.msk.f32.vlgmr.msra.gmra.mrb[16].mxu1 %vm546_vm0, %v2586_v24  ;;  %v6921_v24 = vld [vmem:[%s5888_s5 + $0x40] sm:$0xff] }
 0x1b7   : > { %5343 = vmatpush3.bf16.msra.mxu1 %v6748_v43  ;;  %5187 = vmatprep.mubr.msk.f32.mxu1 %vm5674_vm1, %v5675_v54 }
 0x1b8   : > { %5348 = vmatprep.subr.bf16.mxu1 %v5673_v58 }
 0x1ba   : > { %v5182_v29 = vpop.f32.mrb[18].mxu0 }
 0x1bb   : > { %v2809_v30 = vpop.f32.mrb[19].mxu0 }
 0x1bc   : > { %v2818_v27 = vmax.f32 %v2809_v30, %v5182_v29  ;;  %v6923_v29 = vstv %s4597_s17  ;;  %v713_v30 = vadd.f32 %v712_v33, %v709_v15  ;;  %s6997_s17 = sld [smem:[#allocation8 + $0x87]]  ;;  %v7004_v33 = vld [vmem:[%s5888_s5 + $0xe0] sm:$0xff] }
 0x1be   : > { %5188 = vmatmul.mubr.msk.f32.vlgmr.msra.gmra.mrb[18].mxu1 %vm546_vm0, %v2818_v27  ;;  %v716_v27 = vmul.f32 %v6921_v24, %v6923_v29 }
 0x1bf   : > { %5350 = vmatpush3.bf16.msra.mxu1 %v6748_v43  ;;  %5201 = vmatprep.mubr.msk.f32.mxu1 %vm5674_vm1, %v5675_v54 }
 0x1c0   : > { %5355 = vmatprep.subr.bf16.mxu1 %v5673_v58 }
 0x1c1   : > { %v5196_v3 = vpop.f32.mrb[20].mxu0 }
 0x1c2   : > { %v3041_v16 = vpop.f32.mrb[21].mxu0 }
 0x1c3   : > { %v3050_v7 = vmax.f32 %v3041_v16, %v5196_v3  ;;  %v6928_v3 = vld [vmem:[%s5888_s5 + $0x60] sm:$0xff]  ;;  %v6930_v16 = vstv %s4598_s14  ;;  %s7001_s14 = sld [smem:[#allocation8 + $0x105]] }
 0x1c4   : > { %7601 = vst [vmem:[#allocation31_spill] sm:$0xff] %v6930_v16 }
 0x1c5   : > { %5202 = vmatmul.mubr.msk.f32.vlgmr.msra.gmra.mrb[20].mxu1 %vm546_vm0, %v3050_v7  ;;  %v941_v7 = vmul.f32 %v6870_v48, %v6905_v53 }
 0x1c6   : > { %5357 = vmatpush3.bf16.msra.mxu1 %v6748_v43  ;;  %5215 = vmatprep.mubr.msk.f32.mxu1 %vm5674_vm1, %v5675_v54 }
 0x1c7   : > { %5362 = vmatprep.subr.bf16.mxu1 %v5673_v58 }
 0x1c9   : > { %v5210_v57 = vpop.f32.mrb[22].mxu0 }
 0x1ca   : > { %v3273_v38 = vpop.f32.mrb[23].mxu0 }
 0x1cb   : > { %v3282_v12 = vmax.f32 %v3273_v38, %v5210_v57  ;;  %v944_v57 = vmul.f32 %v6908_v31, %v6872_v1  ;;  %v6936_v38 = vstv %s4613_s0  ;;  %s7020_s0 = sld [smem:[#allocation8 + $0x183]] }
 0x1cd   : > { %5216 = vmatmul.mubr.msk.f32.vlgmr.msra.gmra.mrb[22].mxu1 %vm546_vm0, %v3282_v12 }
 0x1ce   : > { %5364 = vmatpush3.bf16.msra.mxu1 %v6748_v43  ;;  %5229 = vmatprep.mubr.msk.f32.mxu1 %vm5674_vm1, %v5675_v54 }
 0x1cf   : > { %5369 = vmatprep.subr.bf16.mxu1 %v5673_v58 }
 0x1d2   : > { %v5224_v60 = vpop.f32.mrb[24].mxu0 }
 0x1d3   : > { %v3556_v50 = vpop.f32.mrb[25].mxu0 }
 0x1d4   : > { %v3565_v9 = vmax.f32 %v3556_v50, %v5224_v60  ;;  %v717_v60 = vadd.f32 %v716_v27, %v713_v30  ;;  %v720_v50 = vmul.f32 %v6928_v3, %v6930_v16  ;;  %v732_v27 = vmul.f32 %v6987_v2, %v6989_v0 }
 0x1d6   : > { %5230 = vmatmul.mubr.msk.f32.vlgmr.msra.gmra.mrb[24].mxu1 %vm546_vm0, %v3565_v9 }
 0x1d7   : > { %5371 = vmatpush3.bf16.msra.mxu1 %v6748_v43  ;;  %5243 = vmatprep.mubr.msk.f32.mxu1 %vm5674_vm1, %v5675_v54 }
 0x1d8   : > { %5376 = vmatprep.subr.bf16.mxu1 %v5673_v58 }
 0x1db   : > { %v5238_v22 = vpop.f32.mrb[26].mxu0 }
 0x1dc   : > { %v3788_v23 = vpop.f32.mrb[27].mxu0 }
 0x1dd   : > { %v3797_v39 = vmax.f32 %v3788_v23, %v5238_v22  ;;  %v6945_v22 = vld [vmem:[%s5888_s5 + $0x80] sm:$0xff]  ;;  %v6947_v23 = vstv %s4599_s16  ;;  %s7033_s16 = sld [smem:[#allocation8 + $0x106]] }
 0x1df   : > { %5244 = vmatmul.mubr.msk.f32.vlgmr.msra.gmra.mrb[26].mxu1 %vm546_vm0, %v3797_v39  ;;  %v945_v39 = vadd.f32 %v944_v57, %v941_v7  ;;  %v7009_v7 = vstv %s6955_s21  ;;  %v7012_v57 = vstv %s6957_s4  ;;  %s7091_s21 = sld [smem:[#allocation10 + $0x1]]  ;;  %s7096_s4 = sld [smem:[#allocation8 + $0x186]] }
 0x1e0   : > { %5378 = vmatpush3.bf16.msra.mxu1 %v6748_v43  ;;  %5257 = vmatprep.mubr.msk.f32.mxu1 %vm5674_vm1, %v5675_v54 }
 0x1e1   : > { %5383 = vmatprep.subr.bf16.mxu1 %v5673_v58 }
 0x1e3   : > { %v5252_v21 = vpop.f32.mrb[28].mxu0 }
 0x1e4   : > { %v4020_v44 = vpop.f32.mrb[29].mxu0 }
 0x1e5   : > { %v4029_v14 = vmax.f32 %v4020_v44, %v5252_v21  ;;  %v948_v21 = vmul.f32 %v6921_v24, %v6936_v38  ;;  %v6951_v44 = vstv %s4614_s19  ;;  %s7039_s19 = sld [smem:[#allocation10 + $0x80]] }
 0x1e7   : > { %5258 = vmatmul.mubr.msk.f32.vlgmr.msra.gmra.mrb[28].mxu1 %vm546_vm0, %v4029_v14  ;;  %v721_v14 = vadd.f32 %v720_v50, %v717_v60  ;;  %v7015_v60 = vstv %s6966_s10  ;;  %v7018_v50 = vstv %s6968_s18  ;;  %s7131_s10 = sld [smem:[#allocation10 + $0x82]] }
 0x1e8   : > { %5385 = vmatpush3.bf16.msra.mxu1 %v6748_v43  ;;  %5271 = vmatprep.mubr.msk.f32.mxu1 %vm5674_vm1, %v5675_v54  ;;  %s4637_s18 = sld [smem:[#allocation10 + $0x2]] }
 0x1ec   : > { %v5266_v17 = vpop.f32.mrb[30].mxu0 }
 0x1ed   : > { %v4252_v34 = vpop.f32.mrb[31].mxu0 }
 0x1ee   : > { %v4261_v40 = vmax.f32 %v4252_v34, %v5266_v17  ;;  %v724_v17 = vmul.f32 %v6945_v22, %v6947_v23  ;;  %v6962_v34 = vld [vmem:[%s5888_s5 + $0xa0] sm:$0xff] }
 0x1f0   : > { %5272 = vmatmul.mubr.msk.f32.vlgmr.msra.gmra.mrb[30].mxu1 %vm546_vm0, %v4261_v40  ;;  %v6964_v40 = vstv %s4600_s15  ;;  %s7043_s15 = sld [smem:[#allocation8 + $0x184]] }
 0x249   : > { %v6834_v62 = vpop.f32.mrb[0].mxu1 }
 0x24a   : > { %703 = vrot.lane.b32.xlu0 %v6834_v62, %s5676_s13  ;;  %v5063_v5 = vpop.f32.mrb[1].mxu1 }
 0x24b   : > { %v949_v5 = vadd.f32 %v948_v21, %v945_v39  ;;  %v736_v21 = vmul.f32 %v7004_v33, %v7009_v7 }
 0x251   : > { %v6838_v11 = vpop.f32.mrb[2].mxu1 }
 0x252   : > { %935 = vrot.lane.b32.xlu0 %v6838_v11, %s5676_s13  ;;  %v5077_v28 = vpop.f32.mrb[3].mxu1 }
 0x253   : > { %v952_v28 = vmul.f32 %v6928_v3, %v6951_v44 }
 0x255   : > { %v953_v59 = vadd.f32 %v952_v28, %v949_v5  ;;  %v1184_v5 = vmul.f32 %v6928_v3, %v7012_v57 }
 0x25a   : > { %v6842_v10 = vpop.f32.mrb[4].mxu1 }
 0x25b   : > { %1167 = vrot.lane.b32.xlu0 %v6842_v10, %s5676_s13  ;;  %v5091_v46 = vpop.f32.mrb[5].mxu1 }
 0x25c   : > { %v6972_v46 = vstv %s4615_s24  ;;  %s7059_s24 = sld [smem:[#allocation8 + $0x107]] }
 0x25d   : > { %7603 = vst [vmem:[#allocation33_spill] sm:$0xff] %v6972_v46  ;;  %v956_v52 = vmul.f32 %v6945_v22, %v6972_v46 }
 0x263   : > { %v6846_v36 = vpop.f32.mrb[6].mxu1 }
 0x264   : > { %1399 = vrot.lane.b32.xlu0 %v6846_v36, %s5676_s13  ;;  %v5105_v43 = vpop.f32.mrb[7].mxu1 }
 0x265   : > { %v1173_v43 = vmul.f32 %v6890_v51, %v6905_v53 }
 0x26a   : > { %v6850_v35 = vpop.f32.mrb[8].mxu1 }
 0x26b   : > { %1682 = vrot.lane.b32.xlu1 %v6850_v35, %s5676_s13  ;;  %v5119_v8 = vpop.f32.mrb[9].mxu1 }
 0x26c   : > { %v1176_v8 = vmul.f32 %v6908_v31, %v6892_v55 }
 0x272   : > { %v6854_v63 = vpop.f32.mrb[10].mxu1 }
 0x273   : > { %1914 = vrot.lane.b32.xlu1 %v6854_v63, %s5676_s13  ;;  %v5133_v58 = vpop.f32.mrb[11].mxu1 }
 0x274   : > { %v725_v58 = vadd.f32 %v724_v17, %v721_v14  ;;  %v7027_v14 = vstv %s6974_s12  ;;  %s4653_s12 = sld [smem:[#allocation10 + $0x83]] }
 0x279   : > { %v6858_v54 = vpop.f32.mrb[12].mxu1 }
 0x27a   : > { %7593 = vst [vmem:[#allocation23_spill] sm:$0xff] %v6858_v54  ;;  %2146 = vrot.lane.b32.xlu1 %v6858_v54, %s5676_s13  ;;  %v5147_v18 = vpop.f32.mrb[13].mxu1 }
 0x27b   : > { %v728_v18 = vmul.f32 %v6962_v34, %v6964_v40 }
 0x27d   : > { %v729_v30 = vadd.f32 %v728_v18, %v725_v58  ;;  %v1408_v58 = vmul.f32 %v6908_v31, %v7018_v50  ;;  %v7041_v18 = vstv %s4647_s6  ;;  %v7052_v31 = vstv %s6997_s17  ;;  %s4655_s6 = sld [smem:[#allocation10 + $0x100]]  ;;  %s4566_s17 = sshll.u32 %s5644_s28, 1 }
 0x27f   : > { %v733_v28 = vadd.f32 %v732_v27, %v729_v30  ;;  %v7057_v27 = vstv %s7001_s14  ;;  %s7265_s14 = sadd.s32 %s5640_s27, %s4566_s17  ;;  %s7420_s17 = sld [smem:[#allocation8 + $0x104]] }
 0x280   : > { %s4567_s28 = sshll.u32 %s7265_s14, 2  ;;  %s7422_s14 = sld [smem:[#allocation8 + $0x182]] }
 0x281   : > { %v6862_v42 = vpop.f32.mrb[14].mxu1  ;;  %p459_p1 = scmp.lt.s32.totalorder %s4567_s28, 15 }
 0x282   : > { %7594 = vst [vmem:[#allocation24_spill] sm:$0xff] %v6862_v42  ;;  %2378 = vrot.lane.b32.xlu1 %v6862_v42, %s5676_s13  ;;  %v5161_v37 = vpop.f32.mrb[15].mxu1 }
 0x283   : > { %v6982_v37 = vstv %s4630_s9  ;;  %s7064_s9 = sld [smem:[#allocation10 + $0x81]]  ;;  %s7645_s28 = smov (!%p459_p1, %s4567_s28), 15 }
 0x284   : > { %v1180_v15 = vmul.f32 %v6921_v24, %v6982_v37  ;;  %s4568_s27 = sshll.u32 %s7645_s28, 3  ;;  %s7429_s28 = sld [smem:[#allocation8 + $0x87]] }
 0x289   : > { %v6866_v56 = vpop.f32.mrb[16].mxu1  ;;  %v7119_v42 = vstv %s7064_s9  ;;  %s7336_s9 = sld [smem:[#allocation8 + $0x82]] }
 0x28a   : > { %7595 = vst [vmem:[#allocation25_spill] sm:$0xff] %v6866_v56  ;;  %2661 = vrot.lane.b32.xlu0 %v6866_v56, %s5676_s13  ;;  %v5175_v6 = vpop.f32.mrb[17].mxu1  ;;  %7609 = vst [vmem:[#allocation39_spill] sm:$0xff] %v7119_v42 }
 0x291   : > { %v6880_v25 = vpop.f32.mrb[18].mxu1 }
 0x292   : > { %7596 = vst [vmem:[#allocation26_spill] sm:$0xff] %v6880_v25  ;;  %2893 = vrot.lane.b32.xlu1 %v6880_v25, %s5676_s13  ;;  %v5189_v13 = vpop.f32.mrb[19].mxu1  ;;  %v7112_v25 = vstv %s7059_s24  ;;  %s7321_s24 = sld [smem:[#allocation8 + $0x81]] }
 0x293   : > { %7608 = vst [vmem:[#allocation38_spill] sm:$0xff] %v7112_v25 }
 0x298   : > { %v6900_v4 = vpop.f32.mrb[20].mxu1 }
 0x299   : > { %7599 = vst [vmem:[#allocation29_spill] sm:$0xff] %v6900_v4  ;;  %3125 = vrot.lane.b32.xlu0 %v6900_v4, %s5676_s13  ;;  %v5203_v41 = vpop.f32.mrb[21].mxu1 }
 0x29a   : > { %v6995_v41 = vstv %s4616_s20  ;;  %s7071_s20 = sld [smem:[#allocation10]] }
 0x29b   : > { %7605 = vst [vmem:[#allocation35_spill] sm:$0xff] %v6995_v41  ;;  %v960_v39 = vmul.f32 %v6962_v34, %v6995_v41 }
 0x2a0   : > { %v6914_v20 = vpop.f32.mrb[22].mxu1 }
 0x2a1   : > { %7600 = vst [vmem:[#allocation30_spill] sm:$0xff] %v6914_v20  ;;  %v5217_v26 = vpop.f32.mrb[23].mxu1 }
 0x2a2   : > { %v1177_v26 = vadd.f32 %v1176_v8, %v1173_v43  ;;  %v7031_v43 = vstv %s4632_s11  ;;  %v1405_v8 = vmul.f32 %v7015_v60, %v6905_v53  ;;  %s4654_s11 = sld [smem:[#allocation10 + $0x3]] }
 0x2a3   : > { %v1188_v30 = vmul.f32 %v6945_v22, %v7031_v43 }
 0x2a4   : > { %v1181_v17 = vadd.f32 %v1180_v15, %v1177_v26 }
 0x2a6   : > { %v1185_v15 = vadd.f32 %v1184_v5, %v1181_v17  ;;  %v7067_v17 = vstv %s7020_s0  ;;  %s7439_s0 = sld [smem:[#allocation8 + $0x183]] }
 0x2a9   : > { %v6938_v12 = vpop.f32.mrb[24].mxu1 }
 0x2aa   : > { %7602 = vst [vmem:[#allocation32_spill] sm:$0xff] %v6938_v12  ;;  %3640 = vrot.lane.b32.xlu0 %v6938_v12, %s5676_s13  ;;  %v5231_v9 = vpop.f32.mrb[25].mxu1 }
 0x2ab   : > { %v957_v9 = vadd.f32 %v956_v52, %v953_v59  ;;  %v964_v52 = vmul.f32 %v6987_v2, %v7027_v14 }
 0x2ad   : > { %v961_v59 = vadd.f32 %v960_v39, %v957_v9  ;;  %v737_v9 = vadd.f32 %v736_v21, %v733_v28  ;;  %v968_v21 = vmul.f32 %v7004_v33, %v7052_v31  ;;  %v7076_v28 = vld [vmem:[%s5888_s5 + $0x8] sm:$0xff] }
 0x2ae   : > { %3357 = vrot.lane.b32.xlu0 %v6914_v20, %s5676_s13  ;;  %v7094_v20 = vstv %s7043_s15  ;;  %s7317_s15 = sld [smem:[#allocation8 + $0x80]] }
 0x2af   : > { %v965_v5 = vadd.f32 %v964_v52, %v961_v59  ;;  %v1416_v59 = vmul.f32 %v6928_v3, %v7067_v17  ;;  %v7089_v52 = vstv %s7039_s19  ;;  %v7105_v3 = vld [vmem:[%s5888_s5 + $0x48] sm:$0xff]  ;;  %s7315_s19 = scalar_lea.vmem %s7546_s7, %s4568_s27  ;;  %s7431_s27 = sld [smem:[#allocation8 + $0x105]] }
 0x2b2   : > { %v6984_v6 = vpop.f32.mrb[26].mxu1 }
 0x2b3   : > { %7604 = vst [vmem:[#allocation34_spill] sm:$0xff] %v6984_v6  ;;  %3872 = vrot.lane.b32.xlu1 %v6984_v6, %s5676_s13  ;;  %v5245_v13 = vpop.f32.mrb[27].mxu1  ;;  %v1409_v6 = vadd.f32 %v1408_v58, %v1405_v8  ;;  %v1189_v8 = vadd.f32 %v1188_v30, %v1185_v15  ;;  %v1688_v15 = vmul.f32 %v7076_v28, %v6910_v45 }
 0x2ba   : > { %v7045_v13 = vpop.f32.mrb[28].mxu1 }
 0x2bb   : > { %7606 = vst [vmem:[#allocation36_spill] sm:$0xff] %v7045_v13  ;;  %4104 = vrot.lane.b32.xlu1 %v7045_v13, %s5676_s13  ;;  %v5259_v53 = vpop.f32.mrb[29].mxu1 }
 0x2bc   : > { %v704_v26 = vpop.permute.xlu0 %703  ;;  %v1412_v53 = vmul.f32 %v6921_v24, %v7041_v18  ;;  %v1192_v24 = vmul.f32 %v6962_v34, %v7057_v27 }
 0x2bd   : > { %v706_v39 = vmax.f32 %v6834_v62, %v704_v26  ;;  %v7079_v62 = vld [vmem:[%s5888_s5 + $0x28] sm:$0xff]  ;;  %v7084_v26 = vstv %s7033_s16  ;;  %s7450_s16 = sld [smem:[#allocation8 + $0x106]] }
 0x2be   : > { %v1413_v13 = vadd.f32 %v1412_v53, %v1409_v6  ;;  %v1691_v6 = vmul.f32 %v7079_v62, %v6912_v19  ;;  %v1193_v12 = vadd.f32 %v1192_v24, %v1189_v8  ;;  %v1196_v4 = vmul.f32 %v6987_v2, %v7084_v26 }
 0x2bf   : > { %v738_v58 = vadd.f32 %v737_v9, %v706_v39  ;;  %v969_v9 = vadd.f32 %v968_v21, %v965_v5  ;;  %v1420_v21 = vmul.f32 %v6945_v22, %v7094_v20  ;;  %v1695_v24 = vmul.f32 %v7105_v3, %v6923_v29 }
 0x2c0   : > { %v1417_v5 = vadd.f32 %v1416_v59, %v1413_v13  ;;  %v1692_v8 = vadd.f32 %v1691_v6, %v1688_v15  ;;  %v1197_v22 = vadd.f32 %v1196_v4, %v1193_v12  ;;  %v1200_v13 = vmul.f32 %v7004_v33, %v7112_v25 }
 0x2c1   : > { %v741_v56 = vadd.f32 %v7089_v52, %v738_v58  ;;  %v1920_v59 = vmul.f32 %v7076_v28, %v6870_v48  ;;  %v1923_v15 = vmul.f32 %v7079_v62, %v6872_v1  ;;  %v7149_v4 = vstv %s7096_s4  ;;  %v7154_v1 = vld [vmem:[%s5888_s5 + $0x88] sm:$0xff]  ;;  %s7374_s4 = sld [smem:[#allocation8 + $0x84]] }
 0x2c2   : > { %v1421_v54 = vadd.f32 %v1420_v21, %v1417_v5  ;;  %v1696_v12 = vadd.f32 %v1695_v24, %v1692_v8  ;;  %v1428_v24 = vmul.f32 %v6987_v2, %v7149_v4 }
 0x2c3   : > { %v7102_v30 = vpop.f32.mrb[30].mxu1  ;;  %v742_v6 = vmax.f32 %v741_v56, 0.0  ;;  %v1201_v56 = vadd.f32 %v1200_v13, %v1197_v22  ;;  %v1924_v5 = vadd.f32 %v1923_v15, %v1920_v59  ;;  %v1703_v22 = vmul.f32 %v7154_v1, %v6947_v23  ;;  %v7172_v15 = vld [vmem:[%s5888_s5 + $0xa8] sm:$0xff] }
 0x2c4   : > { %7607 = vst [vmem:[#allocation37_spill] sm:$0xff] %v7102_v30  ;;  %4336 = vrot.lane.b32.xlu1 %v7102_v30, %s5676_s13  ;;  %v5273_v39 = vpop.f32.mrb[31].mxu1  ;;  %v936_v53 = vpop.permute.xlu0 %935  ;;  %v7122_v30 = vstv %s7069_s22  ;;  %s7124_s13 = sld [smem:[#allocation8 + $0x187]]  ;;  %v7169_v59 = vstv %s7131_s10  ;;  %s7355_s22 = sld [smem:[#allocation8 + $0x83]] }
 0x2c5   : > { %v938_v61 = vmax.f32 %v6838_v11, %v936_v53  ;;  %v7129_v39 = vstv %s7071_s20  ;;  %v7134_v11 = vld [vmem:[%s5888_s5 + $0x68] sm:$0xff]  ;;  %7610 = vst [vmem:[#allocation40_spill] sm:$0xff] %v7169_v59  ;;  %s7361_s20 = sld [smem:[#allocation8 + $0x100]]  ;;  %s7390_s10 = sld [smem:[#allocation8 + $0x85]] }
 0x2c6   : > { %v1699_v47 = vmul.f32 %v7134_v11, %v6930_v16  ;;  %v745_v21 = vmul.f32 %v7129_v39, %v742_v6 }
 0x2c7   : > { %v970_v58 = vadd.f32 %v969_v9, %v938_v61  ;;  %v1424_v61 = vmul.f32 %v6962_v34, %v7122_v30  ;;  %v7146_v9 = vstv %s7091_s21  ;;  %v1927_v34 = vmul.f32 %v7105_v3, %v6936_v38  ;;  %s7363_s21 = sld [smem:[#allocation8 + $0x101]] }
 0x2c8   : > { %v1700_v25 = vadd.f32 %v1699_v47, %v1696_v12 }
 0x2c9   : > { %v973_v53 = vadd.f32 %v7119_v42, %v970_v58  ;;  %v1425_v8 = vadd.f32 %v1424_v61, %v1421_v54  ;;  %v1931_v54 = vmul.f32 %v7134_v11, %v6951_v44  ;;  %v1928_v2 = vadd.f32 %v1927_v34, %v1924_v5 }
 0x2ca   : > { %v7164_v16 = vstv %s7124_s13  ;;  %s7378_s13 = sld [smem:[#allocation8 + $0x102]] }
 0x2cb   : > { %v974_v48 = vmax.f32 %v973_v53, 0.0  ;;  %v1429_v47 = vadd.f32 %v1428_v24, %v1425_v8  ;;  %v1432_v61 = vmul.f32 %v7004_v33, %v7164_v16  ;;  %v1932_v5 = vadd.f32 %v1931_v54, %v1928_v2 }
 0x2cc   : > { %v2159_v33 = vmul.f32 %v7105_v3, %v6982_v37  ;;  %v7195_v24 = vstv %s4653_s12  ;;  %v1939_v54 = vmul.f32 %v7172_v15, %v6995_v41  ;;  %v2384_v2 = vmul.f32 %v7076_v28, %v7015_v60  ;;  %s7398_s12 = sld [smem:[#allocation8 + $0x180]] }
 0x2cd   : > { %v977_v58 = vmul.f32 %v7146_v9, %v974_v48  ;;  %v1168_v42 = vpop.permute.xlu0 %1167  ;;  %v1704_v48 = vadd.f32 %v1703_v22, %v1700_v25  ;;  %v1433_v8 = vadd.f32 %v1432_v61, %v1429_v47 }
 0x2ce   : > { %v1170_v53 = vmax.f32 %v6842_v10, %v1168_v42  ;;  %v2152_v10 = vmul.f32 %v7076_v28, %v6890_v51  ;;  %v2155_v42 = vmul.f32 %v7079_v62, %v6892_v55  ;;  %v1935_v51 = vmul.f32 %v7154_v1, %v6972_v46  ;;  %v7201_v46 = vld [vmem:[%s5888_s5 + $0xe8] sm:$0xff] }
 0x2cf   : > { %v978_v13 = vadd.f32 %v977_v58, %v745_v21  ;;  %v1707_v21 = vmul.f32 %v7172_v15, %v6964_v40  ;;  %v7185_v58 = vstv %s4637_s18  ;;  %v2391_v28 = vmul.f32 %v7105_v3, %v7041_v18  ;;  %s7392_s18 = sld [smem:[#allocation8 + $0x103]] }
 0x2d0   : > { %v1202_v6 = vadd.f32 %v1201_v56, %v1170_v53  ;;  %v7188_v56 = vld [vmem:[%s5888_s5 + $0xc8] sm:$0xff]  ;;  %v2156_v34 = vadd.f32 %v2155_v42, %v2152_v10  ;;  %v2387_v10 = vmul.f32 %v7079_v62, %v7018_v50  ;;  %v1936_v47 = vadd.f32 %v1935_v51, %v1932_v5 }
 0x2d1   : > { %v1708_v22 = vadd.f32 %v1707_v21, %v1704_v48  ;;  %v2395_v3 = vmul.f32 %v7134_v11, %v7067_v17 }
 0x2d2   : > { %v1205_v12 = vadd.f32 %v7169_v59, %v1202_v6  ;;  %v1711_v6 = vmul.f32 %v7188_v56, %v6989_v0  ;;  %v2160_v61 = vadd.f32 %v2159_v33, %v2156_v34  ;;  %v2388_v41 = vadd.f32 %v2387_v10, %v2384_v2 }
 0x2d3   : > { %v1940_v62 = vadd.f32 %v1939_v54, %v1936_v47  ;;  %v1947_v2 = vmul.f32 %v7201_v46, %v7052_v31  ;;  %v2171_v47 = vmul.f32 %v7172_v15, %v7057_v27 }
 0x2d4   : > { %v1206_v55 = vmax.f32 %v1205_v12, 0.0  ;;  %v2163_v12 = vmul.f32 %v7134_v11, %v7012_v57  ;;  %v1712_v21 = vadd.f32 %v1711_v6, %v1708_v22  ;;  %v2392_v6 = vadd.f32 %v2391_v28, %v2388_v41 }
 0x2d6   : > { %v1209_v25 = vmul.f32 %v7185_v58, %v1206_v55  ;;  %v1400_v53 = vpop.permute.xlu0 %1399  ;;  %v7213_v55 = vstv %s4654_s11  ;;  %v2164_v51 = vadd.f32 %v2163_v12, %v2160_v61  ;;  %v2670_v12 = vmul.f32 %v6878_v49, %v6912_v19  ;;  %s7400_s11 = sld [smem:[#allocation8 + $0x181]] }
 0x2d7   : > { %v1402_v59 = vmax.f32 %v6846_v36, %v1400_v53  ;;  %v1715_v36 = vmul.f32 %v7201_v46, %v7009_v7 }
 0x2d8   : > { %v1210_v42 = vadd.f32 %v1209_v25, %v978_v13  ;;  %v1943_v13 = vmul.f32 %v7188_v56, %v7027_v14  ;;  %v7223_v25 = vstv %s4655_s6  ;;  %s7408_s6 = sld [smem:[#allocation8 + $0x86]] }
 0x2d9   : > { %v1434_v48 = vadd.f32 %v1433_v8, %v1402_v59  ;;  %v2167_v59 = vmul.f32 %v7154_v1, %v7031_v43  ;;  %v1716_v33 = vadd.f32 %v1715_v36, %v1712_v21  ;;  %v2396_v21 = vadd.f32 %v2395_v3, %v2392_v6  ;;  %v7611_v3 = vld [vmem:[#allocation38_spill] sm:$0xff] }
 0x2da   : > { %v1944_v54 = vadd.f32 %v1943_v13, %v1940_v62  ;;  %v2399_v36 = vmul.f32 %v7154_v1, %v7094_v20 }
 0x2db   : > { %v1437_v53 = vadd.f32 %v7195_v24, %v1434_v48  ;;  %v2168_v10 = vadd.f32 %v2167_v59, %v2164_v51  ;;  %v7237_v48 = vld [vmem:[%s5888_s5 + $0x50] sm:$0xff] }
 0x2dc   : > { %v2674_v59 = vmul.f32 %v7237_v48, %v6923_v29  ;;  %v2400_v1 = vadd.f32 %v2399_v36, %v2396_v21 }
 0x2dd   : > { %v1438_v5 = vmax.f32 %v1437_v53, 0.0  ;;  %v1683_v34 = vpop.permute.xlu1 %1682  ;;  %v1948_v53 = vadd.f32 %v1947_v2, %v1944_v54  ;;  %v2172_v28 = vadd.f32 %v2171_v47, %v2168_v10  ;;  %v2179_v54 = vmul.f32 %v7201_v46, %v7611_v3  ;;  %v7612_v10 = vld [vmem:[#allocation31_spill] sm:$0xff] }
 0x2de   : > { %v1685_v8 = vmax.f32 %v6850_v35, %v1683_v34  ;;  %v2667_v35 = vmul.f32 %v6875_v32, %v6910_v45 }
 0x2df   : > { %v1441_v22 = vmul.f32 %v7213_v55, %v1438_v5 }
 0x2e0   : > { %v1717_v41 = vadd.f32 %v1716_v33, %v1685_v8  ;;  %v2671_v51 = vadd.f32 %v2670_v12, %v2667_v35  ;;  %v7249_v33 = vld [vmem:[%s5888_s5 + $0x70] sm:$0xff]  ;;  %v2403_v8 = vmul.f32 %v7172_v15, %v7122_v30  ;;  %v7613_v35 = vld [vmem:[#allocation39_spill] sm:$0xff] }
 0x2e1   : > { %v1442_v61 = vadd.f32 %v1441_v22, %v1210_v42  ;;  %v2175_v42 = vmul.f32 %v7188_v56, %v7084_v26  ;;  %v2678_v47 = vmul.f32 %v7249_v33, %v7612_v10 }
 0x2e2   : > { %v1720_v5 = vadd.f32 %v1717_v41, %v7089_v52  ;;  %v2675_v2 = vadd.f32 %v2674_v59, %v2671_v51  ;;  %v7262_v41 = vld [vmem:[%s5888_s5 + $0x90] sm:$0xff]  ;;  %v2404_v15 = vadd.f32 %v2403_v8, %v2400_v1  ;;  %v7615_v59 = vld [vmem:[#allocation23_spill] sm:$0xff]  ;;  %v2411_v8 = vmul.f32 %v7201_v46, %v7164_v16 }
 0x2e3   : > { %v1445_v11 = vadd.f32 %v7223_v25, %v1442_v61  ;;  %v2176_v6 = vadd.f32 %v2175_v42, %v2172_v28  ;;  %v7614_v42 = vld [vmem:[#allocation27_spill] sm:$0xff]  ;;  %v3138_v46 = vmul.f32 %v7237_v48, %v6982_v37  ;;  %v7620_v37 = vld [vmem:[#allocation28_spill] sm:$0xff] }
 0x2e4   : > { %v1721_v61 = vmax.f32 %v1720_v5, 0.0  ;;  %v2679_v28 = vadd.f32 %v2678_v47, %v2675_v2 }
 0x2e5   : > { %v4656_v62 = vmul.f32 -1.442695, %v1445_v11  ;;  %v1915_v13 = vpop.permute.xlu1 %1914  ;;  %v2407_v11 = vmul.f32 %v7188_v56, %v7149_v4  ;;  %v2180_v36 = vadd.f32 %v2179_v54, %v2176_v6  ;;  %v2910_v56 = vmul.f32 %v7249_v33, %v6951_v44  ;;  %v7617_v44 = vld [vmem:[#allocation33_spill] sm:$0xff] }
 0x2e6   : > { %v1917_v34 = vmax.f32 %v6854_v63, %v1915_v13  ;;  %v2906_v63 = vmul.f32 %v7237_v48, %v6936_v38  ;;  %v2682_v38 = vmul.f32 %v7262_v41, %v6947_v23  ;;  %v1724_v13 = vmul.f32 %v1721_v61, %v7129_v39  ;;  %v7616_v61 = vld [vmem:[#allocation40_spill] sm:$0xff] }
 0x2e7   : > { %5515 = vpow2.f32 %v4656_v62  ;;  %v2408_v1 = vadd.f32 %v2407_v11, %v2404_v15  ;;  %v2914_v15 = vmul.f32 %v7262_v41, %v7617_v44 }
 0x2e8   : > { %v1949_v22 = vadd.f32 %v1948_v53, %v1917_v34  ;;  %v2907_v62 = vadd.f32 %v2906_v63, %v7614_v42  ;;  %v7277_v34 = vld [vmem:[%s5888_s5 + $0xb0] sm:$0xff]  ;;  %v2683_v2 = vadd.f32 %v2682_v38, %v2679_v28  ;;  %v7618_v38 = vld [vmem:[#allocation24_spill] sm:$0xff] }
 0x2e9   : > { %v2686_v47 = vmul.f32 %v7277_v34, %v6964_v40  ;;  %v2412_v11 = vadd.f32 %v2411_v8, %v2408_v1 }
 0x2ea   : > { %v1952_v12 = vadd.f32 %v1949_v22, %v7613_v35 }
 0x2ec   : > { %v1953_v21 = vmax.f32 %v1952_v12, 0.0  ;;  %v2147_v53 = vpop.permute.xlu1 %2146 }
 0x2ed   : > { %v2149_v5 = vmax.f32 %v7615_v59, %v2147_v53  ;;  %v2911_v53 = vadd.f32 %v2910_v56, %v2907_v62  ;;  %v7298_v62 = vld [vmem:[%s5888_s5 + $0xf0] sm:$0xff]  ;;  %v7619_v56 = vld [vmem:[#allocation35_spill] sm:$0xff] }
 0x2ee   : > { %v1956_v51 = vmul.f32 %v1953_v21, %v7146_v9  ;;  %v7287_v21 = vld [vmem:[%s5888_s5 + $0xd0] sm:$0xff]  ;;  %v2918_v1 = vmul.f32 %v7277_v34, %v7619_v56  ;;  %v7333_v56 = vld [vmem:[%s5888_s5 + $0x38] sm:$0xff] }
 0x2ef   : > { %v2181_v6 = vadd.f32 %v2180_v36, %v2149_v5  ;;  %v2915_v5 = vadd.f32 %v2914_v15, %v2911_v53  ;;  %v2922_v53 = vmul.f32 %v7287_v21, %v7027_v14 }
 0x2f0   : > { %v1957_v22 = vadd.f32 %v1956_v51, %v1724_v13  ;;  %v2687_v13 = vadd.f32 %v2686_v47, %v2683_v2  ;;  %v2690_v51 = vmul.f32 %v7287_v21, %v6989_v0 }
 0x2f1   : > { %v5516_v54 = vpop.eup %5515  ;;  %v2184_v12 = vadd.f32 %v2181_v6, %v7616_v61  ;;  %v3139_v6 = vadd.f32 %v3138_v46, %v7620_v37  ;;  %v2919_v44 = vadd.f32 %v2918_v1, %v2915_v5  ;;  %v7621_v46 = vld [vmem:[#allocation25_spill] sm:$0xff]  ;;  %v7330_v5 = vld [vmem:[%s5888_s5 + $0x18] sm:$0xff]  ;;  %v3154_v37 = vmul.f32 %v7287_v21, %v7084_v26 }
 0x2f2   : > { %v1449_v63 = vadd.f32 1.0, %v5516_v54  ;;  %v3142_v54 = vmul.f32 %v7249_v33, %v7012_v57  ;;  %v2691_v47 = vadd.f32 %v2690_v51, %v2687_v13 }
 0x2f3   : > { %v2185_v36 = vmax.f32 %v2184_v12, 0.0  ;;  %v2694_v12 = vmul.f32 %v7298_v62, %v7009_v7 }
 0x2f4   : > { %5517 = vrcp.f32 %v1449_v63  ;;  %v2379_v28 = vpop.permute.xlu1 %2378 }
 0x2f5   : > { %v2381_v42 = vmax.f32 %v7618_v38, %v2379_v28  ;;  %v2188_v59 = vmul.f32 %v2185_v36, %v7185_v58  ;;  %v3143_v36 = vadd.f32 %v3142_v54, %v3139_v6  ;;  %v2695_v14 = vadd.f32 %v2694_v12, %v2691_v47 }
 0x2f6   : > { %v2923_v38 = vadd.f32 %v2922_v53, %v2919_v44  ;;  %v3646_v6 = vmul.f32 %v7330_v5, %v6910_v45  ;;  %v3363_v47 = vmul.f32 %v6875_v32, %v7015_v60  ;;  %v3366_v12 = vmul.f32 %v6878_v49, %v7018_v50  ;;  %v7622_v45 = vld [vmem:[#allocation26_spill] sm:$0xff] }
 0x2f7   : > { %v2413_v8 = vadd.f32 %v2412_v11, %v2381_v42  ;;  %v2189_v63 = vadd.f32 %v2188_v59, %v1957_v22  ;;  %v3146_v11 = vmul.f32 %v7262_v41, %v7031_v43  ;;  %v2926_v42 = vmul.f32 %v7298_v62, %v7052_v31  ;;  %v7366_v50 = vld [vmem:[%s5888_s5 + $0x78] sm:$0xff] }
 0x2f8   : > { %v3150_v59 = vmul.f32 %v7277_v34, %v7057_v27  ;;  %v3649_v27 = vmul.f32 %v7333_v56, %v6912_v19  ;;  %v3877_v53 = vstv %s7317_s15  ;;  %v3158_v19 = vmul.f32 %v7298_v62, %v7611_v3  ;;  %s7466_s15 = sld [smem:[#allocation8 + $0x107]] }
 0x2f9   : > { %v2416_v2 = vadd.f32 %v2413_v8, %v7195_v24  ;;  %v3147_v51 = vadd.f32 %v3146_v11, %v3143_v36  ;;  %v2927_v31 = vadd.f32 %v2926_v42, %v2923_v38  ;;  %v3880_v36 = vstv %s7321_s24  ;;  %s7474_s24 = sld [smem:[#allocation8 + $0x185]] }
 0x2fa   : > { %v3650_v11 = vadd.f32 %v3649_v27, %v3646_v6  ;;  %v3881_v3 = vmul.f32 %v7333_v56, %v3880_v36  ;;  %v3657_v38 = vmul.f32 %v7366_v50, %v7612_v10  ;;  %v3888_v6 = vstv %s7355_s22  ;;  %v7412_v36 = vld [vmem:[%s5888_s5 + $0xd8] sm:$0xff]  ;;  %s7484_s22 = sld [smem:[#allocation8 + $0x186]] }
 0x2fb   : > { %v2417_v15 = vmax.f32 %v2416_v2, 0.0  ;;  %v7345_v2 = vld [vmem:[%s5888_s5 + $0x58] sm:$0xff] }
 0x2fc   : > { %v2662_v57 = vpop.permute.xlu0 %2661  ;;  %v3653_v32 = vmul.f32 %v7345_v2, %v6923_v29 }
 0x2fd   : > { %v2420_v22 = vmul.f32 %v2417_v15, %v7213_v55  ;;  %v2664_v28 = vmax.f32 %v7621_v46, %v2662_v57  ;;  %v3367_v57 = vadd.f32 %v3366_v12, %v3363_v47  ;;  %v7403_v12 = vld [vmem:[%s5888_s5 + $0xb8] sm:$0xff] }
 0x2fe   : > { %v5518_v43 = vpop.eup %5517 }
 0x2ff   : > { %1453 = vst.msk [vmem:[%s7315_s19] sm:$0xff] %vm1452_vm2, %v5518_v43  ;;  %v2421_v13 = vadd.f32 %v2420_v22, %v2189_v63  ;;  %v2696_v8 = vadd.f32 %v2695_v14, %v2664_v28  ;;  %v3151_v63 = vadd.f32 %v3150_v59, %v3147_v51  ;;  %v3370_v22 = vmul.f32 %v7237_v48, %v7041_v18  ;;  %v7381_v48 = vld [vmem:[%s5888_s5 + $0x98] sm:$0xff] }
 0x300   : > { %v3878_v14 = vmul.f32 %v7330_v5, %v3877_v53  ;;  %v3884_v28 = vstv %s7336_s9  ;;  %v3654_v43 = vadd.f32 %v3653_v32, %v3650_v11  ;;  %v3378_v53 = vmul.f32 %v7262_v41, %v7094_v20  ;;  %s7476_s9 = sld [smem:[#allocation10 + $0x81]] }
 0x301   : > { %v2424_v1 = vadd.f32 %v2421_v13, %v7223_v25  ;;  %v2699_v26 = vadd.f32 %v2696_v8, %v7089_v52  ;;  %v3155_v60 = vadd.f32 %v3154_v37, %v3151_v63  ;;  %v3371_v13 = vadd.f32 %v3370_v22, %v3367_v57 }
 0x302   : > { %v3882_v59 = vadd.f32 %v3881_v3, %v3878_v14  ;;  %v3658_v27 = vadd.f32 %v3657_v38, %v3654_v43  ;;  %v3665_v20 = vmul.f32 %v7403_v12, %v6964_v40  ;;  %v4116_v41 = vstv %s7378_s13  ;;  %s4912_s13 = sld [smem:[#allocation10 + $0x2]] }
 0x303   : > { %v4747_v54 = vmul.f32 -1.442695, %v2424_v1  ;;  %v2700_v46 = vmax.f32 %v2699_v26, 0.0  ;;  %v3159_v18 = vadd.f32 %v3158_v19, %v3155_v60  ;;  %v3885_v1 = vmul.f32 %v7345_v2, %v3884_v28 }
 0x304   : > { %v2894_v44 = vpop.permute.xlu1 %2893  ;;  %v3892_v19 = vstv %s7374_s4  ;;  %v3382_v57 = vmul.f32 %v7277_v34, %v7122_v30  ;;  %v3669_v22 = vmul.f32 %v7412_v36, %v6989_v0  ;;  %v4117_v28 = vmul.f32 %v7345_v2, %v4116_v41  ;;  %s4911_s4 = sld [smem:[#allocation10 + $0x82]] }
 0x305   : > { %5519 = vpow2.f32 %v4747_v54  ;;  %v2896_v15 = vmax.f32 %v7622_v45, %v2894_v44  ;;  %v2703_v8 = vmul.f32 %v2700_v46, %v7129_v39  ;;  %v4112_v54 = vstv %s7363_s21  ;;  %s7495_s21 = sld [smem:[#allocation8 + $0x187]] }
 0x306   : > { %v3889_v45 = vmul.f32 %v7366_v50, %v3888_v6  ;;  %v4113_v32 = vmul.f32 %v7333_v56, %v4112_v54  ;;  %v3893_v40 = vmul.f32 %v7381_v48, %v3892_v19  ;;  %v3896_v46 = vstv %s7390_s10  ;;  %s4928_s10 = sld [smem:[#allocation10 + $0x83]] }
 0x307   : > { %v2928_v49 = vadd.f32 %v2927_v31, %v2896_v15  ;;  %v7623_v31 = vld [vmem:[#allocation29_spill] sm:$0xff]  ;;  %v4120_v30 = vstv %s7392_s18  ;;  %v4341_v34 = vstv %s7398_s12  ;;  %v4344_v38 = vstv %s7400_s11  ;;  %s4929_s18 = sld [smem:[#allocation10 + $0x3]]  ;;  %s4930_s12 = sld [smem:[#allocation10 + $0x100]] }
 0x309   : > { %v2931_v29 = vadd.f32 %v2928_v49, %v7613_v35  ;;  %v3374_v35 = vmul.f32 %v7249_v33, %v7067_v17  ;;  %v3661_v17 = vmul.f32 %v7381_v48, %v6947_v23  ;;  %v4109_v33 = vstv %s7361_s20  ;;  %s7486_s20 = sld [smem:[#allocation10 + $0x1]] }
 0x30a   : > { %v3886_v23 = vadd.f32 %v3885_v1, %v3882_v59  ;;  %v4110_v11 = vmul.f32 %v7330_v5, %v4109_v33  ;;  %v4121_v1 = vmul.f32 %v7366_v50, %v4120_v30 }
 0x30b   : > { %v2932_v42 = vmax.f32 %v2931_v29, 0.0  ;;  %v3126_v51 = vpop.permute.xlu0 %3125  ;;  %v3375_v44 = vadd.f32 %v3374_v35, %v3371_v13  ;;  %v3662_v49 = vadd.f32 %v3661_v17, %v3658_v27  ;;  %v3897_v35 = vmul.f32 %v7403_v12, %v3896_v46 }
 0x30c   : > { %v3128_v37 = vmax.f32 %v7623_v31, %v3126_v51  ;;  %v3890_v14 = vadd.f32 %v3889_v45, %v3886_v23  ;;  %v4114_v29 = vadd.f32 %v4113_v32, %v4110_v11  ;;  %v3900_v51 = vstv %s7408_s6 }
 0x30d   : > { %v2935_v10 = vmul.f32 %v2932_v42, %v7146_v9  ;;  %v3379_v60 = vadd.f32 %v3378_v53, %v3375_v44  ;;  %v3666_v43 = vadd.f32 %v3665_v20, %v3662_v49  ;;  %v7444_v42 = vld [vmem:[%s5888_s5 + $0xf8] sm:$0xff]  ;;  %s7459_s5 = sld [smem:[#allocation8 + $0x184]]  ;;  %v3390_v27 = vmul.f32 %v7298_v62, %v7164_v16  ;;  %v7624_v16 = vld [vmem:[#allocation32_spill] sm:$0xff] }
 0x30e   : > { %v3160_v47 = vadd.f32 %v3159_v18, %v3128_v37  ;;  %v3894_v13 = vadd.f32 %v3893_v40, %v3890_v14  ;;  %v4118_v59 = vadd.f32 %v4117_v28, %v4114_v29  ;;  %v4348_v37 = vstv %s7422_s14  ;;  %v7625_v49 = vld [vmem:[#allocation30_spill] sm:$0xff] }
 0x30f   : > { %v5520_v9 = vpop.eup %5519  ;;  %v2936_v63 = vadd.f32 %v2935_v10, %v2703_v8  ;;  %v3383_v18 = vadd.f32 %v3382_v57, %v3379_v60  ;;  %v4342_v8 = vmul.f32 %v7330_v5, %v4341_v34  ;;  %v4345_v10 = vmul.f32 %v7333_v56, %v4344_v38  ;;  %v7626_v34 = vld [vmem:[#allocation34_spill] sm:$0xff] }
 0x310   : > { %v2428_v26 = vadd.f32 1.0, %v5520_v9  ;;  %v3163_v15 = vadd.f32 %v3160_v47, %v7616_v61  ;;  %v3670_v31 = vadd.f32 %v3669_v22, %v3666_v43  ;;  %v3898_v54 = vadd.f32 %v3897_v35, %v3894_v13 }
 0x311   : > { %v3901_v5 = vmul.f32 %v7412_v36, %v3900_v51  ;;  %v3904_v9 = vstv %s7429_s28  ;;  %v4128_v56 = vstv %s7431_s27  ;;  %v4346_v47 = vadd.f32 %v4345_v10, %v4342_v8 }
 0x312   : > { %5521 = vrcp.f32 %v2428_v26  ;;  %v3164_v61 = vmax.f32 %v3163_v15, 0.0  ;;  %v4349_v44 = vmul.f32 %v7345_v2, %v4348_v37  ;;  %v4352_v26 = vstv %s7439_s0 }
 0x313   : > { %v3902_v15 = vadd.f32 %v3901_v5, %v3898_v54  ;;  %v3905_v19 = vmul.f32 %v7444_v42, %v3904_v9  ;;  %v4129_v11 = vmul.f32 %v7403_v12, %v4128_v56  ;;  %v4132_v32 = vstv %s7450_s16  ;;  %v7627_v9 = vld [vmem:[#allocation36_spill] sm:$0xff] }
 0x314   : > { %v3167_v3 = vmul.f32 %v3164_v61, %v7185_v58  ;;  %v3386_v58 = vmul.f32 %v7287_v21, %v7149_v4  ;;  %v3673_v4 = vmul.f32 %v7444_v42, %v7009_v7  ;;  %v4124_v21 = vstv %s7420_s17 }
 0x315   : > { %v4122_v7 = vadd.f32 %v4121_v1, %v4118_v59  ;;  %v4350_v41 = vadd.f32 %v4349_v44, %v4346_v47  ;;  %v4353_v61 = vmul.f32 %v7366_v50, %v4352_v26  ;;  %v4356_v57 = vstv %s7459_s5  ;;  %v7628_v26 = vld [vmem:[#allocation37_spill] sm:$0xff] }
 0x316   : > { %v7441_v0 = vadd.f32 %v3167_v3, %v2936_v63  ;;  %v3387_v6 = vadd.f32 %v3386_v58, %v3383_v18  ;;  %v4125_v63 = vmul.f32 %v7381_v48, %v4124_v21  ;;  %v3674_v53 = vadd.f32 %v3673_v4, %v3670_v31 }
 0x317   : > { %v3906_v14 = vadd.f32 %v3905_v19, %v3902_v15  ;;  %v4133_v40 = vmul.f32 %v7412_v36, %v4132_v32  ;;  %v4136_v3 = vstv %s7466_s15  ;;  %v4354_v43 = vadd.f32 %v4353_v61, %v4350_v41 }
 0x318   : > { %v3391_v23 = vadd.f32 %v3390_v27, %v3387_v6  ;;  %v4126_v20 = vadd.f32 %v4125_v63, %v4122_v7  ;;  %v4357_v50 = vmul.f32 %v7381_v48, %v4356_v57  ;;  %v4360_v18 = vstv %s7474_s24 }
 0x319   : > { %v3909_v13 = vstv %s7476_s9  ;;  %v4137_v51 = vmul.f32 %v7444_v42, %v4136_v3  ;;  %v4361_v48 = vmul.f32 %v7403_v12, %v4360_v18  ;;  %v4364_v10 = vstv %s7484_s22 }
 0x31a   : > { %v4130_v28 = vadd.f32 %v4129_v11, %v4126_v20  ;;  %v4358_v1 = vadd.f32 %v4357_v50, %v4354_v43  ;;  %v3913_v4 = vstv %s7486_s20  ;;  %v4368_v5 = vstv %s7495_s21 }
 0x31b   : > { %v4141_v63 = vstv %s4911_s4  ;;  %v4381_v41 = vstv %s4930_s12 }
 0x31c   : > { %v5522_v17 = vpop.eup %5521  ;;  %v3641_v33 = vpop.permute.xlu0 %3640  ;;  %v4134_v59 = vadd.f32 %v4133_v40, %v4130_v28  ;;  %v4362_v27 = vadd.f32 %v4361_v48, %v4358_v1 }
 0x31d   : > { %4748 = vst.msk [vmem:[%s7315_s19 + $0x8] sm:$0xff] %vm1452_vm2, %v5522_v17  ;;  %v3643_v62 = vmax.f32 %v7624_v16, %v3641_v33  ;;  %v4365_v17 = vmul.f32 %v7412_v36, %v4364_v10 }
 0x31e   : > { %v4138_v6 = vadd.f32 %v4137_v51, %v4134_v59 }
 0x31f   : > { %v3675_v60 = vadd.f32 %v3674_v53, %v3643_v62  ;;  %v4366_v47 = vadd.f32 %v4365_v17, %v4362_v27  ;;  %v4145_v53 = vstv %s4912_s13 }
 0x320   : > { %v3358_v45 = vpop.permute.xlu0 %3357 }
 0x321   : > { %v3360_v2 = vmax.f32 %v7625_v49, %v3358_v45  ;;  %v3678_v30 = vadd.f32 %v3675_v60, %v7089_v52  ;;  %v4373_v45 = vstv %s4928_s10 }
 0x323   : > { %v3392_v22 = vadd.f32 %v3391_v23, %v3360_v2  ;;  %v3679_v52 = vmax.f32 %v3678_v30, 0.0  ;;  %v4377_v2 = vstv %s4929_s18 }
 0x325   : > { %v3395_v46 = vadd.f32 %v3392_v22, %v7195_v24  ;;  %v3873_v29 = vpop.permute.xlu1 %3872 }
 0x326   : > { %v3875_v38 = vmax.f32 %v7626_v34, %v3873_v29 }
 0x327   : > { %v3396_v58 = vmax.f32 %v3395_v46, 0.0 }
 0x328   : > { %v3907_v35 = vadd.f32 %v3906_v14, %v3875_v38 }
 0x329   : > { %v3399_v24 = vmul.f32 %v3396_v58, %v7213_v55  ;;  %v3682_v55 = vmul.f32 %v3679_v52, %v7129_v39 }
 0x32a   : > { %v3910_v8 = vadd.f32 %v3909_v13, %v3907_v35 }
 0x32b   : > { %v3400_v31 = vadd.f32 %v3399_v24, %v7441_v0 }
 0x32c   : > { %v3911_v21 = vmax.f32 %v3910_v8, 0.0 }
 0x32d   : > { %v3403_v37 = vadd.f32 %v3400_v31, %v7223_v25  ;;  %v4105_v54 = vpop.permute.xlu1 %4104  ;;  %v4369_v25 = vmul.f32 %v7444_v42, %v4368_v5 }
 0x32e   : > { %v3914_v33 = vmul.f32 %v3913_v4, %v3911_v21  ;;  %v4107_v56 = vmax.f32 %v7627_v9, %v4105_v54 }
 0x32f   : > { %v4839_v12 = vmul.f32 -1.442695, %v3403_v37  ;;  %v4370_v16 = vadd.f32 %v4369_v25, %v4366_v47 }
 0x330   : > { %v3915_v7 = vadd.f32 %v3914_v33, %v3682_v55  ;;  %v4139_v0 = vadd.f32 %v4138_v6, %v4107_v56 }
 0x331   : > { %5523 = vpow2.f32 %v4839_v12 }
 0x332   : > { %v4142_v44 = vadd.f32 %v4141_v63, %v4139_v0 }
 0x334   : > { %v4143_v36 = vmax.f32 %v4142_v44, 0.0 }
 0x336   : > { %v4337_v39 = vpop.permute.xlu1 %4336  ;;  %v4146_v62 = vmul.f32 %v4145_v53, %v4143_v36 }
 0x337   : > { %v4339_v23 = vmax.f32 %v7628_v26, %v4337_v39 }
 0x338   : > { %v4147_v15 = vadd.f32 %v4146_v62, %v3915_v7 }
 0x339   : > { %v4371_v19 = vadd.f32 %v4370_v16, %v4339_v23 }
 0x33b   : > { %v5524_v11 = vpop.eup %5523  ;;  %v4374_v32 = vadd.f32 %v4373_v45, %v4371_v19 }
 0x33c   : > { %v3407_v49 = vadd.f32 1.0, %v5524_v11 }
 0x33d   : > { %v4375_v42 = vmax.f32 %v4374_v32, 0.0 }
 0x33e   : > { %5525 = vrcp.f32 %v3407_v49 }
 0x33f   : > { %v4378_v20 = vmul.f32 %v4377_v2, %v4375_v42 }
 0x341   : > { %v4379_v61 = vadd.f32 %v4378_v20, %v4147_v15 }
 0x343   : > { %v4382_v60 = vadd.f32 %v4381_v41, %v4379_v61 }
 0x345   : > { %v4931_v57 = vmul.f32 -1.442695, %v4382_v60 }
 0x347   : > { %5527 = vpow2.f32 %v4931_v57 }
 0x348   : > { %v5526_v22 = vpop.eup %5525 }
 0x349   : > { %4840 = vst.msk [vmem:[%s7315_s19 + $0x10] sm:$0xff] %vm1452_vm2, %v5526_v22 }
 0x351   : > { %v5528_v14 = vpop.eup %5527 }
 0x352   : > { %v4386_v40 = vadd.f32 1.0, %v5528_v14 }
 0x354   : > { %5529 = vrcp.f32 %v4386_v40 }
 0x35e   : > { %v5530_v3 = vpop.eup %5529 }
 0x35f   : > { %4932 = vst.msk [vmem:[%s7315_s19 + $0x18] sm:$0xff] %vm1452_vm2, %v5530_v3 }
 0x360 PF: > { %s25_s8 = sadd.s32 1, %s5656_s8   ;;  %s7629_s11 = sld [smem:[#allocation21_spill]] }
 0x361   : > { %p22_p2 = scmp.ge.s32.totalorder %s25_s8, 6   ;;  %s7630_s6 = sld [smem:[#allocation22_spill]] }
 0x362   : > { %s7631_s24 = smov %s5632_s25  ;;  %s7632_s25 = smov %s5636_s26 }
 0x363   : > { %s7633_s26 = smov %s5796_s23  ;;  %s7634_s27 = smov %s5648_s29 }
 0x364   : > { %s7635_s28 = smov %s5652_s30  ;;  %24 = sbr.rel (!%p22_p2) target bundleno = 14 (0xe), region = 189 }
 0x366   : > { %s7636_s29 = smov %s7629_s11 }
 0x367   : > { %s7637_s30 = smov %s7630_s6 }
 0x36b   :  { %4419 = vsyncpa [#allocation3], 1 }
 0x36c   :  { %4421 = vsyncpa [#allocation3 + $0x1], 1 }
 0x36d   :  { %4422 = vsyncpa [#allocation6], 1 }
 0x36e   :  { %4424 = vsyncpa [#allocation6 + $0x1], 1 }
 0x36f   :  { %4425 = vsyncpa [#allocation4], 1 }
 0x370   :  { %4427 = vsyncpa [#allocation4 + $0x1], 1 }
 0x371   :  { %4428 = vsyncpa [#allocation9], 1 }

</bundles_post_ra>
